<compile_context>
chip_gen: v7x
topology: tpu7x:2x2x1
jax: 0.10.0
libtpu: 0.0.40
codegen_flags: <defaults>
</compile_context>

<pallas_src>
import jax
import jax.numpy as jnp
from jax import lax
from jax.experimental import pallas as pl
from jax.experimental.pallas import tpu as pltpu

EPS = 1e-12


def bert_output_kernel(x_ref, w_ref, p_ref, res_ref, o_ref):
    # Dense: [tm, I] @ [I, H] -> [tm, H]. Activation tile is loaded in its native dtype
    # and cast to the (bf16) weight dtype in-register; accumulation stays f32 on the MXU.
    w = w_ref[...]
    h = jnp.dot(x_ref[...].astype(w.dtype), w, preferred_element_type=jnp.float32)

    # Packed params: row 0 = dense bias, row 1 = LN gamma, row 2 = LN beta.
    p = p_ref[...].astype(jnp.float32)
    bias, gamma, beta = p[0:1, :], p[1:2, :], p[2:3, :]

    # Bias + residual (nn.Dropout is identity at inference), in f32.
    h = h + bias + res_ref[...].astype(jnp.float32)

    # LayerNorm (TF style: eps inside the sqrt), biased variance over the last dim.
    # One-pass stats: var = E[h^2] - E[h]^2; rsqrt on a (tm, 1) column -> single EUP op.
    u = jnp.mean(h, axis=-1, keepdims=True)
    m2 = jnp.mean(h * h, axis=-1, keepdims=True)
    inv = lax.rsqrt(m2 - u * u + EPS)

    # Fused affine: gamma * (h - u) * inv + beta == (h*inv - u*inv) * gamma + beta.
    o_ref[...] = ((h * inv - u * inv) * gamma + beta).astype(o_ref.dtype)


def bert_output(hidden_states, input_tensor, W, b, gamma, beta, *,
                tm=512, matmul_dtype=jnp.bfloat16):
    """hidden_states: [B, S, I], input_tensor: [B, S, H] -> [B, S, H]."""
    B, S, I = hidden_states.shape
    H = input_tensor.shape[-1]
    M = B * S
    out_dtype = input_tensor.dtype

    # No host-side dtype cast / pad of the big activation tensors: both would be extra
    # full HBM passes in front of a bandwidth-limited kernel.
    x2d = hidden_states.reshape(M, I)
    r2d = input_tensor.reshape(M, H)
    w_c = W.astype(matmul_dtype)                       # one-time, small (I x H)
    params = jnp.stack([b, gamma, beta]).astype(jnp.float32)   # (3, H)

    # Generation-aware VMEM capacity (falls back to the v7x per-TC minimum).
    try:
        vmem_cap = int(getattr(pltpu.get_tpu_info(), "vmem_capacity_bytes", 64 << 20))
    except Exception:  # pragma: no cover - e.g. interpret mode off-TPU
        vmem_cap = 64 << 20
    vmem_budget_cap = int(0.75 * vmem_cap)

    x_it = jnp.dtype(x2d.dtype).itemsize
    r_it = jnp.dtype(r2d.dtype).itemsize
    o_it = jnp.dtype(out_dtype).itemsize
    w_it = jnp.dtype(matmul_dtype).itemsize

    def vmem_budget(tm_):
        return (I * H * w_it                    # resident weight, Buffered(1)
                + 2 * tm_ * I * x_it            # activation tile (double-buffered)
                + 2 * tm_ * H * r_it            # residual tile (double-buffered)
                + 2 * tm_ * H * o_it            # output tile (double-buffered)
                + 3 * H * 4                     # packed bias/gamma/beta
                + 4 * tm_ * H * 4)              # f32 epilogue temporaries (h, h*h, ...)

    # Row tile: biggest multiple of 8 that fits the budget (512 default on v5e/v6e;
    # auto-halves on v7x's smaller VMEM).
    tm = int(min(tm, M))
    tm = max(8, (tm // 8) * 8)
    while vmem_budget(tm) > vmem_budget_cap and tm > 64:
        tm = max(64, tm // 2)
    assert vmem_budget(tm) <= vmem_budget_cap, (
        f"tile budget {vmem_budget(tm)} B exceeds VMEM headroom ({vmem_budget_cap} B); "
        "lower tm or add a K grid axis")
    # TODO(synk): if I*H*2B grows beyond ~1/4 of per-TC VMEM (e.g. H>=2048 with I=4H on
    # v7x), add a K(=I) grid axis with a VMEM f32 accumulator + pl.when init/finalize
    # instead of keeping W fully resident.

    n_blocks = pl.cdiv(M, tm)   # ragged last block: reads padded, writes masked by Pallas
    vmem_limit = int(min(vmem_cap, vmem_budget(tm) + (16 << 20)))

    # Constant-index inputs: single-buffered (nothing to prefetch across steps).
    # NOTE: with a constant index_map these should DMA exactly once; if a Mosaic dump
    # ever shows per-step re-fetch, switch W to memory_space=pl.ANY + one manual
    # make_async_copy into a VMEM scratch.
    resident = lambda shape: pl.BlockSpec(shape, lambda i: (0, 0),
                                          pipeline_mode=pl.Buffered(1))

    out2d = pl.pallas_call(
        bert_output_kernel,
        out_shape=jax.ShapeDtypeStruct((M, H), out_dtype),
        grid_spec=pltpu.PrefetchScalarGridSpec(
            num_scalar_prefetch=0,
            grid=(n_blocks,),
            in_specs=[
                pl.BlockSpec((tm, I), lambda i: (i, 0)),   # activation tile
                resident((I, H)),                          # resident dense weight (bf16)
                resident((3, H)),                          # packed bias / gamma / beta
                pl.BlockSpec((tm, H), lambda i: (i, 0)),   # residual tile
            ],
            out_specs=pl.BlockSpec((tm, H), lambda i: (i, 0)),
        ),
        compiler_params=pltpu.CompilerParams(
            dimension_semantics=("parallel",),   # megacore-shards the row axis
            vmem_limit_bytes=vmem_limit,
        ),
    )(x2d, w_c, params, r2d)

    return out2d.reshape(B, S, H)


def reference(hidden_states, input_tensor, W, b, gamma, beta):
    h = hidden_states @ W + b
    h = h + input_tensor
    u = jnp.mean(h, axis=-1, keepdims=True)
    s = jnp.mean((h - u) ** 2, axis=-1, keepdims=True)
    xn = (h - u) / jnp.sqrt(s + EPS)
    return gamma * xn + beta


if __name__ == "__main__":
    # Small but representative config: lane-dense hidden size (multiple of 128),
    # I = 4*H like BERT's FFN, and M = B*S = 2048 rows so tm=512 gives 4 grid blocks
    # (>= 2 per TensorCore on v7x -> pipelining and megacore actually engage).
    B, S, H, I = 8, 256, 256, 1024

    key = jax.random.PRNGKey(0)
    k1, k2, k3, k4, k5 = jax.random.split(key, 5)

    hidden_states = jax.random.normal(k1, (B, S, I), dtype=jnp.float32)
    input_tensor = jax.random.normal(k2, (B, S, H), dtype=jnp.float32)

    # Deterministic synthetic parameters (shapes match nn.Linear(I, H) + BertLayerNorm(H)).
    W = jax.random.normal(k3, (I, H), dtype=jnp.float32) * (1.0 / jnp.sqrt(I))
    b = jax.random.normal(k4, (H,), dtype=jnp.float32) * 0.02
    gamma = jnp.ones((H,), dtype=jnp.float32) + 0.01 * jax.random.normal(k5, (H,), dtype=jnp.float32)
    beta = jnp.zeros((H,), dtype=jnp.float32)

    out = bert_output(hidden_states, input_tensor, W, b, gamma, beta)
    out = jax.block_until_ready(out)

    ref = reference(hidden_states, input_tensor, W, b, gamma, beta)
    assert out.shape == (B, S, H)
    # bf16 matmul operands (f32 accumulation) -> loosened tolerance vs. f32 reference.
    assert jnp.allclose(out, ref, atol=3e-2, rtol=3e-2), "mismatch vs reference"

    print("KERNEL_OK")
</pallas_src>

<mosaic_0001>
module attributes {stable_mosaic.version = 11 : i64} {
  func.func @bert_output_kernel(%arg0: i32, %arg1: memref<512x1024xf32, #tpu.memory_space<vmem>>, %arg2: memref<1024x256xbf16, #tpu.memory_space<vmem>>, %arg3: memref<3x256xf32, #tpu.memory_space<vmem>>, %arg4: memref<512x256xf32, #tpu.memory_space<vmem>>, %arg5: memref<512x256xf32, #tpu.memory_space<vmem>>) attributes {dimension_semantics = [#tpu.dimension_semantics<parallel>], iteration_bounds = array<i64: 4>, scalar_prefetch = 0 : i64, scratch_operands = 0 : i64, tpu.core_type = #tpu.core_type<tc>, window_params = [{transform_indices = @transform_0, window_bounds = array<i64: 512, 1024>}, {pipeline_mode = #tpu.pipeline_mode<synchronous>, transform_indices = @transform_1, window_bounds = array<i64: 1024, 256>}, {pipeline_mode = #tpu.pipeline_mode<synchronous>, transform_indices = @transform_2, window_bounds = array<i64: 3, 256>}, {transform_indices = @transform_3, window_bounds = array<i64: 512, 256>}, {transform_indices = @transform_4, window_bounds = array<i64: 512, 256>}]} {
    %c0 = arith.constant 0 : index
    %c0_0 = arith.constant 0 : index
    %0 = vector.load %arg2[%c0, %c0_0] : memref<1024x256xbf16, #tpu.memory_space<vmem>>, vector<1024x256xbf16>
    %c0_1 = arith.constant 0 : index
    %c0_2 = arith.constant 0 : index
    %1 = vector.load %arg1[%c0_1, %c0_2] : memref<512x1024xf32, #tpu.memory_space<vmem>>, vector<512x1024xf32>
    %2 = arith.truncf %1 : vector<512x1024xf32> to vector<512x1024xbf16>
    %cst = arith.constant dense<0.000000e+00> : vector<512x256xf32>
    %3 = tpu.matmul %2, %0, %cst {dimension_numbers = #tpu.dot_dimension_numbers<[1], [0], [0], [1], [0, 0, 1, 1], [], []>} : vector<512x1024xbf16>, vector<1024x256xbf16>, vector<512x256xf32> -> vector<512x256xf32>
    %c0_3 = arith.constant 0 : index
    %c0_4 = arith.constant 0 : index
    %4 = vector.load %arg3[%c0_3, %c0_4] : memref<3x256xf32, #tpu.memory_space<vmem>>, vector<3x256xf32>
    %5 = vector.extract_strided_slice %4 {offsets = [0, 0], sizes = [1, 256], strides = [1, 1]} : vector<3x256xf32> to vector<1x256xf32>
    %6 = vector.extract_strided_slice %4 {offsets = [1, 0], sizes = [1, 256], strides = [1, 1]} : vector<3x256xf32> to vector<1x256xf32>
    %7 = vector.extract_strided_slice %4 {offsets = [2, 0], sizes = [1, 256], strides = [1, 1]} : vector<3x256xf32> to vector<1x256xf32>
    %8 = vector.broadcast %5 : vector<1x256xf32> to vector<512x256xf32>
    %9 = arith.addf %3, %8 : vector<512x256xf32>
    %c0_5 = arith.constant 0 : index
    %c0_6 = arith.constant 0 : index
    %10 = vector.load %arg4[%c0_5, %c0_6] : memref<512x256xf32, #tpu.memory_space<vmem>>, vector<512x256xf32>
    %11 = arith.addf %9, %10 : vector<512x256xf32>
    %cst_7 = arith.constant dense<0.000000e+00> : vector<512xf32>
    %12 = vector.multi_reduction <add>, %11, %cst_7 [1] : vector<512x256xf32> to vector<512xf32>
    %13 = vector.shape_cast %12 : vector<512xf32> to vector<512x1xf32>
    %cst_8 = arith.constant 2.560000e+02 : f32
    %14 = vector.broadcast %cst_8 : f32 to vector<512x1xf32>
    %15 = arith.divf %13, %14 : vector<512x1xf32>
    %16 = arith.mulf %11, %11 : vector<512x256xf32>
    %cst_9 = arith.constant dense<0.000000e+00> : vector<512xf32>
    %17 = vector.multi_reduction <add>, %16, %cst_9 [1] : vector<512x256xf32> to vector<512xf32>
    %18 = vector.shape_cast %17 : vector<512xf32> to vector<512x1xf32>
    %cst_10 = arith.constant 2.560000e+02 : f32
    %19 = vector.broadcast %cst_10 : f32 to vector<512x1xf32>
    %20 = arith.divf %18, %19 : vector<512x1xf32>
    %21 = arith.mulf %15, %15 : vector<512x1xf32>
    %22 = arith.subf %20, %21 : vector<512x1xf32>
    %cst_11 = arith.constant 9.99999996E-13 : f32
    %23 = vector.broadcast %cst_11 : f32 to vector<512x1xf32>
    %24 = arith.addf %22, %23 : vector<512x1xf32>
    %25 = math.rsqrt %24 : vector<512x1xf32>
    %26 = vector.broadcast %25 : vector<512x1xf32> to vector<512x256xf32>
    %27 = arith.mulf %11, %26 : vector<512x256xf32>
    %28 = arith.mulf %15, %25 : vector<512x1xf32>
    %29 = vector.broadcast %28 : vector<512x1xf32> to vector<512x256xf32>
    %30 = arith.subf %27, %29 : vector<512x256xf32>
    %31 = vector.broadcast %6 : vector<1x256xf32> to vector<512x256xf32>
    %32 = arith.mulf %30, %31 : vector<512x256xf32>
    %33 = vector.broadcast %7 : vector<1x256xf32> to vector<512x256xf32>
    %34 = arith.addf %32, %33 : vector<512x256xf32>
    %c0_12 = arith.constant 0 : index
    %c0_13 = arith.constant 0 : index
    %35 = vector.load %arg5[%c0_12, %c0_13] : memref<512x256xf32, #tpu.memory_space<vmem>>, vector<512x256xf32>
    tpu.vector_store %arg5[%c0_12, %c0_13], %34 {strides = array<i32>} : memref<512x256xf32, #tpu.memory_space<vmem>>, vector<512x256xf32>,
    return
  }
  func.func @transform_0(%arg0: i32) -> (i32, i32) {
    %c0_i32 = arith.constant 0 : i32
    %c0_i32_0 = arith.constant 0 : i32
    return %arg0, %c0_i32 : i32, i32
  }
  func.func @transform_1(%arg0: i32) -> (i32, i32) {
    %c0_i32 = arith.constant 0 : i32
    %c0_i32_0 = arith.constant 0 : i32
    %c0_i32_1 = arith.constant 0 : i32
    return %c0_i32, %c0_i32_0 : i32, i32
  }
  func.func @transform_2(%arg0: i32) -> (i32, i32) {
    %c0_i32 = arith.constant 0 : i32
    %c0_i32_0 = arith.constant 0 : i32
    %c0_i32_1 = arith.constant 0 : i32
    return %c0_i32, %c0_i32_0 : i32, i32
  }
  func.func @transform_3(%arg0: i32) -> (i32, i32) {
    %c0_i32 = arith.constant 0 : i32
    %c0_i32_0 = arith.constant 0 : i32
    return %arg0, %c0_i32 : i32, i32
  }
  func.func @transform_4(%arg0: i32) -> (i32, i32) {
    %c0_i32 = arith.constant 0 : i32
    %c0_i32_0 = arith.constant 0 : i32
    return %arg0, %c0_i32 : i32, i32
  }
}

</mosaic_0001>

<bundles_post_ra>
// kernel: tpu_custom_call.1
= control target key start
LH: loop header
LB: loop body
LE: loop exit
PB: predicated region body
PF: predicated region fallthrough
CT: control target
= control target key end

     0   :  { %9 = vsyncpa [#allocation3], 0  ;;  %s9638_s0 = inlined_call_operand.hbm [shape: f32[2048,1024], index: 0, kind: input, shape index: {}]   ;;  %s9639_s1 = inlined_call_operand.hbm [shape: bf16[1024,256], index: 1, kind: input, shape index: {}]   ;;  %s9640_s2 = inlined_call_operand.hbm [shape: f32[3,256], index: 2, kind: input, shape index: {}]   ;;  %s9641_s3 = inlined_call_operand.hbm [shape: f32[2048,256], index: 3, kind: input, shape index: {}]   ;;  %s9642_s4 = inlined_call_operand.hbm [shape: f32[2048,256], index: 4, kind: output, shape index: {}]  }
   0x1   :  { %11 = vsyncpa [#allocation3 + $0x1], 0 }
   0x2   :  { %12 = vsyncpa [#allocation6], 0 }
   0x3   :  { %13 = vsyncpa [#allocation9], 0 }
   0x4   :  { %15 = vsyncpa [#allocation9 + $0x1], 0 }
   0x5   :  { %16 = vsyncpa [#allocation4], 0 }
   0x6   :  { %18 = vsyncpa [#allocation4 + $0x1], 0  ;;  %s6580_s15 = smov 0   ;;  %s6582_s16 = smov 0  }
   0x7   :  { %s6584_s17 = smov 0   ;;  %s6586_s18 = smov 0  }
   0x8 LB: > { %s6601_s19 = sadd.s32 4294967295, %s6540_s18   ;;  %s5279_s20 = sadd.s32 4294967294, %s6540_s18   ;;  %s6540_s18 = sphi %s6586_s18, %s10005_s18   ;;  %s6536_s17 = sphi %s6584_s17, %s10004_s17   ;;  %s6532_s16 = sphi %s6582_s16, %s10003_s16   ;;  %s6528_s15 = sphi %s6580_s15, %s10002_s15  }
   0x9   : > { %s6605_s21 = sadd.s32 1, %s6540_s18   ;;  %s31_s22 = sadd.s32 1, %s6536_s17 }
   0xa   : > { %s28_s23 = ssub.s32 %s6540_s18, %s6605_s21  ;;  %p38_p0 = scmp.ne.s32.totalorder %s6536_s17, %s6532_s16 }
   0xb   : > { %p29_p1 = scmp.eq.s32.totalorder %s28_s23, 0  ;;  %p39_p2 = scmp.eq.s32.totalorder %s6540_s18, 0 }
   0xc   : > { %p44_p3 = scmp.ne.s32.totalorder %s6532_s16, %s6528_s15  ;;  %p9643_p4 = scmp.eq.s32.totalorder %s6601_s19, 0 }
   0xd   : > { %s6617_s24 = scalar_select %p29_p1, %s6536_s17, %s31_s22  }
   0xe   : > { %p6619_p5 = por %p39_p2, %p38_p0  ;;  %p6625_p6 = por %p9643_p4, %p44_p3 }
   0xf   : > { %9741 = sst [smem:[#allocation15_spill]] %s6617_s24  ;;  %p136_p7 = scmp.eq.s32.totalorder %s6601_s19, 3 }
  0x10   : > { %s9742_s25 = scalar_select %p6619_p5, 1, 0 }
  0x11   : > { %s9743_s26 = scalar_select %p6625_p6, 1, 0 }
  0x12   : > { %p142_p8 = scmp.eq.s32.totalorder %s5279_s20, 3  ;;  %p5280_p9 = scmp.ge.s32.totalorder %s6540_s18, 1 }
  0x13   : > { %p149_p10 = scmp.lt.s32.totalorder %s6540_s18, 5  ;;  %p6632_p11 = por %p136_p7, %p38_p0 }
  0x14   : > { %p6636_p12 = por %p142_p8, %p44_p3  ;;  %s6542_s30 = smov [#allocation5]  }
  0x15   : > { %s9744_s27 = scalar_select %p6632_p11, 1, 0 }
  0x16   : > { %s9745_s28 = scalar_select %p6636_p12, 1, 0 }
  0x17   : > { %p6640_p13 = pnand %p5280_p9, %p149_p10  ;;  %s161_s5 = sshll.u32 %s6542_s30, 4  ;;  %s162_s5 = int_to_ptr.vmem [resolvable:$true] %s161_s5 }
  0x18   : > { %s6543_s7 = smov [#allocation7]   ;;  %s6350_s11 = scalar_lea.hbm %s9639_s1, 16384 }
  0x19   : > { %s9746_s29 = scalar_select %p6640_p13, 1, 0 }
  0x1a   : > { %p5964_p1 = pneg %p6640_p13  ;;  %s175_s8 = sshll.u32 %s6543_s7, 4  ;;  %s176_s8 = int_to_ptr.vmem [resolvable:$true] %s175_s8 }
  0x1b   : > { %p6351_p3 = scmp.ne.s32.totalorder %s9639_s1, %s6350_s11  ;;  %p6357_p10 = scmp.lt.u32.totalorder %s6350_s11, %s9639_s1 }
  0x1c   : > { %p6648_p2 = pnand %p5964_p1, %p9643_p4 }
  0x1e   : > { %p6352_p7 = pneg %p6648_p2 }
  0x20   : > { %p6353_p8 = pnand %p6352_p7, %p6351_p3 }
  0x22   : > { %p6354_p9 = pneg %p6353_p8 }
  0x24   : > { %p6359_p1 = pnand %p6357_p10, %p6354_p9 }
  0x26   : > { %6362 = shalt.err (!%p6359_p1)
}
  0x27   : > { %s6363_s22 = scalar_lea.vmem %s162_s5, 16384  ;;  %p6371_p11 = scmp.lt.s32.totalorder %s162_s5, %s162_s5 }
  0x28   : > { %p6364_p4 = scmp.ne.s32.totalorder %s162_s5, %s6363_s22  ;;  %p6372_p6 = scmp.lt.s32.totalorder %s6363_s22, %s6363_s22 }
  0x2a   : > { %p6366_p0 = pnand %p6364_p4, %p6352_p7  ;;  %p6373_p13 = por %p6372_p6, %p6371_p11 }
  0x2c   : > { %p6367_p12 = pneg %p6366_p0 }
  0x2e   : > { %p6374_p5 = pnand %p6373_p13, %p6367_p12 }
  0x30   : > { %6377 = shalt.err (!%p6374_p5)
}
  0x31   : > { %s6544_s23 = smov 128   ;;  %s6545_s30 = smov 8  }
  0x32   : > { %5967 = dma.hbm_to_vmem [thread:$0]  (!%p6648_p2), %s9639_s1, 16384, %s162_s5, [#allocation6], %s6544_s23, %s6544_s23, %s6545_s30  }
  0x33   : > { %s6676_s10 = sand.u32 1, %s6536_s17   ;;  %s6378_s13 = scalar_lea.hbm %s9640_s2, 128 }
  0x34   : > { %p6379_p4 = scmp.ne.s32.totalorder %s9640_s2, %s6378_s13  ;;  %p6385_p11 = scmp.lt.u32.totalorder %s6378_s13, %s9640_s2 }
  0x36   : > { %p6381_p5 = pnand %p6379_p4, %p6352_p7 }
  0x38   : > { %p6382_p6 = pneg %p6381_p5 }
  0x3a   : > { %p6387_p12 = pnand %p6385_p11, %p6382_p6 }
  0x3c   : > { %6390 = shalt.err (!%p6387_p12)
}
  0x3d   : > { %s6391_s5 = scalar_lea.vmem %s176_s8, 128  ;;  %p6399_p8 = scmp.lt.s32.totalorder %s176_s8, %s176_s8 }
  0x3e   : > { %p6392_p13 = scmp.ne.s32.totalorder %s176_s8, %s6391_s5  ;;  %p6400_p9 = scmp.lt.s32.totalorder %s6391_s5, %s6391_s5 }
  0x40   : > { %p6394_p0 = pnand %p6392_p13, %p6352_p7  ;;  %p6401_p10 = por %p6400_p9, %p6399_p8 }
  0x42   : > { %p6395_p3 = pneg %p6394_p0 }
  0x44   : > { %p6402_p1 = pnand %p6401_p10, %p6395_p3 }
  0x46   : > { %6405 = shalt.err (!%p6402_p1)
}
  0x47   : > { %5970 = dma.hbm_to_vmem [thread:$0]  (!%p6648_p2), %s9640_s2, 128, %s176_s8, [#allocation6]  }
  0x48   : > { %s5284_s24 = sshll.u32 %s6676_s10, 12  ;;  %s5433_s7 = sshll.u32 %s6540_s18, 16 }
  0x49   : > { %s6703_s12 = scalar_lea.hbm %s9638_s0, %s5433_s7  ;;  %s190_s6 = scalar_lea.vmem [#allocation2], %s5284_s24 }
  0x4a   : > { %s198_s13 = sshll.u32 %s190_s6, 4  ;;  %p9748_p7 = scmp.ne.s32.totalorder %s9742_s25, 0  ;;  %s6705_s13 = int_to_ptr.vmem [resolvable:$true] %s198_s13 }
  0x4b   : > { %p9749_p4 = scmp.lt.s32.totalorder %s6540_s18, 4  ;;  %s187_s8 = scalar_lea.sflag [#allocation3], %s6676_s10 }
  0x4c   : > { %s6406_s20 = scalar_lea.hbm %s6703_s12, 65536  ;;  %s6411_s25 = scalar_lea.hbm %s9638_s0, 262144 }
  0x4d   : > { %p6711_p5 = pnand %p9749_p4, %p9748_p7  ;;  %p6407_p2 = scmp.ne.s32.totalorder %s6703_s12, %s6406_s20 }
  0x4e   : > { %p6412_p13 = scmp.lt.u32.totalorder %s6703_s12, %s9638_s0  ;;  %p6413_p0 = scmp.lt.u32.totalorder %s6411_s25, %s6406_s20 }
  0x4f   : > { %p6408_p6 = pneg %p6711_p5  ;;  %p6415_p8 = scmp.lt.u32.totalorder %s6406_s20, %s6703_s12 }
  0x50   : > { %p6414_p3 = por %p6413_p0, %p6412_p13 }
  0x51   : > { %p6409_p11 = pnand %p6408_p6, %p6407_p2 }
  0x52   : > { %p6416_p9 = por %p6415_p8, %p6414_p3 }
  0x53   : > { %p6410_p12 = pneg %p6409_p11 }
  0x55   : > { %p6417_p10 = pnand %p6416_p9, %p6410_p12 }
  0x57   : > { %6420 = shalt.err (!%p6417_p10)
}
  0x58   : > { %s6421_s24 = scalar_lea.vmem %s6705_s13, 65536  ;;  %s6546_s7 = smov [#allocation2]  }
  0x59   : > { %p6422_p1 = scmp.ne.s32.totalorder %s6705_s13, %s6421_s24  ;;  %s6426_s9 = sshll.u32 %s6546_s7, 4  ;;  %s6427_s9 = int_to_ptr.vmem [resolvable:$false] %s6426_s9 }
  0x5a   : > { %s6428_s11 = scalar_lea.vmem %s6427_s9, 131072  ;;  %p6429_p2 = scmp.lt.s32.totalorder %s6705_s13, %s6427_s9 }
  0x5b   : > { %p6424_p7 = pnand %p6422_p1, %p6408_p6  ;;  %p6430_p11 = scmp.lt.s32.totalorder %s6428_s11, %s6421_s24 }
  0x5d   : > { %p6425_p4 = pneg %p6424_p7  ;;  %p6431_p13 = por %p6430_p11, %p6429_p2 }
  0x5f   : > { %p6432_p0 = pnand %p6431_p13, %p6425_p4 }
  0x61   : > { %6435 = shalt.err (!%p6432_p0)
}
  0x62   : > { %s6547_s6 = smov 1024   ;;  %s6548_s20 = smov 64  }
  0x63   : > { %5974 = dma.hbm_to_vmem [thread:$0]  (!%p6711_p5), %s6703_s12, 65536, %s6705_s13, %s187_s8, %s6547_s6, %s6547_s6, %s6548_s20  }
  0x64   : > { %s5288_s22 = sshll.u32 %s6676_s10, 10  ;;  %s5435_s5 = sshll.u32 %s6540_s18, 14 }
  0x65   : > { %s6748_s30 = scalar_lea.hbm %s9641_s3, %s5435_s5  ;;  %s212_s24 = scalar_lea.vmem [#allocation8], %s5288_s22 }
  0x66   : > { %s220_s7 = sshll.u32 %s212_s24, 4  ;;  %s209_s9 = scalar_lea.sflag [#allocation9], %s6676_s10  ;;  %s6750_s7 = int_to_ptr.vmem [resolvable:$true] %s220_s7 }
  0x67   : > { %s6436_s11 = scalar_lea.hbm %s6748_s30, 16384  ;;  %s6441_s8 = scalar_lea.hbm %s9641_s3, 65536 }
  0x68   : > { %p6437_p12 = scmp.ne.s32.totalorder %s6748_s30, %s6436_s11  ;;  %p6442_p9 = scmp.lt.u32.totalorder %s6748_s30, %s9641_s3 }
  0x69   : > { %p6443_p10 = scmp.lt.u32.totalorder %s6441_s8, %s6436_s11  ;;  %p6445_p7 = scmp.lt.u32.totalorder %s6436_s11, %s6748_s30 }
  0x6a   : > { %p6439_p3 = pnand %p6437_p12, %p6408_p6 }
  0x6b   : > { %p6444_p1 = por %p6443_p10, %p6442_p9 }
  0x6c   : > { %p6440_p8 = pneg %p6439_p3 }
  0x6d   : > { %p6446_p4 = por %p6445_p7, %p6444_p1 }
  0x6f   : > { %p6447_p2 = pnand %p6446_p4, %p6440_p8 }
  0x71   : > { %6450 = shalt.err (!%p6447_p2)
}
  0x72   : > { %s6451_s22 = scalar_lea.vmem %s6750_s7, 16384  ;;  %s6549_s5 = smov [#allocation8]  }
  0x73   : > { %p6452_p11 = scmp.ne.s32.totalorder %s6750_s7, %s6451_s22  ;;  %s6456_s25 = sshll.u32 %s6549_s5, 4  ;;  %s6457_s25 = int_to_ptr.vmem [resolvable:$false] %s6456_s25 }
  0x74   : > { %s6458_s23 = scalar_lea.vmem %s6457_s25, 32768  ;;  %p6459_p12 = scmp.lt.s32.totalorder %s6750_s7, %s6457_s25 }
  0x75   : > { %p6454_p13 = pnand %p6452_p11, %p6408_p6  ;;  %p6460_p3 = scmp.lt.s32.totalorder %s6458_s23, %s6451_s22 }
  0x77   : > { %p6455_p0 = pneg %p6454_p13  ;;  %p6461_p9 = por %p6460_p3, %p6459_p12 }
  0x79   : > { %p6462_p10 = pnand %p6461_p9, %p6455_p0 }
  0x7b   : > { %6465 = shalt.err (!%p6462_p10)
}
  0x7c   : > { %s6550_s24 = smov 256   ;;  %s6551_s11 = smov 16  }
  0x7d   : > { %5977 = dma.hbm_to_vmem [thread:$0]  (!%p6711_p5), %s6748_s30, 16384, %s6750_s7, %s209_s9, %s6550_s24, %s6550_s24, %s6551_s11  }
  0x7e   : > { %p9751_p6 = scmp.ne.s32.totalorder %s9746_s29, 0 }
  0x80   : > { %232 = sbr.rel (%p9751_p6) target bundleno = 1184 (0x4a0), region = 36 }
  0x87   : > { %s6781_s12 = sand.u32 1, %s6532_s16   ;;  %p9752_p8 = scmp.ne.s32.totalorder %s9743_s26, 0 }
  0x88   : > { %s5293_s13 = sshll.u32 %s6781_s12, 12  ;;  %s235_s8 = scalar_lea.sflag [#allocation3], %s6781_s12 }
  0x89   : > { %s6785_s6 = scalar_lea.vmem [#allocation2], %s5293_s13 }
  0x8a   : > { %6511 = dma.done.wait (%p9752_p8), %s235_s8, 65536  }
  0x8b   : > { %6513 = vsyncadd (%p9752_p8), %s235_s8, 4294901760  ;;  %p9753_p5 = scmp.eq.s32.totalorder %s6601_s19, 0 }
  0x8d   : > { %6515 = dma.done.wait (%p9753_p5), [#allocation6], 16512   ;;  %p9754_p1 = pmov %p9753_p5 }
  0x8e   : > { %s5296_s29 = sshll.u32 %s6781_s12, 10  ;;  %s252_s10 = scalar_lea.sflag [#allocation9], %s6781_s12 }
  0x8f   : > { %6517 = vsyncadd (%p9754_p1), [#allocation6], 4294950784  ;;  %s6799_s14 = scalar_lea.vmem [#allocation8], %s5296_s29 }
  0x90   : > { %6519 = dma.done.wait (%p9752_p8), %s252_s10, 16384  }
  0x91   : > { %6521 = vsyncadd (%p9752_p8), %s252_s10, 4294950912  ;;  %v6030_v0 = vld [vmem:[#allocation5 + $0x4] ss:$8 sps:$4 sm:$0xff]   ;;  %v6034_v2 = vld [vmem:[#allocation5] ss:$8 sps:$4 sm:$0xff]   ;;  %s8033_s26 = scalar_lea.vmem [#allocation10], %s5296_s29 }
  0x92   : > { %v6032_v1 = vld [vmem:[#allocation5 + $0x204] ss:$8 sps:$4 sm:$0xff]   ;;  %1844 = vmatprep.subr.bf16.mxu1 %v6030_v0  ;;  %v6035_v3 = vld [vmem:[#allocation5 + $0x200] ss:$8 sps:$4 sm:$0xff]   ;;  %v6036_v4 = vld [vmem:[#allocation5 + $0x14] ss:$8 sps:$4 sm:$0xff]  }
  0x93   : > { %2550 = vmatprep.subr.bf16.mxu0 %v6032_v1  ;;  %1845 = vmatpush1.bf16.msra.mxu1 %v6034_v2  ;;  %v6038_v5 = vld [vmem:[#allocation5 + $0x214] ss:$8 sps:$4 sm:$0xff]   ;;  %v6040_v6 = vld [vmem:[#allocation5 + $0x10] ss:$8 sps:$4 sm:$0xff]   ;;  %v6042_v8 = vld [vmem:[#allocation5 + $0x24] ss:$8 sps:$4 sm:$0xff]  }
  0x94   : > { %2551 = vmatpush1.bf16.msra.mxu0 %v6035_v3  ;;  %1846 = vmatprep.subr.bf16.mxu1 %v6036_v4  ;;  %v6041_v7 = vld [vmem:[#allocation5 + $0x210] ss:$8 sps:$4 sm:$0xff]   ;;  %v6044_v9 = vld [vmem:[#allocation5 + $0x224] ss:$8 sps:$4 sm:$0xff]   ;;  %v6046_v10 = vld [vmem:[#allocation5 + $0x20] ss:$8 sps:$4 sm:$0xff]  }
  0x95   : > { %2552 = vmatprep.subr.bf16.mxu0 %v6038_v5  ;;  %v6047_v11 = vld [vmem:[#allocation5 + $0x220] ss:$8 sps:$4 sm:$0xff]   ;;  %v6048_v12 = vld [vmem:[#allocation5 + $0x34] ss:$8 sps:$4 sm:$0xff]   ;;  %v6052_v14 = vld [vmem:[#allocation5 + $0x30] ss:$8 sps:$4 sm:$0xff]  }
  0x96   : > { %v6050_v13 = vld [vmem:[#allocation5 + $0x234] ss:$8 sps:$4 sm:$0xff]   ;;  %v6053_v15 = vld [vmem:[#allocation5 + $0x230] ss:$8 sps:$4 sm:$0xff]   ;;  %v6054_v16 = vld [vmem:[#allocation5 + $0x44] ss:$8 sps:$4 sm:$0xff]  }
  0x97   : > { %1847 = vmatpush1.bf16.msra.mxu1 %v6040_v6  ;;  %v6056_v17 = vld [vmem:[#allocation5 + $0x244] ss:$8 sps:$4 sm:$0xff]   ;;  %v6058_v18 = vld [vmem:[#allocation5 + $0x40] ss:$8 sps:$4 sm:$0xff]   ;;  %v6060_v20 = vld [vmem:[#allocation5 + $0x54] ss:$8 sps:$4 sm:$0xff]  }
  0x98   : > { %2553 = vmatpush1.bf16.msra.mxu0 %v6041_v7  ;;  %1848 = vmatprep.subr.bf16.mxu1 %v6042_v8  ;;  %v6059_v19 = vld [vmem:[#allocation5 + $0x240] ss:$8 sps:$4 sm:$0xff]   ;;  %v6062_v21 = vld [vmem:[#allocation5 + $0x254] ss:$8 sps:$4 sm:$0xff]   ;;  %v6064_v22 = vld [vmem:[#allocation5 + $0x50] ss:$8 sps:$4 sm:$0xff]  }
  0x99   : > { %2554 = vmatprep.subr.bf16.mxu0 %v6044_v9  ;;  %v6065_v23 = vld [vmem:[#allocation5 + $0x250] ss:$8 sps:$4 sm:$0xff]   ;;  %v6066_v24 = vld [vmem:[#allocation5 + $0x64] ss:$8 sps:$4 sm:$0xff]   ;;  %v6070_v26 = vld [vmem:[#allocation5 + $0x60] ss:$8 sps:$4 sm:$0xff]  }
  0x9a   : > { %v6068_v25 = vld [vmem:[#allocation5 + $0x264] ss:$8 sps:$4 sm:$0xff]   ;;  %v6071_v27 = vld [vmem:[#allocation5 + $0x260] ss:$8 sps:$4 sm:$0xff]   ;;  %v6072_v28 = vld [vmem:[#allocation5 + $0x74] ss:$8 sps:$4 sm:$0xff]  }
  0x9b   : > { %1849 = vmatpush1.bf16.msra.mxu1 %v6046_v10  ;;  %v6074_v29 = vld [vmem:[#allocation5 + $0x274] ss:$8 sps:$4 sm:$0xff]   ;;  %v6076_v30 = vld [vmem:[#allocation5 + $0x70] ss:$8 sps:$4 sm:$0xff]   ;;  %v6078_v32 = vld [vmem:[#allocation5 + $0x84] ss:$8 sps:$4 sm:$0xff]  }
  0x9c   : > { %2555 = vmatpush1.bf16.msra.mxu0 %v6047_v11  ;;  %1850 = vmatprep.subr.bf16.mxu1 %v6048_v12  ;;  %v6077_v31 = vld [vmem:[#allocation5 + $0x270] ss:$8 sps:$4 sm:$0xff]   ;;  %v6080_v33 = vld [vmem:[#allocation5 + $0x284] ss:$8 sps:$4 sm:$0xff]   ;;  %v6082_v34 = vld [vmem:[#allocation5 + $0x80] ss:$8 sps:$4 sm:$0xff]  }
  0x9d   : > { %2556 = vmatprep.subr.bf16.mxu0 %v6050_v13  ;;  %v6083_v35 = vld [vmem:[#allocation5 + $0x280] ss:$8 sps:$4 sm:$0xff]   ;;  %v6084_v36 = vld [vmem:[#allocation5 + $0x94] ss:$8 sps:$4 sm:$0xff]   ;;  %v6088_v38 = vld [vmem:[#allocation5 + $0x90] ss:$8 sps:$4 sm:$0xff]  }
  0x9e   : > { %v6086_v37 = vld [vmem:[#allocation5 + $0x294] ss:$8 sps:$4 sm:$0xff]   ;;  %v6089_v39 = vld [vmem:[#allocation5 + $0x290] ss:$8 sps:$4 sm:$0xff]   ;;  %v6090_v40 = vld [vmem:[#allocation5 + $0xa4] ss:$8 sps:$4 sm:$0xff]  }
  0x9f   : > { %1851 = vmatpush1.bf16.msra.mxu1 %v6052_v14  ;;  %v6092_v41 = vld [vmem:[#allocation5 + $0x2a4] ss:$8 sps:$4 sm:$0xff]   ;;  %v6094_v42 = vld [vmem:[#allocation5 + $0xa0] ss:$8 sps:$4 sm:$0xff]   ;;  %v6096_v44 = vld [vmem:[#allocation5 + $0xb4] ss:$8 sps:$4 sm:$0xff]  }
  0xa0   : > { %2557 = vmatpush1.bf16.msra.mxu0 %v6053_v15  ;;  %1852 = vmatprep.subr.bf16.mxu1 %v6054_v16  ;;  %v6095_v43 = vld [vmem:[#allocation5 + $0x2a0] ss:$8 sps:$4 sm:$0xff]   ;;  %v6098_v45 = vld [vmem:[#allocation5 + $0x2b4] ss:$8 sps:$4 sm:$0xff]   ;;  %v6100_v50 = vld [vmem:[#allocation5 + $0xb0] ss:$8 sps:$4 sm:$0xff]  }
  0xa1   : > { %2558 = vmatprep.subr.bf16.mxu0 %v6056_v17  ;;  %v417_v46 = vld [vmem:[%s6785_s6 + $0x8] sm:$0xff]  ;;  %v6101_v51 = vld [vmem:[#allocation5 + $0x2b0] ss:$8 sps:$4 sm:$0xff]   ;;  %v6108_v58 = vld [vmem:[#allocation5 + $0xd4] ss:$8 sps:$4 sm:$0xff]   ;;  %s5437_s30 = sshll.u32 %s6601_s19, 14 }
  0xa2   : > { %v425_v47 = vld [vmem:[%s6785_s6 + $0x48] sm:$0xff]  ;;  %v6110_v59 = vld [vmem:[#allocation5 + $0x2d4] ss:$8 sps:$4 sm:$0xff]   ;;  %v6112_v60 = vld [vmem:[#allocation5 + $0xd0] ss:$8 sps:$4 sm:$0xff]   ;;  %s5164_s7 = sshll.u32 %s8033_s26, 4  ;;  %s9589_s22 = scalar_lea.hbm %s9642_s4, %s5437_s30  ;;  %s9591_s7 = int_to_ptr.vmem [resolvable:$true] %s5164_s7 }
  0xa3   : > { %1853 = vmatpush1.bf16.msra.mxu1 %v6058_v18  ;;  %v421_v48 = vld [vmem:[%s6785_s6 + $0x28] sm:$0xff]  ;;  %v929_v52 = vpack.c.bf16 %v425_v47, %v417_v46  ;;  %v6113_v61 = vld [vmem:[#allocation5 + $0x2d0] ss:$8 sps:$4 sm:$0xff]   ;;  %v6120_v2 = vld [vmem:[#allocation5 + $0xf4] ss:$8 sps:$4 sm:$0xff]   ;;  %s5150_s19 = scalar_lea.sflag [#allocation4], %s6781_s12 }
  0xa4   : > { %2559 = vmatpush1.bf16.msra.mxu0 %v6059_v19  ;;  %1854 = vmatprep.subr.bf16.mxu1 %v6060_v20  ;;  %v429_v49 = vld [vmem:[%s6785_s6 + $0x68] sm:$0xff]  ;;  %v6122_v3 = vld [vmem:[#allocation5 + $0x2f4] ss:$8 sps:$4 sm:$0xff]   ;;  %v6124_v4 = vld [vmem:[#allocation5 + $0xf0] ss:$8 sps:$4 sm:$0xff]   ;;  %s6466_s5 = scalar_lea.vmem %s9591_s7, 16384 }
  0xa5   : > { %2560 = vmatprep.subr.bf16.mxu0 %v6062_v21  ;;  %v933_v53 = vpack.c.bf16 %v429_v49, %v421_v48  ;;  %v6102_v54 = vld [vmem:[#allocation5 + $0xc4] ss:$8 sps:$4 sm:$0xff]   ;;  %1876 = vmatprep.mubr.bf16.mxu1 %v929_v52  ;;  %v6106_v56 = vld [vmem:[#allocation5 + $0xc0] ss:$8 sps:$4 sm:$0xff]   ;;  %v6125_v5 = vld [vmem:[#allocation5 + $0x2f0] ss:$8 sps:$4 sm:$0xff]   ;;  %p6467_p7 = scmp.ne.s32.totalorder %s9591_s7, %s6466_s5 }
  0xa6   : > { %v6104_v55 = vld [vmem:[#allocation5 + $0x2c4] ss:$8 sps:$4 sm:$0xff]   ;;  %v6107_v57 = vld [vmem:[#allocation5 + $0x2c0] ss:$8 sps:$4 sm:$0xff]   ;;  %v6149_v46 = vld [vmem:[#allocation5 + $0x334] ss:$8 sps:$4 sm:$0xff]  }
  0xa7   : > { %1855 = vmatpush1.bf16.msra.mxu1 %v6064_v22  ;;  %2582 = vmatprep.mubr.bf16.mxu0 %v933_v53  ;;  %v6114_v62 = vld [vmem:[#allocation5 + $0xe4] ss:$8 sps:$4 sm:$0xff]   ;;  %v6118_v0 = vld [vmem:[#allocation5 + $0xe0] ss:$8 sps:$4 sm:$0xff]   ;;  %v6144_v52 = vld [vmem:[#allocation5 + $0x130] ss:$8 sps:$4 sm:$0xff]  }
  0xa8   : > { %2561 = vmatpush1.bf16.msra.mxu0 %v6065_v23  ;;  %1856 = vmatprep.subr.bf16.mxu1 %v6066_v24  ;;  %v6116_v63 = vld [vmem:[#allocation5 + $0x2e4] ss:$8 sps:$4 sm:$0xff]   ;;  %v6119_v1 = vld [vmem:[#allocation5 + $0x2e0] ss:$8 sps:$4 sm:$0xff]   ;;  %v6147_v53 = vld [vmem:[#allocation5 + $0x330] ss:$8 sps:$4 sm:$0xff]  }
  0xa9   : > { %2562 = vmatprep.subr.bf16.mxu0 %v6068_v25  ;;  %v416_v6 = vld [vmem:[%s6785_s6] sm:$0xff]  ;;  %v433_v12 = vld [vmem:[%s6785_s6 + $0x88] sm:$0xff]  ;;  %p9999_p4 = scmp.ne.s32.totalorder %s9744_s27, 0  ;;  %s6552_s25 = smov [#allocation10]  }
  0xaa   : > { %v424_v7 = vld [vmem:[%s6785_s6 + $0x40] sm:$0xff]  ;;  %v441_v13 = vld [vmem:[%s6785_s6 + $0xc8] sm:$0xff]  ;;  %s6470_s23 = sshll.u32 %s6552_s25, 4  ;;  %s6471_s23 = int_to_ptr.vmem [resolvable:$false] %s6470_s23 }
  0xab   : > { %1857 = vmatpush1.bf16.msra.mxu1 %v6070_v26  ;;  %v6128_v8 = vld [vmem:[#allocation5 + $0x104] ss:$8 sps:$4 sm:$0xff]   ;;  %v928_v16 = vpack.c.bf16 %v424_v7, %v416_v6  ;;  %v6126_v18 = vld [vmem:[#allocation5 + $0x100] ss:$8 sps:$4 sm:$0xff]   ;;  %v937_v20 = vpack.c.bf16 %v441_v13, %v433_v12  ;;  %v6134_v26 = vld [vmem:[#allocation5 + $0x114] ss:$8 sps:$4 sm:$0xff]   ;;  %p6468_p2 = pnand %p6467_p7, %p9999_p4  ;;  %p6473_p13 = scmp.lt.s32.totalorder %s9591_s7, %s6471_s23 }
  0xac   : > { %2563 = vmatpush1.bf16.msra.mxu0 %v6071_v27  ;;  %1858 = vmatprep.subr.bf16.mxu1 %v6072_v28  ;;  %v420_v9 = vld [vmem:[%s6785_s6 + $0x20] sm:$0xff]  ;;  %v437_v14 = vld [vmem:[%s6785_s6 + $0xa8] sm:$0xff]  ;;  %v6137_v27 = vld [vmem:[#allocation5 + $0x314] ss:$8 sps:$4 sm:$0xff]   ;;  %s6472_s24 = scalar_lea.vmem %s6471_s23, 32768 }
  0xad   : > { %2564 = vmatprep.subr.bf16.mxu0 %v6074_v29  ;;  %v428_v10 = vld [vmem:[%s6785_s6 + $0x60] sm:$0xff]  ;;  %v445_v15 = vld [vmem:[%s6785_s6 + $0xe8] sm:$0xff]  ;;  %v6156_v6 = vld [vmem:[#allocation5 + $0x150] ss:$8 sps:$4 sm:$0xff]   ;;  %p6469_p11 = pneg %p6468_p2  ;;  %p6474_p0 = scmp.lt.s32.totalorder %s6472_s24, %s6466_s5 }
  0xae   : > { %v6131_v11 = vld [vmem:[#allocation5 + $0x304] ss:$8 sps:$4 sm:$0xff]   ;;  %v932_v17 = vpack.c.bf16 %v428_v10, %v420_v9  ;;  %v6129_v19 = vld [vmem:[#allocation5 + $0x300] ss:$8 sps:$4 sm:$0xff]   ;;  %v941_v21 = vpack.c.bf16 %v445_v15, %v437_v14  ;;  %v6158_v7 = vld [vmem:[#allocation5 + $0x154] ss:$8 sps:$4 sm:$0xff]  }
  0xaf   : > { %1859 = vmatpush1.bf16.msra.mxu1 %v6076_v30  ;;  %v432_v22 = vld [vmem:[%s6785_s6 + $0x80] sm:$0xff]  ;;  %v449_v28 = vld [vmem:[%s6785_s6 + $0x108] sm:$0xff]  ;;  %v6159_v10 = vld [vmem:[#allocation5 + $0x350] ss:$8 sps:$4 sm:$0xff]   ;;  %p6475_p12 = por %p6474_p0, %p6473_p13 }
  0xb0   : > { %2565 = vmatpush1.bf16.msra.mxu0 %v6077_v31  ;;  %1860 = vmatprep.subr.bf16.mxu1 %v6078_v32  ;;  %v440_v23 = vld [vmem:[%s6785_s6 + $0xc0] sm:$0xff]  ;;  %v457_v29 = vld [vmem:[%s6785_s6 + $0x148] sm:$0xff]  ;;  %v6132_v32 = vld [vmem:[#allocation5 + $0x110] ss:$8 sps:$4 sm:$0xff]  }
  0xb1   : > { %2566 = vmatprep.subr.bf16.mxu0 %v6080_v33  ;;  %v436_v24 = vld [vmem:[%s6785_s6 + $0xa0] sm:$0xff]  ;;  %v453_v30 = vld [vmem:[%s6785_s6 + $0x128] sm:$0xff]  ;;  %v6135_v33 = vld [vmem:[#allocation5 + $0x310] ss:$8 sps:$4 sm:$0xff]   ;;  %p6476_p3 = pnand %p6475_p12, %p6469_p11 }
  0xb2   : > { %v444_v25 = vld [vmem:[%s6785_s6 + $0xe0] sm:$0xff]  ;;  %v461_v31 = vld [vmem:[%s6785_s6 + $0x168] sm:$0xff] }
  0xb3   : > { %1861 = vmatpush1.bf16.msra.mxu1 %v6082_v34  ;;  %v6140_v34 = vld [vmem:[#allocation5 + $0x124] ss:$8 sps:$4 sm:$0xff]  }
  0xb4   : > { %2567 = vmatpush1.bf16.msra.mxu0 %v6083_v35  ;;  %1862 = vmatprep.subr.bf16.mxu1 %v6084_v36  ;;  %v6143_v35 = vld [vmem:[#allocation5 + $0x324] ss:$8 sps:$4 sm:$0xff]   ;;  %v936_v36 = vpack.c.bf16 %v440_v23, %v432_v22  ;;  %v6162_v22 = vld [vmem:[#allocation5 + $0x160] ss:$8 sps:$4 sm:$0xff]  }
  0xb5   : > { %2568 = vmatprep.subr.bf16.mxu0 %v6086_v37  ;;  %v940_v37 = vpack.c.bf16 %v444_v25, %v436_v24  ;;  %v460_v47 = vld [vmem:[%s6785_s6 + $0x160] sm:$0xff]  ;;  %v465_v48 = vld [vmem:[%s6785_s6 + $0x188] sm:$0xff] }
  0xb6   : > { %v473_v49 = vld [vmem:[%s6785_s6 + $0x1c8] sm:$0xff]  ;;  %v480_v14 = vld [vmem:[%s6785_s6 + $0x200] sm:$0xff] }
  0xb7   : > { %1863 = vmatpush1.bf16.msra.mxu1 %v6088_v38  ;;  %v945_v38 = vpack.c.bf16 %v457_v29, %v449_v28  ;;  %v488_v15 = vld [vmem:[%s6785_s6 + $0x240] sm:$0xff] }
  0xb8   : > { %2569 = vmatpush1.bf16.msra.mxu0 %v6089_v39  ;;  %1864 = vmatprep.subr.bf16.mxu1 %v6090_v40  ;;  %v949_v39 = vpack.c.bf16 %v461_v31, %v453_v30  ;;  %v6138_v40 = vld [vmem:[#allocation5 + $0x120] ss:$8 sps:$4 sm:$0xff]   ;;  %v6164_v23 = vld [vmem:[#allocation5 + $0x164] ss:$8 sps:$4 sm:$0xff]   ;;  %v960_v24 = vpack.c.bf16 %v488_v15, %v480_v14 }
  0xb9   : > { %2570 = vmatprep.subr.bf16.mxu0 %v6092_v41  ;;  %v6141_v41 = vld [vmem:[#allocation5 + $0x320] ss:$8 sps:$4 sm:$0xff]  }
  0xba   : > { %v496_v30 = vld [vmem:[%s6785_s6 + $0x280] sm:$0xff] }
  0xbb   : > { %1865 = vmatpush1.bf16.msra.mxu1 %v6094_v42  ;;  %v448_v42 = vld [vmem:[%s6785_s6 + $0x100] sm:$0xff] }
  0xbc   : > { %2571 = vmatpush1.bf16.msra.mxu0 %v6095_v43  ;;  %1866 = vmatprep.subr.bf16.mxu1 %v6096_v44  ;;  %v456_v43 = vld [vmem:[%s6785_s6 + $0x140] sm:$0xff] }
  0xbd   : > { %2572 = vmatprep.subr.bf16.mxu0 %v6098_v45  ;;  %v452_v44 = vld [vmem:[%s6785_s6 + $0x120] sm:$0xff]  ;;  %v6146_v45 = vld [vmem:[#allocation5 + $0x134] ss:$8 sps:$4 sm:$0xff]  }
  0xbe   : > { %v504_v31 = vld [vmem:[%s6785_s6 + $0x2c0] sm:$0xff] }
  0xbf   : > { %1867 = vmatpush1.bf16.msra.mxu1 %v6100_v50  ;;  %v469_v50 = vld [vmem:[%s6785_s6 + $0x1a8] sm:$0xff]  ;;  %v544_v14 = vld [vmem:[%s6785_s6 + $0x400] sm:$0xff] }
  0xc0   : > { %2573 = vmatpush1.bf16.msra.mxu0 %v6101_v51  ;;  %1868 = vmatprep.subr.bf16.mxu1 %v6102_v54  ;;  %v477_v51 = vld [vmem:[%s6785_s6 + $0x1e8] sm:$0xff]  ;;  %v552_v15 = vld [vmem:[%s6785_s6 + $0x440] sm:$0xff] }
  0xc1   : > { %2574 = vmatprep.subr.bf16.mxu0 %v6104_v55  ;;  %v6152_v54 = vld [vmem:[#allocation5 + $0x144] ss:$8 sps:$4 sm:$0xff]   ;;  %v944_v55 = vpack.c.bf16 %v456_v43, %v448_v42  ;;  %v6171_v42 = vld [vmem:[#allocation5 + $0x370] ss:$8 sps:$4 sm:$0xff]   ;;  %v6173_v43 = vld [vmem:[#allocation5 + $0x374] ss:$8 sps:$4 sm:$0xff]  }
  0xc3   : > { %1869 = vmatpush1.bf16.msra.mxu1 %v6106_v56  ;;  %v948_v56 = vpack.c.bf16 %v460_v47, %v452_v44  ;;  %v520_v47 = vld [vmem:[%s6785_s6 + $0x340] sm:$0xff] }
  0xc4   : > { %2575 = vmatpush1.bf16.msra.mxu0 %v6107_v57  ;;  %1870 = vmatprep.subr.bf16.mxu1 %v6108_v58  ;;  %v6155_v57 = vld [vmem:[#allocation5 + $0x344] ss:$8 sps:$4 sm:$0xff]   ;;  %v953_v58 = vpack.c.bf16 %v473_v49, %v465_v48 }
  0xc5   : > { %2576 = vmatprep.subr.bf16.mxu0 %v6110_v59  ;;  %v957_v59 = vpack.c.bf16 %v477_v51, %v469_v50  ;;  %v516_v48 = vld [vmem:[%s6785_s6 + $0x320] sm:$0xff]  ;;  %v529_v50 = vld [vmem:[%s6785_s6 + $0x388] sm:$0xff] }
  0xc6   : > { %v524_v49 = vld [vmem:[%s6785_s6 + $0x360] sm:$0xff]  ;;  %v537_v51 = vld [vmem:[%s6785_s6 + $0x3c8] sm:$0xff] }
  0xc7   : > { %1871 = vmatpush1.bf16.msra.mxu1 %v6112_v60  ;;  %v6150_v60 = vld [vmem:[#allocation5 + $0x140] ss:$8 sps:$4 sm:$0xff]  }
  0xc8   : > { %2577 = vmatpush1.bf16.msra.mxu0 %v6113_v61  ;;  %1872 = vmatprep.subr.bf16.mxu1 %v6114_v62  ;;  %v6153_v61 = vld [vmem:[#allocation5 + $0x340] ss:$8 sps:$4 sm:$0xff]  }
  0xc9   : > { %2578 = vmatprep.subr.bf16.mxu0 %v6116_v63  ;;  %v464_v62 = vld [vmem:[%s6785_s6 + $0x180] sm:$0xff] }
  0xca   : > { %v472_v63 = vld [vmem:[%s6785_s6 + $0x1c0] sm:$0xff] }
  0xcb   : > { %1873 = vmatpush1.bf16.msra.mxu1 %v6118_v0  ;;  %v468_v0 = vld [vmem:[%s6785_s6 + $0x1a0] sm:$0xff] }
  0xcc   : > { %2579 = vmatpush1.bf16.msra.mxu0 %v6119_v1  ;;  %1874 = vmatprep.subr.bf16.mxu1 %v6120_v2  ;;  %v476_v1 = vld [vmem:[%s6785_s6 + $0x1e0] sm:$0xff]  ;;  %v481_v2 = vld [vmem:[%s6785_s6 + $0x208] sm:$0xff] }
  0xcd   : > { %2580 = vmatprep.subr.bf16.mxu0 %v6122_v3  ;;  %v489_v3 = vld [vmem:[%s6785_s6 + $0x248] sm:$0xff]  ;;  %v956_v9 = vpack.c.bf16 %v476_v1, %v468_v0  ;;  %v532_v0 = vld [vmem:[%s6785_s6 + $0x3a0] sm:$0xff] }
  0xce   : > { %v961_v12 = vpack.c.bf16 %v489_v3, %v481_v2  ;;  %v540_v1 = vld [vmem:[%s6785_s6 + $0x3e0] sm:$0xff]  ;;  %v545_v2 = vld [vmem:[%s6785_s6 + $0x408] sm:$0xff] }
  0xcf   : > { %1875 = vmatpush1.bf16.msra.mxu1 %v6124_v4  ;;  %v485_v4 = vld [vmem:[%s6785_s6 + $0x228] sm:$0xff] }
  0xd0   : > { %2581 = vmatpush1.bf16.msra.mxu0 %v6125_v5  ;;  %2197 = vmatprep.subr.bf16.mxu1 %v6128_v8  ;;  %v493_v5 = vld [vmem:[%s6785_s6 + $0x268] sm:$0xff]  ;;  %v952_v8 = vpack.c.bf16 %v472_v63, %v464_v62  ;;  %v528_v62 = vld [vmem:[%s6785_s6 + $0x380] sm:$0xff] }
  0xd1   : > { %2903 = vmatprep.subr.bf16.mxu0 %v6131_v11  ;;  %v6161_v11 = vld [vmem:[#allocation5 + $0x354] ss:$8 sps:$4 sm:$0xff]   ;;  %v965_v13 = vpack.c.bf16 %v493_v5, %v485_v4  ;;  %v536_v63 = vld [vmem:[%s6785_s6 + $0x3c0] sm:$0xff]  ;;  %v553_v3 = vld [vmem:[%s6785_s6 + $0x448] sm:$0xff] }
  0xd2   : > { %1877 = vmatmul.mubr.bf16.vlgmr.msra.gmra.mrb[0].mxu1 %v928_v16  ;;  %v484_v16 = vld [vmem:[%s6785_s6 + $0x220] sm:$0xff]  ;;  %v549_v4 = vld [vmem:[%s6785_s6 + $0x428] sm:$0xff] }
  0xd3   : > { %2583 = vmatmul.mubr.bf16.vlgmr.msra.gmra.mrb[0].mxu0 %v932_v17  ;;  %2198 = vmatpush1.bf16.msra.mxu1 %v6126_v18  ;;  %v492_v17 = vld [vmem:[%s6785_s6 + $0x260] sm:$0xff]  ;;  %v497_v18 = vld [vmem:[%s6785_s6 + $0x288] sm:$0xff] }
  0xd4   : > { %2904 = vmatpush1.bf16.msra.mxu0 %v6129_v19  ;;  %1886 = vmatprep.mubr.bf16.mxu1 %v937_v20  ;;  %v505_v19 = vld [vmem:[%s6785_s6 + $0x2c8] sm:$0xff]  ;;  %v964_v25 = vpack.c.bf16 %v492_v17, %v484_v16  ;;  %v548_v16 = vld [vmem:[%s6785_s6 + $0x420] sm:$0xff] }
  0xd5   : > { %2592 = vmatprep.mubr.bf16.mxu0 %v941_v21  ;;  %2199 = vmatprep.subr.bf16.mxu1 %v6134_v26  ;;  %v501_v20 = vld [vmem:[%s6785_s6 + $0x2a8] sm:$0xff]  ;;  %v969_v28 = vpack.c.bf16 %v505_v19, %v497_v18  ;;  %v556_v17 = vld [vmem:[%s6785_s6 + $0x460] sm:$0xff] }
  0xd6   : > { %2905 = vmatprep.subr.bf16.mxu0 %v6137_v27  ;;  %v509_v21 = vld [vmem:[%s6785_s6 + $0x2e8] sm:$0xff] }
  0xd7   : > { %2200 = vmatpush1.bf16.msra.mxu1 %v6132_v32  ;;  %v6165_v26 = vld [vmem:[#allocation5 + $0x360] ss:$8 sps:$4 sm:$0xff]   ;;  %v6167_v27 = vld [vmem:[#allocation5 + $0x364] ss:$8 sps:$4 sm:$0xff]   ;;  %v973_v29 = vpack.c.bf16 %v509_v21, %v501_v20 }
  0xd8   : > { %2906 = vmatpush1.bf16.msra.mxu0 %v6135_v33  ;;  %2201 = vmatprep.subr.bf16.mxu1 %v6140_v34  ;;  %v500_v32 = vld [vmem:[%s6785_s6 + $0x2a0] sm:$0xff]  ;;  %v513_v34 = vld [vmem:[%s6785_s6 + $0x308] sm:$0xff] }
  0xd9   : > { %2907 = vmatprep.subr.bf16.mxu0 %v6143_v35  ;;  %v508_v33 = vld [vmem:[%s6785_s6 + $0x2e0] sm:$0xff]  ;;  %v521_v35 = vld [vmem:[%s6785_s6 + $0x348] sm:$0xff] }
  0xda   : > { %1887 = vmatmul.mubr.bf16.gmra.mrb[4].mxu1 %v936_v36  ;;  %v517_v36 = vld [vmem:[%s6785_s6 + $0x328] sm:$0xff]  ;;  %v977_v44 = vpack.c.bf16 %v521_v35, %v513_v34 }
  0xdb   : > { %2593 = vmatmul.mubr.bf16.gmra.mrb[4].mxu0 %v940_v37  ;;  %1896 = vmatprep.mubr.bf16.mxu1 %v945_v38  ;;  %v525_v37 = vld [vmem:[%s6785_s6 + $0x368] sm:$0xff]  ;;  %v6168_v38 = vld [vmem:[#allocation5 + $0x170] ss:$8 sps:$4 sm:$0xff]  }
  0xdc   : > { %2602 = vmatprep.mubr.bf16.mxu0 %v949_v39  ;;  %2202 = vmatpush1.bf16.msra.mxu1 %v6138_v40  ;;  %v6170_v39 = vld [vmem:[#allocation5 + $0x174] ss:$8 sps:$4 sm:$0xff]   ;;  %v968_v40 = vpack.c.bf16 %v504_v31, %v496_v30  ;;  %v557_v5 = vld [vmem:[%s6785_s6 + $0x468] sm:$0xff]  ;;  %v560_v30 = vld [vmem:[%s6785_s6 + $0x480] sm:$0xff] }
  0xdd   : > { %2908 = vmatpush1.bf16.msra.mxu0 %v6141_v41  ;;  %2203 = vmatprep.subr.bf16.mxu1 %v6146_v45  ;;  %v972_v41 = vpack.c.bf16 %v508_v33, %v500_v32  ;;  %v981_v45 = vpack.c.bf16 %v525_v37, %v517_v36  ;;  %v561_v18 = vld [vmem:[%s6785_s6 + $0x488] sm:$0xff]  ;;  %v568_v31 = vld [vmem:[%s6785_s6 + $0x4c0] sm:$0xff] }
  0xde   : > { %2909 = vmatprep.subr.bf16.mxu0 %v6149_v46  ;;  %v512_v46 = vld [vmem:[%s6785_s6 + $0x300] sm:$0xff]  ;;  %v569_v19 = vld [vmem:[%s6785_s6 + $0x4c8] sm:$0xff] }
  0xdf   : > { %v565_v20 = vld [vmem:[%s6785_s6 + $0x4a8] sm:$0xff]  ;;  %v564_v32 = vld [vmem:[%s6785_s6 + $0x4a0] sm:$0xff] }
  0xe0   : > { %2204 = vmatpush1.bf16.msra.mxu1 %v6144_v52  ;;  %v533_v52 = vld [vmem:[%s6785_s6 + $0x3a8] sm:$0xff]  ;;  %v572_v33 = vld [vmem:[%s6785_s6 + $0x4e0] sm:$0xff] }
  0xe1   : > { %2910 = vmatpush1.bf16.msra.mxu0 %v6147_v53  ;;  %2205 = vmatprep.subr.bf16.mxu1 %v6152_v54  ;;  %v541_v53 = vld [vmem:[%s6785_s6 + $0x3e8] sm:$0xff] }
  0xe2   : > { %2911 = vmatprep.subr.bf16.mxu0 %v6155_v57  ;;  %1897 = vmatmul.mubr.bf16.gmra.mrb[8].mxu1 %v944_v55  ;;  %v6174_v54 = vld [vmem:[#allocation5 + $0x180] ss:$8 sps:$4 sm:$0xff]   ;;  %v6176_v55 = vld [vmem:[#allocation5 + $0x184] ss:$8 sps:$4 sm:$0xff]   ;;  %v980_v57 = vpack.c.bf16 %v524_v49, %v516_v48 }
  0xe3   : > { %2603 = vmatmul.mubr.bf16.gmra.mrb[8].mxu0 %v948_v56  ;;  %1906 = vmatprep.mubr.bf16.mxu1 %v953_v58  ;;  %v976_v56 = vpack.c.bf16 %v520_v47, %v512_v46  ;;  %v6177_v58 = vld [vmem:[#allocation5 + $0x380] ss:$8 sps:$4 sm:$0xff]  }
  0xe4   : > { %2612 = vmatprep.mubr.bf16.mxu0 %v957_v59  ;;  %2206 = vmatpush1.bf16.msra.mxu1 %v6150_v60  ;;  %v6179_v59 = vld [vmem:[#allocation5 + $0x384] ss:$8 sps:$4 sm:$0xff]   ;;  %v985_v60 = vpack.c.bf16 %v537_v51, %v529_v50 }
  0xe5   : > { %2912 = vmatpush1.bf16.msra.mxu0 %v6153_v61  ;;  %2207 = vmatprep.subr.bf16.mxu1 %v6158_v7  ;;  %v989_v61 = vpack.c.bf16 %v541_v53, %v533_v52  ;;  %v6182_v7 = vld [vmem:[#allocation5 + $0x194] ss:$8 sps:$4 sm:$0xff]   ;;  %v573_v21 = vld [vmem:[%s6785_s6 + $0x4e8] sm:$0xff]  ;;  %v576_v46 = vld [vmem:[%s6785_s6 + $0x500] sm:$0xff] }
  0xe6   : > { %2913 = vmatprep.subr.bf16.mxu0 %v6161_v11  ;;  %v6185_v11 = vld [vmem:[#allocation5 + $0x394] ss:$8 sps:$4 sm:$0xff]   ;;  %v577_v34 = vld [vmem:[%s6785_s6 + $0x508] sm:$0xff]  ;;  %v584_v47 = vld [vmem:[%s6785_s6 + $0x540] sm:$0xff] }
  0xe7   : > { %v585_v35 = vld [vmem:[%s6785_s6 + $0x548] sm:$0xff]  ;;  %v580_v48 = vld [vmem:[%s6785_s6 + $0x520] sm:$0xff] }
  0xe8   : > { %2208 = vmatpush1.bf16.msra.mxu1 %v6156_v6  ;;  %v6180_v6 = vld [vmem:[#allocation5 + $0x190] ss:$8 sps:$4 sm:$0xff]   ;;  %v581_v36 = vld [vmem:[%s6785_s6 + $0x528] sm:$0xff]  ;;  %v588_v49 = vld [vmem:[%s6785_s6 + $0x560] sm:$0xff] }
  0xe9   : > { %2914 = vmatpush1.bf16.msra.mxu0 %v6159_v10  ;;  %2209 = vmatprep.subr.bf16.mxu1 %v6164_v23  ;;  %v6183_v10 = vld [vmem:[#allocation5 + $0x390] ss:$8 sps:$4 sm:$0xff]   ;;  %v6188_v23 = vld [vmem:[#allocation5 + $0x1a4] ss:$8 sps:$4 sm:$0xff]  }
  0xea   : > { %1907 = vmatmul.mubr.bf16.gmra.mrb[12].mxu1 %v952_v8  ;;  %2915 = vmatprep.subr.bf16.mxu0 %v6167_v27  ;;  %v984_v8 = vpack.c.bf16 %v536_v63, %v528_v62  ;;  %v6191_v27 = vld [vmem:[#allocation5 + $0x3a4] ss:$8 sps:$4 sm:$0xff]  }
  0xeb   : > { %2613 = vmatmul.mubr.bf16.gmra.mrb[12].mxu0 %v956_v9  ;;  %1916 = vmatprep.mubr.bf16.mxu1 %v961_v12  ;;  %v988_v9 = vpack.c.bf16 %v540_v1, %v532_v0  ;;  %v993_v12 = vpack.c.bf16 %v553_v3, %v545_v2  ;;  %v589_v37 = vld [vmem:[%s6785_s6 + $0x568] sm:$0xff]  ;;  %v592_v62 = vld [vmem:[%s6785_s6 + $0x580] sm:$0xff] }
  0xec   : > { %2622 = vmatprep.mubr.bf16.mxu0 %v965_v13  ;;  %2210 = vmatpush1.bf16.msra.mxu1 %v6162_v22  ;;  %v997_v13 = vpack.c.bf16 %v557_v5, %v549_v4  ;;  %v6186_v22 = vld [vmem:[#allocation5 + $0x1a0] ss:$8 sps:$4 sm:$0xff]  }
  0xed   : > { %2916 = vmatpush1.bf16.msra.mxu0 %v6165_v26  ;;  %2211 = vmatprep.subr.bf16.mxu1 %v6170_v39  ;;  %v6189_v26 = vld [vmem:[#allocation5 + $0x3a0] ss:$8 sps:$4 sm:$0xff]   ;;  %v6194_v39 = vld [vmem:[#allocation5 + $0x1b4] ss:$8 sps:$4 sm:$0xff]  }
  0xee   : > { %2917 = vmatprep.subr.bf16.mxu0 %v6173_v43  ;;  %v6197_v43 = vld [vmem:[#allocation5 + $0x3b4] ss:$8 sps:$4 sm:$0xff]   ;;  %v593_v50 = vld [vmem:[%s6785_s6 + $0x588] sm:$0xff]  ;;  %v600_v63 = vld [vmem:[%s6785_s6 + $0x5c0] sm:$0xff] }
  0xef   : > { %v601_v51 = vld [vmem:[%s6785_s6 + $0x5c8] sm:$0xff]  ;;  %v596_v0 = vld [vmem:[%s6785_s6 + $0x5a0] sm:$0xff] }
  0xf0   : > { %2212 = vmatpush1.bf16.msra.mxu1 %v6168_v38  ;;  %v6192_v38 = vld [vmem:[#allocation5 + $0x1b0] ss:$8 sps:$4 sm:$0xff]   ;;  %v597_v52 = vld [vmem:[%s6785_s6 + $0x5a8] sm:$0xff]  ;;  %v604_v1 = vld [vmem:[%s6785_s6 + $0x5e0] sm:$0xff] }
  0xf1   : > { %2918 = vmatpush1.bf16.msra.mxu0 %v6171_v42  ;;  %2213 = vmatprep.subr.bf16.mxu1 %v6176_v55  ;;  %v6195_v42 = vld [vmem:[#allocation5 + $0x3b0] ss:$8 sps:$4 sm:$0xff]   ;;  %v605_v53 = vld [vmem:[%s6785_s6 + $0x5e8] sm:$0xff] }
  0xf2   : > { %1917 = vmatmul.mubr.bf16.gmra.mrb[16].mxu1 %v960_v24  ;;  %2919 = vmatprep.subr.bf16.mxu0 %v6179_v59  ;;  %v992_v24 = vpack.c.bf16 %v552_v15, %v544_v14  ;;  %v6200_v55 = vld [vmem:[#allocation5 + $0x1c4] ss:$8 sps:$4 sm:$0xff]  }
  0xf3   : > { %2623 = vmatmul.mubr.bf16.gmra.mrb[16].mxu0 %v964_v25  ;;  %1926 = vmatprep.mubr.bf16.mxu1 %v969_v28  ;;  %v996_v25 = vpack.c.bf16 %v556_v17, %v548_v16  ;;  %v1001_v28 = vpack.c.bf16 %v569_v19, %v561_v18  ;;  %v6203_v59 = vld [vmem:[#allocation5 + $0x3c4] ss:$8 sps:$4 sm:$0xff]  }
  0xf4   : > { %2632 = vmatprep.mubr.bf16.mxu0 %v973_v29  ;;  %2214 = vmatpush1.bf16.msra.mxu1 %v6174_v54  ;;  %v1005_v29 = vpack.c.bf16 %v573_v21, %v565_v20  ;;  %v6198_v54 = vld [vmem:[#allocation5 + $0x1c0] ss:$8 sps:$4 sm:$0xff]  }
  0xf5   : > { %2920 = vmatpush1.bf16.msra.mxu0 %v6177_v58  ;;  %2215 = vmatprep.subr.bf16.mxu1 %v6182_v7  ;;  %v6201_v58 = vld [vmem:[#allocation5 + $0x3c0] ss:$8 sps:$4 sm:$0xff]   ;;  %v6206_v7 = vld [vmem:[#allocation5 + $0x1d4] ss:$8 sps:$4 sm:$0xff]  }
  0xf6   : > { %2921 = vmatprep.subr.bf16.mxu0 %v6185_v11  ;;  %v609_v2 = vld [vmem:[%s6785_s6 + $0x608] sm:$0xff]  ;;  %v6209_v11 = vld [vmem:[#allocation5 + $0x3d4] ss:$8 sps:$4 sm:$0xff]   ;;  %v608_v14 = vld [vmem:[%s6785_s6 + $0x600] sm:$0xff] }
  0xf7   : > { %v617_v3 = vld [vmem:[%s6785_s6 + $0x648] sm:$0xff]  ;;  %v616_v15 = vld [vmem:[%s6785_s6 + $0x640] sm:$0xff] }
  0xf8   : > { %2216 = vmatpush1.bf16.msra.mxu1 %v6180_v6  ;;  %v613_v4 = vld [vmem:[%s6785_s6 + $0x628] sm:$0xff]  ;;  %v6204_v6 = vld [vmem:[#allocation5 + $0x1d0] ss:$8 sps:$4 sm:$0xff]   ;;  %v612_v16 = vld [vmem:[%s6785_s6 + $0x620] sm:$0xff] }
  0xf9   : > { %2922 = vmatpush1.bf16.msra.mxu0 %v6183_v10  ;;  %2217 = vmatprep.subr.bf16.mxu1 %v6188_v23  ;;  %v621_v5 = vld [vmem:[%s6785_s6 + $0x668] sm:$0xff]  ;;  %v6207_v10 = vld [vmem:[#allocation5 + $0x3d0] ss:$8 sps:$4 sm:$0xff]   ;;  %v620_v17 = vld [vmem:[%s6785_s6 + $0x660] sm:$0xff] }
  0xfa   : > { %1927 = vmatmul.mubr.bf16.gmra.mrb[20].mxu1 %v968_v40  ;;  %2923 = vmatprep.subr.bf16.mxu0 %v6191_v27  ;;  %v1000_v40 = vpack.c.bf16 %v568_v31, %v560_v30  ;;  %v625_v18 = vld [vmem:[%s6785_s6 + $0x688] sm:$0xff]  ;;  %v1028_v23 = vpack.c.bf16 %v620_v17, %v612_v16  ;;  %v632_v27 = vld [vmem:[%s6785_s6 + $0x6c0] sm:$0xff] }
  0xfb   : > { %2633 = vmatmul.mubr.bf16.gmra.mrb[20].mxu0 %v972_v41  ;;  %1936 = vmatprep.mubr.bf16.mxu1 %v977_v44  ;;  %v1004_v41 = vpack.c.bf16 %v572_v33, %v564_v32  ;;  %v1009_v44 = vpack.c.bf16 %v585_v35, %v577_v34  ;;  %v633_v19 = vld [vmem:[%s6785_s6 + $0x6c8] sm:$0xff]  ;;  %v636_v32 = vld [vmem:[%s6785_s6 + $0x6e0] sm:$0xff] }
  0xfc   : > { %2642 = vmatprep.mubr.bf16.mxu0 %v981_v45  ;;  %2218 = vmatpush1.bf16.msra.mxu1 %v6186_v22  ;;  %v1013_v45 = vpack.c.bf16 %v589_v37, %v581_v36  ;;  %v629_v20 = vld [vmem:[%s6785_s6 + $0x6a8] sm:$0xff]  ;;  %v1024_v22 = vpack.c.bf16 %v616_v15, %v608_v14 }
  0xfd   : > { %2924 = vmatpush1.bf16.msra.mxu0 %v6189_v26  ;;  %2219 = vmatprep.subr.bf16.mxu1 %v6194_v39  ;;  %v637_v21 = vld [vmem:[%s6785_s6 + $0x6e8] sm:$0xff]  ;;  %v624_v26 = vld [vmem:[%s6785_s6 + $0x680] sm:$0xff] }
  0xfe   : > { %2925 = vmatprep.subr.bf16.mxu0 %v6197_v43  ;;  %v6212_v30 = vld [vmem:[#allocation5 + $0x1e4] ss:$8 sps:$4 sm:$0xff]   ;;  %v6213_v31 = vld [vmem:[#allocation5 + $0x3e0] ss:$8 sps:$4 sm:$0xff]  }
  0xff   : > { %v641_v33 = vld [vmem:[%s6785_s6 + $0x708] sm:$0xff]  ;;  %v648_v43 = vld [vmem:[%s6785_s6 + $0x740] sm:$0xff] }
 0x100   : > { %2220 = vmatpush1.bf16.msra.mxu1 %v6192_v38  ;;  %v6215_v34 = vld [vmem:[#allocation5 + $0x3e4] ss:$8 sps:$4 sm:$0xff]   ;;  %v1032_v38 = vpack.c.bf16 %v632_v27, %v624_v26 }
 0x101   : > { %2926 = vmatpush1.bf16.msra.mxu0 %v6195_v42  ;;  %2221 = vmatprep.subr.bf16.mxu1 %v6200_v55  ;;  %v649_v35 = vld [vmem:[%s6785_s6 + $0x748] sm:$0xff]  ;;  %v640_v42 = vld [vmem:[%s6785_s6 + $0x700] sm:$0xff] }
 0x102   : > { %1937 = vmatmul.mubr.bf16.gmra.mrb[24].mxu1 %v976_v56  ;;  %v1008_v56 = vpack.c.bf16 %v584_v47, %v576_v46  ;;  %2927 = vmatprep.subr.bf16.mxu0 %v6203_v59  ;;  %v645_v36 = vld [vmem:[%s6785_s6 + $0x728] sm:$0xff]  ;;  %v664_v55 = vld [vmem:[%s6785_s6 + $0x7c0] sm:$0xff]  ;;  %v6219_v59 = vld [vmem:[#allocation5 + $0x3f0] ss:$8 sps:$4 sm:$0xff]  }
 0x103   : > { %2643 = vmatmul.mubr.bf16.gmra.mrb[24].mxu0 %v980_v57  ;;  %1946 = vmatprep.mubr.bf16.mxu1 %v985_v60  ;;  %v1012_v57 = vpack.c.bf16 %v588_v49, %v580_v48  ;;  %v1017_v60 = vpack.c.bf16 %v601_v51, %v593_v50  ;;  %v653_v37 = vld [vmem:[%s6785_s6 + $0x768] sm:$0xff]  ;;  %v1040_v50 = vpack.c.bf16 %v648_v43, %v640_v42  ;;  %v720_v42 = vld [vmem:[%s6785_s6 + $0x980] sm:$0xff] }
 0x104   : > { %2652 = vmatprep.mubr.bf16.mxu0 %v989_v61  ;;  %v1021_v61 = vpack.c.bf16 %v605_v53, %v597_v52  ;;  %2222 = vmatpush1.bf16.msra.mxu1 %v6198_v54  ;;  %v657_v46 = vld [vmem:[%s6785_s6 + $0x788] sm:$0xff]  ;;  %v656_v54 = vld [vmem:[%s6785_s6 + $0x780] sm:$0xff] }
 0x105   : > { %2928 = vmatpush1.bf16.msra.mxu0 %v6201_v58  ;;  %2223 = vmatprep.subr.bf16.mxu1 %v6206_v7  ;;  %v665_v47 = vld [vmem:[%s6785_s6 + $0x7c8] sm:$0xff]  ;;  %v6218_v58 = vld [vmem:[#allocation5 + $0x1f4] ss:$8 sps:$4 sm:$0xff]   ;;  %v680_v7 = vld [vmem:[%s6785_s6 + $0x840] sm:$0xff] }
 0x106   : > { %2929 = vmatprep.subr.bf16.mxu0 %v6209_v11  ;;  %v661_v48 = vld [vmem:[%s6785_s6 + $0x7a8] sm:$0xff]  ;;  %v1049_v52 = vpack.c.bf16 %v665_v47, %v657_v46  ;;  %v728_v43 = vld [vmem:[%s6785_s6 + $0x9c0] sm:$0xff] }
 0x107   : > { %v669_v49 = vld [vmem:[%s6785_s6 + $0x7e8] sm:$0xff] }
 0x108   : > { %2224 = vmatpush1.bf16.msra.mxu1 %v6204_v6  ;;  %v1053_v53 = vpack.c.bf16 %v669_v49, %v661_v48  ;;  %v672_v6 = vld [vmem:[%s6785_s6 + $0x800] sm:$0xff]  ;;  %v697_v11 = vld [vmem:[%s6785_s6 + $0x8c8] sm:$0xff] }
 0x109   : > { %2930 = vmatpush1.bf16.msra.mxu0 %v6207_v10  ;;  %2225 = vmatprep.subr.bf16.mxu1 %v6212_v30  ;;  %v689_v10 = vld [vmem:[%s6785_s6 + $0x888] sm:$0xff]  ;;  %v1056_v14 = vpack.c.bf16 %v680_v7, %v672_v6  ;;  %v704_v30 = vld [vmem:[%s6785_s6 + $0x900] sm:$0xff] }
 0x10a   : > { %1947 = vmatmul.mubr.bf16.gmra.mrb[28].mxu1 %v984_v8  ;;  %v1016_v8 = vpack.c.bf16 %v600_v63, %v592_v62  ;;  %2931 = vmatprep.subr.bf16.mxu0 %v6215_v34  ;;  %v6221_v62 = vld [vmem:[#allocation5 + $0x3f4] ss:$8 sps:$4 sm:$0xff]   ;;  %v681_v63 = vld [vmem:[%s6785_s6 + $0x848] sm:$0xff]  ;;  %v1065_v16 = vpack.c.bf16 %v697_v11, %v689_v10 }
 0x10b   : > { %2653 = vmatmul.mubr.bf16.gmra.mrb[28].mxu0 %v988_v9  ;;  %1956 = vmatprep.mubr.bf16.mxu1 %v993_v12  ;;  %v1020_v9 = vpack.c.bf16 %v604_v1, %v596_v0  ;;  %v1025_v12 = vpack.c.bf16 %v617_v3, %v609_v2  ;;  %v677_v0 = vld [vmem:[%s6785_s6 + $0x828] sm:$0xff]  ;;  %v1048_v2 = vpack.c.bf16 %v664_v55, %v656_v54  ;;  %v736_v54 = vld [vmem:[%s6785_s6 + $0xa00] sm:$0xff] }
 0x10c   : > { %2662 = vmatprep.mubr.bf16.mxu0 %v997_v13  ;;  %v1029_v13 = vpack.c.bf16 %v621_v5, %v613_v4  ;;  %v685_v1 = vld [vmem:[%s6785_s6 + $0x868] sm:$0xff]  ;;  %v744_v55 = vld [vmem:[%s6785_s6 + $0xa40] sm:$0xff] }
 0x10d   : > { %2932 = vmatpush1.bf16.msra.mxu0 %v6213_v31  ;;  %v1061_v5 = vpack.c.bf16 %v685_v1, %v677_v0  ;;  %v712_v31 = vld [vmem:[%s6785_s6 + $0x940] sm:$0xff]  ;;  %v721_v34 = vld [vmem:[%s6785_s6 + $0x988] sm:$0xff] }
 0x10e   : > { %2933 = vmatprep.subr.bf16.mxu0 %v6221_v62  ;;  %v737_v46 = vld [vmem:[%s6785_s6 + $0xa08] sm:$0xff]  ;;  %v1088_v62 = vpack.c.bf16 %v744_v55, %v736_v54 }
 0x10f   : > { %v745_v47 = vld [vmem:[%s6785_s6 + $0xa48] sm:$0xff] }
 0x110   : > { %v741_v48 = vld [vmem:[%s6785_s6 + $0xa28] sm:$0xff] }
 0x111   : > { %2934 = vmatpush1.bf16.msra.mxu0 %v6219_v59  ;;  %v749_v49 = vld [vmem:[%s6785_s6 + $0xa68] sm:$0xff] }
 0x112   : > { %1957 = vmatmul.mubr.bf16.gmra.mrb[32].mxu1 %v992_v24  ;;  %v1033_v24 = vpack.c.bf16 %v633_v19, %v625_v18  ;;  %v688_v18 = vld [vmem:[%s6785_s6 + $0x880] sm:$0xff]  ;;  %v761_v59 = vld [vmem:[%s6785_s6 + $0xac8] sm:$0xff] }
 0x113   : > { %2663 = vmatmul.mubr.bf16.gmra.mrb[32].mxu0 %v996_v25  ;;  %1966 = vmatprep.mubr.bf16.mxu1 %v1001_v28  ;;  %v1037_v25 = vpack.c.bf16 %v637_v21, %v629_v20  ;;  %v628_v28 = vld [vmem:[%s6785_s6 + $0x6a0] sm:$0xff]  ;;  %v769_v6 = vld [vmem:[%s6785_s6 + $0xb08] sm:$0xff] }
 0x114   : > { %2672 = vmatprep.mubr.bf16.mxu0 %v1005_v29  ;;  %v6210_v29 = vld [vmem:[#allocation5 + $0x1e0] ss:$8 sps:$4 sm:$0xff]   ;;  %v1036_v39 = vpack.c.bf16 %v636_v32, %v628_v28 }
 0x115   : > { %2226 = vmatpush1.bf16.msra.mxu1 %v6210_v29  ;;  %v696_v19 = vld [vmem:[%s6785_s6 + $0x8c0] sm:$0xff]  ;;  %v777_v7 = vld [vmem:[%s6785_s6 + $0xb48] sm:$0xff] }
 0x116   : > { %2227 = vmatprep.subr.bf16.mxu1 %v6218_v58  ;;  %v692_v20 = vld [vmem:[%s6785_s6 + $0x8a0] sm:$0xff]  ;;  %v1064_v26 = vpack.c.bf16 %v696_v19, %v688_v18  ;;  %v753_v58 = vld [vmem:[%s6785_s6 + $0xa88] sm:$0xff] }
 0x117   : > { %v700_v21 = vld [vmem:[%s6785_s6 + $0x8e0] sm:$0xff]  ;;  %v1097_v0 = vpack.c.bf16 %v761_v59, %v753_v58  ;;  %v785_v18 = vld [vmem:[%s6785_s6 + $0xb88] sm:$0xff] }
 0x118   : > { %v1068_v27 = vpack.c.bf16 %v700_v21, %v692_v20  ;;  %v708_v32 = vld [vmem:[%s6785_s6 + $0x920] sm:$0xff]  ;;  %v793_v19 = vld [vmem:[%s6785_s6 + $0xbc8] sm:$0xff] }
 0x119   : > { %v789_v20 = vld [vmem:[%s6785_s6 + $0xba8] sm:$0xff] }
 0x11a   : > { %1967 = vmatmul.mubr.bf16.gmra.mrb[36].mxu1 %v1000_v40  ;;  %v1041_v40 = vpack.c.bf16 %v649_v35, %v641_v33  ;;  %v716_v33 = vld [vmem:[%s6785_s6 + $0x960] sm:$0xff]  ;;  %v729_v35 = vld [vmem:[%s6785_s6 + $0x9c8] sm:$0xff] }
 0x11b   : > { %2673 = vmatmul.mubr.bf16.gmra.mrb[36].mxu0 %v1004_v41  ;;  %1976 = vmatprep.mubr.bf16.mxu1 %v1009_v44  ;;  %v1045_v41 = vpack.c.bf16 %v653_v37, %v645_v36  ;;  %v644_v44 = vld [vmem:[%s6785_s6 + $0x720] sm:$0xff]  ;;  %v725_v36 = vld [vmem:[%s6785_s6 + $0x9a8] sm:$0xff] }
 0x11c   : > { %2682 = vmatprep.mubr.bf16.mxu0 %v1013_v45  ;;  %v652_v45 = vld [vmem:[%s6785_s6 + $0x760] sm:$0xff]  ;;  %v733_v37 = vld [vmem:[%s6785_s6 + $0x9e8] sm:$0xff] }
 0x11d   : > { %v1044_v51 = vpack.c.bf16 %v652_v45, %v644_v44  ;;  %v724_v44 = vld [vmem:[%s6785_s6 + $0x9a0] sm:$0xff]  ;;  %v797_v21 = vld [vmem:[%s6785_s6 + $0xbe8] sm:$0xff] }
 0x11e   : > { %v732_v45 = vld [vmem:[%s6785_s6 + $0x9e0] sm:$0xff]  ;;  %v833_v54 = vld [vmem:[%s6785_s6 + $0xd08] sm:$0xff] }
 0x11f   : > { %v841_v55 = vld [vmem:[%s6785_s6 + $0xd48] sm:$0xff] }
 0x122   : > { %1977 = vmatmul.mubr.bf16.gmra.mrb[40].mxu1 %v1008_v56  ;;  %v660_v56 = vld [vmem:[%s6785_s6 + $0x7a0] sm:$0xff] }
 0x123   : > { %2683 = vmatmul.mubr.bf16.gmra.mrb[40].mxu0 %v1012_v57  ;;  %1986 = vmatprep.mubr.bf16.mxu1 %v1017_v60  ;;  %v6216_v57 = vld [vmem:[#allocation5 + $0x1f0] ss:$8 sps:$4 sm:$0xff]   ;;  %v668_v60 = vld [vmem:[%s6785_s6 + $0x7e0] sm:$0xff] }
 0x124   : > { %2692 = vmatprep.mubr.bf16.mxu0 %v1021_v61  ;;  %v673_v61 = vld [vmem:[%s6785_s6 + $0x808] sm:$0xff]  ;;  %2228 = vmatpush1.bf16.msra.mxu1 %v6216_v57  ;;  %v1052_v3 = vpack.c.bf16 %v668_v60, %v660_v56  ;;  %v740_v56 = vld [vmem:[%s6785_s6 + $0xa20] sm:$0xff] }
 0x125   : > { %v1057_v4 = vpack.c.bf16 %v681_v63, %v673_v61  ;;  %v748_v57 = vld [vmem:[%s6785_s6 + $0xa60] sm:$0xff]  ;;  %v757_v60 = vld [vmem:[%s6785_s6 + $0xaa8] sm:$0xff] }
 0x126   : > { %v765_v61 = vld [vmem:[%s6785_s6 + $0xae8] sm:$0xff]  ;;  %v1092_v63 = vpack.c.bf16 %v748_v57, %v740_v56 }
 0x127   : > { %v1101_v1 = vpack.c.bf16 %v765_v61, %v757_v60  ;;  %v837_v56 = vld [vmem:[%s6785_s6 + $0xd28] sm:$0xff]  ;;  %v1137_v60 = vpack.c.bf16 %v841_v55, %v833_v54 }
 0x128   : > { %v845_v57 = vld [vmem:[%s6785_s6 + $0xd68] sm:$0xff] }
 0x129   : > { %v1141_v61 = vpack.c.bf16 %v845_v57, %v837_v56 }
 0x12a   : > { %1987 = vmatmul.mubr.bf16.gmra.mrb[44].mxu1 %v1016_v8  ;;  %v676_v8 = vld [vmem:[%s6785_s6 + $0x820] sm:$0xff] }
 0x12b   : > { %2693 = vmatmul.mubr.bf16.gmra.mrb[44].mxu0 %v1020_v9  ;;  %1996 = vmatprep.mubr.bf16.mxu1 %v1025_v12  ;;  %v684_v9 = vld [vmem:[%s6785_s6 + $0x860] sm:$0xff]  ;;  %v693_v12 = vld [vmem:[%s6785_s6 + $0x8a8] sm:$0xff] }
 0x12c   : > { %2702 = vmatprep.mubr.bf16.mxu0 %v1029_v13  ;;  %v701_v13 = vld [vmem:[%s6785_s6 + $0x8e8] sm:$0xff]  ;;  %v1060_v15 = vpack.c.bf16 %v684_v9, %v676_v8 }
 0x12d   : > { %v1069_v17 = vpack.c.bf16 %v701_v13, %v693_v12  ;;  %v773_v8 = vld [vmem:[%s6785_s6 + $0xb28] sm:$0xff]  ;;  %v1105_v12 = vpack.c.bf16 %v777_v7, %v769_v6 }
 0x12e   : > { %v781_v9 = vld [vmem:[%s6785_s6 + $0xb68] sm:$0xff] }
 0x12f   : > { %v1109_v13 = vpack.c.bf16 %v781_v9, %v773_v8 }
 0x132   : > { %1997 = vmatmul.mubr.bf16.gmra.mrb[48].mxu1 %v1024_v22  ;;  %v705_v22 = vld [vmem:[%s6785_s6 + $0x908] sm:$0xff] }
 0x133   : > { %2703 = vmatmul.mubr.bf16.gmra.mrb[48].mxu0 %v1028_v23  ;;  %2006 = vmatprep.mubr.bf16.mxu1 %v1033_v24  ;;  %v713_v23 = vld [vmem:[%s6785_s6 + $0x948] sm:$0xff] }
 0x134   : > { %2712 = vmatprep.mubr.bf16.mxu0 %v1037_v25  ;;  %v709_v24 = vld [vmem:[%s6785_s6 + $0x928] sm:$0xff]  ;;  %v1073_v28 = vpack.c.bf16 %v713_v23, %v705_v22 }
 0x135   : > { %v717_v25 = vld [vmem:[%s6785_s6 + $0x968] sm:$0xff] }
 0x136   : > { %v1077_v29 = vpack.c.bf16 %v717_v25, %v709_v24  ;;  %v1113_v24 = vpack.c.bf16 %v793_v19, %v785_v18  ;;  %v1117_v25 = vpack.c.bf16 %v797_v21, %v789_v20 }
 0x13a   : > { %2007 = vmatmul.mubr.bf16.gmra.mrb[52].mxu1 %v1032_v38  ;;  %v1072_v38 = vpack.c.bf16 %v712_v31, %v704_v30  ;;  %v801_v30 = vld [vmem:[%s6785_s6 + $0xc08] sm:$0xff] }
 0x13b   : > { %2713 = vmatmul.mubr.bf16.gmra.mrb[52].mxu0 %v1036_v39  ;;  %2016 = vmatprep.mubr.bf16.mxu1 %v1041_v40  ;;  %v1076_v39 = vpack.c.bf16 %v716_v33, %v708_v32  ;;  %v1081_v40 = vpack.c.bf16 %v729_v35, %v721_v34  ;;  %v809_v31 = vld [vmem:[%s6785_s6 + $0xc48] sm:$0xff] }
 0x13c   : > { %2722 = vmatprep.mubr.bf16.mxu0 %v1045_v41  ;;  %v1085_v41 = vpack.c.bf16 %v733_v37, %v725_v36  ;;  %v805_v32 = vld [vmem:[%s6785_s6 + $0xc28] sm:$0xff]  ;;  %v1121_v36 = vpack.c.bf16 %v809_v31, %v801_v30 }
 0x13d   : > { %v813_v33 = vld [vmem:[%s6785_s6 + $0xc68] sm:$0xff] }
 0x13e   : > { %v1125_v37 = vpack.c.bf16 %v813_v33, %v805_v32 }
 0x142   : > { %2017 = vmatmul.mubr.bf16.gmra.mrb[56].mxu1 %v1040_v50  ;;  %v1080_v50 = vpack.c.bf16 %v728_v43, %v720_v42  ;;  %v817_v42 = vld [vmem:[%s6785_s6 + $0xc88] sm:$0xff] }
 0x143   : > { %2723 = vmatmul.mubr.bf16.gmra.mrb[56].mxu0 %v1044_v51  ;;  %2026 = vmatprep.mubr.bf16.mxu1 %v1049_v52  ;;  %v1084_v51 = vpack.c.bf16 %v732_v45, %v724_v44  ;;  %v1089_v52 = vpack.c.bf16 %v745_v47, %v737_v46  ;;  %v825_v43 = vld [vmem:[%s6785_s6 + $0xcc8] sm:$0xff] }
 0x144   : > { %2732 = vmatprep.mubr.bf16.mxu0 %v1053_v53  ;;  %v1093_v53 = vpack.c.bf16 %v749_v49, %v741_v48  ;;  %v821_v44 = vld [vmem:[%s6785_s6 + $0xca8] sm:$0xff]  ;;  %v1129_v48 = vpack.c.bf16 %v825_v43, %v817_v42 }
 0x145   : > { %v829_v45 = vld [vmem:[%s6785_s6 + $0xce8] sm:$0xff] }
 0x146   : > { %v1133_v49 = vpack.c.bf16 %v829_v45, %v821_v44 }
 0x14a   : > { %2027 = vmatmul.mubr.bf16.gmra.mrb[60].mxu1 %v1048_v2  ;;  %v752_v2 = vld [vmem:[%s6785_s6 + $0xa80] sm:$0xff] }
 0x14b   : > { %2733 = vmatmul.mubr.bf16.gmra.mrb[60].mxu0 %v1052_v3  ;;  %2036 = vmatprep.mubr.bf16.mxu1 %v1057_v4  ;;  %v760_v3 = vld [vmem:[%s6785_s6 + $0xac0] sm:$0xff] }
 0x14c   : > { %2742 = vmatprep.mubr.bf16.mxu0 %v1061_v5  ;;  %v756_v4 = vld [vmem:[%s6785_s6 + $0xaa0] sm:$0xff]  ;;  %v1096_v10 = vpack.c.bf16 %v760_v3, %v752_v2  ;;  %v849_v2 = vld [vmem:[%s6785_s6 + $0xd88] sm:$0xff] }
 0x14d   : > { %v764_v5 = vld [vmem:[%s6785_s6 + $0xae0] sm:$0xff]  ;;  %v857_v3 = vld [vmem:[%s6785_s6 + $0xdc8] sm:$0xff] }
 0x14e   : > { %v1100_v11 = vpack.c.bf16 %v764_v5, %v756_v4  ;;  %v853_v4 = vld [vmem:[%s6785_s6 + $0xda8] sm:$0xff]  ;;  %v1145_v8 = vpack.c.bf16 %v857_v3, %v849_v2 }
 0x14f   : > { %v861_v5 = vld [vmem:[%s6785_s6 + $0xde8] sm:$0xff] }
 0x150   : > { %v1149_v9 = vpack.c.bf16 %v861_v5, %v853_v4 }
 0x152   : > { %2037 = vmatmul.mubr.bf16.gmra.mrb[64].mxu1 %v1056_v14  ;;  %v768_v14 = vld [vmem:[%s6785_s6 + $0xb00] sm:$0xff] }
 0x153   : > { %2743 = vmatmul.mubr.bf16.gmra.mrb[64].mxu0 %v1060_v15  ;;  %2046 = vmatprep.mubr.bf16.mxu1 %v1065_v16  ;;  %v776_v15 = vld [vmem:[%s6785_s6 + $0xb40] sm:$0xff] }
 0x154   : > { %2752 = vmatprep.mubr.bf16.mxu0 %v1069_v17  ;;  %v772_v16 = vld [vmem:[%s6785_s6 + $0xb20] sm:$0xff]  ;;  %v1104_v22 = vpack.c.bf16 %v776_v15, %v768_v14  ;;  %v865_v14 = vld [vmem:[%s6785_s6 + $0xe08] sm:$0xff] }
 0x155   : > { %v780_v17 = vld [vmem:[%s6785_s6 + $0xb60] sm:$0xff]  ;;  %v873_v15 = vld [vmem:[%s6785_s6 + $0xe48] sm:$0xff] }
 0x156   : > { %v1108_v23 = vpack.c.bf16 %v780_v17, %v772_v16  ;;  %v869_v16 = vld [vmem:[%s6785_s6 + $0xe28] sm:$0xff]  ;;  %v1153_v20 = vpack.c.bf16 %v873_v15, %v865_v14 }
 0x157   : > { %v877_v17 = vld [vmem:[%s6785_s6 + $0xe68] sm:$0xff] }
 0x158   : > { %v1157_v21 = vpack.c.bf16 %v877_v17, %v869_v16 }
 0x15a   : > { %2047 = vmatmul.mubr.bf16.gmra.mrb[68].mxu1 %v1064_v26  ;;  %v784_v26 = vld [vmem:[%s6785_s6 + $0xb80] sm:$0xff] }
 0x15b   : > { %2753 = vmatmul.mubr.bf16.gmra.mrb[68].mxu0 %v1068_v27  ;;  %2056 = vmatprep.mubr.bf16.mxu1 %v1073_v28  ;;  %v792_v27 = vld [vmem:[%s6785_s6 + $0xbc0] sm:$0xff] }
 0x15c   : > { %2762 = vmatprep.mubr.bf16.mxu0 %v1077_v29  ;;  %v788_v28 = vld [vmem:[%s6785_s6 + $0xba0] sm:$0xff]  ;;  %v1112_v34 = vpack.c.bf16 %v792_v27, %v784_v26  ;;  %v881_v26 = vld [vmem:[%s6785_s6 + $0xe88] sm:$0xff] }
 0x15d   : > { %v796_v29 = vld [vmem:[%s6785_s6 + $0xbe0] sm:$0xff]  ;;  %v889_v27 = vld [vmem:[%s6785_s6 + $0xec8] sm:$0xff] }
 0x15e   : > { %v1116_v35 = vpack.c.bf16 %v796_v29, %v788_v28  ;;  %v885_v28 = vld [vmem:[%s6785_s6 + $0xea8] sm:$0xff]  ;;  %v1161_v32 = vpack.c.bf16 %v889_v27, %v881_v26 }
 0x15f   : > { %v893_v29 = vld [vmem:[%s6785_s6 + $0xee8] sm:$0xff] }
 0x160   : > { %v1165_v33 = vpack.c.bf16 %v893_v29, %v885_v28 }
 0x162   : > { %2057 = vmatmul.mubr.bf16.gmra.mrb[72].mxu1 %v1072_v38  ;;  %v800_v38 = vld [vmem:[%s6785_s6 + $0xc00] sm:$0xff] }
 0x163   : > { %2763 = vmatmul.mubr.bf16.gmra.mrb[72].mxu0 %v1076_v39  ;;  %2066 = vmatprep.mubr.bf16.mxu1 %v1081_v40  ;;  %v808_v39 = vld [vmem:[%s6785_s6 + $0xc40] sm:$0xff] }
 0x164   : > { %2772 = vmatprep.mubr.bf16.mxu0 %v1085_v41  ;;  %v804_v40 = vld [vmem:[%s6785_s6 + $0xc20] sm:$0xff]  ;;  %v1120_v46 = vpack.c.bf16 %v808_v39, %v800_v38  ;;  %v897_v38 = vld [vmem:[%s6785_s6 + $0xf08] sm:$0xff] }
 0x165   : > { %v812_v41 = vld [vmem:[%s6785_s6 + $0xc60] sm:$0xff]  ;;  %v905_v39 = vld [vmem:[%s6785_s6 + $0xf48] sm:$0xff] }
 0x166   : > { %v1124_v47 = vpack.c.bf16 %v812_v41, %v804_v40  ;;  %v901_v40 = vld [vmem:[%s6785_s6 + $0xf28] sm:$0xff]  ;;  %v1169_v44 = vpack.c.bf16 %v905_v39, %v897_v38 }
 0x167   : > { %v909_v41 = vld [vmem:[%s6785_s6 + $0xf68] sm:$0xff] }
 0x168   : > { %v1173_v45 = vpack.c.bf16 %v909_v41, %v901_v40 }
 0x16a   : > { %2067 = vmatmul.mubr.bf16.gmra.mrb[76].mxu1 %v1080_v50  ;;  %v816_v50 = vld [vmem:[%s6785_s6 + $0xc80] sm:$0xff] }
 0x16b   : > { %2773 = vmatmul.mubr.bf16.gmra.mrb[76].mxu0 %v1084_v51  ;;  %2076 = vmatprep.mubr.bf16.mxu1 %v1089_v52  ;;  %v824_v51 = vld [vmem:[%s6785_s6 + $0xcc0] sm:$0xff] }
 0x16c   : > { %2782 = vmatprep.mubr.bf16.mxu0 %v1093_v53  ;;  %v820_v52 = vld [vmem:[%s6785_s6 + $0xca0] sm:$0xff]  ;;  %v1128_v58 = vpack.c.bf16 %v824_v51, %v816_v50  ;;  %v913_v50 = vld [vmem:[%s6785_s6 + $0xf88] sm:$0xff] }
 0x16d   : > { %v828_v53 = vld [vmem:[%s6785_s6 + $0xce0] sm:$0xff]  ;;  %v921_v51 = vld [vmem:[%s6785_s6 + $0xfc8] sm:$0xff] }
 0x16e   : > { %v1132_v59 = vpack.c.bf16 %v828_v53, %v820_v52  ;;  %v917_v52 = vld [vmem:[%s6785_s6 + $0xfa8] sm:$0xff]  ;;  %v1177_v56 = vpack.c.bf16 %v921_v51, %v913_v50 }
 0x16f   : > { %v925_v53 = vld [vmem:[%s6785_s6 + $0xfe8] sm:$0xff] }
 0x170   : > { %v1181_v57 = vpack.c.bf16 %v925_v53, %v917_v52 }
 0x172   : > { %2077 = vmatmul.mubr.bf16.gmra.mrb[80].mxu1 %v1088_v62  ;;  %v832_v62 = vld [vmem:[%s6785_s6 + $0xd00] sm:$0xff] }
 0x173   : > { %2783 = vmatmul.mubr.bf16.gmra.mrb[80].mxu0 %v1092_v63  ;;  %2086 = vmatprep.mubr.bf16.mxu1 %v1097_v0  ;;  %v840_v63 = vld [vmem:[%s6785_s6 + $0xd40] sm:$0xff] }
 0x174   : > { %2792 = vmatprep.mubr.bf16.mxu0 %v1101_v1  ;;  %v836_v0 = vld [vmem:[%s6785_s6 + $0xd20] sm:$0xff]  ;;  %v1136_v6 = vpack.c.bf16 %v840_v63, %v832_v62  ;;  %v419_v62 = vld [vmem:[%s6785_s6 + $0x18] sm:$0xff] }
 0x175   : > { %v844_v1 = vld [vmem:[%s6785_s6 + $0xd60] sm:$0xff]  ;;  %v427_v63 = vld [vmem:[%s6785_s6 + $0x58] sm:$0xff] }
 0x176   : > { %v1140_v7 = vpack.c.bf16 %v844_v1, %v836_v0  ;;  %v423_v0 = vld [vmem:[%s6785_s6 + $0x38] sm:$0xff]  ;;  %v931_v4 = vpack.c.bf16 %v427_v63, %v419_v62 }
 0x177   : > { %v431_v1 = vld [vmem:[%s6785_s6 + $0x78] sm:$0xff] }
 0x178   : > { %v935_v5 = vpack.c.bf16 %v431_v1, %v423_v0 }
 0x17a   : > { %2087 = vmatmul.mubr.bf16.gmra.mrb[84].mxu1 %v1096_v10  ;;  %v848_v10 = vld [vmem:[%s6785_s6 + $0xd80] sm:$0xff] }
 0x17b   : > { %2793 = vmatmul.mubr.bf16.gmra.mrb[84].mxu0 %v1100_v11  ;;  %2096 = vmatprep.mubr.bf16.mxu1 %v1105_v12  ;;  %v856_v11 = vld [vmem:[%s6785_s6 + $0xdc0] sm:$0xff] }
 0x17c   : > { %2802 = vmatprep.mubr.bf16.mxu0 %v1109_v13  ;;  %v852_v12 = vld [vmem:[%s6785_s6 + $0xda0] sm:$0xff]  ;;  %v1144_v18 = vpack.c.bf16 %v856_v11, %v848_v10  ;;  %v435_v10 = vld [vmem:[%s6785_s6 + $0x98] sm:$0xff] }
 0x17d   : > { %v860_v13 = vld [vmem:[%s6785_s6 + $0xde0] sm:$0xff]  ;;  %v443_v11 = vld [vmem:[%s6785_s6 + $0xd8] sm:$0xff] }
 0x17e   : > { %v1148_v19 = vpack.c.bf16 %v860_v13, %v852_v12  ;;  %v439_v12 = vld [vmem:[%s6785_s6 + $0xb8] sm:$0xff]  ;;  %v939_v16 = vpack.c.bf16 %v443_v11, %v435_v10 }
 0x17f   : > { %v447_v13 = vld [vmem:[%s6785_s6 + $0xf8] sm:$0xff] }
 0x180   : > { %v943_v17 = vpack.c.bf16 %v447_v13, %v439_v12 }
 0x182   : > { %2097 = vmatmul.mubr.bf16.gmra.mrb[88].mxu1 %v1104_v22  ;;  %v864_v22 = vld [vmem:[%s6785_s6 + $0xe00] sm:$0xff] }
 0x183   : > { %2803 = vmatmul.mubr.bf16.gmra.mrb[88].mxu0 %v1108_v23  ;;  %2106 = vmatprep.mubr.bf16.mxu1 %v1113_v24  ;;  %v872_v23 = vld [vmem:[%s6785_s6 + $0xe40] sm:$0xff] }
 0x184   : > { %2812 = vmatprep.mubr.bf16.mxu0 %v1117_v25  ;;  %v868_v24 = vld [vmem:[%s6785_s6 + $0xe20] sm:$0xff]  ;;  %v1152_v30 = vpack.c.bf16 %v872_v23, %v864_v22  ;;  %v451_v22 = vld [vmem:[%s6785_s6 + $0x118] sm:$0xff] }
 0x185   : > { %v876_v25 = vld [vmem:[%s6785_s6 + $0xe60] sm:$0xff]  ;;  %v459_v23 = vld [vmem:[%s6785_s6 + $0x158] sm:$0xff] }
 0x186   : > { %v1156_v31 = vpack.c.bf16 %v876_v25, %v868_v24  ;;  %v455_v24 = vld [vmem:[%s6785_s6 + $0x138] sm:$0xff]  ;;  %v947_v28 = vpack.c.bf16 %v459_v23, %v451_v22 }
 0x187   : > { %v463_v25 = vld [vmem:[%s6785_s6 + $0x178] sm:$0xff] }
 0x188   : > { %v951_v29 = vpack.c.bf16 %v463_v25, %v455_v24 }
 0x18a   : > { %2107 = vmatmul.mubr.bf16.gmra.mrb[92].mxu1 %v1112_v34  ;;  %v880_v34 = vld [vmem:[%s6785_s6 + $0xe80] sm:$0xff] }
 0x18b   : > { %2813 = vmatmul.mubr.bf16.gmra.mrb[92].mxu0 %v1116_v35  ;;  %2116 = vmatprep.mubr.bf16.mxu1 %v1121_v36  ;;  %v888_v35 = vld [vmem:[%s6785_s6 + $0xec0] sm:$0xff] }
 0x18c   : > { %2822 = vmatprep.mubr.bf16.mxu0 %v1125_v37  ;;  %v884_v36 = vld [vmem:[%s6785_s6 + $0xea0] sm:$0xff]  ;;  %v1160_v42 = vpack.c.bf16 %v888_v35, %v880_v34  ;;  %v467_v34 = vld [vmem:[%s6785_s6 + $0x198] sm:$0xff] }
 0x18d   : > { %v892_v37 = vld [vmem:[%s6785_s6 + $0xee0] sm:$0xff]  ;;  %v475_v35 = vld [vmem:[%s6785_s6 + $0x1d8] sm:$0xff] }
 0x18e   : > { %v1164_v43 = vpack.c.bf16 %v892_v37, %v884_v36  ;;  %v471_v36 = vld [vmem:[%s6785_s6 + $0x1b8] sm:$0xff]  ;;  %v955_v40 = vpack.c.bf16 %v475_v35, %v467_v34 }
 0x18f   : > { %v479_v37 = vld [vmem:[%s6785_s6 + $0x1f8] sm:$0xff] }
 0x190   : > { %v959_v41 = vpack.c.bf16 %v479_v37, %v471_v36 }
 0x192   : > { %2117 = vmatmul.mubr.bf16.gmra.mrb[96].mxu1 %v1120_v46  ;;  %v896_v46 = vld [vmem:[%s6785_s6 + $0xf00] sm:$0xff] }
 0x193   : > { %2823 = vmatmul.mubr.bf16.gmra.mrb[96].mxu0 %v1124_v47  ;;  %2126 = vmatprep.mubr.bf16.mxu1 %v1129_v48  ;;  %v904_v47 = vld [vmem:[%s6785_s6 + $0xf40] sm:$0xff] }
 0x194   : > { %2832 = vmatprep.mubr.bf16.mxu0 %v1133_v49  ;;  %v900_v48 = vld [vmem:[%s6785_s6 + $0xf20] sm:$0xff]  ;;  %v1168_v54 = vpack.c.bf16 %v904_v47, %v896_v46  ;;  %v483_v46 = vld [vmem:[%s6785_s6 + $0x218] sm:$0xff] }
 0x195   : > { %v908_v49 = vld [vmem:[%s6785_s6 + $0xf60] sm:$0xff]  ;;  %v491_v47 = vld [vmem:[%s6785_s6 + $0x258] sm:$0xff] }
 0x196   : > { %v1172_v55 = vpack.c.bf16 %v908_v49, %v900_v48  ;;  %v487_v48 = vld [vmem:[%s6785_s6 + $0x238] sm:$0xff]  ;;  %v963_v52 = vpack.c.bf16 %v491_v47, %v483_v46 }
 0x197   : > { %v495_v49 = vld [vmem:[%s6785_s6 + $0x278] sm:$0xff] }
 0x198   : > { %v967_v53 = vpack.c.bf16 %v495_v49, %v487_v48 }
 0x19a   : > { %2127 = vmatmul.mubr.bf16.gmra.mrb[100].mxu1 %v1128_v58  ;;  %v912_v58 = vld [vmem:[%s6785_s6 + $0xf80] sm:$0xff] }
 0x19b   : > { %2833 = vmatmul.mubr.bf16.gmra.mrb[100].mxu0 %v1132_v59  ;;  %2136 = vmatprep.mubr.bf16.mxu1 %v1137_v60  ;;  %v920_v59 = vld [vmem:[%s6785_s6 + $0xfc0] sm:$0xff] }
 0x19c   : > { %2842 = vmatprep.mubr.bf16.mxu0 %v1141_v61  ;;  %v916_v60 = vld [vmem:[%s6785_s6 + $0xfa0] sm:$0xff]  ;;  %v1176_v2 = vpack.c.bf16 %v920_v59, %v912_v58  ;;  %v499_v58 = vld [vmem:[%s6785_s6 + $0x298] sm:$0xff] }
 0x19d   : > { %v924_v61 = vld [vmem:[%s6785_s6 + $0xfe0] sm:$0xff]  ;;  %v507_v59 = vld [vmem:[%s6785_s6 + $0x2d8] sm:$0xff] }
 0x19e   : > { %v1180_v3 = vpack.c.bf16 %v924_v61, %v916_v60  ;;  %v503_v60 = vld [vmem:[%s6785_s6 + $0x2b8] sm:$0xff]  ;;  %v971_v0 = vpack.c.bf16 %v507_v59, %v499_v58 }
 0x19f   : > { %v511_v61 = vld [vmem:[%s6785_s6 + $0x2f8] sm:$0xff] }
 0x1a0   : > { %v975_v1 = vpack.c.bf16 %v511_v61, %v503_v60 }
 0x1a2   : > { %2137 = vmatmul.mubr.bf16.gmra.mrb[104].mxu1 %v1136_v6  ;;  %v418_v6 = vld [vmem:[%s6785_s6 + $0x10] sm:$0xff] }
 0x1a3   : > { %2843 = vmatmul.mubr.bf16.gmra.mrb[104].mxu0 %v1140_v7  ;;  %2146 = vmatprep.mubr.bf16.mxu1 %v1145_v8  ;;  %v426_v7 = vld [vmem:[%s6785_s6 + $0x50] sm:$0xff] }
 0x1a4   : > { %2852 = vmatprep.mubr.bf16.mxu0 %v1149_v9  ;;  %v422_v8 = vld [vmem:[%s6785_s6 + $0x30] sm:$0xff]  ;;  %v930_v14 = vpack.c.bf16 %v426_v7, %v418_v6  ;;  %v515_v6 = vld [vmem:[%s6785_s6 + $0x318] sm:$0xff] }
 0x1a5   : > { %v430_v9 = vld [vmem:[%s6785_s6 + $0x70] sm:$0xff]  ;;  %v523_v7 = vld [vmem:[%s6785_s6 + $0x358] sm:$0xff] }
 0x1a6   : > { %v934_v15 = vpack.c.bf16 %v430_v9, %v422_v8  ;;  %v519_v8 = vld [vmem:[%s6785_s6 + $0x338] sm:$0xff]  ;;  %v979_v12 = vpack.c.bf16 %v523_v7, %v515_v6 }
 0x1a7   : > { %v527_v9 = vld [vmem:[%s6785_s6 + $0x378] sm:$0xff] }
 0x1a8   : > { %v983_v13 = vpack.c.bf16 %v527_v9, %v519_v8 }
 0x1aa   : > { %2147 = vmatmul.mubr.bf16.gmra.mrb[108].mxu1 %v1144_v18  ;;  %v434_v18 = vld [vmem:[%s6785_s6 + $0x90] sm:$0xff] }
 0x1ab   : > { %2853 = vmatmul.mubr.bf16.gmra.mrb[108].mxu0 %v1148_v19  ;;  %2156 = vmatprep.mubr.bf16.mxu1 %v1153_v20  ;;  %v442_v19 = vld [vmem:[%s6785_s6 + $0xd0] sm:$0xff] }
 0x1ac   : > { %2862 = vmatprep.mubr.bf16.mxu0 %v1157_v21  ;;  %v438_v20 = vld [vmem:[%s6785_s6 + $0xb0] sm:$0xff]  ;;  %v938_v26 = vpack.c.bf16 %v442_v19, %v434_v18  ;;  %v531_v18 = vld [vmem:[%s6785_s6 + $0x398] sm:$0xff] }
 0x1ad   : > { %v446_v21 = vld [vmem:[%s6785_s6 + $0xf0] sm:$0xff]  ;;  %v539_v19 = vld [vmem:[%s6785_s6 + $0x3d8] sm:$0xff] }
 0x1ae   : > { %v942_v27 = vpack.c.bf16 %v446_v21, %v438_v20  ;;  %v535_v20 = vld [vmem:[%s6785_s6 + $0x3b8] sm:$0xff]  ;;  %v987_v24 = vpack.c.bf16 %v539_v19, %v531_v18 }
 0x1af   : > { %v543_v21 = vld [vmem:[%s6785_s6 + $0x3f8] sm:$0xff] }
 0x1b0   : > { %v991_v25 = vpack.c.bf16 %v543_v21, %v535_v20 }
 0x1b2   : > { %2157 = vmatmul.mubr.bf16.gmra.mrb[112].mxu1 %v1152_v30  ;;  %v450_v30 = vld [vmem:[%s6785_s6 + $0x110] sm:$0xff] }
 0x1b3   : > { %2863 = vmatmul.mubr.bf16.gmra.mrb[112].mxu0 %v1156_v31  ;;  %2166 = vmatprep.mubr.bf16.mxu1 %v1161_v32  ;;  %v458_v31 = vld [vmem:[%s6785_s6 + $0x150] sm:$0xff] }
 0x1b4   : > { %2872 = vmatprep.mubr.bf16.mxu0 %v1165_v33  ;;  %v454_v32 = vld [vmem:[%s6785_s6 + $0x130] sm:$0xff]  ;;  %v946_v38 = vpack.c.bf16 %v458_v31, %v450_v30  ;;  %v547_v30 = vld [vmem:[%s6785_s6 + $0x418] sm:$0xff] }
 0x1b5   : > { %v462_v33 = vld [vmem:[%s6785_s6 + $0x170] sm:$0xff]  ;;  %v555_v31 = vld [vmem:[%s6785_s6 + $0x458] sm:$0xff] }
 0x1b6   : > { %v950_v39 = vpack.c.bf16 %v462_v33, %v454_v32  ;;  %v551_v32 = vld [vmem:[%s6785_s6 + $0x438] sm:$0xff]  ;;  %v995_v36 = vpack.c.bf16 %v555_v31, %v547_v30  ;;  %v1186_v30 = vlaneseq }
 0x1b7   : > { %v559_v33 = vld [vmem:[%s6785_s6 + $0x478] sm:$0xff] }
 0x1b8   : > { %v999_v37 = vpack.c.bf16 %v559_v33, %v551_v32 }
 0x1ba   : > { %2167 = vmatmul.mubr.bf16.gmra.mrb[116].mxu1 %v1160_v42  ;;  %v466_v42 = vld [vmem:[%s6785_s6 + $0x190] sm:$0xff] }
 0x1bb   : > { %2873 = vmatmul.mubr.bf16.gmra.mrb[116].mxu0 %v1164_v43  ;;  %2176 = vmatprep.mubr.bf16.mxu1 %v1169_v44  ;;  %v474_v43 = vld [vmem:[%s6785_s6 + $0x1d0] sm:$0xff] }
 0x1bc   : > { %2882 = vmatprep.mubr.bf16.mxu0 %v1173_v45  ;;  %v470_v44 = vld [vmem:[%s6785_s6 + $0x1b0] sm:$0xff]  ;;  %v954_v50 = vpack.c.bf16 %v474_v43, %v466_v42  ;;  %v563_v42 = vld [vmem:[%s6785_s6 + $0x498] sm:$0xff] }
 0x1bd   : > { %v478_v45 = vld [vmem:[%s6785_s6 + $0x1f0] sm:$0xff]  ;;  %v571_v43 = vld [vmem:[%s6785_s6 + $0x4d8] sm:$0xff] }
 0x1be   : > { %v958_v51 = vpack.c.bf16 %v478_v45, %v470_v44  ;;  %v567_v44 = vld [vmem:[%s6785_s6 + $0x4b8] sm:$0xff]  ;;  %v1003_v48 = vpack.c.bf16 %v571_v43, %v563_v42 }
 0x1bf   : > { %v575_v45 = vld [vmem:[%s6785_s6 + $0x4f8] sm:$0xff] }
 0x1c0   : > { %v1007_v49 = vpack.c.bf16 %v575_v45, %v567_v44 }
 0x1c2   : > { %2177 = vmatmul.mubr.bf16.gmra.mrb[120].mxu1 %v1168_v54  ;;  %v482_v54 = vld [vmem:[%s6785_s6 + $0x210] sm:$0xff] }
 0x1c3   : > { %2883 = vmatmul.mubr.bf16.gmra.mrb[120].mxu0 %v1172_v55  ;;  %2186 = vmatprep.mubr.bf16.mxu1 %v1177_v56  ;;  %v490_v55 = vld [vmem:[%s6785_s6 + $0x250] sm:$0xff] }
 0x1c4   : > { %2892 = vmatprep.mubr.bf16.mxu0 %v1181_v57  ;;  %v486_v56 = vld [vmem:[%s6785_s6 + $0x230] sm:$0xff]  ;;  %v962_v62 = vpack.c.bf16 %v490_v55, %v482_v54  ;;  %v579_v54 = vld [vmem:[%s6785_s6 + $0x518] sm:$0xff] }
 0x1c5   : > { %v494_v57 = vld [vmem:[%s6785_s6 + $0x270] sm:$0xff]  ;;  %v587_v55 = vld [vmem:[%s6785_s6 + $0x558] sm:$0xff] }
 0x1c6   : > { %v966_v63 = vpack.c.bf16 %v494_v57, %v486_v56  ;;  %v583_v56 = vld [vmem:[%s6785_s6 + $0x538] sm:$0xff]  ;;  %v1011_v60 = vpack.c.bf16 %v587_v55, %v579_v54 }
 0x1c7   : > { %v591_v57 = vld [vmem:[%s6785_s6 + $0x578] sm:$0xff] }
 0x1c8   : > { %v1015_v61 = vpack.c.bf16 %v591_v57, %v583_v56  ;;  %v642_v57 = vld [vmem:[%s6785_s6 + $0x710] sm:$0xff] }
 0x1ca   : > { %2187 = vmatmul.mubr.bf16.gmra.mrb[124].mxu1 %v1176_v2  ;;  %v498_v2 = vld [vmem:[%s6785_s6 + $0x290] sm:$0xff] }
 0x1cb   : > { %2893 = vmatmul.mubr.bf16.gmra.mrb[124].mxu0 %v1180_v3  ;;  %2229 = vmatprep.mubr.bf16.mxu1 %v931_v4  ;;  %v506_v3 = vld [vmem:[%s6785_s6 + $0x2d0] sm:$0xff] }
 0x1cc   : > { %2935 = vmatprep.mubr.bf16.mxu0 %v935_v5  ;;  %v502_v4 = vld [vmem:[%s6785_s6 + $0x2b0] sm:$0xff]  ;;  %v970_v10 = vpack.c.bf16 %v506_v3, %v498_v2  ;;  %v595_v2 = vld [vmem:[%s6785_s6 + $0x598] sm:$0xff] }
 0x1cd   : > { %v510_v5 = vld [vmem:[%s6785_s6 + $0x2f0] sm:$0xff]  ;;  %v603_v3 = vld [vmem:[%s6785_s6 + $0x5d8] sm:$0xff] }
 0x1ce   : > { %v974_v11 = vpack.c.bf16 %v510_v5, %v502_v4  ;;  %v599_v4 = vld [vmem:[%s6785_s6 + $0x5b8] sm:$0xff]  ;;  %v1019_v8 = vpack.c.bf16 %v603_v3, %v595_v2 }
 0x1cf   : > { %v607_v5 = vld [vmem:[%s6785_s6 + $0x5f8] sm:$0xff] }
 0x1d0   : > { %v1023_v9 = vpack.c.bf16 %v607_v5, %v599_v4  ;;  %v658_v5 = vld [vmem:[%s6785_s6 + $0x790] sm:$0xff] }
 0x1d2   : > { %2230 = vmatmul.mubr.bf16.vlgmr.msra.gmra.mrb[0].mxu1 %v930_v14  ;;  %v514_v14 = vld [vmem:[%s6785_s6 + $0x310] sm:$0xff] }
 0x1d3   : > { %2936 = vmatmul.mubr.bf16.vlgmr.msra.gmra.mrb[0].mxu0 %v934_v15  ;;  %2239 = vmatprep.mubr.bf16.mxu1 %v939_v16  ;;  %v522_v15 = vld [vmem:[%s6785_s6 + $0x350] sm:$0xff] }
 0x1d4   : > { %2945 = vmatprep.mubr.bf16.mxu0 %v943_v17  ;;  %v518_v16 = vld [vmem:[%s6785_s6 + $0x330] sm:$0xff]  ;;  %v978_v22 = vpack.c.bf16 %v522_v15, %v514_v14  ;;  %v611_v14 = vld [vmem:[%s6785_s6 + $0x618] sm:$0xff] }
 0x1d5   : > { %v526_v17 = vld [vmem:[%s6785_s6 + $0x370] sm:$0xff]  ;;  %v619_v15 = vld [vmem:[%s6785_s6 + $0x658] sm:$0xff] }
 0x1d6   : > { %v982_v23 = vpack.c.bf16 %v526_v17, %v518_v16  ;;  %v615_v16 = vld [vmem:[%s6785_s6 + $0x638] sm:$0xff]  ;;  %v1027_v20 = vpack.c.bf16 %v619_v15, %v611_v14 }
 0x1d7   : > { %v623_v17 = vld [vmem:[%s6785_s6 + $0x678] sm:$0xff] }
 0x1d8   : > { %v1031_v21 = vpack.c.bf16 %v623_v17, %v615_v16  ;;  %v674_v17 = vld [vmem:[%s6785_s6 + $0x810] sm:$0xff] }
 0x1da   : > { %2240 = vmatmul.mubr.bf16.gmra.mrb[4].mxu1 %v938_v26  ;;  %v530_v26 = vld [vmem:[%s6785_s6 + $0x390] sm:$0xff] }
 0x1db   : > { %2946 = vmatmul.mubr.bf16.gmra.mrb[4].mxu0 %v942_v27  ;;  %2249 = vmatprep.mubr.bf16.mxu1 %v947_v28  ;;  %v538_v27 = vld [vmem:[%s6785_s6 + $0x3d0] sm:$0xff] }
 0x1dc   : > { %2955 = vmatprep.mubr.bf16.mxu0 %v951_v29  ;;  %v534_v28 = vld [vmem:[%s6785_s6 + $0x3b0] sm:$0xff]  ;;  %v986_v34 = vpack.c.bf16 %v538_v27, %v530_v26  ;;  %v627_v26 = vld [vmem:[%s6785_s6 + $0x698] sm:$0xff] }
 0x1dd   : > { %v542_v29 = vld [vmem:[%s6785_s6 + $0x3f0] sm:$0xff]  ;;  %v635_v27 = vld [vmem:[%s6785_s6 + $0x6d8] sm:$0xff] }
 0x1de   : > { %v990_v35 = vpack.c.bf16 %v542_v29, %v534_v28  ;;  %v631_v28 = vld [vmem:[%s6785_s6 + $0x6b8] sm:$0xff]  ;;  %v1035_v33 = vpack.c.bf16 %v635_v27, %v627_v26 }
 0x1df   : > { %v639_v29 = vld [vmem:[%s6785_s6 + $0x6f8] sm:$0xff] }
 0x1e2   : > { %2250 = vmatmul.mubr.bf16.gmra.mrb[8].mxu1 %v946_v38  ;;  %v546_v38 = vld [vmem:[%s6785_s6 + $0x410] sm:$0xff] }
 0x1e3   : > { %2956 = vmatmul.mubr.bf16.gmra.mrb[8].mxu0 %v950_v39  ;;  %2259 = vmatprep.mubr.bf16.mxu1 %v955_v40  ;;  %v554_v39 = vld [vmem:[%s6785_s6 + $0x450] sm:$0xff] }
 0x1e4   : > { %2965 = vmatprep.mubr.bf16.mxu0 %v959_v41  ;;  %v550_v40 = vld [vmem:[%s6785_s6 + $0x430] sm:$0xff]  ;;  %v994_v46 = vpack.c.bf16 %v554_v39, %v546_v38 }
 0x1e5   : > { %v558_v41 = vld [vmem:[%s6785_s6 + $0x470] sm:$0xff] }
 0x1e6   : > { %v998_v47 = vpack.c.bf16 %v558_v41, %v550_v40  ;;  %v630_v38 = vld [vmem:[%s6785_s6 + $0x6b0] sm:$0xff]  ;;  %v643_v40 = vld [vmem:[%s6785_s6 + $0x718] sm:$0xff] }
 0x1e7   : > { %v638_v39 = vld [vmem:[%s6785_s6 + $0x6f0] sm:$0xff]  ;;  %v651_v41 = vld [vmem:[%s6785_s6 + $0x758] sm:$0xff] }
 0x1e8   : > { %v1038_v54 = vpack.c.bf16 %v638_v39, %v630_v38  ;;  %v1043_v55 = vpack.c.bf16 %v651_v41, %v643_v40 }
 0x1ea   : > { %2260 = vmatmul.mubr.bf16.gmra.mrb[12].mxu1 %v954_v50  ;;  %v562_v50 = vld [vmem:[%s6785_s6 + $0x490] sm:$0xff] }
 0x1eb   : > { %2966 = vmatmul.mubr.bf16.gmra.mrb[12].mxu0 %v958_v51  ;;  %2269 = vmatprep.mubr.bf16.mxu1 %v963_v52  ;;  %v570_v51 = vld [vmem:[%s6785_s6 + $0x4d0] sm:$0xff] }
 0x1ec   : > { %2975 = vmatprep.mubr.bf16.mxu0 %v967_v53  ;;  %v566_v52 = vld [vmem:[%s6785_s6 + $0x4b0] sm:$0xff]  ;;  %v1002_v58 = vpack.c.bf16 %v570_v51, %v562_v50 }
 0x1ed   : > { %v574_v53 = vld [vmem:[%s6785_s6 + $0x4f0] sm:$0xff] }
 0x1ee   : > { %v1006_v59 = vpack.c.bf16 %v574_v53, %v566_v52 }
 0x1f2   : > { %2270 = vmatmul.mubr.bf16.gmra.mrb[16].mxu1 %v962_v62  ;;  %v578_v62 = vld [vmem:[%s6785_s6 + $0x510] sm:$0xff] }
 0x1f3   : > { %2976 = vmatmul.mubr.bf16.gmra.mrb[16].mxu0 %v966_v63  ;;  %2279 = vmatprep.mubr.bf16.mxu1 %v971_v0  ;;  %v586_v63 = vld [vmem:[%s6785_s6 + $0x550] sm:$0xff] }
 0x1f4   : > { %2985 = vmatprep.mubr.bf16.mxu0 %v975_v1  ;;  %v582_v0 = vld [vmem:[%s6785_s6 + $0x530] sm:$0xff]  ;;  %v1010_v6 = vpack.c.bf16 %v586_v63, %v578_v62  ;;  %v667_v62 = vld [vmem:[%s6785_s6 + $0x7d8] sm:$0xff] }
 0x1f5   : > { %v590_v1 = vld [vmem:[%s6785_s6 + $0x570] sm:$0xff]  ;;  %v663_v63 = vld [vmem:[%s6785_s6 + $0x7b8] sm:$0xff] }
 0x1f6   : > { %v1014_v7 = vpack.c.bf16 %v590_v1, %v582_v0  ;;  %v671_v0 = vld [vmem:[%s6785_s6 + $0x7f8] sm:$0xff] }
 0x1f7   : > { %v1055_v4 = vpack.c.bf16 %v671_v0, %v663_v63  ;;  %v726_v63 = vld [vmem:[%s6785_s6 + $0x9b0] sm:$0xff] }
 0x1f8   : > { %v734_v0 = vld [vmem:[%s6785_s6 + $0x9f0] sm:$0xff] }
 0x1fa   : > { %2280 = vmatmul.mubr.bf16.gmra.mrb[20].mxu1 %v970_v10  ;;  %v594_v10 = vld [vmem:[%s6785_s6 + $0x590] sm:$0xff] }
 0x1fb   : > { %2986 = vmatmul.mubr.bf16.gmra.mrb[20].mxu0 %v974_v11  ;;  %2289 = vmatprep.mubr.bf16.mxu1 %v979_v12  ;;  %v602_v11 = vld [vmem:[%s6785_s6 + $0x5d0] sm:$0xff] }
 0x1fc   : > { %2995 = vmatprep.mubr.bf16.mxu0 %v983_v13  ;;  %v598_v12 = vld [vmem:[%s6785_s6 + $0x5b0] sm:$0xff]  ;;  %v1018_v18 = vpack.c.bf16 %v602_v11, %v594_v10  ;;  %v683_v10 = vld [vmem:[%s6785_s6 + $0x858] sm:$0xff] }
 0x1fd   : > { %v606_v13 = vld [vmem:[%s6785_s6 + $0x5f0] sm:$0xff]  ;;  %v679_v11 = vld [vmem:[%s6785_s6 + $0x838] sm:$0xff] }
 0x1fe   : > { %v1022_v19 = vpack.c.bf16 %v606_v13, %v598_v12  ;;  %v687_v12 = vld [vmem:[%s6785_s6 + $0x878] sm:$0xff] }
 0x1ff   : > { %v1063_v16 = vpack.c.bf16 %v687_v12, %v679_v11  ;;  %v742_v11 = vld [vmem:[%s6785_s6 + $0xa30] sm:$0xff] }
 0x200   : > { %v750_v12 = vld [vmem:[%s6785_s6 + $0xa70] sm:$0xff] }
 0x202   : > { %2290 = vmatmul.mubr.bf16.gmra.mrb[24].mxu1 %v978_v22  ;;  %v610_v22 = vld [vmem:[%s6785_s6 + $0x610] sm:$0xff] }
 0x203   : > { %2996 = vmatmul.mubr.bf16.gmra.mrb[24].mxu0 %v982_v23  ;;  %2299 = vmatprep.mubr.bf16.mxu1 %v987_v24  ;;  %v618_v23 = vld [vmem:[%s6785_s6 + $0x650] sm:$0xff] }
 0x204   : > { %3005 = vmatprep.mubr.bf16.mxu0 %v991_v25  ;;  %v614_v24 = vld [vmem:[%s6785_s6 + $0x630] sm:$0xff]  ;;  %v1026_v31 = vpack.c.bf16 %v618_v23, %v610_v22  ;;  %v699_v22 = vld [vmem:[%s6785_s6 + $0x8d8] sm:$0xff] }
 0x205   : > { %v622_v25 = vld [vmem:[%s6785_s6 + $0x670] sm:$0xff]  ;;  %v695_v23 = vld [vmem:[%s6785_s6 + $0x8b8] sm:$0xff] }
 0x206   : > { %v1030_v32 = vpack.c.bf16 %v622_v25, %v614_v24  ;;  %v703_v24 = vld [vmem:[%s6785_s6 + $0x8f8] sm:$0xff] }
 0x20a   : > { %2300 = vmatmul.mubr.bf16.gmra.mrb[28].mxu1 %v986_v34  ;;  %v1039_v34 = vpack.c.bf16 %v639_v29, %v631_v28  ;;  %v1071_v28 = vpack.c.bf16 %v703_v24, %v695_v23  ;;  %v690_v29 = vld [vmem:[%s6785_s6 + $0x890] sm:$0xff] }
 0x20b   : > { %3006 = vmatmul.mubr.bf16.gmra.mrb[28].mxu0 %v990_v35  ;;  %2309 = vmatprep.mubr.bf16.mxu1 %v995_v36  ;;  %v626_v35 = vld [vmem:[%s6785_s6 + $0x690] sm:$0xff]  ;;  %v7170_v36 = vshrl.u32 %v1186_v30, 7 }
 0x20c   : > { %3015 = vmatprep.mubr.bf16.mxu0 %v999_v37  ;;  %v634_v37 = vld [vmem:[%s6785_s6 + $0x6d0] sm:$0xff] }
 0x20d   : > { %v7178_v42 = vsub.s32 1, %v7170_v36  ;;  %v4735_v43 = vsub.s32 5, %v7170_v36  ;;  %v7182_v44 = vsub.s32 2, %v7170_v36  ;;  %v4881_v45 = vsub.s32 6, %v7170_v36  ;;  %v698_v30 = vld [vmem:[%s6785_s6 + $0x8d0] sm:$0xff] }
 0x20e   : > { %v1034_v53 = vpack.c.bf16 %v634_v37, %v626_v35  ;;  %v711_v35 = vld [vmem:[%s6785_s6 + $0x938] sm:$0xff]  ;;  %v1066_v38 = vpack.c.bf16 %v698_v30, %v690_v29  ;;  %v758_v23 = vld [vmem:[%s6785_s6 + $0xab0] sm:$0xff] }
 0x20f   : > { %v719_v37 = vld [vmem:[%s6785_s6 + $0x978] sm:$0xff]  ;;  %v766_v24 = vld [vmem:[%s6785_s6 + $0xaf0] sm:$0xff] }
 0x210   : > { %v1079_v41 = vpack.c.bf16 %v719_v37, %v711_v35  ;;  %v1102_v30 = vpack.c.bf16 %v766_v24, %v758_v23  ;;  %v774_v35 = vld [vmem:[%s6785_s6 + $0xb30] sm:$0xff] }
 0x211   : > { %v782_v37 = vld [vmem:[%s6785_s6 + $0xb70] sm:$0xff] }
 0x212   : > { %2310 = vmatmul.mubr.bf16.gmra.mrb[32].mxu1 %v994_v46  ;;  %v647_v46 = vld [vmem:[%s6785_s6 + $0x738] sm:$0xff] }
 0x213   : > { %3016 = vmatmul.mubr.bf16.gmra.mrb[32].mxu0 %v998_v47  ;;  %2319 = vmatprep.mubr.bf16.mxu1 %v1003_v48  ;;  %v655_v47 = vld [vmem:[%s6785_s6 + $0x778] sm:$0xff]  ;;  %v7187_v48 = vld [vmem:[#allocation7] sm:$0x77] }
 0x214   : > { %3025 = vmatprep.mubr.bf16.mxu0 %v1007_v49  ;;  %v4732_v49 = vrot.slane %v7187_v48, %v7178_v42  ;;  %v7192_v50 = vrot.slane %v7187_v48, %v4735_v43  ;;  %v4878_v51 = vrot.slane %v7187_v48, %v7182_v44  ;;  %v7197_v52 = vrot.slane %v7187_v48, %v4881_v45  ;;  %v706_v43 = vld [vmem:[%s6785_s6 + $0x910] sm:$0xff] }
 0x215   : > { %v1047_v56 = vpack.c.bf16 %v655_v47, %v647_v46  ;;  %v714_v45 = vld [vmem:[%s6785_s6 + $0x950] sm:$0xff] }
 0x216   : > { %v710_v46 = vld [vmem:[%s6785_s6 + $0x930] sm:$0xff] }
 0x217   : > { %v718_v47 = vld [vmem:[%s6785_s6 + $0x970] sm:$0xff] }
 0x21a   : > { %2320 = vmatmul.mubr.bf16.gmra.mrb[36].mxu1 %v1002_v58  ;;  %v650_v58 = vld [vmem:[%s6785_s6 + $0x750] sm:$0xff] }
 0x21b   : > { %3026 = vmatmul.mubr.bf16.gmra.mrb[36].mxu0 %v1006_v59  ;;  %2329 = vmatprep.mubr.bf16.mxu1 %v1011_v60  ;;  %v646_v59 = vld [vmem:[%s6785_s6 + $0x730] sm:$0xff]  ;;  %v1042_v1 = vpack.c.bf16 %v650_v58, %v642_v57  ;;  %v1074_v57 = vpack.c.bf16 %v714_v45, %v706_v43  ;;  %v1078_v58 = vpack.c.bf16 %v718_v47, %v710_v46 }
 0x21c   : > { %3035 = vmatprep.mubr.bf16.mxu0 %v1015_v61  ;;  %v654_v60 = vld [vmem:[%s6785_s6 + $0x770] sm:$0xff]  ;;  %v659_v61 = vld [vmem:[%s6785_s6 + $0x798] sm:$0xff]  ;;  %v1110_v45 = vpack.c.bf16 %v782_v37, %v774_v35 }
 0x21d   : > { %v1046_v2 = vpack.c.bf16 %v654_v60, %v646_v59  ;;  %v1051_v3 = vpack.c.bf16 %v667_v62, %v659_v61  ;;  %v722_v61 = vld [vmem:[%s6785_s6 + $0x990] sm:$0xff] }
 0x21e   : > { %v730_v62 = vld [vmem:[%s6785_s6 + $0x9d0] sm:$0xff] }
 0x222   : > { %2330 = vmatmul.mubr.bf16.gmra.mrb[40].mxu1 %v1010_v6  ;;  %v666_v6 = vld [vmem:[%s6785_s6 + $0x7d0] sm:$0xff] }
 0x223   : > { %3036 = vmatmul.mubr.bf16.gmra.mrb[40].mxu0 %v1014_v7  ;;  %2339 = vmatprep.mubr.bf16.mxu1 %v1019_v8  ;;  %v662_v7 = vld [vmem:[%s6785_s6 + $0x7b0] sm:$0xff]  ;;  %v1050_v13 = vpack.c.bf16 %v666_v6, %v658_v5  ;;  %v1082_v5 = vpack.c.bf16 %v730_v62, %v722_v61  ;;  %v1086_v6 = vpack.c.bf16 %v734_v0, %v726_v63 }
 0x224   : > { %3045 = vmatprep.mubr.bf16.mxu0 %v1023_v9  ;;  %v670_v8 = vld [vmem:[%s6785_s6 + $0x7f0] sm:$0xff]  ;;  %v675_v9 = vld [vmem:[%s6785_s6 + $0x818] sm:$0xff] }
 0x225   : > { %v1054_v14 = vpack.c.bf16 %v670_v8, %v662_v7  ;;  %v1059_v15 = vpack.c.bf16 %v683_v10, %v675_v9  ;;  %v738_v9 = vld [vmem:[%s6785_s6 + $0xa10] sm:$0xff] }
 0x226   : > { %v746_v10 = vld [vmem:[%s6785_s6 + $0xa50] sm:$0xff] }
 0x22a   : > { %2340 = vmatmul.mubr.bf16.gmra.mrb[44].mxu1 %v1018_v18  ;;  %v682_v18 = vld [vmem:[%s6785_s6 + $0x850] sm:$0xff] }
 0x22b   : > { %3046 = vmatmul.mubr.bf16.gmra.mrb[44].mxu0 %v1022_v19  ;;  %2349 = vmatprep.mubr.bf16.mxu1 %v1027_v20  ;;  %v678_v19 = vld [vmem:[%s6785_s6 + $0x830] sm:$0xff]  ;;  %v1058_v25 = vpack.c.bf16 %v682_v18, %v674_v17  ;;  %v1090_v17 = vpack.c.bf16 %v746_v10, %v738_v9  ;;  %v1094_v18 = vpack.c.bf16 %v750_v12, %v742_v11 }
 0x22c   : > { %3055 = vmatprep.mubr.bf16.mxu0 %v1031_v21  ;;  %v686_v20 = vld [vmem:[%s6785_s6 + $0x870] sm:$0xff]  ;;  %v691_v21 = vld [vmem:[%s6785_s6 + $0x898] sm:$0xff] }
 0x22d   : > { %v1062_v26 = vpack.c.bf16 %v686_v20, %v678_v19  ;;  %v1067_v27 = vpack.c.bf16 %v699_v22, %v691_v21  ;;  %v754_v21 = vld [vmem:[%s6785_s6 + $0xa90] sm:$0xff] }
 0x22e   : > { %v762_v22 = vld [vmem:[%s6785_s6 + $0xad0] sm:$0xff] }
 0x22f   : > { %v1098_v29 = vpack.c.bf16 %v762_v22, %v754_v21 }
 0x232   : > { %2350 = vmatmul.mubr.bf16.gmra.mrb[48].mxu1 %v1026_v31  ;;  %v694_v31 = vld [vmem:[%s6785_s6 + $0x8b0] sm:$0xff] }
 0x233   : > { %3056 = vmatmul.mubr.bf16.gmra.mrb[48].mxu0 %v1030_v32  ;;  %2359 = vmatprep.mubr.bf16.mxu1 %v1035_v33  ;;  %v702_v32 = vld [vmem:[%s6785_s6 + $0x8f0] sm:$0xff]  ;;  %v707_v33 = vld [vmem:[%s6785_s6 + $0x918] sm:$0xff] }
 0x234   : > { %3065 = vmatprep.mubr.bf16.mxu0 %v1039_v34  ;;  %v715_v34 = vld [vmem:[%s6785_s6 + $0x958] sm:$0xff]  ;;  %v1070_v39 = vpack.c.bf16 %v702_v32, %v694_v31 }
 0x235   : > { %v1075_v40 = vpack.c.bf16 %v715_v34, %v707_v33  ;;  %v770_v33 = vld [vmem:[%s6785_s6 + $0xb10] sm:$0xff] }
 0x236   : > { %v778_v34 = vld [vmem:[%s6785_s6 + $0xb50] sm:$0xff] }
 0x237   : > { %v1106_v43 = vpack.c.bf16 %v778_v34, %v770_v33  ;;  %v855_v33 = vld [vmem:[%s6785_s6 + $0xdb8] sm:$0xff] }
 0x238   : > { %v863_v34 = vld [vmem:[%s6785_s6 + $0xdf8] sm:$0xff] }
 0x23a   : > { %2360 = vmatmul.mubr.bf16.gmra.mrb[52].mxu1 %v1034_v53  ;;  %v723_v53 = vld [vmem:[%s6785_s6 + $0x998] sm:$0xff] }
 0x23b   : > { %3066 = vmatmul.mubr.bf16.gmra.mrb[52].mxu0 %v1038_v54  ;;  %2369 = vmatprep.mubr.bf16.mxu1 %v1043_v55  ;;  %v731_v54 = vld [vmem:[%s6785_s6 + $0x9d8] sm:$0xff] }
 0x23c   : > { %3075 = vmatprep.mubr.bf16.mxu0 %v1047_v56  ;;  %v727_v55 = vld [vmem:[%s6785_s6 + $0x9b8] sm:$0xff]  ;;  %v1083_v59 = vpack.c.bf16 %v731_v54, %v723_v53  ;;  %v786_v53 = vld [vmem:[%s6785_s6 + $0xb90] sm:$0xff] }
 0x23d   : > { %v735_v56 = vld [vmem:[%s6785_s6 + $0x9f8] sm:$0xff]  ;;  %v794_v54 = vld [vmem:[%s6785_s6 + $0xbd0] sm:$0xff] }
 0x23e   : > { %v1087_v60 = vpack.c.bf16 %v735_v56, %v727_v55  ;;  %v790_v55 = vld [vmem:[%s6785_s6 + $0xbb0] sm:$0xff]  ;;  %v1114_v61 = vpack.c.bf16 %v794_v54, %v786_v53  ;;  %v867_v54 = vld [vmem:[%s6785_s6 + $0xe18] sm:$0xff] }
 0x23f   : > { %v798_v56 = vld [vmem:[%s6785_s6 + $0xbf0] sm:$0xff] }
 0x240   : > { %v1118_v62 = vpack.c.bf16 %v798_v56, %v790_v55  ;;  %v862_v53 = vld [vmem:[%s6785_s6 + $0xdf0] sm:$0xff]  ;;  %v875_v55 = vld [vmem:[%s6785_s6 + $0xe58] sm:$0xff] }
 0x241   : > { %v871_v56 = vld [vmem:[%s6785_s6 + $0xe38] sm:$0xff] }
 0x242   : > { %2370 = vmatmul.mubr.bf16.gmra.mrb[56].mxu1 %v1042_v1  ;;  %v739_v1 = vld [vmem:[%s6785_s6 + $0xa18] sm:$0xff] }
 0x243   : > { %3076 = vmatmul.mubr.bf16.gmra.mrb[56].mxu0 %v1046_v2  ;;  %2379 = vmatprep.mubr.bf16.mxu1 %v1051_v3  ;;  %v747_v2 = vld [vmem:[%s6785_s6 + $0xa58] sm:$0xff] }
 0x244   : > { %3085 = vmatprep.mubr.bf16.mxu0 %v1055_v4  ;;  %v743_v3 = vld [vmem:[%s6785_s6 + $0xa38] sm:$0xff]  ;;  %v1091_v7 = vpack.c.bf16 %v747_v2, %v739_v1  ;;  %v802_v1 = vld [vmem:[%s6785_s6 + $0xc10] sm:$0xff] }
 0x245   : > { %v751_v4 = vld [vmem:[%s6785_s6 + $0xa78] sm:$0xff]  ;;  %v810_v2 = vld [vmem:[%s6785_s6 + $0xc50] sm:$0xff] }
 0x246   : > { %v1095_v8 = vpack.c.bf16 %v751_v4, %v743_v3  ;;  %v806_v3 = vld [vmem:[%s6785_s6 + $0xc30] sm:$0xff]  ;;  %v1122_v9 = vpack.c.bf16 %v810_v2, %v802_v1  ;;  %v3256_v1 = vld [vmem:[%s6799_s14] sm:$0xff] }
 0x247   : > { %v814_v4 = vld [vmem:[%s6785_s6 + $0xc70] sm:$0xff] }
 0x248   : > { %v1126_v10 = vpack.c.bf16 %v814_v4, %v806_v3 }
 0x24a   : > { %2380 = vmatmul.mubr.bf16.gmra.mrb[60].mxu1 %v1050_v13  ;;  %v755_v13 = vld [vmem:[%s6785_s6 + $0xa98] sm:$0xff] }
 0x24b   : > { %3086 = vmatmul.mubr.bf16.gmra.mrb[60].mxu0 %v1054_v14  ;;  %2389 = vmatprep.mubr.bf16.mxu1 %v1059_v15  ;;  %v763_v14 = vld [vmem:[%s6785_s6 + $0xad8] sm:$0xff] }
 0x24c   : > { %3095 = vmatprep.mubr.bf16.mxu0 %v1063_v16  ;;  %v759_v15 = vld [vmem:[%s6785_s6 + $0xab8] sm:$0xff]  ;;  %v1099_v19 = vpack.c.bf16 %v763_v14, %v755_v13  ;;  %v818_v13 = vld [vmem:[%s6785_s6 + $0xc90] sm:$0xff] }
 0x24d   : > { %v767_v16 = vld [vmem:[%s6785_s6 + $0xaf8] sm:$0xff]  ;;  %v826_v14 = vld [vmem:[%s6785_s6 + $0xcd0] sm:$0xff] }
 0x24e   : > { %v1103_v20 = vpack.c.bf16 %v767_v16, %v759_v15  ;;  %v822_v15 = vld [vmem:[%s6785_s6 + $0xcb0] sm:$0xff]  ;;  %v1130_v21 = vpack.c.bf16 %v826_v14, %v818_v13  ;;  %v3258_v13 = vld [vmem:[%s6799_s14 + $0x10] sm:$0xff] }
 0x24f   : > { %v830_v16 = vld [vmem:[%s6785_s6 + $0xcf0] sm:$0xff] }
 0x250   : > { %v1134_v22 = vpack.c.bf16 %v830_v16, %v822_v15 }
 0x252   : > { %2390 = vmatmul.mubr.bf16.gmra.mrb[64].mxu1 %v1058_v25  ;;  %v771_v25 = vld [vmem:[%s6785_s6 + $0xb18] sm:$0xff] }
 0x253   : > { %3096 = vmatmul.mubr.bf16.gmra.mrb[64].mxu0 %v1062_v26  ;;  %2399 = vmatprep.mubr.bf16.mxu1 %v1067_v27  ;;  %v779_v26 = vld [vmem:[%s6785_s6 + $0xb58] sm:$0xff] }
 0x254   : > { %3105 = vmatprep.mubr.bf16.mxu0 %v1071_v28  ;;  %v775_v27 = vld [vmem:[%s6785_s6 + $0xb38] sm:$0xff]  ;;  %v1107_v31 = vpack.c.bf16 %v779_v26, %v771_v25  ;;  %v834_v25 = vld [vmem:[%s6785_s6 + $0xd10] sm:$0xff] }
 0x255   : > { %v783_v28 = vld [vmem:[%s6785_s6 + $0xb78] sm:$0xff]  ;;  %v842_v26 = vld [vmem:[%s6785_s6 + $0xd50] sm:$0xff] }
 0x256   : > { %v1111_v32 = vpack.c.bf16 %v783_v28, %v775_v27  ;;  %v1188_v27 = vsub.s32 0, %v7170_v36  ;;  %v838_v28 = vld [vmem:[%s6785_s6 + $0xd30] sm:$0xff]  ;;  %v1138_v35 = vpack.c.bf16 %v842_v26, %v834_v25  ;;  %v891_v26 = vld [vmem:[%s6785_s6 + $0xed8] sm:$0xff] }
 0x25a   : > { %2400 = vmatmul.mubr.bf16.gmra.mrb[68].mxu1 %v1066_v38  ;;  %v787_v38 = vld [vmem:[%s6785_s6 + $0xb98] sm:$0xff] }
 0x25b   : > { %3106 = vmatmul.mubr.bf16.gmra.mrb[68].mxu0 %v1070_v39  ;;  %2409 = vmatprep.mubr.bf16.mxu1 %v1075_v40  ;;  %v795_v39 = vld [vmem:[%s6785_s6 + $0xbd8] sm:$0xff] }
 0x25c   : > { %3115 = vmatprep.mubr.bf16.mxu0 %v1079_v41  ;;  %v791_v40 = vld [vmem:[%s6785_s6 + $0xbb8] sm:$0xff]  ;;  %v1115_v46 = vpack.c.bf16 %v795_v39, %v787_v38  ;;  %v1189_v38 = vrot.slane %v7187_v48, %v1188_v27 }
 0x25d   : > { %v799_v41 = vld [vmem:[%s6785_s6 + $0xbf8] sm:$0xff] }
 0x25e   : > { %v1119_v47 = vpack.c.bf16 %v799_v41, %v791_v40  ;;  %v1151_v41 = vpack.c.bf16 %v863_v34, %v855_v33 }
 0x262   : > { %2410 = vmatmul.mubr.bf16.gmra.mrb[72].mxu1 %v1074_v57  ;;  %v803_v57 = vld [vmem:[%s6785_s6 + $0xc18] sm:$0xff] }
 0x263   : > { %3116 = vmatmul.mubr.bf16.gmra.mrb[72].mxu0 %v1078_v58  ;;  %2419 = vmatprep.mubr.bf16.mxu1 %v1083_v59  ;;  %v811_v58 = vld [vmem:[%s6785_s6 + $0xc58] sm:$0xff] }
 0x264   : > { %3125 = vmatprep.mubr.bf16.mxu0 %v1087_v60  ;;  %v807_v59 = vld [vmem:[%s6785_s6 + $0xc38] sm:$0xff]  ;;  %v1123_v63 = vpack.c.bf16 %v811_v58, %v803_v57 }
 0x265   : > { %v815_v60 = vld [vmem:[%s6785_s6 + $0xc78] sm:$0xff] }
 0x266   : > { %v1127_v0 = vpack.c.bf16 %v815_v60, %v807_v59  ;;  %v879_v57 = vld [vmem:[%s6785_s6 + $0xe78] sm:$0xff] }
 0x26a   : > { %2420 = vmatmul.mubr.bf16.gmra.mrb[76].mxu1 %v1082_v5  ;;  %v819_v5 = vld [vmem:[%s6785_s6 + $0xc98] sm:$0xff] }
 0x26b   : > { %3126 = vmatmul.mubr.bf16.gmra.mrb[76].mxu0 %v1086_v6  ;;  %2429 = vmatprep.mubr.bf16.mxu1 %v1091_v7  ;;  %v827_v6 = vld [vmem:[%s6785_s6 + $0xcd8] sm:$0xff] }
 0x26c   : > { %3135 = vmatprep.mubr.bf16.mxu0 %v1095_v8  ;;  %v823_v7 = vld [vmem:[%s6785_s6 + $0xcb8] sm:$0xff]  ;;  %v1131_v11 = vpack.c.bf16 %v827_v6, %v819_v5  ;;  %v1155_v5 = vpack.c.bf16 %v875_v55, %v867_v54  ;;  %v1159_v6 = vpack.c.bf16 %v879_v57, %v871_v56  ;;  %v3261_v56 = vld [vmem:[%s6799_s14 + $0x28] sm:$0xff] }
 0x26d   : > { %v831_v8 = vld [vmem:[%s6785_s6 + $0xcf8] sm:$0xff] }
 0x26e   : > { %v1135_v12 = vpack.c.bf16 %v831_v8, %v823_v7  ;;  %v3257_v8 = vld [vmem:[%s6799_s14 + $0x8] sm:$0xff] }
 0x272   : > { %2430 = vmatmul.mubr.bf16.gmra.mrb[80].mxu1 %v1090_v17  ;;  %v835_v17 = vld [vmem:[%s6785_s6 + $0xd18] sm:$0xff] }
 0x273   : > { %3136 = vmatmul.mubr.bf16.gmra.mrb[80].mxu0 %v1094_v18  ;;  %2439 = vmatprep.mubr.bf16.mxu1 %v1099_v19  ;;  %v843_v18 = vld [vmem:[%s6785_s6 + $0xd58] sm:$0xff] }
 0x274   : > { %3145 = vmatprep.mubr.bf16.mxu0 %v1103_v20  ;;  %v839_v19 = vld [vmem:[%s6785_s6 + $0xd38] sm:$0xff]  ;;  %v1139_v23 = vpack.c.bf16 %v843_v18, %v835_v17  ;;  %v3259_v17 = vld [vmem:[%s6799_s14 + $0x18] sm:$0xff]  ;;  %v866_v18 = vld [vmem:[%s6785_s6 + $0xe10] sm:$0xff] }
 0x275   : > { %v847_v20 = vld [vmem:[%s6785_s6 + $0xd78] sm:$0xff] }
 0x276   : > { %v1143_v24 = vpack.c.bf16 %v847_v20, %v839_v19  ;;  %v874_v19 = vld [vmem:[%s6785_s6 + $0xe50] sm:$0xff] }
 0x27a   : > { %2440 = vmatmul.mubr.bf16.gmra.mrb[84].mxu1 %v1098_v29  ;;  %v846_v29 = vld [vmem:[%s6785_s6 + $0xd70] sm:$0xff] }
 0x27b   : > { %3146 = vmatmul.mubr.bf16.gmra.mrb[84].mxu0 %v1102_v30  ;;  %2449 = vmatprep.mubr.bf16.mxu1 %v1107_v31  ;;  %v1192_v30 = vsub.s32 4, %v7170_v36  ;;  %v851_v31 = vld [vmem:[%s6785_s6 + $0xd98] sm:$0xff]  ;;  %v1142_v37 = vpack.c.bf16 %v846_v29, %v838_v28  ;;  %v7307_v36 = vrot.slane %v1189_v38, %v1188_v27 }
 0x27c   : > { %3155 = vmatprep.mubr.bf16.mxu0 %v1111_v32  ;;  %v859_v32 = vld [vmem:[%s6785_s6 + $0xdd8] sm:$0xff] }
 0x27d   : > { %v1193_v39 = vrot.slane %v7187_v48, %v1192_v30  ;;  %v1147_v40 = vpack.c.bf16 %v859_v32, %v851_v31  ;;  %v895_v28 = vld [vmem:[%s6785_s6 + $0xef8] sm:$0xff] }
 0x282   : > { %2450 = vmatmul.mubr.bf16.gmra.mrb[88].mxu1 %v1106_v43  ;;  %v850_v43 = vld [vmem:[%s6785_s6 + $0xd90] sm:$0xff] }
 0x283   : > { %3156 = vmatmul.mubr.bf16.gmra.mrb[88].mxu0 %v1110_v45  ;;  %2459 = vmatprep.mubr.bf16.mxu1 %v1115_v46  ;;  %v858_v45 = vld [vmem:[%s6785_s6 + $0xdd0] sm:$0xff]  ;;  %v7311_v46 = vrot.slane %v1193_v39, %v1188_v27  ;;  %v887_v27 = vld [vmem:[%s6785_s6 + $0xeb8] sm:$0xff] }
 0x284   : > { %3165 = vmatprep.mubr.bf16.mxu0 %v1119_v47  ;;  %v854_v47 = vld [vmem:[%s6785_s6 + $0xdb0] sm:$0xff]  ;;  %v1167_v54 = vpack.c.bf16 %v895_v28, %v887_v27 }
 0x28a   : > { %2460 = vmatmul.mubr.bf16.gmra.mrb[92].mxu1 %v1114_v61 }
 0x28b   : > { %3166 = vmatmul.mubr.bf16.gmra.mrb[92].mxu0 %v1118_v62  ;;  %2469 = vmatprep.mubr.bf16.mxu1 %v1123_v63  ;;  %v1146_v63 = vpack.c.bf16 %v858_v45, %v850_v43 }
 0x28c   : > { %3175 = vmatprep.mubr.bf16.mxu0 %v1127_v0  ;;  %v1150_v0 = vpack.c.bf16 %v862_v53, %v854_v47 }
 0x292   : > { %2470 = vmatmul.mubr.bf16.gmra.mrb[96].mxu1 %v1122_v9 }
 0x293   : > { %3176 = vmatmul.mubr.bf16.gmra.mrb[96].mxu0 %v1126_v10  ;;  %2479 = vmatprep.mubr.bf16.mxu1 %v1131_v11 }
 0x294   : > { %3185 = vmatprep.mubr.bf16.mxu0 %v1135_v12 }
 0x29a   : > { %2480 = vmatmul.mubr.bf16.gmra.mrb[100].mxu1 %v1130_v21 }
 0x29b   : > { %3186 = vmatmul.mubr.bf16.gmra.mrb[100].mxu0 %v1134_v22  ;;  %2489 = vmatprep.mubr.bf16.mxu1 %v1139_v23  ;;  %v870_v22 = vld [vmem:[%s6785_s6 + $0xe30] sm:$0xff] }
 0x29c   : > { %3195 = vmatprep.mubr.bf16.mxu0 %v1143_v24  ;;  %v878_v23 = vld [vmem:[%s6785_s6 + $0xe70] sm:$0xff]  ;;  %v883_v24 = vld [vmem:[%s6785_s6 + $0xe98] sm:$0xff] }
 0x29d   : > { %v1158_v38 = vpack.c.bf16 %v878_v23, %v870_v22  ;;  %v1163_v53 = vpack.c.bf16 %v891_v26, %v883_v24 }
 0x2a2   : > { %2490 = vmatmul.mubr.bf16.gmra.mrb[104].mxu1 %v1138_v35 }
 0x2a3   : > { %3196 = vmatmul.mubr.bf16.gmra.mrb[104].mxu0 %v1142_v37  ;;  %2499 = vmatprep.mubr.bf16.mxu1 %v1147_v40  ;;  %v1154_v37 = vpack.c.bf16 %v874_v19, %v866_v18  ;;  %v3260_v40 = vld [vmem:[%s6799_s14 + $0x20] sm:$0xff]  ;;  %v911_v18 = vld [vmem:[%s6785_s6 + $0xf78] sm:$0xff] }
 0x2a4   : > { %3205 = vmatprep.mubr.bf16.mxu0 %v1151_v41 }
 0x2a5   : > { %v2231_v58 = vpop.f32.mrb[0].mxu1 }
 0x2a6   : > { %v2937_v59 = vpop.f32.mrb[0].mxu0  ;;  %v5438_v60 = vadd.f32 %v2231_v58, %v7307_v36  ;;  %v2233_v61 = vpop.f32.mrb[1].mxu1 }
 0x2a7   : > { %v2939_v62 = vpop.f32.mrb[1].mxu0  ;;  %v5440_v2 = vadd.f32 %v2233_v61, %v7311_v46  ;;  %v2235_v3 = vpop.f32.mrb[2].mxu1 }
 0x2a8   : > { %v2941_v4 = vpop.f32.mrb[2].mxu0  ;;  %v5439_v7 = vadd.f32 %v5438_v60, %v2937_v59  ;;  %v5442_v9 = vadd.f32 %v2235_v3, %v7307_v36  ;;  %v2237_v10 = vpop.f32.mrb[3].mxu1 }
 0x2a9   : > { %v2943_v11 = vpop.f32.mrb[3].mxu0  ;;  %v5441_v12 = vadd.f32 %v5440_v2, %v2939_v62  ;;  %v5444_v14 = vadd.f32 %v2237_v10, %v7311_v46  ;;  %v886_v10 = vld [vmem:[%s6785_s6 + $0xeb0] sm:$0xff] }
 0x2aa   : > { %v7326_v15 = vadd.f32 %v5439_v7, %v3256_v1  ;;  %v5443_v16 = vadd.f32 %v5442_v9, %v2941_v4  ;;  %2500 = vmatmul.mubr.bf16.gmra.mrb[108].mxu1 %v1146_v63  ;;  %v3262_v63 = vld [vmem:[%s6799_s14 + $0x30] sm:$0xff]  ;;  %v890_v7 = vld [vmem:[%s6785_s6 + $0xed0] sm:$0xff] }
 0x2ab   : > { %3206 = vmatmul.mubr.bf16.gmra.mrb[108].mxu0 %v1150_v0  ;;  %v7331_v20 = vadd.f32 %v5441_v12, %v3257_v8  ;;  %v5445_v21 = vadd.f32 %v5444_v14, %v2943_v11  ;;  %2509 = vmatprep.mubr.bf16.mxu1 %v1155_v5  ;;  %v3263_v5 = vld [vmem:[%s6799_s14 + $0x38] sm:$0xff]  ;;  %v894_v11 = vld [vmem:[%s6785_s6 + $0xef0] sm:$0xff]  ;;  %v899_v12 = vld [vmem:[%s6785_s6 + $0xf18] sm:$0xff] }
 0x2ac   : > { %3215 = vmatprep.mubr.bf16.mxu0 %v1159_v6  ;;  %v7336_v25 = vadd.f32 %v5443_v16, %v3258_v13  ;;  %v3769_v60 = vmul.f32 %v7326_v15, %v7326_v15  ;;  %v882_v6 = vld [vmem:[%s6785_s6 + $0xe90] sm:$0xff]  ;;  %v907_v16 = vld [vmem:[%s6785_s6 + $0xf58] sm:$0xff] }
 0x2ad   : > { %v7341_v29 = vadd.f32 %v5445_v21, %v3259_v17  ;;  %v2241_v30 = vpop.f32.mrb[4].mxu1  ;;  %v3512_v32 = vadd.f32 %v7331_v20, %v7326_v15  ;;  %v3770_v61 = vmul.f32 %v7331_v20, %v7331_v20  ;;  %v903_v17 = vld [vmem:[%s6785_s6 + $0xf38] sm:$0xff] }
 0x2ae   : > { %v2947_v31 = vpop.f32.mrb[4].mxu0  ;;  %v5446_v33 = vadd.f32 %v2241_v30, %v7307_v36  ;;  %v2243_v34 = vpop.f32.mrb[5].mxu1  ;;  %v3771_v39 = vmul.f32 %v7336_v25, %v7336_v25 }
 0x2af   : > { %v2949_v35 = vpop.f32.mrb[5].mxu0  ;;  %v5448_v41 = vadd.f32 %v2243_v34, %v7311_v46  ;;  %3513 = vadd.xlane.f32.xlu0 %v3512_v32  ;;  %v2245_v45 = vpop.f32.mrb[6].mxu1  ;;  %v3772_v47 = vmul.f32 %v7341_v29, %v7341_v29  ;;  %v3515_v2 = vadd.f32 %v7341_v29, %v7336_v25  ;;  %v3897_v14 = vadd.f32 %v3770_v61, %v3769_v60 }
 0x2b0   : > { %v2951_v43 = vpop.f32.mrb[6].mxu0  ;;  %v5447_v55 = vadd.f32 %v5446_v33, %v2947_v31  ;;  %v5450_v57 = vadd.f32 %v2245_v45, %v7307_v36  ;;  %v2247_v58 = vpop.f32.mrb[7].mxu1  ;;  %v1162_v31 = vpack.c.bf16 %v890_v7, %v882_v6  ;;  %v1166_v32 = vpack.c.bf16 %v894_v11, %v886_v10  ;;  %v3264_v33 = vld [vmem:[%s6799_s14 + $0x40] sm:$0xff]  ;;  %v923_v10 = vld [vmem:[%s6785_s6 + $0xfd8] sm:$0xff] }
 0x2b1   : > { %v2953_v59 = vpop.f32.mrb[7].mxu0  ;;  %v5449_v62 = vadd.f32 %v5448_v41, %v2949_v35  ;;  %v5452_v0 = vadd.f32 %v2247_v58, %v7311_v46  ;;  %v3900_v1 = vadd.f32 %v3772_v47, %v3771_v39  ;;  %v1175_v39 = vpack.c.bf16 %v911_v18, %v903_v17  ;;  %v3265_v41 = vld [vmem:[%s6799_s14 + $0x48] sm:$0xff] }
 0x2b2   : > { %v7362_v3 = vadd.f32 %v5447_v55, %v3260_v40  ;;  %v5451_v4 = vadd.f32 %v5450_v57, %v2951_v43  ;;  %2510 = vmatmul.mubr.bf16.gmra.mrb[112].mxu1 %v1154_v37 }
 0x2b3   : > { %3216 = vmatmul.mubr.bf16.gmra.mrb[112].mxu0 %v1158_v38  ;;  %v7367_v8 = vadd.f32 %v5449_v62, %v3261_v56  ;;  %v5453_v9 = vadd.f32 %v5452_v0, %v2953_v59  ;;  %3901 = vadd.xlane.f32.xlu1 %v3900_v1  ;;  %v1171_v38 = vpack.c.bf16 %v907_v16, %v899_v12  ;;  %v3266_v56 = vld [vmem:[%s6799_s14 + $0x50] sm:$0xff]  ;;  %v3267_v62 = vld [vmem:[%s6799_s14 + $0x58] sm:$0xff] }
 0x2b4   : > { %3516 = vadd.xlane.f32.xlu0 %v3515_v2  ;;  %v7372_v13 = vadd.f32 %v5451_v4, %v3262_v63  ;;  %2519 = vmatprep.mubr.bf16.mxu1 %v1163_v53  ;;  %v3773_v24 = vmul.f32 %v7362_v3, %v7362_v3  ;;  %v898_v63 = vld [vmem:[%s6785_s6 + $0xf10] sm:$0xff] }
 0x2b5   : > { %3225 = vmatprep.mubr.bf16.mxu0 %v1167_v54  ;;  %v7377_v19 = vadd.f32 %v5453_v9, %v3263_v5  ;;  %v2251_v21 = vpop.f32.mrb[8].mxu1  ;;  %v3518_v23 = vadd.f32 %v7367_v8, %v7362_v3  ;;  %v3774_v26 = vmul.f32 %v7367_v8, %v7367_v8  ;;  %v906_v2 = vld [vmem:[%s6785_s6 + $0xf50] sm:$0xff]  ;;  %v915_v9 = vld [vmem:[%s6785_s6 + $0xf98] sm:$0xff] }
 0x2b6   : > { %v2957_v22 = vpop.f32.mrb[8].mxu0  ;;  %v5454_v27 = vadd.f32 %v2251_v21, %v7307_v36  ;;  %v2253_v28 = vpop.f32.mrb[9].mxu1  ;;  %v3775_v53 = vmul.f32 %v7372_v13, %v7372_v13  ;;  %v902_v4 = vld [vmem:[%s6785_s6 + $0xf30] sm:$0xff]  ;;  %v919_v21 = vld [vmem:[%s6785_s6 + $0xfb8] sm:$0xff] }
 0x2b7   : > { %v2959_v30 = vpop.f32.mrb[9].mxu0  ;;  %v5456_v34 = vadd.f32 %v2253_v28, %v7311_v46  ;;  %3519 = vadd.xlane.f32.xlu1 %v3518_v23  ;;  %v2255_v37 = vpop.f32.mrb[10].mxu1  ;;  %v3776_v54 = vmul.f32 %v7377_v19, %v7377_v19  ;;  %v3903_v58 = vadd.f32 %v3774_v26, %v3773_v24  ;;  %v3521_v59 = vadd.f32 %v7377_v19, %v7372_v13  ;;  %v910_v5 = vld [vmem:[%s6785_s6 + $0xf70] sm:$0xff] }
 0x2b8   : > { %v2961_v35 = vpop.f32.mrb[10].mxu0  ;;  %3898 = vadd.xlane.f32.xlu0 %v3897_v14  ;;  %v5455_v40 = vadd.f32 %v5454_v27, %v2957_v22  ;;  %v5458_v43 = vadd.f32 %v2255_v37, %v7307_v36  ;;  %v2257_v45 = vpop.f32.mrb[11].mxu1  ;;  %v927_v22 = vld [vmem:[%s6785_s6 + $0xff8] sm:$0xff]  ;;  %v1170_v27 = vpack.c.bf16 %v906_v2, %v898_v63  ;;  %v1174_v28 = vpack.c.bf16 %v910_v5, %v902_v4  ;;  %v7427_v37 = vld [vmem:[%s6785_s6 + $0xf90] sm:$0xff] }
 0x2b9   : > { %v2963_v47 = vpop.f32.mrb[11].mxu0  ;;  %v5457_v55 = vadd.f32 %v5456_v34, %v2959_v30  ;;  %v5460_v57 = vadd.f32 %v2257_v45, %v7311_v46  ;;  %v3906_v7 = vadd.f32 %v3776_v54, %v3775_v53  ;;  %v3268_v30 = vld [vmem:[%s6799_s14 + $0x60] sm:$0xff]  ;;  %v1183_v53 = vpack.c.bf16 %v927_v22, %v919_v21  ;;  %v918_v5 = vld [vmem:[%s6785_s6 + $0xfb0] sm:$0xff] }
 0x2ba   : > { %v7398_v60 = vadd.f32 %v5455_v40, %v3264_v33  ;;  %v5459_v61 = vadd.f32 %v5458_v43, %v2961_v35  ;;  %2520 = vmatmul.mubr.bf16.gmra.mrb[116].mxu1 %v1162_v31  ;;  %v1179_v35 = vpack.c.bf16 %v923_v10, %v915_v9  ;;  %v3269_v40 = vld [vmem:[%s6799_s14 + $0x68] sm:$0xff]  ;;  %v7467_v22 = vrot.slane %v7192_v50, %v7178_v42 }
 0x2bb   : > { %3226 = vmatmul.mubr.bf16.gmra.mrb[116].mxu0 %v1166_v32  ;;  %v7402_v0 = vadd.f32 %v5457_v55, %v3265_v41  ;;  %v5461_v1 = vadd.f32 %v5460_v57, %v2963_v47  ;;  %3522 = vadd.xlane.f32.xlu1 %v3521_v59  ;;  %v3270_v55 = vld [vmem:[%s6799_s14 + $0x70] sm:$0xff] }
 0x2bc   : > { %3904 = vadd.xlane.f32.xlu0 %v3903_v58  ;;  %v7407_v6 = vadd.f32 %v5459_v61, %v3266_v56  ;;  %2529 = vmatprep.mubr.bf16.mxu1 %v1171_v38  ;;  %v3777_v17 = vmul.f32 %v7398_v60, %v7398_v60  ;;  %v7430_v38 = vld [vmem:[%s6785_s6 + $0xfd0] sm:$0xff] }
 0x2bd   : > { %3235 = vmatprep.mubr.bf16.mxu0 %v1175_v39  ;;  %v7411_v11 = vadd.f32 %v5461_v1, %v3267_v62  ;;  %v2261_v12 = vpop.f32.mrb[12].mxu1  ;;  %v3524_v16 = vadd.f32 %v7402_v0, %v7398_v60  ;;  %v3778_v18 = vmul.f32 %v7402_v0, %v7402_v0  ;;  %v3271_v62 = vld [vmem:[%s6799_s14 + $0x78] sm:$0xff]  ;;  %v1178_v63 = vpack.c.bf16 %v7430_v38, %v7427_v37  ;;  %v3274_v37 = vld [vmem:[%s6799_s14 + $0x90] sm:$0xff] }
 0x2be   : > { %v2967_v14 = vpop.f32.mrb[12].mxu0  ;;  %v5462_v23 = vadd.f32 %v2261_v12, %v7307_v36  ;;  %v2263_v24 = vpop.f32.mrb[13].mxu1  ;;  %v3779_v34 = vmul.f32 %v7407_v6, %v7407_v6  ;;  %v7457_v12 = vrot.slane %v4732_v49, %v7178_v42 }
 0x2bf   : > { %v2969_v26 = vpop.f32.mrb[13].mxu0  ;;  %v5464_v31 = vadd.f32 %v2263_v24, %v7311_v46  ;;  %3907 = vadd.xlane.f32.xlu1 %v3906_v7  ;;  %v2265_v33 = vpop.f32.mrb[14].mxu1  ;;  %v3780_v47 = vmul.f32 %v7411_v11, %v7411_v11  ;;  %v3909_v57 = vadd.f32 %v3778_v18, %v3777_v17  ;;  %v3527_v58 = vadd.f32 %v7411_v11, %v7407_v6  ;;  %v926_v7 = vld [vmem:[%s6785_s6 + $0xff0] sm:$0xff] }
 0x2c0   : > { %v2971_v32 = vpop.f32.mrb[14].mxu0  ;;  %3525 = vadd.xlane.f32.xlu0 %v3524_v16  ;;  %v5463_v39 = vadd.f32 %v5462_v23, %v2967_v14  ;;  %v5466_v41 = vadd.f32 %v2265_v33, %v7307_v36  ;;  %v2267_v43 = vpop.f32.mrb[15].mxu1  ;;  %v3273_v33 = vld [vmem:[%s6799_s14 + $0x88] sm:$0xff] }
 0x2c1   : > { %v2973_v45 = vpop.f32.mrb[15].mxu0  ;;  %v5465_v54 = vadd.f32 %v5464_v31, %v2969_v26  ;;  %v5468_v56 = vadd.f32 %v2267_v43, %v7311_v46  ;;  %v3912_v4 = vadd.f32 %v3780_v47, %v3779_v34  ;;  %v1182_v26 = vpack.c.bf16 %v926_v7, %v918_v5  ;;  %v3276_v7 = vld [vmem:[%s6799_s14 + $0xa0] sm:$0xff] }
 0x2c2   : > { %v7440_v59 = vadd.f32 %v5463_v39, %v3268_v30  ;;  %v5467_v61 = vadd.f32 %v5466_v41, %v2971_v32  ;;  %2530 = vmatmul.mubr.bf16.gmra.mrb[120].mxu1 %v1170_v27  ;;  %v7474_v27 = vrot.slane %v4878_v51, %v7182_v44  ;;  %v3272_v30 = vld [vmem:[%s6799_s14 + $0x80] sm:$0xff] }
 0x2c3   : > { %3236 = vmatmul.mubr.bf16.gmra.mrb[120].mxu0 %v1174_v28  ;;  %v7445_v1 = vadd.f32 %v5465_v54, %v3269_v40  ;;  %v5469_v2 = vadd.f32 %v5468_v56, %v2973_v45  ;;  %3528 = vadd.xlane.f32.xlu1 %v3527_v58  ;;  %v7478_v28 = vrot.slane %v7197_v52, %v7182_v44  ;;  %v3275_v45 = vld [vmem:[%s6799_s14 + $0x98] sm:$0xff] }
 0x2c4   : > { %3910 = vadd.xlane.f32.xlu0 %v3909_v57  ;;  %v7449_v9 = vadd.f32 %v5467_v61, %v3270_v55  ;;  %2539 = vmatprep.mubr.bf16.mxu1 %v1179_v35  ;;  %v3781_v10 = vmul.f32 %v7440_v59, %v7440_v59 }
 0x2c5   : > { %3245 = vmatprep.mubr.bf16.mxu0 %v1183_v53  ;;  %v7459_v14 = vadd.f32 %v5469_v2, %v3271_v62  ;;  %v2271_v16 = vpop.f32.mrb[16].mxu1  ;;  %v3530_v18 = vadd.f32 %v7445_v1, %v7440_v59  ;;  %v3782_v21 = vmul.f32 %v7445_v1, %v7445_v1 }
 0x2c6   : > { %v2977_v17 = vpop.f32.mrb[16].mxu0  ;;  %v5470_v23 = vadd.f32 %v2271_v16, %v7307_v36  ;;  %v2273_v24 = vpop.f32.mrb[17].mxu1  ;;  %v3783_v35 = vmul.f32 %v7449_v9, %v7449_v9 }
 0x2c7   : > { %v2979_v49 = vpop.f32.mrb[17].mxu0  ;;  %v5472_v42 = vadd.f32 %v2273_v24, %v7311_v46  ;;  %3913 = vadd.xlane.f32.xlu1 %v3912_v4  ;;  %v2275_v31 = vpop.f32.mrb[18].mxu1  ;;  %v3784_v44 = vmul.f32 %v7459_v14, %v7459_v14  ;;  %v3915_v39 = vadd.f32 %v3782_v21, %v3781_v10  ;;  %v3533_v40 = vadd.f32 %v7459_v14, %v7449_v9  ;;  %v3277_v21 = vld [vmem:[%s6799_s14 + $0xa8] sm:$0xff] }
 0x2c8   : > { %v2981_v50 = vpop.f32.mrb[18].mxu0  ;;  %3531 = vadd.xlane.f32.xlu0 %v3530_v18  ;;  %v5471_v32 = vadd.f32 %v5470_v23, %v2977_v17  ;;  %v5474_v34 = vadd.f32 %v2275_v31, %v7307_v36  ;;  %v2277_v48 = vpop.f32.mrb[19].mxu1 }
 0x2c9   : > { %v2983_v51 = vpop.f32.mrb[19].mxu0  ;;  %v5473_v52 = vadd.f32 %v5472_v42, %v2979_v49  ;;  %v5476_v38 = vadd.f32 %v2277_v48, %v7311_v46  ;;  %v3918_v55 = vadd.f32 %v3784_v44, %v3783_v35 }
 0x2ca   : > { %v7492_v41 = vadd.f32 %v5471_v32, %v3272_v30  ;;  %v5475_v43 = vadd.f32 %v5474_v34, %v2981_v50  ;;  %2540 = vmatmul.mubr.bf16.gmra.mrb[124].mxu1 %v1178_v63  ;;  %v3278_v50 = vld [vmem:[%s6799_s14 + $0xb0] sm:$0xff] }
 0x2cb   : > { %3246 = vmatmul.mubr.bf16.gmra.mrb[124].mxu0 %v1182_v26  ;;  %v7495_v47 = vadd.f32 %v5473_v52, %v3273_v33  ;;  %v5477_v53 = vadd.f32 %v5476_v38, %v2983_v51  ;;  %3534 = vadd.xlane.f32.xlu1 %v3533_v40  ;;  %v3279_v51 = vld [vmem:[%s6799_s14 + $0xb8] sm:$0xff] }
 0x2cc   : > { %3916 = vadd.xlane.f32.xlu0 %v3915_v39  ;;  %v7497_v54 = vadd.f32 %v5475_v43, %v3274_v37  ;;  %v3785_v62 = vmul.f32 %v7492_v41, %v7492_v41 }
 0x2cd   : > { %v7499_v56 = vadd.f32 %v5477_v53, %v3275_v45  ;;  %v2281_v57 = vpop.f32.mrb[20].mxu1  ;;  %v3536_v61 = vadd.f32 %v7495_v47, %v7492_v41  ;;  %v3786_v63 = vmul.f32 %v7495_v47, %v7495_v47 }
 0x2ce   : > { %v2987_v58 = vpop.f32.mrb[20].mxu0  ;;  %v5478_v2 = vadd.f32 %v2281_v57, %v7307_v36  ;;  %v2283_v4 = vpop.f32.mrb[21].mxu1  ;;  %v3787_v26 = vmul.f32 %v7497_v54, %v7497_v54 }
 0x2cf   : > { %v2989_v5 = vpop.f32.mrb[21].mxu0  ;;  %v5480_v10 = vadd.f32 %v2283_v4, %v7311_v46  ;;  %3919 = vadd.xlane.f32.xlu1 %v3918_v55  ;;  %v2285_v17 = vpop.f32.mrb[22].mxu1  ;;  %v3788_v30 = vmul.f32 %v7499_v56, %v7499_v56  ;;  %v3921_v32 = vadd.f32 %v3786_v63, %v3785_v62  ;;  %v3539_v33 = vadd.f32 %v7499_v56, %v7497_v54 }
 0x2d0   : > { %v2991_v16 = vpop.f32.mrb[22].mxu0  ;;  %3537 = vadd.xlane.f32.xlu0 %v3536_v61  ;;  %v5479_v18 = vadd.f32 %v5478_v2, %v2987_v58  ;;  %v5482_v23 = vadd.f32 %v2285_v17, %v7307_v36  ;;  %v2287_v24 = vpop.f32.mrb[23].mxu1  ;;  %v3280_v61 = vld [vmem:[%s6799_s14 + $0xc0] sm:$0xff] }
 0x2d1   : > { %v2993_v49 = vpop.f32.mrb[23].mxu0  ;;  %v5481_v42 = vadd.f32 %v5480_v10, %v2989_v5  ;;  %v5484_v31 = vadd.f32 %v2287_v24, %v7311_v46  ;;  %v3924_v37 = vadd.f32 %v3788_v30, %v3787_v26  ;;  %v3281_v5 = vld [vmem:[%s6799_s14 + $0xc8] sm:$0xff] }
 0x2d2   : > { %v7520_v34 = vadd.f32 %v5479_v18, %v3276_v7  ;;  %v5483_v48 = vadd.f32 %v5482_v23, %v2991_v16  ;;  %v3282_v23 = vld [vmem:[%s6799_s14 + $0xd0] sm:$0xff] }
 0x2d3   : > { %v7523_v35 = vadd.f32 %v5481_v42, %v3277_v21  ;;  %v5485_v44 = vadd.f32 %v5484_v31, %v2993_v49  ;;  %3540 = vadd.xlane.f32.xlu1 %v3539_v33 }
 0x2d4   : > { %9755 = vst [vmem:[#allocation16_spill] sm:$0xff] %v7520_v34  ;;  %3922 = vadd.xlane.f32.xlu0 %v3921_v32  ;;  %v7525_v52 = vadd.f32 %v5483_v48, %v3278_v50  ;;  %v3789_v45 = vmul.f32 %v7520_v34, %v7520_v34  ;;  %v3283_v50 = vld [vmem:[%s6799_s14 + $0xd8] sm:$0xff] }
 0x2d5   : > { %9756 = vst [vmem:[#allocation17_spill] sm:$0xff] %v7523_v35  ;;  %v7527_v38 = vadd.f32 %v5485_v44, %v3279_v51  ;;  %v2291_v39 = vpop.f32.mrb[24].mxu1  ;;  %v3542_v43 = vadd.f32 %v7523_v35, %v7520_v34  ;;  %v3790_v53 = vmul.f32 %v7523_v35, %v7523_v35 }
 0x2d6   : > { %9757 = vst [vmem:[#allocation18_spill] sm:$0xff] %v7525_v52  ;;  %v2997_v40 = vpop.f32.mrb[24].mxu0  ;;  %v5486_v55 = vadd.f32 %v2291_v39, %v7307_v36  ;;  %v2293_v57 = vpop.f32.mrb[25].mxu1  ;;  %v3791_v17 = vmul.f32 %v7525_v52, %v7525_v52 }
 0x2d7   : > { %9758 = vst [vmem:[#allocation19_spill] sm:$0xff] %v7527_v38  ;;  %v2999_v58 = vpop.f32.mrb[25].mxu0  ;;  %v5488_v62 = vadd.f32 %v2293_v57, %v7311_v46  ;;  %3925 = vadd.xlane.f32.xlu1 %v3924_v37  ;;  %v2295_v2 = vpop.f32.mrb[26].mxu1  ;;  %v3792_v18 = vmul.f32 %v7527_v38, %v7527_v38  ;;  %v3927_v49 = vadd.f32 %v3790_v53, %v3789_v45  ;;  %v3284_v57 = vld [vmem:[%s6799_s14 + $0xe0] sm:$0xff] }
 0x2d8   : > { %v3001_v63 = vpop.f32.mrb[26].mxu0  ;;  %3543 = vadd.xlane.f32.xlu0 %v3542_v43  ;;  %v5487_v4 = vadd.f32 %v5486_v55, %v2997_v40  ;;  %v5490_v7 = vadd.f32 %v2295_v2, %v7307_v36  ;;  %v2297_v10 = vpop.f32.mrb[27].mxu1  ;;  %v3545_v26 = vadd.f32 %v7527_v38, %v7525_v52  ;;  %v3285_v2 = vld [vmem:[%s6799_s14 + $0xe8] sm:$0xff] }
 0x2d9   : > { %v3003_v16 = vpop.f32.mrb[27].mxu0  ;;  %v5489_v21 = vadd.f32 %v5488_v62, %v2999_v58  ;;  %v5492_v24 = vadd.f32 %v2297_v10, %v7311_v46  ;;  %v3930_v48 = vadd.f32 %v3792_v18, %v3791_v17  ;;  %v3286_v18 = vld [vmem:[%s6799_s14 + $0xf0] sm:$0xff]  ;;  %v3349_v52 = vld [vmem:[%s6799_s14 + $0x2e8] sm:$0xff] }
 0x2da   : > { %v7548_v30 = vadd.f32 %v5487_v4, %v3280_v61  ;;  %v5491_v42 = vadd.f32 %v5490_v7, %v3001_v63 }
 0x2db   : > { %v7551_v31 = vadd.f32 %v5489_v21, %v3281_v5  ;;  %v5493_v32 = vadd.f32 %v5492_v24, %v3003_v16  ;;  %3546 = vadd.xlane.f32.xlu1 %v3545_v26 }
 0x2dc   : > { %9759 = vst [vmem:[#allocation20_spill] sm:$0xff] %v7548_v30  ;;  %3928 = vadd.xlane.f32.xlu0 %v3927_v49  ;;  %v7553_v33 = vadd.f32 %v5491_v42, %v3282_v23  ;;  %v3793_v40 = vmul.f32 %v7548_v30, %v7548_v30  ;;  %v3287_v42 = vld [vmem:[%s6799_s14 + $0xf8] sm:$0xff] }
 0x2dd   : > { %9760 = vst [vmem:[#allocation21_spill] sm:$0xff] %v7551_v31  ;;  %v7555_v51 = vadd.f32 %v5493_v32, %v3283_v50  ;;  %v2301_v44 = vpop.f32.mrb[28].mxu1  ;;  %v3548_v39 = vadd.f32 %v7551_v31, %v7548_v30  ;;  %v3794_v43 = vmul.f32 %v7551_v31, %v7551_v31 }
 0x2de   : > { %9761 = vst [vmem:[#allocation22_spill] sm:$0xff] %v7553_v33  ;;  %v3007_v37 = vpop.f32.mrb[28].mxu0  ;;  %v5494_v45 = vadd.f32 %v2301_v44, %v7307_v36  ;;  %v2303_v53 = vpop.f32.mrb[29].mxu1  ;;  %v3795_v10 = vmul.f32 %v7553_v33, %v7553_v33 }
 0x2df   : > { %9762 = vst [vmem:[#allocation23_spill] sm:$0xff] %v7555_v51  ;;  %v3009_v55 = vpop.f32.mrb[29].mxu0  ;;  %v5496_v58 = vadd.f32 %v2303_v53, %v7311_v46  ;;  %3931 = vadd.xlane.f32.xlu1 %v3930_v48  ;;  %v2305_v62 = vpop.f32.mrb[30].mxu1  ;;  %v3796_v16 = vmul.f32 %v7555_v51, %v7555_v51  ;;  %v3933_v23 = vadd.f32 %v3794_v43, %v3793_v40 }
 0x2e0   : > { %v3011_v61 = vpop.f32.mrb[30].mxu0  ;;  %3549 = vadd.xlane.f32.xlu0 %v3548_v39  ;;  %v5495_v63 = vadd.f32 %v5494_v45, %v3007_v37  ;;  %v5498_v4 = vadd.f32 %v2305_v62, %v7307_v36  ;;  %v2307_v5 = vpop.f32.mrb[31].mxu1  ;;  %v3551_v24 = vadd.f32 %v7555_v51, %v7553_v33 }
 0x2e1   : > { %v3013_v7 = vpop.f32.mrb[31].mxu0  ;;  %v5497_v17 = vadd.f32 %v5496_v58, %v3009_v55  ;;  %v5500_v21 = vadd.f32 %v2307_v5, %v7311_v46  ;;  %v3936_v44 = vadd.f32 %v3796_v16, %v3795_v10  ;;  %v3289_v5 = vld [vmem:[%s6799_s14 + $0x108] sm:$0xff] }
 0x2e2   : > { %v7576_v49 = vadd.f32 %v5495_v63, %v3284_v57  ;;  %v5499_v26 = vadd.f32 %v5498_v4, %v3011_v61  ;;  %v3288_v61 = vld [vmem:[%s6799_s14 + $0x100] sm:$0xff] }
 0x2e3   : > { %v7579_v50 = vadd.f32 %v5497_v17, %v3285_v2  ;;  %v5501_v32 = vadd.f32 %v5500_v21, %v3013_v7  ;;  %3552 = vadd.xlane.f32.xlu1 %v3551_v24 }
 0x2e4   : > { %9763 = vst [vmem:[#allocation24_spill] sm:$0xff] %v7576_v49  ;;  %3934 = vadd.xlane.f32.xlu0 %v3933_v23  ;;  %v7581_v48 = vadd.f32 %v5499_v26, %v3286_v18  ;;  %v3797_v45 = vmul.f32 %v7576_v49, %v7576_v49  ;;  %v3290_v23 = vld [vmem:[%s6799_s14 + $0x110] sm:$0xff] }
 0x2e5   : > { %9764 = vst [vmem:[#allocation25_spill] sm:$0xff] %v7579_v50  ;;  %v7583_v37 = vadd.f32 %v5501_v32, %v3287_v42  ;;  %v2311_v39 = vpop.f32.mrb[32].mxu1  ;;  %v3554_v43 = vadd.f32 %v7579_v50, %v7576_v49  ;;  %v3798_v53 = vmul.f32 %v7579_v50, %v7579_v50  ;;  %v3338_v49 = vld [vmem:[%s6799_s14 + $0x290] sm:$0xff] }
 0x2e6   : > { %9765 = vst [vmem:[#allocation26_spill] sm:$0xff] %v7581_v48  ;;  %v3017_v40 = vpop.f32.mrb[32].mxu0  ;;  %v5502_v55 = vadd.f32 %v2311_v39, %v7307_v36  ;;  %v2313_v57 = vpop.f32.mrb[33].mxu1  ;;  %v3799_v17 = vmul.f32 %v7581_v48, %v7581_v48  ;;  %v3291_v39 = vld [vmem:[%s6799_s14 + $0x118] sm:$0xff] }
 0x2e7   : > { %9766 = vst [vmem:[#allocation27_spill] sm:$0xff] %v7583_v37  ;;  %v3019_v58 = vpop.f32.mrb[33].mxu0  ;;  %v5504_v62 = vadd.f32 %v2313_v57, %v7311_v46  ;;  %3937 = vadd.xlane.f32.xlu1 %v3936_v44  ;;  %v2315_v2 = vpop.f32.mrb[34].mxu1  ;;  %v3800_v18 = vmul.f32 %v7583_v37, %v7583_v37  ;;  %v3939_v26 = vadd.f32 %v3798_v53, %v3797_v45 }
 0x2e8   : > { %v3021_v63 = vpop.f32.mrb[34].mxu0  ;;  %3555 = vadd.xlane.f32.xlu0 %v3554_v43  ;;  %v5503_v4 = vadd.f32 %v5502_v55, %v3017_v40  ;;  %v5506_v7 = vadd.f32 %v2315_v2, %v7307_v36  ;;  %v2317_v10 = vpop.f32.mrb[35].mxu1  ;;  %v3557_v42 = vadd.f32 %v7583_v37, %v7581_v48 }
 0x2e9   : > { %v3023_v16 = vpop.f32.mrb[35].mxu0  ;;  %v5505_v21 = vadd.f32 %v5504_v62, %v3019_v58  ;;  %v5508_v24 = vadd.f32 %v2317_v10, %v7311_v46  ;;  %v3942_v57 = vadd.f32 %v3800_v18, %v3799_v17 }
 0x2ea   : > { %v7604_v32 = vadd.f32 %v5503_v4, %v3288_v61  ;;  %v5507_v44 = vadd.f32 %v5506_v7, %v3021_v63  ;;  %v3292_v7 = vld [vmem:[%s6799_s14 + $0x120] sm:$0xff] }
 0x2eb   : > { %v7607_v40 = vadd.f32 %v5505_v21, %v3289_v5  ;;  %v5509_v43 = vadd.f32 %v5508_v24, %v3023_v16  ;;  %3558 = vadd.xlane.f32.xlu1 %v3557_v42  ;;  %v3293_v21 = vld [vmem:[%s6799_s14 + $0x128] sm:$0xff] }
 0x2ec   : > { %9767 = vst [vmem:[#allocation28_spill] sm:$0xff] %v7604_v32  ;;  %3940 = vadd.xlane.f32.xlu0 %v3939_v26  ;;  %v7609_v55 = vadd.f32 %v5507_v44, %v3290_v23  ;;  %v3801_v62 = vmul.f32 %v7604_v32, %v7604_v32 }
 0x2ed   : > { %9768 = vst [vmem:[#allocation29_spill] sm:$0xff] %v7607_v40  ;;  %v7611_v58 = vadd.f32 %v5509_v43, %v3291_v39  ;;  %v2321_v45 = vpop.f32.mrb[36].mxu1  ;;  %v3560_v61 = vadd.f32 %v7607_v40, %v7604_v32  ;;  %v3802_v63 = vmul.f32 %v7607_v40, %v7607_v40  ;;  %v3294_v43 = vld [vmem:[%s6799_s14 + $0x130] sm:$0xff] }
 0x2ee   : > { %9769 = vst [vmem:[#allocation30_spill] sm:$0xff] %v7609_v55  ;;  %v3027_v53 = vpop.f32.mrb[36].mxu0  ;;  %v5510_v2 = vadd.f32 %v2321_v45, %v7307_v36  ;;  %v2323_v4 = vpop.f32.mrb[37].mxu1  ;;  %v3803_v42 = vmul.f32 %v7609_v55, %v7609_v55 }
 0x2ef   : > { %9770 = vst [vmem:[#allocation31_spill] sm:$0xff] %v7611_v58  ;;  %v3029_v5 = vpop.f32.mrb[37].mxu0  ;;  %v5512_v10 = vadd.f32 %v2323_v4, %v7311_v46  ;;  %3943 = vadd.xlane.f32.xlu1 %v3942_v57  ;;  %v2325_v17 = vpop.f32.mrb[38].mxu1  ;;  %v3804_v44 = vmul.f32 %v7611_v58, %v7611_v58  ;;  %v3945_v57 = vadd.f32 %v3802_v63, %v3801_v62  ;;  %v3295_v4 = vld [vmem:[%s6799_s14 + $0x138] sm:$0xff] }
 0x2f0   : > { %v3031_v16 = vpop.f32.mrb[38].mxu0  ;;  %3561 = vadd.xlane.f32.xlu0 %v3560_v61  ;;  %v5511_v18 = vadd.f32 %v5510_v2, %v3027_v53  ;;  %v5514_v23 = vadd.f32 %v2325_v17, %v7307_v36  ;;  %v2327_v24 = vpop.f32.mrb[39].mxu1  ;;  %v3563_v61 = vadd.f32 %v7611_v58, %v7609_v55 }
 0x2f1   : > { %v3033_v26 = vpop.f32.mrb[39].mxu0  ;;  %v5513_v39 = vadd.f32 %v5512_v10, %v3029_v5  ;;  %v5516_v45 = vadd.f32 %v2327_v24, %v7311_v46  ;;  %v3948_v5 = vadd.f32 %v3804_v44, %v3803_v42 }
 0x2f2   : > { %v7632_v53 = vadd.f32 %v5511_v18, %v3292_v7  ;;  %v5515_v2 = vadd.f32 %v5514_v23, %v3031_v16 }
 0x2f3   : > { %v7635_v17 = vadd.f32 %v5513_v39, %v3293_v21  ;;  %v5517_v40 = vadd.f32 %v5516_v45, %v3033_v26  ;;  %3564 = vadd.xlane.f32.xlu1 %v3563_v61  ;;  %v3296_v26 = vld [vmem:[%s6799_s14 + $0x140] sm:$0xff] }
 0x2f4   : > { %9771 = vst [vmem:[#allocation32_spill] sm:$0xff] %v7632_v53  ;;  %3946 = vadd.xlane.f32.xlu0 %v3945_v57  ;;  %v7637_v32 = vadd.f32 %v5515_v2, %v3294_v43  ;;  %v3805_v16 = vmul.f32 %v7632_v53, %v7632_v53  ;;  %v3297_v43 = vld [vmem:[%s6799_s14 + $0x148] sm:$0xff] }
 0x2f5   : > { %9772 = vst [vmem:[#allocation33_spill] sm:$0xff] %v7635_v17  ;;  %v7639_v10 = vadd.f32 %v5517_v40, %v3295_v4  ;;  %v2331_v62 = vpop.f32.mrb[40].mxu1  ;;  %v3566_v7 = vadd.f32 %v7635_v17, %v7632_v53  ;;  %v3806_v18 = vmul.f32 %v7635_v17, %v7635_v17  ;;  %v3298_v17 = vld [vmem:[%s6799_s14 + $0x150] sm:$0xff] }
 0x2f6   : > { %9773 = vst [vmem:[#allocation34_spill] sm:$0xff] %v7637_v32  ;;  %v3037_v63 = vpop.f32.mrb[40].mxu0  ;;  %v5518_v21 = vadd.f32 %v2331_v62, %v7307_v36  ;;  %v2333_v23 = vpop.f32.mrb[41].mxu1  ;;  %v3807_v2 = vmul.f32 %v7637_v32, %v7637_v32 }
 0x2f7   : > { %9774 = vst [vmem:[#allocation35_spill] sm:$0xff] %v7639_v10  ;;  %v3039_v24 = vpop.f32.mrb[41].mxu0  ;;  %v5520_v40 = vadd.f32 %v2333_v23, %v7311_v46  ;;  %3949 = vadd.xlane.f32.xlu1 %v3948_v5  ;;  %v2335_v44 = vpop.f32.mrb[42].mxu1  ;;  %v3808_v4 = vmul.f32 %v7639_v10, %v7639_v10  ;;  %v3951_v5 = vadd.f32 %v3806_v18, %v3805_v16 }
 0x2f8   : > { %v3041_v42 = vpop.f32.mrb[42].mxu0  ;;  %3567 = vadd.xlane.f32.xlu0 %v3566_v7  ;;  %v5519_v39 = vadd.f32 %v5518_v21, %v3037_v63  ;;  %v5522_v45 = vadd.f32 %v2335_v44, %v7307_v36  ;;  %v2337_v57 = vpop.f32.mrb[43].mxu1  ;;  %v3569_v7 = vadd.f32 %v7639_v10, %v7637_v32  ;;  %v3299_v44 = vld [vmem:[%s6799_s14 + $0x158] sm:$0xff] }
 0x2f9   : > { %v3043_v61 = vpop.f32.mrb[43].mxu0  ;;  %v5521_v62 = vadd.f32 %v5520_v40, %v3039_v24  ;;  %v5524_v23 = vadd.f32 %v2337_v57, %v7311_v46  ;;  %v3954_v24 = vadd.f32 %v3808_v4, %v3807_v2  ;;  %v3300_v57 = vld [vmem:[%s6799_s14 + $0x160] sm:$0xff] }
 0x2fa   : > { %v7660_v63 = vadd.f32 %v5519_v39, %v3296_v26  ;;  %v5523_v21 = vadd.f32 %v5522_v45, %v3041_v42 }
 0x2fb   : > { %v7663_v53 = vadd.f32 %v5521_v62, %v3297_v43  ;;  %v5525_v58 = vadd.f32 %v5524_v23, %v3043_v61  ;;  %3570 = vadd.xlane.f32.xlu1 %v3569_v7  ;;  %v3301_v62 = vld [vmem:[%s6799_s14 + $0x168] sm:$0xff] }
 0x2fc   : > { %9775 = vst [vmem:[#allocation36_spill] sm:$0xff] %v7660_v63  ;;  %3952 = vadd.xlane.f32.xlu0 %v3951_v5  ;;  %v7665_v55 = vadd.f32 %v5523_v21, %v3298_v17  ;;  %v3809_v42 = vmul.f32 %v7660_v63, %v7660_v63 }
 0x2fd   : > { %9776 = vst [vmem:[#allocation37_spill] sm:$0xff] %v7663_v53  ;;  %v7667_v40 = vadd.f32 %v5525_v58, %v3299_v44  ;;  %v2341_v16 = vpop.f32.mrb[44].mxu1  ;;  %v3572_v26 = vadd.f32 %v7663_v53, %v7660_v63  ;;  %v3810_v39 = vmul.f32 %v7663_v53, %v7663_v53  ;;  %v3302_v53 = vld [vmem:[%s6799_s14 + $0x170] sm:$0xff] }
 0x2fe   : > { %9777 = vst [vmem:[#allocation38_spill] sm:$0xff] %v7665_v55  ;;  %v3047_v18 = vpop.f32.mrb[44].mxu0  ;;  %v5526_v43 = vadd.f32 %v2341_v16, %v7307_v36  ;;  %v2343_v45 = vpop.f32.mrb[45].mxu1  ;;  %v3811_v21 = vmul.f32 %v7665_v55, %v7665_v55 }
 0x2ff   : > { %9778 = vst [vmem:[#allocation39_spill] sm:$0xff] %v7667_v40  ;;  %v3049_v17 = vpop.f32.mrb[45].mxu0  ;;  %v5528_v58 = vadd.f32 %v2343_v45, %v7311_v46  ;;  %3955 = vadd.xlane.f32.xlu1 %v3954_v24  ;;  %v2345_v2 = vpop.f32.mrb[46].mxu1  ;;  %v3812_v44 = vmul.f32 %v7667_v40, %v7667_v40  ;;  %v3957_v24 = vadd.f32 %v3810_v39, %v3809_v42 }
 0x300   : > { %v3051_v61 = vpop.f32.mrb[46].mxu0  ;;  %3573 = vadd.xlane.f32.xlu0 %v3572_v26  ;;  %v5527_v4 = vadd.f32 %v5526_v43, %v3047_v18  ;;  %v5530_v23 = vadd.f32 %v2345_v2, %v7307_v36  ;;  %v2347_v5 = vpop.f32.mrb[47].mxu1  ;;  %v3575_v26 = vadd.f32 %v7667_v40, %v7665_v55  ;;  %v3303_v2 = vld [vmem:[%s6799_s14 + $0x178] sm:$0xff] }
 0x301   : > { %v3053_v7 = vpop.f32.mrb[47].mxu0  ;;  %v5529_v16 = vadd.f32 %v5528_v58, %v3049_v17  ;;  %v5532_v45 = vadd.f32 %v2347_v5, %v7311_v46  ;;  %v3960_v17 = vadd.f32 %v3812_v44, %v3811_v21  ;;  %v3304_v5 = vld [vmem:[%s6799_s14 + $0x180] sm:$0xff] }
 0x302   : > { %v7688_v18 = vadd.f32 %v5527_v4, %v3300_v57  ;;  %v5531_v43 = vadd.f32 %v5530_v23, %v3051_v61 }
 0x303   : > { %v7691_v63 = vadd.f32 %v5529_v16, %v3301_v62  ;;  %v5533_v10 = vadd.f32 %v5532_v45, %v3053_v7  ;;  %3576 = vadd.xlane.f32.xlu1 %v3575_v26  ;;  %v3305_v16 = vld [vmem:[%s6799_s14 + $0x188] sm:$0xff] }
 0x304   : > { %9779 = vst [vmem:[#allocation40_spill] sm:$0xff] %v7688_v18  ;;  %3958 = vadd.xlane.f32.xlu0 %v3957_v24  ;;  %v7693_v32 = vadd.f32 %v5531_v43, %v3302_v53  ;;  %v3813_v61 = vmul.f32 %v7688_v18, %v7688_v18 }
 0x305   : > { %9780 = vst [vmem:[#allocation41_spill] sm:$0xff] %v7691_v63  ;;  %v7695_v58 = vadd.f32 %v5533_v10, %v3303_v2  ;;  %v2351_v42 = vpop.f32.mrb[48].mxu1  ;;  %v3578_v57 = vadd.f32 %v7691_v63, %v7688_v18  ;;  %v3814_v4 = vmul.f32 %v7691_v63, %v7691_v63  ;;  %v3306_v63 = vld [vmem:[%s6799_s14 + $0x190] sm:$0xff] }
 0x306   : > { %9781 = vst [vmem:[#allocation42_spill] sm:$0xff] %v7693_v32  ;;  %v3057_v39 = vpop.f32.mrb[48].mxu0  ;;  %v5534_v62 = vadd.f32 %v2351_v42, %v7307_v36  ;;  %v2353_v23 = vpop.f32.mrb[49].mxu1  ;;  %v3815_v43 = vmul.f32 %v7693_v32, %v7693_v32 }
 0x307   : > { %9782 = vst [vmem:[#allocation43_spill] sm:$0xff] %v7695_v58  ;;  %v3059_v53 = vpop.f32.mrb[49].mxu0  ;;  %v5536_v10 = vadd.f32 %v2353_v23, %v7311_v46  ;;  %3961 = vadd.xlane.f32.xlu1 %v3960_v17  ;;  %v2355_v21 = vpop.f32.mrb[50].mxu1  ;;  %v3816_v2 = vmul.f32 %v7695_v58, %v7695_v58  ;;  %v3963_v17 = vadd.f32 %v3814_v4, %v3813_v61 }
 0x308   : > { %v3061_v7 = vpop.f32.mrb[50].mxu0  ;;  %3579 = vadd.xlane.f32.xlu0 %v3578_v57  ;;  %v5535_v44 = vadd.f32 %v5534_v62, %v3057_v39  ;;  %v5538_v45 = vadd.f32 %v2355_v21, %v7307_v36  ;;  %v2357_v24 = vpop.f32.mrb[51].mxu1  ;;  %v3581_v57 = vadd.f32 %v7695_v58, %v7693_v32  ;;  %v3307_v21 = vld [vmem:[%s6799_s14 + $0x198] sm:$0xff] }
 0x309   : > { %v3063_v26 = vpop.f32.mrb[51].mxu0  ;;  %v5537_v42 = vadd.f32 %v5536_v10, %v3059_v53  ;;  %v5540_v23 = vadd.f32 %v2357_v24, %v7311_v46  ;;  %v3966_v53 = vadd.f32 %v3816_v2, %v3815_v43  ;;  %v3308_v24 = vld [vmem:[%s6799_s14 + $0x1a0] sm:$0xff] }
 0x30a   : > { %v7716_v39 = vadd.f32 %v5535_v44, %v3304_v5  ;;  %v5539_v62 = vadd.f32 %v5538_v45, %v3061_v7 }
 0x30b   : > { %v7719_v18 = vadd.f32 %v5537_v42, %v3305_v16  ;;  %v5541_v40 = vadd.f32 %v5540_v23, %v3063_v26  ;;  %3582 = vadd.xlane.f32.xlu1 %v3581_v57  ;;  %v3309_v42 = vld [vmem:[%s6799_s14 + $0x1a8] sm:$0xff] }
 0x30c   : > { %9783 = vst [vmem:[#allocation44_spill] sm:$0xff] %v7716_v39  ;;  %3964 = vadd.xlane.f32.xlu0 %v3963_v17  ;;  %v7721_v55 = vadd.f32 %v5539_v62, %v3306_v63  ;;  %v3817_v7 = vmul.f32 %v7716_v39, %v7716_v39 }
 0x30d   : > { %9784 = vst [vmem:[#allocation45_spill] sm:$0xff] %v7719_v18  ;;  %v7723_v10 = vadd.f32 %v5541_v40, %v3307_v21  ;;  %v2361_v61 = vpop.f32.mrb[52].mxu1  ;;  %v3584_v5 = vadd.f32 %v7719_v18, %v7716_v39  ;;  %v3818_v44 = vmul.f32 %v7719_v18, %v7719_v18  ;;  %v3310_v18 = vld [vmem:[%s6799_s14 + $0x1b0] sm:$0xff] }
 0x30e   : > { %9785 = vst [vmem:[#allocation46_spill] sm:$0xff] %v7721_v55  ;;  %v3067_v4 = vpop.f32.mrb[52].mxu0  ;;  %v5542_v16 = vadd.f32 %v2361_v61, %v7307_v36  ;;  %v2363_v45 = vpop.f32.mrb[53].mxu1  ;;  %v3819_v62 = vmul.f32 %v7721_v55, %v7721_v55 }
 0x30f   : > { %9786 = vst [vmem:[#allocation47_spill] sm:$0xff] %v7723_v10  ;;  %v3069_v63 = vpop.f32.mrb[53].mxu0  ;;  %v5544_v40 = vadd.f32 %v2363_v45, %v7311_v46  ;;  %3967 = vadd.xlane.f32.xlu1 %v3966_v53  ;;  %v2365_v43 = vpop.f32.mrb[54].mxu1  ;;  %v3820_v21 = vmul.f32 %v7723_v10, %v7723_v10  ;;  %v3969_v53 = vadd.f32 %v3818_v44, %v3817_v7 }
 0x310   : > { %v3071_v26 = vpop.f32.mrb[54].mxu0  ;;  %3585 = vadd.xlane.f32.xlu0 %v3584_v5  ;;  %v5543_v2 = vadd.f32 %v5542_v16, %v3067_v4  ;;  %v5546_v23 = vadd.f32 %v2365_v43, %v7307_v36  ;;  %v2367_v17 = vpop.f32.mrb[55].mxu1  ;;  %v3587_v5 = vadd.f32 %v7723_v10, %v7721_v55  ;;  %v3311_v43 = vld [vmem:[%s6799_s14 + $0x1b8] sm:$0xff] }
 0x311   : > { %v3073_v57 = vpop.f32.mrb[55].mxu0  ;;  %v5545_v61 = vadd.f32 %v5544_v40, %v3069_v63  ;;  %v5548_v45 = vadd.f32 %v2367_v17, %v7311_v46  ;;  %v3972_v63 = vadd.f32 %v3820_v21, %v3819_v62  ;;  %v3312_v17 = vld [vmem:[%s6799_s14 + $0x1c0] sm:$0xff] }
 0x312   : > { %v7744_v4 = vadd.f32 %v5543_v2, %v3308_v24  ;;  %v5547_v16 = vadd.f32 %v5546_v23, %v3071_v26 }
 0x313   : > { %v7747_v39 = vadd.f32 %v5545_v61, %v3309_v42  ;;  %v5549_v58 = vadd.f32 %v5548_v45, %v3073_v57  ;;  %3588 = vadd.xlane.f32.xlu1 %v3587_v5  ;;  %v3313_v61 = vld [vmem:[%s6799_s14 + $0x1c8] sm:$0xff] }
 0x314   : > { %9787 = vst [vmem:[#allocation48_spill] sm:$0xff] %v7744_v4  ;;  %3970 = vadd.xlane.f32.xlu0 %v3969_v53  ;;  %v7749_v32 = vadd.f32 %v5547_v16, %v3310_v18  ;;  %v3821_v26 = vmul.f32 %v7744_v4, %v7744_v4 }
 0x315   : > { %9788 = vst [vmem:[#allocation49_spill] sm:$0xff] %v7747_v39  ;;  %v7751_v40 = vadd.f32 %v5549_v58, %v3311_v43  ;;  %v2371_v7 = vpop.f32.mrb[56].mxu1  ;;  %v3590_v24 = vadd.f32 %v7747_v39, %v7744_v4  ;;  %v3822_v2 = vmul.f32 %v7747_v39, %v7747_v39  ;;  %v3314_v39 = vld [vmem:[%s6799_s14 + $0x1d0] sm:$0xff] }
 0x316   : > { %9789 = vst [vmem:[#allocation50_spill] sm:$0xff] %v7749_v32  ;;  %v3077_v44 = vpop.f32.mrb[56].mxu0  ;;  %v5550_v42 = vadd.f32 %v2371_v7, %v7307_v36  ;;  %v2373_v23 = vpop.f32.mrb[57].mxu1  ;;  %v3823_v16 = vmul.f32 %v7749_v32, %v7749_v32 }
 0x317   : > { %9790 = vst [vmem:[#allocation51_spill] sm:$0xff] %v7751_v40  ;;  %v3079_v18 = vpop.f32.mrb[57].mxu0  ;;  %v5552_v58 = vadd.f32 %v2373_v23, %v7311_v46  ;;  %3973 = vadd.xlane.f32.xlu1 %v3972_v63  ;;  %v2375_v62 = vpop.f32.mrb[58].mxu1  ;;  %v3824_v43 = vmul.f32 %v7751_v40, %v7751_v40  ;;  %v3975_v63 = vadd.f32 %v3822_v2, %v3821_v26 }
 0x318   : > { %v3081_v57 = vpop.f32.mrb[58].mxu0  ;;  %3591 = vadd.xlane.f32.xlu0 %v3590_v24  ;;  %v5551_v21 = vadd.f32 %v5550_v42, %v3077_v44  ;;  %v5554_v45 = vadd.f32 %v2375_v62, %v7307_v36  ;;  %v2377_v53 = vpop.f32.mrb[59].mxu1  ;;  %v3593_v24 = vadd.f32 %v7751_v40, %v7749_v32  ;;  %v3315_v62 = vld [vmem:[%s6799_s14 + $0x1d8] sm:$0xff] }
 0x319   : > { %v3083_v5 = vpop.f32.mrb[59].mxu0  ;;  %v5553_v7 = vadd.f32 %v5552_v58, %v3079_v18  ;;  %v5556_v23 = vadd.f32 %v2377_v53, %v7311_v46  ;;  %v3978_v18 = vadd.f32 %v3824_v43, %v3823_v16  ;;  %v3316_v53 = vld [vmem:[%s6799_s14 + $0x1e0] sm:$0xff] }
 0x31a   : > { %v7772_v44 = vadd.f32 %v5551_v21, %v3312_v17  ;;  %v5555_v42 = vadd.f32 %v5554_v45, %v3081_v57 }
 0x31b   : > { %v7775_v4 = vadd.f32 %v5553_v7, %v3313_v61  ;;  %v5557_v10 = vadd.f32 %v5556_v23, %v3083_v5  ;;  %3594 = vadd.xlane.f32.xlu1 %v3593_v24  ;;  %v3317_v7 = vld [vmem:[%s6799_s14 + $0x1e8] sm:$0xff] }
 0x31c   : > { %9791 = vst [vmem:[#allocation52_spill] sm:$0xff] %v7772_v44  ;;  %3976 = vadd.xlane.f32.xlu0 %v3975_v63  ;;  %v7777_v55 = vadd.f32 %v5555_v42, %v3314_v39  ;;  %v3825_v57 = vmul.f32 %v7772_v44, %v7772_v44 }
 0x31d   : > { %9792 = vst [vmem:[#allocation53_spill] sm:$0xff] %v7775_v4  ;;  %v7779_v58 = vadd.f32 %v5557_v10, %v3315_v62  ;;  %v2381_v26 = vpop.f32.mrb[60].mxu1  ;;  %v3596_v17 = vadd.f32 %v7775_v4, %v7772_v44  ;;  %v3826_v21 = vmul.f32 %v7775_v4, %v7775_v4  ;;  %v3318_v4 = vld [vmem:[%s6799_s14 + $0x1f0] sm:$0xff] }
 0x31e   : > { %9793 = vst [vmem:[#allocation54_spill] sm:$0xff] %v7777_v55  ;;  %v3087_v2 = vpop.f32.mrb[60].mxu0  ;;  %v5558_v61 = vadd.f32 %v2381_v26, %v7307_v36  ;;  %v2383_v45 = vpop.f32.mrb[61].mxu1  ;;  %v3827_v42 = vmul.f32 %v7777_v55, %v7777_v55 }
 0x31f   : > { %9794 = vst [vmem:[#allocation55_spill] sm:$0xff] %v7779_v58  ;;  %v3089_v39 = vpop.f32.mrb[61].mxu0  ;;  %v5560_v10 = vadd.f32 %v2383_v45, %v7311_v46  ;;  %3979 = vadd.xlane.f32.xlu1 %v3978_v18  ;;  %v2385_v16 = vpop.f32.mrb[62].mxu1  ;;  %v3828_v62 = vmul.f32 %v7779_v58, %v7779_v58  ;;  %v3981_v18 = vadd.f32 %v3826_v21, %v3825_v57 }
 0x320   : > { %v3091_v5 = vpop.f32.mrb[62].mxu0  ;;  %3597 = vadd.xlane.f32.xlu0 %v3596_v17  ;;  %v5559_v43 = vadd.f32 %v5558_v61, %v3087_v2  ;;  %v5562_v23 = vadd.f32 %v2385_v16, %v7307_v36  ;;  %v2387_v63 = vpop.f32.mrb[63].mxu1  ;;  %v3599_v17 = vadd.f32 %v7779_v58, %v7777_v55  ;;  %v3319_v16 = vld [vmem:[%s6799_s14 + $0x1f8] sm:$0xff] }
 0x321   : > { %v3093_v24 = vpop.f32.mrb[63].mxu0  ;;  %v5561_v26 = vadd.f32 %v5560_v10, %v3089_v39  ;;  %v5564_v45 = vadd.f32 %v2387_v63, %v7311_v46  ;;  %v3984_v39 = vadd.f32 %v3828_v62, %v3827_v42  ;;  %v3320_v63 = vld [vmem:[%s6799_s14 + $0x200] sm:$0xff] }
 0x322   : > { %v7800_v2 = vadd.f32 %v5559_v43, %v3316_v53  ;;  %v5563_v61 = vadd.f32 %v5562_v23, %v3091_v5 }
 0x323   : > { %v7803_v44 = vadd.f32 %v5561_v26, %v3317_v7  ;;  %v5565_v40 = vadd.f32 %v5564_v45, %v3093_v24  ;;  %3600 = vadd.xlane.f32.xlu1 %v3599_v17  ;;  %v3321_v26 = vld [vmem:[%s6799_s14 + $0x208] sm:$0xff] }
 0x324   : > { %9795 = vst [vmem:[#allocation56_spill] sm:$0xff] %v7800_v2  ;;  %3982 = vadd.xlane.f32.xlu0 %v3981_v18  ;;  %v7805_v32 = vadd.f32 %v5563_v61, %v3318_v4  ;;  %v3829_v5 = vmul.f32 %v7800_v2, %v7800_v2 }
 0x325   : > { %9796 = vst [vmem:[#allocation57_spill] sm:$0xff] %v7803_v44  ;;  %v7807_v10 = vadd.f32 %v5565_v40, %v3319_v16  ;;  %v2391_v57 = vpop.f32.mrb[64].mxu1  ;;  %v3602_v53 = vadd.f32 %v7803_v44, %v7800_v2  ;;  %v3830_v43 = vmul.f32 %v7803_v44, %v7803_v44  ;;  %v3322_v44 = vld [vmem:[%s6799_s14 + $0x210] sm:$0xff] }
 0x326   : > { %9797 = vst [vmem:[#allocation58_spill] sm:$0xff] %v7805_v32  ;;  %v3097_v21 = vpop.f32.mrb[64].mxu0  ;;  %v5566_v7 = vadd.f32 %v2391_v57, %v7307_v36  ;;  %v2393_v23 = vpop.f32.mrb[65].mxu1  ;;  %v3831_v61 = vmul.f32 %v7805_v32, %v7805_v32 }
 0x327   : > { %9798 = vst [vmem:[#allocation59_spill] sm:$0xff] %v7807_v10  ;;  %v3099_v4 = vpop.f32.mrb[65].mxu0  ;;  %v5568_v40 = vadd.f32 %v2393_v23, %v7311_v46  ;;  %3985 = vadd.xlane.f32.xlu1 %v3984_v39  ;;  %v2395_v42 = vpop.f32.mrb[66].mxu1  ;;  %v3832_v16 = vmul.f32 %v7807_v10, %v7807_v10  ;;  %v3987_v39 = vadd.f32 %v3830_v43, %v3829_v5 }
 0x328   : > { %v3101_v24 = vpop.f32.mrb[66].mxu0  ;;  %3603 = vadd.xlane.f32.xlu0 %v3602_v53  ;;  %v5567_v62 = vadd.f32 %v5566_v7, %v3097_v21  ;;  %v5570_v45 = vadd.f32 %v2395_v42, %v7307_v36  ;;  %v2397_v18 = vpop.f32.mrb[67].mxu1  ;;  %v3605_v53 = vadd.f32 %v7807_v10, %v7805_v32  ;;  %v3323_v42 = vld [vmem:[%s6799_s14 + $0x218] sm:$0xff] }
 0x329   : > { %v3103_v17 = vpop.f32.mrb[67].mxu0  ;;  %v5569_v57 = vadd.f32 %v5568_v40, %v3099_v4  ;;  %v5572_v23 = vadd.f32 %v2397_v18, %v7311_v46  ;;  %v3990_v4 = vadd.f32 %v3832_v16, %v3831_v61  ;;  %v3324_v18 = vld [vmem:[%s6799_s14 + $0x220] sm:$0xff] }
 0x32a   : > { %v7828_v21 = vadd.f32 %v5567_v62, %v3320_v63  ;;  %v5571_v7 = vadd.f32 %v5570_v45, %v3101_v24 }
 0x32b   : > { %v7831_v2 = vadd.f32 %v5569_v57, %v3321_v26  ;;  %v5573_v58 = vadd.f32 %v5572_v23, %v3103_v17  ;;  %3606 = vadd.xlane.f32.xlu1 %v3605_v53  ;;  %v3325_v57 = vld [vmem:[%s6799_s14 + $0x228] sm:$0xff] }
 0x32c   : > { %9799 = vst [vmem:[#allocation60_spill] sm:$0xff] %v7828_v21  ;;  %3988 = vadd.xlane.f32.xlu0 %v3987_v39  ;;  %v7833_v55 = vadd.f32 %v5571_v7, %v3322_v44  ;;  %v3833_v24 = vmul.f32 %v7828_v21, %v7828_v21 }
 0x32d   : > { %9800 = vst [vmem:[#allocation61_spill] sm:$0xff] %v7831_v2  ;;  %v7835_v40 = vadd.f32 %v5573_v58, %v3323_v42  ;;  %v2401_v5 = vpop.f32.mrb[68].mxu1  ;;  %v3608_v63 = vadd.f32 %v7831_v2, %v7828_v21  ;;  %v3834_v62 = vmul.f32 %v7831_v2, %v7831_v2  ;;  %v3326_v2 = vld [vmem:[%s6799_s14 + $0x230] sm:$0xff] }
 0x32e   : > { %9801 = vst [vmem:[#allocation62_spill] sm:$0xff] %v7833_v55  ;;  %v3107_v43 = vpop.f32.mrb[68].mxu0  ;;  %v5574_v26 = vadd.f32 %v2401_v5, %v7307_v36  ;;  %v2403_v45 = vpop.f32.mrb[69].mxu1  ;;  %v3835_v7 = vmul.f32 %v7833_v55, %v7833_v55 }
 0x32f   : > { %9802 = vst [vmem:[#allocation63_spill] sm:$0xff] %v7835_v40  ;;  %v3109_v44 = vpop.f32.mrb[69].mxu0  ;;  %v5576_v58 = vadd.f32 %v2403_v45, %v7311_v46  ;;  %3991 = vadd.xlane.f32.xlu1 %v3990_v4  ;;  %v2405_v61 = vpop.f32.mrb[70].mxu1  ;;  %v3836_v42 = vmul.f32 %v7835_v40, %v7835_v40  ;;  %v3993_v4 = vadd.f32 %v3834_v62, %v3833_v24 }
 0x330   : > { %v3111_v17 = vpop.f32.mrb[70].mxu0  ;;  %3609 = vadd.xlane.f32.xlu0 %v3608_v63  ;;  %v5575_v16 = vadd.f32 %v5574_v26, %v3107_v43  ;;  %v5578_v23 = vadd.f32 %v2405_v61, %v7307_v36  ;;  %v2407_v39 = vpop.f32.mrb[71].mxu1  ;;  %v3611_v63 = vadd.f32 %v7835_v40, %v7833_v55  ;;  %v3327_v61 = vld [vmem:[%s6799_s14 + $0x238] sm:$0xff] }
 0x331   : > { %v3113_v53 = vpop.f32.mrb[71].mxu0  ;;  %v5577_v5 = vadd.f32 %v5576_v58, %v3109_v44  ;;  %v5580_v45 = vadd.f32 %v2407_v39, %v7311_v46  ;;  %v3996_v44 = vadd.f32 %v3836_v42, %v3835_v7  ;;  %v3328_v39 = vld [vmem:[%s6799_s14 + $0x240] sm:$0xff] }
 0x332   : > { %v7856_v43 = vadd.f32 %v5575_v16, %v3324_v18  ;;  %v5579_v26 = vadd.f32 %v5578_v23, %v3111_v17 }
 0x333   : > { %v7859_v21 = vadd.f32 %v5577_v5, %v3325_v57  ;;  %v5581_v10 = vadd.f32 %v5580_v45, %v3113_v53  ;;  %3612 = vadd.xlane.f32.xlu1 %v3611_v63  ;;  %v3329_v5 = vld [vmem:[%s6799_s14 + $0x248] sm:$0xff] }
 0x334   : > { %9803 = vst [vmem:[#allocation64_spill] sm:$0xff] %v7856_v43  ;;  %3994 = vadd.xlane.f32.xlu0 %v3993_v4  ;;  %v7861_v32 = vadd.f32 %v5579_v26, %v3326_v2  ;;  %v3837_v17 = vmul.f32 %v7856_v43, %v7856_v43 }
 0x335   : > { %9804 = vst [vmem:[#allocation65_spill] sm:$0xff] %v7859_v21  ;;  %v7863_v58 = vadd.f32 %v5581_v10, %v3327_v61  ;;  %v2411_v24 = vpop.f32.mrb[72].mxu1  ;;  %v3614_v18 = vadd.f32 %v7859_v21, %v7856_v43  ;;  %v3838_v16 = vmul.f32 %v7859_v21, %v7859_v21  ;;  %v3330_v21 = vld [vmem:[%s6799_s14 + $0x250] sm:$0xff] }
 0x336   : > { %9805 = vst [vmem:[#allocation66_spill] sm:$0xff] %v7861_v32  ;;  %v3117_v62 = vpop.f32.mrb[72].mxu0  ;;  %v5582_v57 = vadd.f32 %v2411_v24, %v7307_v36  ;;  %v2413_v23 = vpop.f32.mrb[73].mxu1  ;;  %v3839_v26 = vmul.f32 %v7861_v32, %v7861_v32 }
 0x337   : > { %9806 = vst [vmem:[#allocation67_spill] sm:$0xff] %v7863_v58  ;;  %v3119_v2 = vpop.f32.mrb[73].mxu0  ;;  %v5584_v10 = vadd.f32 %v2413_v23, %v7311_v46  ;;  %3997 = vadd.xlane.f32.xlu1 %v3996_v44  ;;  %v2415_v7 = vpop.f32.mrb[74].mxu1  ;;  %v3840_v61 = vmul.f32 %v7863_v58, %v7863_v58  ;;  %v3999_v44 = vadd.f32 %v3838_v16, %v3837_v17 }
 0x338   : > { %v3121_v53 = vpop.f32.mrb[74].mxu0  ;;  %3615 = vadd.xlane.f32.xlu0 %v3614_v18  ;;  %v5583_v42 = vadd.f32 %v5582_v57, %v3117_v62  ;;  %v5586_v45 = vadd.f32 %v2415_v7, %v7307_v36  ;;  %v2417_v4 = vpop.f32.mrb[75].mxu1  ;;  %v3617_v18 = vadd.f32 %v7863_v58, %v7861_v32  ;;  %v3331_v7 = vld [vmem:[%s6799_s14 + $0x258] sm:$0xff] }
 0x339   : > { %v3123_v63 = vpop.f32.mrb[75].mxu0  ;;  %v5585_v24 = vadd.f32 %v5584_v10, %v3119_v2  ;;  %v5588_v23 = vadd.f32 %v2417_v4, %v7311_v46  ;;  %v4002_v10 = vadd.f32 %v3840_v61, %v3839_v26 }
 0x33a   : > { %v7884_v62 = vadd.f32 %v5583_v42, %v3328_v39  ;;  %v5587_v57 = vadd.f32 %v5586_v45, %v3121_v53 }
 0x33b   : > { %v7887_v43 = vadd.f32 %v5585_v24, %v3329_v5  ;;  %v5589_v40 = vadd.f32 %v5588_v23, %v3123_v63  ;;  %3618 = vadd.xlane.f32.xlu1 %v3617_v18  ;;  %v3333_v23 = vld [vmem:[%s6799_s14 + $0x268] sm:$0xff] }
 0x33c   : > { %9807 = vst [vmem:[#allocation68_spill] sm:$0xff] %v7884_v62  ;;  %4000 = vadd.xlane.f32.xlu0 %v3999_v44  ;;  %v7889_v55 = vadd.f32 %v5587_v57, %v3330_v21  ;;  %v3514_v2 = vpop.xlane.xlu0 %3513  ;;  %v3841_v53 = vmul.f32 %v7884_v62, %v7884_v62 }
 0x33d   : > { %9808 = vst [vmem:[#allocation69_spill] sm:$0xff] %v7887_v43  ;;  %v7891_v37 = vadd.f32 %v5589_v40, %v3331_v7  ;;  %v2421_v17 = vpop.f32.mrb[76].mxu1  ;;  %v3620_v39 = vadd.f32 %v7887_v43, %v7884_v62  ;;  %v3842_v42 = vmul.f32 %v7887_v43, %v7887_v43  ;;  %v7900_v4 = vmul.f32 0.00390625, %v3514_v2  ;;  %v3332_v40 = vld [vmem:[%s6799_s14 + $0x260] sm:$0xff] }
 0x33e   : > { %9809 = vst [vmem:[#allocation70_spill] sm:$0xff] %v7889_v55  ;;  %v3127_v16 = vpop.f32.mrb[76].mxu0  ;;  %v5590_v5 = vadd.f32 %v2421_v17, %v7307_v36  ;;  %v2423_v21 = vpop.f32.mrb[77].mxu1  ;;  %v3843_v7 = vmul.f32 %v7889_v55, %v7889_v55 }
 0x33f   : > { %9810 = vst [vmem:[#allocation71_spill] sm:$0xff] %v7891_v37  ;;  %v3129_v45 = vpop.f32.mrb[77].mxu0  ;;  %v5592_v63 = vadd.f32 %v2423_v21, %v7311_v46  ;;  %4003 = vadd.xlane.f32.xlu1 %v4002_v10  ;;  %v2425_v61 = vpop.f32.mrb[78].mxu1  ;;  %v3844_v2 = vmul.f32 %v7891_v37, %v7891_v37  ;;  %v4005_v10 = vadd.f32 %v3842_v42, %v3841_v53 }
 0x340   : > { %v3131_v26 = vpop.f32.mrb[78].mxu0  ;;  %3621 = vadd.xlane.f32.xlu0 %v3620_v39  ;;  %v5591_v24 = vadd.f32 %v5590_v5, %v3127_v16  ;;  %v5594_v44 = vadd.f32 %v2425_v61, %v7307_v36  ;;  %v3902_v57 = vpop.xlane.xlu1 %3901  ;;  %v3623_v39 = vadd.f32 %v7891_v37, %v7889_v55  ;;  %v3334_v61 = vld [vmem:[%s6799_s14 + $0x270] sm:$0xff]  ;;  %v4153_v32 = vmul.f32 %v7900_v4, %v7900_v4 }
 0x341   : > { %v3133_v18 = vpop.f32.mrb[79].mxu0  ;;  %v5593_v17 = vadd.f32 %v5592_v63, %v3129_v45  ;;  %v3517_v21 = vpop.xlane.xlu0 %3516  ;;  %v4090_v45 = vmul.f32 0.00390625, %v3902_v57  ;;  %v3335_v63 = vld [vmem:[%s6799_s14 + $0x278] sm:$0xff] }
 0x342   : > { %v2427_v43 = vpop.f32.mrb[79].mxu1  ;;  %v7912_v16 = vadd.f32 %v5591_v24, %v3332_v40  ;;  %v5595_v5 = vadd.f32 %v5594_v44, %v3131_v26  ;;  %v7915_v62 = vmul.f32 0.00390625, %v3517_v21  ;;  %v4008_v26 = vadd.f32 %v3844_v2, %v3843_v7 }
 0x343   : > { %v5596_v58 = vadd.f32 %v2427_v43, %v7311_v46  ;;  %v7920_v48 = vadd.f32 %v5593_v17, %v3333_v23  ;;  %3624 = vadd.xlane.f32.xlu1 %v3623_v39 }
 0x344   : > { %9811 = vst [vmem:[#allocation72_spill] sm:$0xff] %v7912_v16  ;;  %4006 = vadd.xlane.f32.xlu0 %v4005_v10  ;;  %v4154_v53 = vmul.f32 %v7915_v62, %v7915_v62  ;;  %v3520_v40 = vpop.xlane.xlu1 %3519  ;;  %v3845_v24 = vmul.f32 %v7912_v16, %v7912_v16  ;;  %v7927_v43 = vadd.f32 %v5595_v5, %v3334_v61  ;;  %v3336_v61 = vld [vmem:[%s6799_s14 + $0x280] sm:$0xff] }
 0x345   : > { %9812 = vst [vmem:[#allocation73_spill] sm:$0xff] %v7920_v48  ;;  %v5597_v42 = vadd.f32 %v5596_v58, %v3133_v18  ;;  %v3899_v44 = vpop.xlane.xlu0 %3898  ;;  %v7929_v21 = vmul.f32 0.00390625, %v3520_v40  ;;  %v2431_v23 = vpop.f32.mrb[80].mxu1  ;;  %v3626_v57 = vadd.f32 %v7920_v48, %v7912_v16  ;;  %v3846_v17 = vmul.f32 %v7920_v48, %v7920_v48 }
 0x346   : > { %9813 = vst [vmem:[#allocation74_spill] sm:$0xff] %v7927_v43  ;;  %v4218_v10 = vsub.f32 %v4090_v45, %v4154_v53  ;;  %v4089_v18 = vmul.f32 0.00390625, %v3899_v44  ;;  %v5598_v7 = vadd.f32 %v2431_v23, %v7307_v36  ;;  %v3137_v2 = vpop.f32.mrb[80].mxu0  ;;  %v2433_v39 = vpop.f32.mrb[81].mxu1  ;;  %v3337_v44 = vld [vmem:[%s6799_s14 + $0x288] sm:$0xff] }
 0x347   : > { %v7935_v58 = vadd.f32 %v5597_v42, %v3335_v63  ;;  %v4155_v5 = vmul.f32 %v7929_v21, %v7929_v21  ;;  %v5600_v40 = vadd.f32 %v2433_v39, %v7311_v46  ;;  %v3139_v16 = vpop.f32.mrb[81].mxu0  ;;  %4009 = vadd.xlane.f32.xlu1 %v4008_v26  ;;  %v2435_v48 = vpop.f32.mrb[82].mxu1  ;;  %v4011_v45 = vadd.f32 %v3846_v17, %v3845_v24 }
 0x348   : > { %3627 = vadd.xlane.f32.xlu0 %v3626_v57  ;;  %v4282_v63 = vadd.f32 1e-12, %v4218_v10  ;;  %v4217_v53 = vsub.f32 %v4089_v18, %v4153_v32  ;;  %v5599_v42 = vadd.f32 %v5598_v7, %v3137_v2  ;;  %v3141_v37 = vpop.f32.mrb[82].mxu0  ;;  %v5602_v23 = vadd.f32 %v2435_v48, %v7307_v36  ;;  %v3523_v55 = vpop.xlane.xlu1 %3522  ;;  %v3339_v2 = vld [vmem:[%s6799_s14 + $0x298] sm:$0xff] }
 0x349   : > { %9814 = vst [vmem:[#allocation75_spill] sm:$0xff] %v7935_v58  ;;  %v5601_v50 = vadd.f32 %v5600_v40, %v3139_v16  ;;  %v3143_v51 = vpop.f32.mrb[83].mxu0  ;;  %v3905_v33 = vpop.xlane.xlu0 %3904  ;;  %v7945_v31 = vmul.f32 0.00390625, %v3523_v55  ;;  %v3629_v26 = vadd.f32 %v7935_v58, %v7927_v43  ;;  %v3847_v24 = vmul.f32 %v7927_v43, %v7927_v43 }
 0x34a   : > { %6222 = vrsqrt.f32 %v4282_v63  ;;  %v4281_v32 = vadd.f32 1e-12, %v4217_v53  ;;  %v7951_v57 = vadd.f32 %v5599_v42, %v3336_v61  ;;  %v5603_v17 = vadd.f32 %v5602_v23, %v3141_v37  ;;  %v2437_v48 = vpop.f32.mrb[83].mxu1 }
 0x34b   : > { %v7953_v10 = vadd.f32 %v5601_v50, %v3337_v44  ;;  %v4091_v16 = vmul.f32 0.00390625, %v3905_v33  ;;  %v4156_v55 = vmul.f32 %v7945_v31, %v7945_v31  ;;  %v5604_v18 = vadd.f32 %v2437_v48, %v7311_v46  ;;  %3630 = vadd.xlane.f32.xlu1 %v3629_v26  ;;  %v3340_v48 = vld [vmem:[%s6799_s14 + $0x2a0] sm:$0xff] }
 0x34c   : > { %9815 = vst [vmem:[#allocation76_spill] sm:$0xff] %v7951_v57  ;;  %4012 = vadd.xlane.f32.xlu0 %v4011_v45  ;;  %6224 = vrsqrt.f32 %v4281_v32  ;;  %v7958_v7 = vadd.f32 %v5603_v17, %v3338_v49  ;;  %v3908_v39 = vpop.xlane.xlu1 %3907  ;;  %v3848_v61 = vmul.f32 %v7935_v58, %v7935_v58  ;;  %v3849_v50 = vmul.f32 %v7951_v57, %v7951_v57 }
 0x34d   : > { %9816 = vst [vmem:[#allocation77_spill] sm:$0xff] %v7953_v10  ;;  %v4219_v33 = vsub.f32 %v4091_v16, %v4155_v5  ;;  %v5605_v37 = vadd.f32 %v5604_v18, %v3143_v51  ;;  %v4092_v40 = vmul.f32 0.00390625, %v3908_v39  ;;  %v3526_v63 = vpop.xlane.xlu0 %3525  ;;  %v2441_v53 = vpop.f32.mrb[84].mxu1  ;;  %v3632_v45 = vadd.f32 %v7953_v10, %v7951_v57  ;;  %v3341_v57 = vld [vmem:[%s6799_s14 + $0x2a8] sm:$0xff] }
 0x34e   : > { %9817 = vst [vmem:[#allocation78_spill] sm:$0xff] %v7958_v7  ;;  %v7967_v42 = vmul.f32 0.00390625, %v3526_v63  ;;  %v5606_v49 = vadd.f32 %v2441_v53, %v7307_v36  ;;  %v3147_v44 = vpop.f32.mrb[84].mxu0  ;;  %v2443_v23 = vpop.f32.mrb[85].mxu1  ;;  %v4014_v26 = vadd.f32 %v3848_v61, %v3847_v24  ;;  %v3850_v32 = vmul.f32 %v7953_v10, %v7953_v10 }
 0x34f   : > { %v4283_v17 = vadd.f32 1e-12, %v4219_v33  ;;  %v7972_v5 = vadd.f32 %v5605_v37, %v3339_v2  ;;  %v4220_v51 = vsub.f32 %v4092_v40, %v4156_v55  ;;  %v5608_v16 = vadd.f32 %v2443_v23, %v7311_v46  ;;  %v3149_v18 = vpop.f32.mrb[85].mxu0  ;;  %v2445_v39 = vpop.f32.mrb[86].mxu1  ;;  %v3342_v40 = vld [vmem:[%s6799_s14 + $0x2b0] sm:$0xff] }
 0x350   : > { %3633 = vadd.xlane.f32.xlu0 %v3632_v45  ;;  %v4157_v63 = vmul.f32 %v7967_v42, %v7967_v42  ;;  %v5607_v53 = vadd.f32 %v5606_v49, %v3147_v44  ;;  %v3151_v24 = vpop.f32.mrb[86].mxu0  ;;  %4015 = vadd.xlane.f32.xlu1 %v4014_v26  ;;  %v5610_v61 = vadd.f32 %v2445_v39, %v7307_v36  ;;  %v3529_v33 = vpop.xlane.xlu1 %3528 }
 0x351   : > { %9818 = vst [vmem:[#allocation79_spill] sm:$0xff] %v7972_v5  ;;  %v4017_v2 = vadd.f32 %v3850_v32, %v3849_v50  ;;  %6226 = vrsqrt.f32 %v4283_v17  ;;  %v4284_v55 = vadd.f32 1e-12, %v4220_v51  ;;  %v5609_v37 = vadd.f32 %v5608_v16, %v3149_v18  ;;  %v3153_v10 = vpop.f32.mrb[87].mxu0  ;;  %v3911_v23 = vpop.xlane.xlu0 %3910 }
 0x352   : > { %v7981_v58 = vmul.f32 0.00390625, %v3529_v33  ;;  %v7983_v45 = vadd.f32 %v5607_v53, %v3340_v48  ;;  %v5611_v43 = vadd.f32 %v5610_v61, %v3151_v24  ;;  %v4093_v30 = vmul.f32 0.00390625, %v3911_v23  ;;  %v2447_v49 = vpop.f32.mrb[87].mxu1  ;;  %v3343_v33 = vld [vmem:[%s6799_s14 + $0x2b8] sm:$0xff] }
 0x353   : > { %v3635_v44 = vadd.f32 %v7972_v5, %v7958_v7  ;;  %6228 = vrsqrt.f32 %v4284_v55  ;;  %v7987_v26 = vadd.f32 %v5609_v37, %v3341_v57  ;;  %v5612_v32 = vadd.f32 %v2447_v49, %v7311_v46 }
 0x354   : > { %9819 = vst [vmem:[#allocation80_spill] sm:$0xff] %v7983_v45  ;;  %v4158_v50 = vmul.f32 %v7981_v58, %v7981_v58  ;;  %4018 = vadd.xlane.f32.xlu0 %v4017_v2  ;;  %v6223_v17 = vpop.eup %6222  ;;  %v7992_v51 = vadd.f32 %v5611_v43, %v3342_v40  ;;  %v4221_v48 = vsub.f32 %v4093_v30, %v4157_v63  ;;  %v3914_v16 = vpop.xlane.xlu1 %3913 }
 0x355   : > { %9820 = vst [vmem:[#allocation81_spill] sm:$0xff] %v7987_v26  ;;  %3636 = vadd.xlane.f32.xlu1 %v3635_v44  ;;  %v3851_v18 = vmul.f32 %v7958_v7, %v7958_v7  ;;  %v3852_v39 = vmul.f32 %v7972_v5, %v7972_v5  ;;  %v4411_v57 = vmul.f32 %v6223_v17, %v7336_v25  ;;  %v3532_v2 = vpop.xlane.xlu0 %3531  ;;  %v2451_v43 = vpop.f32.mrb[88].mxu1  ;;  %v4094_v63 = vmul.f32 0.00390625, %v3914_v16 }
 0x356   : > { %9821 = vst [vmem:[#allocation82_spill] sm:$0xff] %v7992_v51  ;;  %v4412_v53 = vmul.f32 %v6223_v17, %v7341_v29  ;;  %v4538_v24 = vmul.f32 %v6223_v17, %v7915_v62  ;;  %v5613_v61 = vadd.f32 %v5612_v32, %v3153_v10  ;;  %v6225_v55 = vpop.eup %6224  ;;  %v4285_v30 = vadd.f32 1e-12, %v4221_v48  ;;  %v3157_v23 = vpop.f32.mrb[88].mxu0 }
 0x357   : > { %v8002_v37 = vmul.f32 0.00390625, %v3532_v2  ;;  %v5614_v40 = vadd.f32 %v2451_v43, %v7307_v36  ;;  %v2453_v49 = vpop.f32.mrb[89].mxu1  ;;  %v4409_v29 = vmul.f32 %v6225_v55, %v7326_v15  ;;  %v4410_v62 = vmul.f32 %v6225_v55, %v7331_v20  ;;  %v3159_v10 = vpop.f32.mrb[89].mxu0  ;;  %v3344_v2 = vld [vmem:[%s6799_s14 + $0x2c0] sm:$0xff] }
 0x358   : > { %v4603_v44 = vsub.f32 %v4411_v57, %v4538_v24  ;;  %v4604_v25 = vsub.f32 %v4412_v53, %v4538_v24  ;;  %v2455_v32 = vpop.f32.mrb[90].mxu1  ;;  %v4537_v17 = vmul.f32 %v6225_v55, %v7900_v4  ;;  %6230 = vrsqrt.f32 %v4285_v30  ;;  %v8011_v5 = vpop.f32.mrb[90].mxu0 }
 0x359   : > { %v8008_v48 = vadd.f32 %v5613_v61, %v3343_v33  ;;  %v4222_v16 = vsub.f32 %v4094_v63, %v4158_v50  ;;  %v3535_v43 = vpop.xlane.xlu1 %3534  ;;  %v8017_v15 = vmul.f32 %v8002_v37, %v8002_v37  ;;  %v5615_v20 = vadd.f32 %v5614_v40, %v3157_v23  ;;  %v3163_v53 = vpop.f32.mrb[91].mxu0 }
 0x35a   : > { %v4749_v7 = vmul.f32 %v7457_v12, %v4603_v44  ;;  %v4750_v57 = vmul.f32 %v7467_v22, %v4604_v25  ;;  %v3917_v4 = vpop.xlane.xlu0 %3916  ;;  %v4601_v24 = vsub.f32 %v4409_v29, %v4537_v17  ;;  %v4602_v61 = vsub.f32 %v4410_v62, %v4537_v17  ;;  %v2457_v55 = vpop.f32.mrb[91].mxu1  ;;  %v3345_v17 = vld [vmem:[%s6799_s14 + $0x2c8] sm:$0xff] }
 0x35b   : > { %9822 = vst [vmem:[#allocation83_spill] sm:$0xff] %v8008_v48  ;;  %v4286_v50 = vadd.f32 1e-12, %v4222_v16  ;;  %v5616_v33 = vadd.f32 %v2453_v49, %v7311_v46  ;;  %v6227_v30 = vpop.eup %6226  ;;  %v8022_v25 = vadd.f32 %v5615_v20, %v3344_v2  ;;  %v4020_v38 = vadd.f32 %v3852_v39, %v3851_v18 }
 0x35c   : > { %v4895_v63 = vadd.f32 %v7474_v27, %v4749_v7  ;;  %v4896_v44 = vadd.f32 %v7478_v28, %v4750_v57  ;;  %v4747_v40 = vmul.f32 %v7457_v12, %v4601_v24  ;;  %v4748_v23 = vmul.f32 %v7467_v22, %v4602_v61 }
 0x35d   : > { %9823 = vst [vmem:[#allocation84_spill] sm:$0xff] %v8022_v25  ;;  %v4413_v29 = vmul.f32 %v6227_v30, %v7362_v3  ;;  %v4414_v62 = vmul.f32 %v6227_v30, %v7367_v8  ;;  %v8029_v16 = vpop.xlane.xlu1 %3919  ;;  %v6229_v49 = vpop.eup %6228  ;;  %v4539_v7 = vmul.f32 %v6227_v30, %v7929_v21  ;;  %6232 = vrsqrt.f32 %v4286_v50  ;;  %4021 = vadd.xlane.f32.xlu1 %v4020_v38 }
 0x35e   : > { %5023 = vst [vmem:[%s8033_s26 + $0x10] sm:$0xff] %v4895_v63  ;;  %5024 = vst [vmem:[%s8033_s26 + $0x18] sm:$0xff] %v4896_v44  ;;  %v5617_v18 = vadd.f32 %v5616_v33, %v3159_v10  ;;  %v3638_v3 = vadd.f32 %v7987_v26, %v7983_v45  ;;  %v8040_v8 = vpop.xlane.xlu0 %3537  ;;  %v8042_v39 = vpop.f32.mrb[92].mxu1  ;;  %v4893_v2 = vadd.f32 %v7474_v27, %v4747_v40  ;;  %v8062_v44 = vmul.f32 0.00390625, %v3535_v43 }
 0x35f   : > { %v4894_v57 = vadd.f32 %v7478_v28, %v4748_v23  ;;  %v4415_v20 = vmul.f32 %v6229_v49, %v7372_v13  ;;  %v4416_v21 = vmul.f32 %v6229_v49, %v7377_v19  ;;  %v8048_v24 = vpop.f32.mrb[92].mxu0  ;;  %v8050_v38 = vpop.f32.mrb[93].mxu1  ;;  %v4605_v10 = vsub.f32 %v4413_v29, %v4539_v7 }
 0x360   : > { %v4606_v61 = vsub.f32 %v4414_v62, %v4539_v7  ;;  %v4540_v50 = vmul.f32 %v6229_v49, %v7945_v31  ;;  %v8053_v33 = vadd.f32 %v5617_v18, %v3345_v17  ;;  %3639 = vadd.xlane.f32.xlu0 %v3638_v3  ;;  %v8055_v30 = vpop.f32.mrb[93].mxu0  ;;  %v8057_v63 = vpop.f32.mrb[94].mxu1  ;;  %5021 = vst [vmem:[%s8033_s26] sm:$0xff] %v4893_v2  ;;  %v4095_v19 = vmul.f32 0.00390625, %v3917_v4  ;;  %v3346_v7 = vld [vmem:[%s6799_s14 + $0x2d0] sm:$0xff] }
 0x361   : > { %5022 = vst [vmem:[%s8033_s26 + $0x8] sm:$0xff] %v4894_v57  ;;  %v5618_v13 = vadd.f32 %v2455_v32, %v7307_v36  ;;  %v5620_v40 = vadd.f32 %v2457_v55, %v7311_v46  ;;  %v8065_v23 = vpop.f32.mrb[94].mxu0  ;;  %v8067_v31 = vpop.xlane.xlu1 %3540  ;;  %v4751_v29 = vmul.f32 %v7457_v12, %v4605_v10  ;;  %v4160_v3 = vmul.f32 %v8062_v44, %v8062_v44  ;;  %v3347_v57 = vld [vmem:[%s6799_s14 + $0x2d8] sm:$0xff] }
 0x362   : > { %9824 = vst [vmem:[#allocation85_spill] sm:$0xff] %v8053_v33  ;;  %v4752_v62 = vmul.f32 %v7467_v22, %v4606_v61  ;;  %v4607_v17 = vsub.f32 %v4415_v20, %v4540_v50  ;;  %v4608_v49 = vsub.f32 %v4416_v21, %v4540_v50  ;;  %v8072_v18 = vpop.f32.mrb[95].mxu0  ;;  %v8074_v32 = vpop.xlane.xlu0 %3922  ;;  %v4223_v55 = vsub.f32 %v4095_v19, %v8017_v15 }
 0x363   : > { %v6231_v43 = vpop.eup %6230  ;;  %v5619_v4 = vadd.f32 %v5618_v13, %v8011_v5  ;;  %v5621_v2 = vadd.f32 %v5620_v40, %v3163_v53  ;;  %v8081_v10 = vpop.f32.mrb[95].mxu1  ;;  %v4897_v20 = vadd.f32 %v7474_v27, %v4751_v29  ;;  %v3855_v35 = vmul.f32 %v7992_v51, %v7992_v51 }
 0x364   : > { %v4898_v21 = vadd.f32 %v7478_v28, %v4752_v62  ;;  %v4753_v61 = vmul.f32 %v7457_v12, %v4607_v17  ;;  %v4754_v50 = vmul.f32 %v7467_v22, %v4608_v49  ;;  %v4417_v5 = vmul.f32 %v6231_v43, %v7398_v60 }
 0x365   : > { %v4418_v13 = vmul.f32 %v6231_v43, %v7402_v0  ;;  %v4541_v15 = vmul.f32 %v6231_v43, %v7967_v42  ;;  %v8090_v19 = vadd.f32 %v5619_v4, %v3346_v7  ;;  %v8092_v53 = vpop.xlane.xlu1 %3925  ;;  %5025 = vst [vmem:[%s8033_s26 + $0x20] sm:$0xff] %v4897_v20  ;;  %v4287_v62 = vadd.f32 1e-12, %v4223_v55  ;;  %v8102_v0 = vpop.f32.mrb[96].mxu1 }
 0x366   : > { %5026 = vst [vmem:[%s8033_s26 + $0x28] sm:$0xff] %v4898_v21  ;;  %v4899_v40 = vadd.f32 %v7474_v27, %v4753_v61  ;;  %v4900_v29 = vadd.f32 %v7478_v28, %v4754_v50  ;;  %v8098_v17 = vadd.f32 %v5621_v2, %v3347_v57  ;;  %v8100_v60 = vpop.xlane.xlu0 %3543  ;;  %v3853_v7 = vmul.f32 %v7983_v45, %v7983_v45  ;;  %v8108_v4 = vpop.f32.mrb[96].mxu0 }
 0x367   : > { %9825 = vst [vmem:[#allocation86_spill] sm:$0xff] %v8090_v19  ;;  %v4609_v42 = vsub.f32 %v4417_v5, %v4541_v15  ;;  %v4610_v49 = vsub.f32 %v4418_v13, %v4541_v15  ;;  %v3854_v43 = vmul.f32 %v7987_v26, %v7987_v26  ;;  %v8110_v20 = vpop.f32.mrb[97].mxu1  ;;  %v6233_v21 = vpop.eup %6232  ;;  %6234 = vrsqrt.f32 %v4287_v62 }
 0x368   : > { %9826 = vst [vmem:[#allocation87_spill] sm:$0xff] %v8098_v17  ;;  %5027 = vst [vmem:[%s8033_s26 + $0x30] sm:$0xff] %v4899_v40  ;;  %v3641_v55 = vadd.f32 %v8008_v48, %v7992_v51  ;;  %v4096_v2 = vmul.f32 0.00390625, %v8029_v16  ;;  %v8118_v57 = vmul.f32 0.00390625, %v8040_v8  ;;  %v8120_v61 = vpop.f32.mrb[97].mxu0  ;;  %v8122_v50 = vpop.f32.mrb[98].mxu1  ;;  %v4419_v15 = vmul.f32 %v6233_v21, %v7407_v6 }
 0x369   : > { %5028 = vst [vmem:[%s8033_s26 + $0x38] sm:$0xff] %v4900_v29  ;;  %v4755_v5 = vmul.f32 %v7457_v12, %v4609_v42  ;;  %v4756_v13 = vmul.f32 %v7467_v22, %v4610_v49  ;;  %v4420_v40 = vmul.f32 %v6233_v21, %v7411_v11  ;;  %v8128_v29 = vpop.f32.mrb[98].mxu0  ;;  %v8130_v62 = vpop.xlane.xlu1 %3546  ;;  %v4542_v16 = vmul.f32 %v6233_v21, %v7981_v58 }
 0x36a   : > { %v4023_v8 = vadd.f32 %v3854_v43, %v3853_v7  ;;  %3642 = vadd.xlane.f32.xlu1 %v3641_v55  ;;  %v4224_v26 = vsub.f32 %v4096_v2, %v4160_v3  ;;  %v4161_v42 = vmul.f32 %v8118_v57, %v8118_v57  ;;  %v8135_v49 = vpop.f32.mrb[99].mxu0  ;;  %v8137_v6 = vpop.xlane.xlu0 %3928  ;;  %v5622_v58 = vadd.f32 %v8042_v39, %v7307_v36  ;;  %v3348_v2 = vld [vmem:[%s6799_s14 + $0x2e0] sm:$0xff] }
 0x36b   : > { %v4901_v11 = vadd.f32 %v7474_v27, %v4755_v5  ;;  %v4902_v45 = vadd.f32 %v7478_v28, %v4756_v13  ;;  %v5624_v7 = vadd.f32 %v8050_v38, %v7311_v46  ;;  %v8145_v3 = vpop.f32.mrb[99].mxu1  ;;  %v4611_v43 = vsub.f32 %v4419_v15, %v4542_v16 }
 0x36c   : > { %v4612_v21 = vsub.f32 %v4420_v40, %v4542_v16  ;;  %4024 = vadd.xlane.f32.xlu0 %v4023_v8  ;;  %v4288_v55 = vadd.f32 1e-12, %v4224_v26  ;;  %v5623_v5 = vadd.f32 %v5622_v58, %v8048_v24  ;;  %v3856_v38 = vmul.f32 %v8008_v48, %v8008_v48  ;;  %v3350_v58 = vld [vmem:[%s6799_s14 + $0x2f0] sm:$0xff] }
 0x36d   : > { %5029 = vst [vmem:[%s8033_s26 + $0x40] sm:$0xff] %v4901_v11  ;;  %5030 = vst [vmem:[%s8033_s26 + $0x48] sm:$0xff] %v4902_v45  ;;  %v5625_v39 = vadd.f32 %v5624_v7, %v8055_v30  ;;  %v3644_v13 = vadd.f32 %v8053_v33, %v8022_v25  ;;  %v8159_v15 = vpop.xlane.xlu1 %3931  ;;  %v4757_v26 = vmul.f32 %v7457_v12, %v4611_v43  ;;  %v8167_v24 = vpop.f32.mrb[100].mxu1  ;;  %v4097_v7 = vmul.f32 0.00390625, %v8074_v32 }
 0x36e   : > { %v4758_v40 = vmul.f32 %v7467_v22, %v4612_v21  ;;  %6236 = vrsqrt.f32 %v4288_v55  ;;  %v5626_v45 = vadd.f32 %v8057_v63, %v7307_v36  ;;  %v8165_v16 = vpop.xlane.xlu0 %3549  ;;  %v8169_v30 = vadd.f32 %v5623_v5, %v3348_v2  ;;  %v8175_v48 = vpop.f32.mrb[100].mxu0 }
 0x36f   : > { %v8171_v8 = vadd.f32 %v5625_v39, %v3349_v52  ;;  %v4026_v11 = vadd.f32 %v3856_v38, %v3855_v35  ;;  %v8177_v43 = vpop.f32.mrb[101].mxu1  ;;  %v4903_v21 = vadd.f32 %v7474_v27, %v4757_v26  ;;  %v8183_v52 = vmul.f32 0.00390625, %v8067_v31  ;;  %v8185_v35 = vpop.f32.mrb[101].mxu0 }
 0x370   : > { %9827 = vst [vmem:[#allocation88_spill] sm:$0xff] %v8169_v30  ;;  %v4904_v63 = vadd.f32 %v7478_v28, %v4758_v40  ;;  %3645 = vadd.xlane.f32.xlu0 %v3644_v13  ;;  %v5627_v55 = vadd.f32 %v5626_v45, %v8065_v23  ;;  %v8187_v2 = vpop.f32.mrb[102].mxu1  ;;  %v4225_v32 = vsub.f32 %v4097_v7, %v4161_v42  ;;  %v8195_v23 = vpop.f32.mrb[102].mxu0  ;;  %v4098_v40 = vmul.f32 0.00390625, %v8092_v53 }
 0x371   : > { %9828 = vst [vmem:[#allocation89_spill] sm:$0xff] %v8171_v8  ;;  %4027 = vadd.xlane.f32.xlu1 %v4026_v11  ;;  %v5628_v5 = vadd.f32 %v8081_v10, %v7311_v46  ;;  %v3857_v39 = vmul.f32 %v8022_v25, %v8022_v25  ;;  %v3858_v38 = vmul.f32 %v8053_v33, %v8053_v33  ;;  %9829 = vst [vmem:[#allocation90_spill] sm:$0xff] %v8195_v23  ;;  %v8197_v31 = vpop.xlane.xlu1 %3552  ;;  %v6235_v13 = vpop.eup %6234 }
 0x372   : > { %5031 = vst [vmem:[%s8033_s26 + $0x50] sm:$0xff] %v4903_v21  ;;  %5032 = vst [vmem:[%s8033_s26 + $0x58] sm:$0xff] %v4904_v63  ;;  %v8201_v26 = vadd.f32 %v5627_v55, %v3350_v58  ;;  %v4162_v42 = vmul.f32 %v8183_v52, %v8183_v52  ;;  %v3647_v10 = vadd.f32 %v8098_v17, %v8090_v19  ;;  %v8208_v45 = vpop.f32.mrb[103].mxu0  ;;  %v8210_v11 = vpop.xlane.xlu0 %3934  ;;  %v4289_v58 = vadd.f32 1e-12, %v4225_v32  ;;  %v3351_v63 = vld [vmem:[%s6799_s14 + $0x2f8] sm:$0xff] }
 0x373   : > { %9831 = vst [vmem:[#allocation92_spill] sm:$0xff] %v8208_v45  ;;  %v4421_v7 = vmul.f32 %v6235_v13, %v7440_v59  ;;  %v4422_v33 = vmul.f32 %v6235_v13, %v7445_v1  ;;  %v4543_v21 = vmul.f32 %v6235_v13, %v8002_v37  ;;  %v8216_v55 = vpop.f32.mrb[103].mxu1  ;;  %v5629_v25 = vadd.f32 %v5628_v5, %v8072_v18  ;;  %v3353_v13 = vld [vmem:[%s6799_s14 + $0x308] sm:$0xff] }
 0x374   : > { %9830 = vst [vmem:[#allocation91_spill] sm:$0xff] %v8201_v26  ;;  %v4029_v51 = vadd.f32 %v3858_v38, %v3857_v39  ;;  %v4226_v34 = vsub.f32 %v4098_v40, %v4162_v42  ;;  %v8220_v53 = vmul.f32 0.00390625, %v8100_v60  ;;  %6238 = vrsqrt.f32 %v4289_v58 }
 0x375   : > { %v4613_v45 = vsub.f32 %v4421_v7, %v4543_v21  ;;  %v4614_v23 = vsub.f32 %v4422_v33, %v4543_v21  ;;  %3648 = vadd.xlane.f32.xlu1 %v3647_v10  ;;  %v5630_v59 = vadd.f32 %v8102_v0, %v7307_v36  ;;  %v8224_v1 = vpop.xlane.xlu1 %3937  ;;  %v8226_v37 = vadd.f32 %v5629_v25, %v3351_v63  ;;  %v8234_v33 = vpop.f32.mrb[104].mxu1  ;;  %v3352_v25 = vld [vmem:[%s6799_s14 + $0x300] sm:$0xff] }
 0x376   : > { %4030 = vadd.xlane.f32.xlu0 %v4029_v51  ;;  %v4290_v18 = vadd.f32 1e-12, %v4226_v34  ;;  %v4163_v32 = vmul.f32 %v8220_v53, %v8220_v53  ;;  %v5632_v60 = vadd.f32 %v8110_v20, %v7311_v46  ;;  %v8232_v5 = vpop.xlane.xlu0 %3555  ;;  %v3859_v34 = vmul.f32 %v8090_v19, %v8090_v19  ;;  %v8243_v51 = vpop.f32.mrb[104].mxu0 }
 0x377   : > { %9832 = vst [vmem:[#allocation93_spill] sm:$0xff] %v8226_v37  ;;  %v4759_v39 = vmul.f32 %v7457_v12, %v4613_v45  ;;  %v4760_v0 = vmul.f32 %v7467_v22, %v4614_v23  ;;  %v5631_v38 = vadd.f32 %v5630_v59, %v8108_v4  ;;  %v8245_v42 = vpop.f32.mrb[105].mxu1  ;;  %v3860_v40 = vmul.f32 %v8098_v17, %v8098_v17  ;;  %v8252_v4 = vpop.f32.mrb[105].mxu0 }
 0x378   : > { %v6237_v20 = vpop.eup %6236  ;;  %6240 = vrsqrt.f32 %v4290_v18  ;;  %v5633_v10 = vadd.f32 %v5632_v60, %v8120_v61  ;;  %v3650_v23 = vadd.f32 %v8171_v8, %v8169_v30  ;;  %v8254_v45 = vpop.f32.mrb[106].mxu1 }
 0x379   : > { %v4905_v7 = vadd.f32 %v7474_v27, %v4759_v39  ;;  %v4906_v21 = vadd.f32 %v7478_v28, %v4760_v0  ;;  %v4423_v58 = vmul.f32 %v6237_v20, %v7449_v9  ;;  %v4424_v61 = vmul.f32 %v6237_v20, %v7459_v14  ;;  %v8260_v63 = vpop.f32.mrb[106].mxu0  ;;  %v8262_v59 = vpop.xlane.xlu1 %3558 }
 0x37a   : > { %v4544_v18 = vmul.f32 %v6237_v20, %v8062_v44  ;;  %v8265_v60 = vadd.f32 %v5631_v38, %v3352_v25  ;;  %v8267_v17 = vadd.f32 %v5633_v10, %v3353_v13  ;;  %v4032_v19 = vadd.f32 %v3860_v40, %v3859_v34  ;;  %3651 = vadd.xlane.f32.xlu0 %v3650_v23  ;;  %v8269_v39 = vpop.f32.mrb[107].mxu0  ;;  %v8271_v0 = vpop.xlane.xlu0 %3940  ;;  %v3354_v20 = vld [vmem:[%s6799_s14 + $0x310] sm:$0xff]  ;;  %v3355_v10 = vld [vmem:[%s6799_s14 + $0x318] sm:$0xff] }
 0x37b   : > { %5033 = vst [vmem:[%s8033_s26 + $0x60] sm:$0xff] %v4905_v7  ;;  %5034 = vst [vmem:[%s8033_s26 + $0x68] sm:$0xff] %v4906_v21  ;;  %v5634_v9 = vadd.f32 %v8122_v50, %v7307_v36  ;;  %v4099_v14 = vmul.f32 0.00390625, %v8137_v6  ;;  %v8279_v44 = vmul.f32 0.00390625, %v8130_v62  ;;  %v5636_v38 = vadd.f32 %v8145_v3, %v7311_v46  ;;  %v8283_v25 = vpop.f32.mrb[107].mxu1 }
 0x37c   : > { %9833 = vst [vmem:[#allocation94_spill] sm:$0xff] %v8265_v60  ;;  %9834 = vst [vmem:[#allocation95_spill] sm:$0xff] %v8267_v17  ;;  %v4615_v13 = vsub.f32 %v4423_v58, %v4544_v18  ;;  %v4616_v34 = vsub.f32 %v4424_v61, %v4544_v18  ;;  %4033 = vadd.xlane.f32.xlu1 %v4032_v19  ;;  %v3861_v40 = vmul.f32 %v8169_v30, %v8169_v30 }
 0x37d   : > { %v3862_v50 = vmul.f32 %v8171_v8, %v8171_v8  ;;  %v5635_v6 = vadd.f32 %v5634_v9, %v8128_v29  ;;  %v4227_v62 = vsub.f32 %v4099_v14, %v4163_v32  ;;  %v4164_v23 = vmul.f32 %v8279_v44, %v8279_v44  ;;  %v8295_v7 = vpop.xlane.xlu1 %3943  ;;  %v8303_v8 = vpop.f32.mrb[108].mxu1 }
 0x37e   : > { %v5637_v3 = vadd.f32 %v5636_v38, %v8135_v49  ;;  %v4761_v19 = vmul.f32 %v7457_v12, %v4615_v13  ;;  %v4762_v21 = vmul.f32 %v7467_v22, %v4616_v34  ;;  %v3653_v61 = vadd.f32 %v8226_v37, %v8201_v26  ;;  %v8301_v18 = vpop.xlane.xlu0 %3561  ;;  %v6239_v29 = vpop.eup %6238 }
 0x37f   : > { %v4035_v58 = vadd.f32 %v3862_v50, %v3861_v40  ;;  %v8305_v32 = vadd.f32 %v5635_v6, %v3354_v20  ;;  %v4291_v9 = vadd.f32 1e-12, %v4227_v62  ;;  %v4100_v49 = vmul.f32 0.00390625, %v8159_v15  ;;  %v8310_v38 = vpop.f32.mrb[108].mxu0  ;;  %v8312_v13 = vpop.f32.mrb[109].mxu1 }
 0x380   : > { %v8307_v14 = vadd.f32 %v5637_v3, %v3355_v10  ;;  %v4907_v34 = vadd.f32 %v7474_v27, %v4761_v19  ;;  %v4908_v40 = vadd.f32 %v7478_v28, %v4762_v21  ;;  %v4425_v50 = vmul.f32 %v6239_v29, %v7492_v41  ;;  %v8318_v6 = vpop.f32.mrb[109].mxu0  ;;  %v8320_v10 = vpop.f32.mrb[110].mxu1  ;;  %3654 = vadd.xlane.f32.xlu1 %v3653_v61 }
 0x381   : > { %9835 = vst [vmem:[#allocation96_spill] sm:$0xff] %v8305_v32  ;;  %v4426_v20 = vmul.f32 %v6239_v29, %v7495_v47  ;;  %4036 = vadd.xlane.f32.xlu0 %v4035_v58  ;;  %v4545_v15 = vmul.f32 %v6239_v29, %v8118_v57  ;;  %6242 = vrsqrt.f32 %v4291_v9  ;;  %v4228_v62 = vsub.f32 %v4100_v49, %v4164_v23  ;;  %v8326_v19 = vpop.f32.mrb[110].mxu0  ;;  %v8328_v21 = vpop.xlane.xlu1 %3564 }
 0x382   : > { %9836 = vst [vmem:[#allocation97_spill] sm:$0xff] %v8307_v14  ;;  %v8324_v3 = vmul.f32 0.00390625, %v8165_v16  ;;  %9837 = vst [vmem:[#allocation98_spill] sm:$0xff] %v8326_v19  ;;  %v6241_v41 = vpop.eup %6240  ;;  %v5638_v47 = vadd.f32 %v8167_v24, %v7307_v36  ;;  %v5640_v57 = vadd.f32 %v8177_v43, %v7311_v46  ;;  %v3863_v23 = vmul.f32 %v8201_v26, %v8201_v26  ;;  %v8340_v58 = vpop.f32.mrb[111].mxu0 }
 0x383   : > { %5035 = vst [vmem:[%s8033_s26 + $0x70] sm:$0xff] %v4907_v34  ;;  %5036 = vst [vmem:[%s8033_s26 + $0x78] sm:$0xff] %v4908_v40  ;;  %v3864_v16 = vmul.f32 %v8226_v37, %v8226_v37  ;;  %v8342_v61 = vpop.xlane.xlu0 %3946  ;;  %v4617_v29 = vsub.f32 %v4425_v50, %v4545_v15  ;;  %v4618_v9 = vsub.f32 %v4426_v20, %v4545_v15  ;;  %v3356_v34 = vld [vmem:[%s6799_s14 + $0x320] sm:$0xff]  ;;  %v8347_v40 = vpop.f32.mrb[111].mxu1  ;;  %v4292_v30 = vadd.f32 1e-12, %v4228_v62 }
 0x384   : > { %9838 = vst [vmem:[#allocation99_spill] sm:$0xff] %v8340_v58  ;;  %v4427_v49 = vmul.f32 %v6241_v41, %v7497_v54  ;;  %v4428_v24 = vmul.f32 %v6241_v41, %v7499_v56  ;;  %9839 = vst [vmem:[#allocation100_spill] sm:$0xff] %v8347_v40  ;;  %v4546_v43 = vmul.f32 %v6241_v41, %v8183_v52  ;;  %v3357_v58 = vld [vmem:[%s6799_s14 + $0x328] sm:$0xff] }
 0x385   : > { %v4165_v26 = vmul.f32 %v8324_v3, %v8324_v3  ;;  %v5639_v37 = vadd.f32 %v5638_v47, %v8175_v48  ;;  %v4763_v19 = vmul.f32 %v7457_v12, %v4617_v29  ;;  %v4764_v50 = vmul.f32 %v7467_v22, %v4618_v9  ;;  %v8357_v56 = vpop.xlane.xlu1 %3949  ;;  %v8363_v48 = vpop.f32.mrb[112].mxu1 }
 0x386   : > { %v5641_v54 = vadd.f32 %v5640_v57, %v8185_v35  ;;  %v4038_v20 = vadd.f32 %v3864_v16, %v3863_v23  ;;  %v4619_v15 = vsub.f32 %v4427_v49, %v4546_v43  ;;  %v4620_v40 = vsub.f32 %v4428_v24, %v4546_v43  ;;  %v3358_v49 = vld [vmem:[%s6799_s14 + $0x330] sm:$0xff] }
 0x387   : > { %6244 = vrsqrt.f32 %v4292_v30  ;;  %v8359_v52 = vadd.f32 %v5639_v37, %v3356_v34  ;;  %v8361_v62 = vpop.xlane.xlu0 %3567  ;;  %v4909_v41 = vadd.f32 %v7474_v27, %v4763_v19  ;;  %v4910_v47 = vadd.f32 %v7478_v28, %v4764_v50  ;;  %v8371_v30 = vpop.f32.mrb[112].mxu0 }
 0x388   : > { %v8367_v35 = vadd.f32 %v5641_v54, %v3357_v58  ;;  %4039 = vadd.xlane.f32.xlu1 %v4038_v20  ;;  %v3656_v57 = vadd.f32 %v8267_v17, %v8265_v60  ;;  %v8373_v37 = vpop.f32.mrb[113].mxu1  ;;  %v4765_v23 = vmul.f32 %v7457_v12, %v4619_v15  ;;  %v4766_v16 = vmul.f32 %v7467_v22, %v4620_v40  ;;  %v8380_v9 = vpop.f32.mrb[113].mxu0  ;;  %v9846_v54 = vld [vmem:[#allocation90_spill] sm:$0xff] }
 0x389   : > { %9840 = vst [vmem:[#allocation101_spill] sm:$0xff] %v8359_v52  ;;  %v5642_v19 = vadd.f32 %v8187_v2, %v7307_v36  ;;  %v4101_v29 = vmul.f32 0.00390625, %v8210_v11  ;;  %9842 = vst [vmem:[#allocation103_spill] sm:$0xff] %v8380_v9  ;;  %v8382_v58 = vpop.f32.mrb[114].mxu1  ;;  %v8388_v24 = vmul.f32 0.00390625, %v8197_v31  ;;  %v5644_v34 = vadd.f32 %v8216_v55, %v7311_v46  ;;  %v8396_v40 = vpop.f32.mrb[114].mxu0 }
 0x38a   : > { %9841 = vst [vmem:[#allocation102_spill] sm:$0xff] %v8367_v35  ;;  %9843 = vst [vmem:[#allocation104_spill] sm:$0xff] %v8382_v58  ;;  %3657 = vadd.xlane.f32.xlu0 %v3656_v57  ;;  %v3865_v2 = vmul.f32 %v8265_v60, %v8265_v60  ;;  %v3866_v11 = vmul.f32 %v8267_v17, %v8267_v17  ;;  %v8398_v43 = vpop.xlane.xlu1 %3570  ;;  %v4911_v50 = vadd.f32 %v7474_v27, %v4765_v23  ;;  %v3359_v55 = vld [vmem:[%s6799_s14 + $0x338] sm:$0xff]  ;;  %v9849_v60 = vld [vmem:[#allocation92_spill] sm:$0xff] }
 0x38b   : > { %5037 = vst [vmem:[%s8033_s26 + $0x80] sm:$0xff] %v4909_v41  ;;  %5038 = vst [vmem:[%s8033_s26 + $0x88] sm:$0xff] %v4910_v47  ;;  %v4912_v31 = vadd.f32 %v7478_v28, %v4766_v16  ;;  %v5643_v20 = vadd.f32 %v5642_v19, %v9846_v54  ;;  %v4229_v15 = vsub.f32 %v4101_v29, %v4165_v26  ;;  %v8404_v41 = vpop.f32.mrb[115].mxu0  ;;  %v8406_v47 = vpop.xlane.xlu0 %3952  ;;  %v9850_v26 = vld [vmem:[#allocation16_spill] sm:$0xff]  ;;  %v9851_v19 = vld [vmem:[#allocation17_spill] sm:$0xff] }
 0x38c   : > { %9844 = vst [vmem:[#allocation105_spill] sm:$0xff] %v8396_v40  ;;  %9845 = vst [vmem:[#allocation106_spill] sm:$0xff] %v8398_v43  ;;  %v6243_v57 = vpop.eup %6242  ;;  %v4166_v17 = vmul.f32 %v8388_v24, %v8388_v24  ;;  %v5645_v40 = vadd.f32 %v5644_v34, %v9849_v60  ;;  %v4041_v58 = vadd.f32 %v3866_v11, %v3865_v2  ;;  %v8413_v43 = vpop.f32.mrb[115].mxu1  ;;  %v4102_v60 = vmul.f32 0.00390625, %v8224_v1 }
 0x38d   : > { %9847 = vst [vmem:[#allocation90_spill] sm:$0xff] %v8404_v41  ;;  %9848 = vst [vmem:[#allocation107_spill] sm:$0xff] %v8406_v47  ;;  %v3659_v23 = vadd.f32 %v8307_v14, %v8305_v32  ;;  %v4429_v16 = vmul.f32 %v6243_v57, %v9850_v26  ;;  %v4430_v29 = vmul.f32 %v6243_v57, %v9851_v19  ;;  %v4293_v47 = vadd.f32 1e-12, %v4229_v15  ;;  %v9855_v19 = vld [vmem:[#allocation18_spill] sm:$0xff] }
 0x38e   : > { %5039 = vst [vmem:[%s8033_s26 + $0x90] sm:$0xff] %v4911_v50  ;;  %5040 = vst [vmem:[%s8033_s26 + $0x98] sm:$0xff] %v4912_v31  ;;  %v4547_v54 = vmul.f32 %v6243_v57, %v8220_v53  ;;  %v8420_v41 = vadd.f32 %v5643_v20, %v3358_v49  ;;  %v8422_v9 = vadd.f32 %v5645_v40, %v3359_v55  ;;  %4042 = vadd.xlane.f32.xlu0 %v4041_v58  ;;  %v8428_v2 = vpop.xlane.xlu1 %3955  ;;  %v8436_v31 = vpop.f32.mrb[116].mxu1  ;;  %v3361_v20 = vld [vmem:[%s6799_s14 + $0x348] sm:$0xff] }
 0x38f   : > { %3660 = vadd.xlane.f32.xlu1 %v3659_v23  ;;  %v8426_v34 = vmul.f32 0.00390625, %v8232_v5  ;;  %v5646_v53 = vadd.f32 %v8234_v33, %v7307_v36  ;;  %v5648_v49 = vadd.f32 %v8245_v42, %v7311_v46  ;;  %v8434_v40 = vpop.xlane.xlu0 %3573  ;;  %6246 = vrsqrt.f32 %v4293_v47  ;;  %v3360_v5 = vld [vmem:[%s6799_s14 + $0x340] sm:$0xff]  ;;  %v8444_v55 = vpop.f32.mrb[116].mxu0 }
 0x390   : > { %9852 = vst [vmem:[#allocation92_spill] sm:$0xff] %v8420_v41  ;;  %9853 = vst [vmem:[#allocation16_spill] sm:$0xff] %v8422_v9  ;;  %v4621_v11 = vsub.f32 %v4429_v16, %v4547_v54  ;;  %v4622_v50 = vsub.f32 %v4430_v29, %v4547_v54  ;;  %v4230_v58 = vsub.f32 %v4102_v60, %v4166_v17  ;;  %v8446_v33 = vpop.f32.mrb[117].mxu1  ;;  %v8452_v26 = vpop.f32.mrb[117].mxu0  ;;  %v9856_v54 = vld [vmem:[#allocation19_spill] sm:$0xff] }
 0x391   : > { %v4167_v1 = vmul.f32 %v8426_v34, %v8426_v34  ;;  %v3867_v15 = vmul.f32 %v8305_v32, %v8305_v32  ;;  %9854 = vst [vmem:[#allocation17_spill] sm:$0xff] %v8444_v55  ;;  %v6245_v57 = vpop.eup %6244  ;;  %v5647_v47 = vadd.f32 %v5646_v53, %v8243_v51  ;;  %v5649_v17 = vadd.f32 %v5648_v49, %v8252_v4  ;;  %v8454_v16 = vpop.f32.mrb[118].mxu1 }
 0x392   : > { %v4767_v42 = vmul.f32 %v7457_v12, %v4621_v11  ;;  %v4768_v23 = vmul.f32 %v7467_v22, %v4622_v50  ;;  %v4431_v29 = vmul.f32 %v6245_v57, %v9855_v19  ;;  %v4432_v60 = vmul.f32 %v6245_v57, %v9856_v54  ;;  %v8459_v11 = vpop.f32.mrb[118].mxu0  ;;  %v8461_v50 = vpop.xlane.xlu1 %3576 }
 0x393   : > { %v4548_v32 = vmul.f32 %v6245_v57, %v8279_v44  ;;  %v4294_v55 = vadd.f32 1e-12, %v4230_v58  ;;  %9857 = vst [vmem:[#allocation18_spill] sm:$0xff] %v8461_v50  ;;  %v8465_v53 = vadd.f32 %v5647_v47, %v3360_v5  ;;  %v8467_v49 = vadd.f32 %v5649_v17, %v3361_v20  ;;  %v8469_v19 = vpop.f32.mrb[119].mxu0  ;;  %v8471_v54 = vpop.xlane.xlu0 %3958  ;;  %v3362_v17 = vld [vmem:[%s6799_s14 + $0x350] sm:$0xff] }
 0x394   : > { %v4913_v51 = vadd.f32 %v7474_v27, %v4767_v42  ;;  %v4914_v4 = vadd.f32 %v7478_v28, %v4768_v23  ;;  %v3868_v58 = vmul.f32 %v8307_v14, %v8307_v14  ;;  %v8475_v50 = vpop.f32.mrb[119].mxu1  ;;  %v3662_v5 = vadd.f32 %v8367_v35, %v8359_v52  ;;  %v9865_v14 = vld [vmem:[#allocation20_spill] sm:$0xff] }
 0x395   : > { %9858 = vst [vmem:[#allocation19_spill] sm:$0xff] %v8465_v53  ;;  %9859 = vst [vmem:[#allocation108_spill] sm:$0xff] %v8467_v49  ;;  %v4623_v44 = vsub.f32 %v4431_v29, %v4548_v32  ;;  %v4624_v57 = vsub.f32 %v4432_v60, %v4548_v32  ;;  %6248 = vrsqrt.f32 %v4294_v55  ;;  %v5650_v20 = vadd.f32 %v8254_v45, %v7307_v36 }
 0x396   : > { %5041 = vst [vmem:[%s8033_s26 + $0xa0] sm:$0xff] %v4913_v51  ;;  %5042 = vst [vmem:[%s8033_s26 + $0xa8] sm:$0xff] %v4914_v4  ;;  %v4103_v42 = vmul.f32 0.00390625, %v8271_v0  ;;  %v8485_v23 = vmul.f32 0.00390625, %v8262_v59  ;;  %v4044_v47 = vadd.f32 %v3868_v58, %v3867_v15  ;;  %v5652_v29 = vadd.f32 %v8283_v25, %v7311_v46  ;;  %v8492_v60 = vpop.xlane.xlu1 %3961  ;;  %3663 = vadd.xlane.f32.xlu0 %v3662_v5  ;;  %v3363_v59 = vld [vmem:[%s6799_s14 + $0x358] sm:$0xff]  ;;  %v8502_v15 = vpop.f32.mrb[120].mxu1 }
 0x397   : > { %v4769_v32 = vmul.f32 %v7457_v12, %v4623_v44  ;;  %v4770_v55 = vmul.f32 %v7467_v22, %v4624_v57  ;;  %v5651_v51 = vadd.f32 %v5650_v20, %v8260_v63  ;;  %v3869_v4 = vmul.f32 %v8359_v52, %v8359_v52  ;;  %v8500_v44 = vpop.xlane.xlu0 %3579  ;;  %v8509_v58 = vpop.f32.mrb[120].mxu0 }
 0x398   : > { %v4231_v45 = vsub.f32 %v4103_v42, %v4167_v1  ;;  %v4168_v0 = vmul.f32 %v8485_v23, %v8485_v23  ;;  %4045 = vadd.xlane.f32.xlu1 %v4044_v47  ;;  %v5653_v63 = vadd.f32 %v5652_v29, %v8269_v39  ;;  %v3870_v1 = vmul.f32 %v8367_v35, %v8367_v35  ;;  %v8511_v5 = vpop.f32.mrb[121].mxu1 }
 0x399   : > { %v4915_v25 = vadd.f32 %v7474_v27, %v4769_v32  ;;  %v4916_v57 = vadd.f32 %v7478_v28, %v4770_v55  ;;  %9860 = vst [vmem:[#allocation109_spill] sm:$0xff] %v8509_v58  ;;  %v8513_v20 = vadd.f32 %v5651_v51, %v3362_v17  ;;  %v3665_v52 = vadd.f32 %v8422_v9, %v8420_v41  ;;  %v8518_v55 = vpop.f32.mrb[121].mxu0  ;;  %v8520_v47 = vpop.f32.mrb[122].mxu1  ;;  %v9866_v58 = vld [vmem:[#allocation21_spill] sm:$0xff] }
 0x39a   : > { %v4295_v42 = vadd.f32 1e-12, %v4231_v45  ;;  %v4104_v32 = vmul.f32 0.00390625, %v8295_v7  ;;  %9862 = vst [vmem:[#allocation111_spill] sm:$0xff] %v8518_v55  ;;  %9863 = vst [vmem:[#allocation112_spill] sm:$0xff] %v8520_v47  ;;  %v6247_v39 = vpop.eup %6246  ;;  %v8524_v29 = vadd.f32 %v5653_v63, %v3363_v59  ;;  %v4047_v35 = vadd.f32 %v3870_v1, %v3869_v4  ;;  %v8531_v45 = vpop.f32.mrb[122].mxu0 }
 0x39b   : > { %9861 = vst [vmem:[#allocation110_spill] sm:$0xff] %v8513_v20  ;;  %5043 = vst [vmem:[%s8033_s26 + $0xb0] sm:$0xff] %v4915_v25  ;;  %v8527_v17 = vmul.f32 0.00390625, %v8301_v18  ;;  %v5654_v51 = vadd.f32 %v8303_v8, %v7307_v36  ;;  %v8533_v7 = vpop.xlane.xlu1 %3582  ;;  %v4433_v55 = vmul.f32 %v6247_v39, %v9865_v14  ;;  %v4434_v47 = vmul.f32 %v6247_v39, %v9866_v58  ;;  %v3364_v59 = vld [vmem:[%s6799_s14 + $0x360] sm:$0xff]  ;;  %v8541_v4 = vpop.xlane.xlu0 %3964 }
 0x39c   : > { %5044 = vst [vmem:[%s8033_s26 + $0xb8] sm:$0xff] %v4916_v57  ;;  %9864 = vst [vmem:[#allocation113_spill] sm:$0xff] %v8524_v29  ;;  %v4549_v25 = vmul.f32 %v6247_v39, %v8324_v3  ;;  %6250 = vrsqrt.f32 %v4295_v42  ;;  %v8539_v57 = vpop.f32.mrb[123].mxu0  ;;  %4048 = vadd.xlane.f32.xlu0 %v4047_v35  ;;  %3666 = vadd.xlane.f32.xlu1 %v3665_v52  ;;  %v4232_v18 = vsub.f32 %v4104_v32, %v4168_v0  ;;  %v8547_v1 = vpop.f32.mrb[123].mxu1 }
 0x39d   : > { %9867 = vst [vmem:[#allocation20_spill] sm:$0xff] %v8539_v57  ;;  %v4169_v8 = vmul.f32 %v8527_v17, %v8527_v17  ;;  %v5655_v63 = vadd.f32 %v5654_v51, %v8310_v38  ;;  %v4105_v14 = vmul.f32 0.00390625, %v8342_v61  ;;  %v5656_v42 = vadd.f32 %v8312_v13, %v7311_v46  ;;  %v9869_v13 = vld [vmem:[#allocation22_spill] sm:$0xff]  ;;  %v3365_v57 = vld [vmem:[%s6799_s14 + $0x368] sm:$0xff] }
 0x39e   : > { %v4625_v3 = vsub.f32 %v4433_v55, %v4549_v25  ;;  %v4626_v58 = vsub.f32 %v4434_v47, %v4549_v25  ;;  %v3871_v35 = vmul.f32 %v8420_v41, %v8420_v41  ;;  %v4296_v0 = vadd.f32 1e-12, %v4232_v18  ;;  %v9870_v25 = vld [vmem:[#allocation23_spill] sm:$0xff] }
 0x39f   : > { %v6249_v52 = vpop.eup %6248  ;;  %v8553_v32 = vadd.f32 %v5655_v63, %v3364_v59  ;;  %v3872_v38 = vmul.f32 %v8422_v9, %v8422_v9  ;;  %v3668_v61 = vadd.f32 %v8467_v49, %v8465_v53  ;;  %v8559_v39 = vpop.xlane.xlu1 %3967  ;;  %v5657_v9 = vadd.f32 %v5656_v42, %v8318_v6 }
 0x3a0   : > { %9868 = vst [vmem:[#allocation21_spill] sm:$0xff] %v8559_v39  ;;  %v4771_v55 = vmul.f32 %v7457_v12, %v4625_v3  ;;  %v4772_v47 = vmul.f32 %v7467_v22, %v4626_v58  ;;  %v4435_v51 = vmul.f32 %v6249_v52, %v9869_v13  ;;  %v4436_v41 = vmul.f32 %v6249_v52, %v9870_v25  ;;  %v8566_v18 = vpop.xlane.xlu0 %3585  ;;  %v8568_v59 = vpop.f32.mrb[124].mxu1 }
 0x3a1   : > { %9871 = vst [vmem:[#allocation22_spill] sm:$0xff] %v8568_v59  ;;  %v4550_v63 = vmul.f32 %v6249_v52, %v8388_v24  ;;  %6252 = vrsqrt.f32 %v4296_v0  ;;  %v4050_v39 = vadd.f32 %v3872_v38, %v3871_v35  ;;  %3669 = vadd.xlane.f32.xlu0 %v3668_v61  ;;  %v8572_v3 = vpop.f32.mrb[124].mxu0  ;;  %v8574_v58 = vpop.f32.mrb[125].mxu1  ;;  %v5658_v59 = vadd.f32 %v8320_v10, %v7307_v36  ;;  %v3366_v38 = vld [vmem:[%s6799_s14 + $0x370] sm:$0xff] }
 0x3a2   : > { %v4917_v13 = vadd.f32 %v7474_v27, %v4771_v55  ;;  %v4918_v25 = vadd.f32 %v7478_v28, %v4772_v47  ;;  %v4233_v24 = vsub.f32 %v4105_v14, %v4169_v8  ;;  %v8580_v52 = vpop.f32.mrb[125].mxu0  ;;  %v8582_v0 = vpop.f32.mrb[126].mxu1  ;;  %v8584_v35 = vadd.f32 %v5657_v9, %v3365_v57  ;;  %v9875_v10 = vld [vmem:[#allocation98_spill] sm:$0xff] }
 0x3a3   : > { %9872 = vst [vmem:[#allocation23_spill] sm:$0xff] %v8582_v0  ;;  %v4627_v6 = vsub.f32 %v4435_v51, %v4550_v63  ;;  %v4628_v42 = vsub.f32 %v4436_v41, %v4550_v63  ;;  %4051 = vadd.xlane.f32.xlu1 %v4050_v39  ;;  %v8588_v61 = vmul.f32 0.00390625, %v8328_v21  ;;  %v8590_v55 = vpop.f32.mrb[126].mxu0  ;;  %v8592_v47 = vpop.xlane.xlu1 %3588  ;;  %v5659_v8 = vadd.f32 %v5658_v59, %v9875_v10  ;;  %v9876_v51 = vld [vmem:[#allocation100_spill] sm:$0xff] }
 0x3a4   : > { %9873 = vst [vmem:[#allocation114_spill] sm:$0xff] %v8590_v55  ;;  %9874 = vst [vmem:[#allocation115_spill] sm:$0xff] %v8592_v47  ;;  %v4297_v14 = vadd.f32 1e-12, %v4233_v24  ;;  %v5660_v41 = vadd.f32 %v9876_v51, %v7311_v46  ;;  %v3873_v9 = vmul.f32 %v8465_v53, %v8465_v53  ;;  %v8601_v57 = vpop.f32.mrb[127].mxu0  ;;  %v8603_v39 = vpop.xlane.xlu0 %3970  ;;  %v3874_v59 = vmul.f32 %v8467_v49, %v8467_v49  ;;  %v9881_v53 = vld [vmem:[#allocation99_spill] sm:$0xff] }
 0x3a5   : > { %5045 = vst [vmem:[%s8033_s26 + $0xc0] sm:$0xff] %v4917_v13  ;;  %5046 = vst [vmem:[%s8033_s26 + $0xc8] sm:$0xff] %v4918_v25  ;;  %v4773_v21 = vmul.f32 %v7457_v12, %v4627_v6  ;;  %v4774_v63 = vmul.f32 %v7467_v22, %v4628_v42  ;;  %v4170_v13 = vmul.f32 %v8588_v61, %v8588_v61  ;;  %v3367_v25 = vld [vmem:[%s6799_s14 + $0x378] sm:$0xff]  ;;  %v8612_v24 = vpop.f32.mrb[127].mxu1  ;;  %v9882_v47 = vld [vmem:[#allocation24_spill] sm:$0xff] }
 0x3a6   : > { %9877 = vst [vmem:[#allocation98_spill] sm:$0xff] %v8601_v57  ;;  %9878 = vst [vmem:[#allocation100_spill] sm:$0xff] %v8603_v39  ;;  %v6251_v10 = vpop.eup %6250  ;;  %v8614_v51 = vadd.f32 %v5659_v8, %v3366_v38  ;;  %6254 = vrsqrt.f32 %v4297_v14  ;;  %v5661_v57 = vadd.f32 %v5660_v41, %v9881_v53  ;;  %v3671_v6 = vadd.f32 %v8524_v29, %v8513_v20  ;;  %v9883_v49 = vld [vmem:[#allocation25_spill] sm:$0xff] }
 0x3a7   : > { %9879 = vst [vmem:[#allocation116_spill] sm:$0xff] %v8612_v24  ;;  %v4919_v42 = vadd.f32 %v7474_v27, %v4773_v21  ;;  %v4920_v55 = vadd.f32 %v7478_v28, %v4774_v63  ;;  %v4437_v39 = vmul.f32 %v6251_v10, %v9882_v47  ;;  %v4438_v0 = vmul.f32 %v6251_v10, %v9883_v49  ;;  %v8623_v24 = vpop.xlane.xlu1 %3973  ;;  %v3368_v63 = vld [vmem:[%s6799_s14 + $0x380] sm:$0xff] }
 0x3a8   : > { %9880 = vst [vmem:[#allocation117_spill] sm:$0xff] %v8614_v51  ;;  %v4551_v38 = vmul.f32 %v6251_v10, %v8426_v34  ;;  %v8626_v8 = vadd.f32 %v5661_v57, %v3367_v25  ;;  %v4053_v53 = vadd.f32 %v3874_v59, %v3873_v9  ;;  %3672 = vadd.xlane.f32.xlu1 %v3671_v6  ;;  %v4106_v14 = vmul.f32 0.00390625, %v8357_v56  ;;  %v8629_v41 = vpop.xlane.xlu0 %3591  ;;  %v3369_v25 = vld [vmem:[%s6799_s14 + $0x388] sm:$0xff]  ;;  %v9886_v10 = vld [vmem:[#allocation103_spill] sm:$0xff] }
 0x3a9   : > { %9885 = vst [vmem:[#allocation24_spill] sm:$0xff] %v8629_v41  ;;  %5047 = vst [vmem:[%s8033_s26 + $0xd0] sm:$0xff] %v4919_v42  ;;  %v8634_v47 = vmul.f32 0.00390625, %v8361_v62  ;;  %v5662_v49 = vadd.f32 %v8363_v48, %v7307_v36  ;;  %v5664_v34 = vadd.f32 %v8373_v37, %v7311_v46  ;;  %v3875_v57 = vmul.f32 %v8513_v20, %v8513_v20  ;;  %v9888_v42 = vld [vmem:[#allocation26_spill] sm:$0xff] }
 0x3aa   : > { %9884 = vst [vmem:[#allocation99_spill] sm:$0xff] %v8626_v8  ;;  %5048 = vst [vmem:[%s8033_s26 + $0xd8] sm:$0xff] %v4920_v55  ;;  %v4629_v9 = vsub.f32 %v4437_v39, %v4551_v38  ;;  %v4630_v21 = vsub.f32 %v4438_v0, %v4551_v38  ;;  %4054 = vadd.xlane.f32.xlu0 %v4053_v53  ;;  %v4234_v56 = vsub.f32 %v4106_v14, %v4170_v13  ;;  %v9889_v53 = vld [vmem:[#allocation27_spill] sm:$0xff] }
 0x3ab   : > { %v3876_v55 = vmul.f32 %v8524_v29, %v8524_v29  ;;  %v6253_v62 = vpop.eup %6252  ;;  %v4171_v59 = vmul.f32 %v8634_v47, %v8634_v47  ;;  %v5663_v48 = vadd.f32 %v5662_v49, %v8371_v30  ;;  %v5665_v37 = vadd.f32 %v5664_v34, %v9886_v10  ;;  %v8652_v39 = vpop.xlane.xlu1 %3594 }
 0x3ac   : > { %v3674_v6 = vadd.f32 %v8584_v35, %v8553_v32  ;;  %9887 = vst [vmem:[#allocation25_spill] sm:$0xff] %v8652_v39  ;;  %v4775_v0 = vmul.f32 %v7457_v12, %v4629_v9  ;;  %v4776_v13 = vmul.f32 %v7467_v22, %v4630_v21  ;;  %v4439_v38 = vmul.f32 %v6253_v62, %v9888_v42  ;;  %v8658_v29 = vpop.xlane.xlu0 %3976  ;;  %v9892_v42 = vld [vmem:[#allocation104_spill] sm:$0xff] }
 0x3ad   : > { %v4440_v14 = vmul.f32 %v6253_v62, %v9889_v53  ;;  %9890 = vst [vmem:[#allocation103_spill] sm:$0xff] %v8658_v29  ;;  %v4552_v30 = vmul.f32 %v6253_v62, %v8485_v23  ;;  %v4298_v49 = vadd.f32 1e-12, %v4234_v56  ;;  %v8661_v34 = vadd.f32 %v5663_v48, %v3368_v63  ;;  %v3370_v23 = vld [vmem:[%s6799_s14 + $0x390] sm:$0xff]  ;;  %v9893_v62 = vld [vmem:[#allocation107_spill] sm:$0xff] }
 0x3ae   : > { %v8663_v10 = vadd.f32 %v5665_v37, %v3369_v25  ;;  %v4921_v9 = vadd.f32 %v7474_v27, %v4775_v0  ;;  %v4922_v21 = vadd.f32 %v7478_v28, %v4776_v13  ;;  %v4056_v20 = vadd.f32 %v3876_v55, %v3875_v57  ;;  %3675 = vadd.xlane.f32.xlu0 %v3674_v6  ;;  %v9894_v25 = vld [vmem:[#allocation105_spill] sm:$0xff]  ;;  %v9895_v57 = vld [vmem:[#allocation106_spill] sm:$0xff] }
 0x3af   : > { %v5666_v53 = vadd.f32 %v9892_v42, %v7307_v36  ;;  %v4631_v39 = vsub.f32 %v4439_v38, %v4552_v30  ;;  %v4632_v29 = vsub.f32 %v4440_v14, %v4552_v30  ;;  %6256 = vrsqrt.f32 %v4298_v49  ;;  %v8671_v41 = vpop.xlane.xlu1 %3979  ;;  %v9896_v14 = vld [vmem:[#allocation28_spill] sm:$0xff] }
 0x3b0   : > { %9891 = vst [vmem:[#allocation26_spill] sm:$0xff] %v8663_v10  ;;  %v4107_v56 = vmul.f32 0.00390625, %v9893_v62  ;;  %v6255_v63 = vpop.eup %6254  ;;  %5049 = vst [vmem:[%s8033_s26 + $0xe0] sm:$0xff] %v4921_v9  ;;  %4057 = vadd.xlane.f32.xlu1 %v4056_v20  ;;  %v8677_v55 = vmul.f32 0.00390625, %v9895_v57  ;;  %v5668_v37 = vadd.f32 %v8413_v43, %v7311_v46  ;;  %v3877_v6 = vmul.f32 %v8553_v32, %v8553_v32  ;;  %v8683_v0 = vpop.xlane.xlu0 %3597  ;;  %v9897_v20 = vld [vmem:[#allocation29_spill] sm:$0xff] }
 0x3b1   : > { %5050 = vst [vmem:[%s8033_s26 + $0xe8] sm:$0xff] %v4922_v21  ;;  %v5667_v48 = vadd.f32 %v5666_v53, %v9894_v25  ;;  %v4777_v13 = vmul.f32 %v7457_v12, %v4631_v39  ;;  %v4778_v38 = vmul.f32 %v7467_v22, %v4632_v29  ;;  %v4441_v30 = vmul.f32 %v6255_v63, %v9896_v14  ;;  %v3371_v53 = vld [vmem:[%s6799_s14 + $0x398] sm:$0xff]  ;;  %v9899_v29 = vld [vmem:[#allocation90_spill] sm:$0xff] }
 0x3b2   : > { %v4442_v49 = vmul.f32 %v6255_v63, %v9897_v20  ;;  %v4553_v9 = vmul.f32 %v6255_v63, %v8527_v17  ;;  %v4235_v43 = vsub.f32 %v4107_v56, %v4171_v59  ;;  %v4172_v42 = vmul.f32 %v8677_v55, %v8677_v55 }
 0x3b3   : > { %v8690_v21 = vadd.f32 %v5667_v48, %v3370_v23  ;;  %v4923_v62 = vadd.f32 %v7474_v27, %v4777_v13  ;;  %v4924_v39 = vadd.f32 %v7478_v28, %v4778_v38  ;;  %v5669_v25 = vadd.f32 %v5668_v37, %v9899_v29  ;;  %v8700_v14 = vpop.xlane.xlu1 %3600  ;;  %v3373_v29 = vld [vmem:[%s6799_s14 + $0x3a8] sm:$0xff] }
 0x3b4   : > { %v3878_v57 = vmul.f32 %v8584_v35, %v8584_v35  ;;  %v4633_v17 = vsub.f32 %v4441_v30, %v4553_v9  ;;  %v4634_v63 = vsub.f32 %v4442_v49, %v4553_v9  ;;  %v4299_v23 = vadd.f32 1e-12, %v4235_v43  ;;  %v8704_v56 = vpop.xlane.xlu0 %3982 }
 0x3b5   : > { %9898 = vst [vmem:[#allocation27_spill] sm:$0xff] %v8690_v21  ;;  %v3677_v59 = vadd.f32 %v8626_v8, %v8614_v51  ;;  %5051 = vst [vmem:[%s8033_s26 + $0xf0] sm:$0xff] %v4923_v62  ;;  %v8708_v48 = vadd.f32 %v5669_v25, %v3371_v53  ;;  %v4108_v37 = vmul.f32 0.00390625, %v8428_v2  ;;  %v8712_v38 = vmul.f32 0.00390625, %v8434_v40  ;;  %v3372_v2 = vld [vmem:[%s6799_s14 + $0x3a0] sm:$0xff] }
 0x3b6   : > { %5052 = vst [vmem:[%s8033_s26 + $0xf8] sm:$0xff] %v4924_v39  ;;  %v4059_v13 = vadd.f32 %v3878_v57, %v3877_v6  ;;  %v4779_v30 = vmul.f32 %v7457_v12, %v4633_v17  ;;  %v4780_v20 = vmul.f32 %v7467_v22, %v4634_v63  ;;  %6258 = vrsqrt.f32 %v4299_v23  ;;  %v9901_v39 = vld [vmem:[#allocation17_spill] sm:$0xff] }
 0x3b7   : > { %9900 = vst [vmem:[#allocation104_spill] sm:$0xff] %v8708_v48  ;;  %3678 = vadd.xlane.f32.xlu1 %v3677_v59  ;;  %v5670_v49 = vadd.f32 %v8436_v31, %v7307_v36  ;;  %v4236_v9 = vsub.f32 %v4108_v37, %v4172_v42  ;;  %v4173_v6 = vmul.f32 %v8712_v38, %v8712_v38  ;;  %v8725_v53 = vpop.xlane.xlu1 %3985 }
 0x3b8   : > { %4060 = vadd.xlane.f32.xlu0 %v4059_v13  ;;  %v5672_v40 = vadd.f32 %v8446_v33, %v7311_v46  ;;  %v3879_v43 = vmul.f32 %v8614_v51, %v8614_v51  ;;  %v4925_v62 = vadd.f32 %v7474_v27, %v4779_v30  ;;  %v4926_v31 = vadd.f32 %v7478_v28, %v4780_v20  ;;  %v8733_v57 = vpop.xlane.xlu0 %3603  ;;  %v9902_v13 = vld [vmem:[#allocation30_spill] sm:$0xff]  ;;  %v9903_v30 = vld [vmem:[#allocation31_spill] sm:$0xff] }
 0x3b9   : > { %v5671_v42 = vadd.f32 %v5670_v49, %v9901_v39  ;;  %v3880_v25 = vmul.f32 %v8626_v8, %v8626_v8  ;;  %v6257_v17 = vpop.eup %6256  ;;  %v4300_v33 = vadd.f32 1e-12, %v4236_v9  ;;  %v3680_v23 = vadd.f32 %v8663_v10, %v8661_v34  ;;  %v3374_v8 = vld [vmem:[%s6799_s14 + $0x3b0] sm:$0xff] }
 0x3ba   : > { %v5673_v63 = vadd.f32 %v5672_v40, %v8452_v26  ;;  %v5674_v59 = vadd.f32 %v8454_v16, %v7307_v36  ;;  %5053 = vst [vmem:[%s8033_s26 + $0x100] sm:$0xff] %v4925_v62  ;;  %5054 = vst [vmem:[%s8033_s26 + $0x108] sm:$0xff] %v4926_v31  ;;  %v4443_v37 = vmul.f32 %v6257_v17, %v9902_v13  ;;  %v4109_v13 = vmul.f32 0.00390625, %v8471_v54 }
 0x3bb   : > { %v4444_v20 = vmul.f32 %v6257_v17, %v9903_v30  ;;  %v4554_v49 = vmul.f32 %v6257_v17, %v8588_v61  ;;  %v8745_v39 = vadd.f32 %v5671_v42, %v3372_v2  ;;  %6260 = vrsqrt.f32 %v4300_v33  ;;  %v8751_v16 = vpop.xlane.xlu1 %3606  ;;  %v9904_v30 = vld [vmem:[#allocation18_spill] sm:$0xff]  ;;  %v3375_v33 = vld [vmem:[%s6799_s14 + $0x3b8] sm:$0xff] }
 0x3bc   : > { %v8748_v9 = vadd.f32 %v5673_v63, %v3373_v29  ;;  %v4062_v26 = vadd.f32 %v3880_v25, %v3879_v43  ;;  %3681 = vadd.xlane.f32.xlu0 %v3680_v23  ;;  %v5675_v40 = vadd.f32 %v5674_v59, %v8459_v11  ;;  %v8755_v51 = vmul.f32 0.00390625, %v9904_v30  ;;  %v8757_v61 = vpop.xlane.xlu0 %3988 }
 0x3bd   : > { %v4635_v62 = vsub.f32 %v4443_v37, %v4554_v49  ;;  %v4636_v31 = vsub.f32 %v4444_v20, %v4554_v49  ;;  %v5676_v43 = vadd.f32 %v8475_v50, %v7311_v46  ;;  %v3881_v11 = vmul.f32 %v8661_v34, %v8661_v34 }
 0x3be   : > { %4063 = vadd.xlane.f32.xlu1 %v4062_v26  ;;  %v8759_v2 = vadd.f32 %v5675_v40, %v3374_v8  ;;  %v3882_v42 = vmul.f32 %v8663_v10, %v8663_v10  ;;  %v4237_v25 = vsub.f32 %v4109_v13, %v4173_v6  ;;  %v4174_v17 = vmul.f32 %v8755_v51, %v8755_v51  ;;  %v9905_v40 = vld [vmem:[#allocation32_spill] sm:$0xff] }
 0x3bf   : > { %v4781_v29 = vmul.f32 %v7457_v12, %v4635_v62  ;;  %v4782_v54 = vmul.f32 %v7467_v22, %v4636_v31  ;;  %v5677_v8 = vadd.f32 %v5676_v43, %v8469_v19  ;;  %v3683_v50 = vadd.f32 %v8708_v48, %v8690_v21  ;;  %v8776_v59 = vpop.xlane.xlu1 %3991  ;;  %v9906_v31 = vld [vmem:[#allocation33_spill] sm:$0xff] }
 0x3c0   : > { %v4065_v63 = vadd.f32 %v3882_v42, %v3881_v11  ;;  %v4110_v23 = vmul.f32 0.00390625, %v8492_v60  ;;  %v6259_v37 = vpop.eup %6258  ;;  %v4301_v49 = vadd.f32 1e-12, %v4237_v25  ;;  %v8781_v26 = vmul.f32 0.00390625, %v8500_v44  ;;  %v8783_v19 = vpop.xlane.xlu0 %3609 }
 0x3c1   : > { %v4927_v20 = vadd.f32 %v7474_v27, %v4781_v29  ;;  %v4928_v6 = vadd.f32 %v7478_v28, %v4782_v54  ;;  %v4445_v62 = vmul.f32 %v6259_v37, %v9905_v40  ;;  %v4446_v13 = vmul.f32 %v6259_v37, %v9906_v31 }
 0x3c2   : > { %v4555_v30 = vmul.f32 %v6259_v37, %v8634_v47  ;;  %v8788_v60 = vadd.f32 %v5677_v8, %v3375_v33  ;;  %4066 = vadd.xlane.f32.xlu0 %v4065_v63  ;;  %6262 = vrsqrt.f32 %v4301_v49  ;;  %3684 = vadd.xlane.f32.xlu1 %v3683_v50  ;;  %v4238_v43 = vsub.f32 %v4110_v23, %v4174_v17  ;;  %v9907_v8 = vld [vmem:[#allocation109_spill] sm:$0xff]  ;;  %v3376_v17 = vld [vmem:[%s6799_s14 + $0x3c0] sm:$0xff]  ;;  %v9908_v49 = vld [vmem:[#allocation111_spill] sm:$0xff] }
 0x3c3   : > { %5055 = vst [vmem:[%s8033_s26 + $0x110] sm:$0xff] %v4927_v20  ;;  %5056 = vst [vmem:[%s8033_s26 + $0x118] sm:$0xff] %v4928_v6  ;;  %v4175_v44 = vmul.f32 %v8781_v26, %v8781_v26  ;;  %v5678_v11 = vadd.f32 %v8502_v15, %v7307_v36  ;;  %v5680_v47 = vadd.f32 %v8511_v5, %v7311_v46  ;;  %v8800_v25 = vpop.xlane.xlu1 %3612  ;;  %v3377_v50 = vld [vmem:[%s6799_s14 + $0x3c8] sm:$0xff] }
 0x3c4   : > { %v4637_v42 = vsub.f32 %v4445_v62, %v4555_v30  ;;  %v4638_v29 = vsub.f32 %v4446_v13, %v4555_v30  ;;  %v3883_v54 = vmul.f32 %v8690_v21, %v8690_v21  ;;  %v4302_v33 = vadd.f32 1e-12, %v4238_v43  ;;  %v8809_v37 = vpop.xlane.xlu0 %3994  ;;  %v9909_v62 = vld [vmem:[#allocation112_spill] sm:$0xff]  ;;  %v9910_v13 = vld [vmem:[#allocation34_spill] sm:$0xff]  ;;  %v9911_v43 = vld [vmem:[#allocation35_spill] sm:$0xff] }
 0x3c5   : > { %v5679_v63 = vadd.f32 %v5678_v11, %v9907_v8  ;;  %v3884_v23 = vmul.f32 %v8708_v48, %v8708_v48  ;;  %v3686_v15 = vadd.f32 %v8748_v9, %v8745_v39  ;;  %v6261_v5 = vpop.eup %6260  ;;  %v5681_v40 = vadd.f32 %v5680_v47, %v9908_v49  ;;  %v3378_v49 = vld [vmem:[%s6799_s14 + $0x3d0] sm:$0xff] }
 0x3c6   : > { %v4783_v20 = vmul.f32 %v7457_v12, %v4637_v42  ;;  %v4784_v6 = vmul.f32 %v7467_v22, %v4638_v29  ;;  %v5682_v31 = vadd.f32 %v9909_v62, %v7307_v36  ;;  %v4447_v30 = vmul.f32 %v6261_v5, %v9910_v13 }
 0x3c7   : > { %v4448_v11 = vmul.f32 %v6261_v5, %v9911_v43  ;;  %v4556_v8 = vmul.f32 %v6261_v5, %v8677_v55  ;;  %6264 = vrsqrt.f32 %v4302_v33  ;;  %3687 = vadd.xlane.f32.xlu0 %v3686_v15  ;;  %v8821_v29 = vadd.f32 %v5679_v63, %v3376_v17  ;;  %v8826_v62 = vpop.xlane.xlu1 %3997  ;;  %v9912_v15 = vld [vmem:[#allocation20_spill] sm:$0xff]  ;;  %v3379_v5 = vld [vmem:[%s6799_s14 + $0x3d8] sm:$0xff] }
 0x3c8   : > { %v4929_v48 = vadd.f32 %v7474_v27, %v4783_v20  ;;  %v4930_v42 = vadd.f32 %v7478_v28, %v4784_v6  ;;  %v8823_v47 = vadd.f32 %v5681_v40, %v3377_v50  ;;  %v4068_v10 = vadd.f32 %v3884_v23, %v3883_v54  ;;  %v8829_v55 = vpop.xlane.xlu0 %3615 }
 0x3c9   : > { %v4639_v13 = vsub.f32 %v4447_v30, %v4556_v8  ;;  %v4640_v21 = vsub.f32 %v4448_v11, %v4556_v8  ;;  %v5683_v43 = vadd.f32 %v5682_v31, %v8531_v45  ;;  %v4111_v33 = vmul.f32 0.00390625, %v8541_v4  ;;  %v9913_v31 = vld [vmem:[#allocation21_spill] sm:$0xff]  ;;  %v9914_v8 = vld [vmem:[#allocation36_spill] sm:$0xff] }
 0x3ca   : > { %5057 = vst [vmem:[%s8033_s26 + $0x120] sm:$0xff] %v4929_v48  ;;  %5058 = vst [vmem:[%s8033_s26 + $0x128] sm:$0xff] %v4930_v42  ;;  %v8835_v63 = vmul.f32 0.00390625, %v8533_v7  ;;  %v5684_v17 = vadd.f32 %v8547_v1, %v7311_v46  ;;  %v3885_v50 = vmul.f32 %v8745_v39, %v8745_v39  ;;  %4069 = vadd.xlane.f32.xlu1 %v4068_v10  ;;  %v4112_v30 = vmul.f32 0.00390625, %v9913_v31 }
 0x3cb   : > { %v4785_v54 = vmul.f32 %v7457_v12, %v4639_v13  ;;  %v4786_v45 = vmul.f32 %v7467_v22, %v4640_v21  ;;  %v8843_v23 = vadd.f32 %v5683_v43, %v3378_v49  ;;  %v3886_v48 = vmul.f32 %v8748_v9, %v8748_v9  ;;  %v8858_v11 = vpop.xlane.xlu1 %3618  ;;  %v9915_v49 = vld [vmem:[#allocation37_spill] sm:$0xff] }
 0x3cc   : > { %v4239_v4 = vsub.f32 %v4111_v33, %v4175_v44  ;;  %v4176_v7 = vmul.f32 %v8835_v63, %v8835_v63  ;;  %v5685_v1 = vadd.f32 %v5684_v17, %v9912_v15  ;;  %v3689_v20 = vadd.f32 %v8788_v60, %v8759_v2  ;;  %v6263_v6 = vpop.eup %6262  ;;  %v8856_v44 = vpop.xlane.xlu0 %4000 }
 0x3cd   : > { %v4931_v10 = vadd.f32 %v7474_v27, %v4785_v54  ;;  %v4932_v21 = vadd.f32 %v7478_v28, %v4786_v45  ;;  %v4071_v40 = vadd.f32 %v3886_v48, %v3885_v50  ;;  %v4449_v42 = vmul.f32 %v6263_v6, %v9914_v8  ;;  %v9917_v45 = vld [vmem:[#allocation22_spill] sm:$0xff]  ;;  %v3380_v8 = vld [vmem:[%s6799_s14 + $0x3e0] sm:$0xff] }
 0x3ce   : > { %v4450_v13 = vmul.f32 %v6263_v6, %v9915_v49  ;;  %v4557_v43 = vmul.f32 %v6263_v6, %v8712_v38  ;;  %v4303_v33 = vadd.f32 1e-12, %v4239_v4  ;;  %v8865_v17 = vadd.f32 %v5685_v1, %v3379_v5  ;;  %3690 = vadd.xlane.f32.xlu1 %v3689_v20 }
 0x3cf   : > { %5059 = vst [vmem:[%s8033_s26 + $0x130] sm:$0xff] %v4931_v10  ;;  %5060 = vst [vmem:[%s8033_s26 + $0x138] sm:$0xff] %v4932_v21  ;;  %4072 = vadd.xlane.f32.xlu0 %v4071_v40  ;;  %v4240_v50 = vsub.f32 %v4112_v30, %v4176_v7  ;;  %v8868_v54 = vmul.f32 0.00390625, %v8566_v18  ;;  %v5686_v48 = vadd.f32 %v9917_v45, %v7307_v36  ;;  %v9918_v10 = vld [vmem:[#allocation38_spill] sm:$0xff]  ;;  %v9919_v40 = vld [vmem:[#allocation39_spill] sm:$0xff] }
 0x3d0   : > { %9916 = vst [vmem:[#allocation107_spill] sm:$0xff] %v8865_v17  ;;  %v4641_v15 = vsub.f32 %v4449_v42, %v4557_v43  ;;  %v4642_v31 = vsub.f32 %v4450_v13, %v4557_v43  ;;  %6266 = vrsqrt.f32 %v4303_v33  ;;  %v5688_v38 = vadd.f32 %v8574_v58, %v7311_v46  ;;  %v3381_v58 = vld [vmem:[%s6799_s14 + $0x3e8] sm:$0xff]  ;;  %v8885_v42 = vpop.xlane.xlu0 %3621  ;;  %v8891_v43 = vpop.xlane.xlu1 %4003 }
 0x3d1   : > { %v6265_v4 = vpop.eup %6264  ;;  %v4304_v1 = vadd.f32 1e-12, %v4240_v50  ;;  %v4177_v5 = vmul.f32 %v8868_v54, %v8868_v54  ;;  %v5687_v7 = vadd.f32 %v5686_v48, %v8572_v3  ;;  %v3887_v18 = vmul.f32 %v8759_v2, %v8759_v2 }
 0x3d2   : > { %v4787_v20 = vmul.f32 %v7457_v12, %v4641_v15  ;;  %v4788_v6 = vmul.f32 %v7467_v22, %v4642_v31  ;;  %v4451_v21 = vmul.f32 %v6265_v4, %v9918_v10  ;;  %v4452_v30 = vmul.f32 %v6265_v4, %v9919_v40  ;;  %v9923_v10 = vld [vmem:[#allocation116_spill] sm:$0xff] }
 0x3d3   : > { %v4558_v49 = vmul.f32 %v6265_v4, %v8755_v51  ;;  %6268 = vrsqrt.f32 %v4304_v1  ;;  %v8888_v3 = vadd.f32 %v5687_v7, %v3380_v8  ;;  %v5689_v13 = vadd.f32 %v5688_v38, %v8580_v52  ;;  %v9920_v8 = vld [vmem:[#allocation23_spill] sm:$0xff]  ;;  %v3382_v4 = vld [vmem:[%s6799_s14 + $0x3f0] sm:$0xff]  ;;  %v9921_v1 = vld [vmem:[#allocation100_spill] sm:$0xff] }
 0x3d4   : > { %v4933_v33 = vadd.f32 %v7474_v27, %v4787_v20  ;;  %v4934_v50 = vadd.f32 %v7478_v28, %v4788_v6  ;;  %v3888_v45 = vmul.f32 %v8788_v60, %v8788_v60  ;;  %v3692_v48 = vadd.f32 %v8823_v47, %v8821_v29  ;;  %v9922_v20 = vld [vmem:[#allocation115_spill] sm:$0xff] }
 0x3d5   : > { %v4643_v51 = vsub.f32 %v4451_v21, %v4558_v49  ;;  %v4644_v15 = vsub.f32 %v4452_v30, %v4558_v49  ;;  %v8899_v31 = vadd.f32 %v5689_v13, %v3381_v58  ;;  %v5690_v52 = vadd.f32 %v9920_v8, %v7307_v36  ;;  %v9924_v58 = vld [vmem:[#allocation114_spill] sm:$0xff]  ;;  %v3383_v36 = vld [vmem:[%s6799_s14 + $0x3f8] sm:$0xff] }
 0x3d6   : > { %5061 = vst [vmem:[%s8033_s26 + $0x140] sm:$0xff] %v4933_v33  ;;  %5062 = vst [vmem:[%s8033_s26 + $0x148] sm:$0xff] %v4934_v50  ;;  %v4074_v38 = vadd.f32 %v3888_v45, %v3887_v18  ;;  %3693 = vadd.xlane.f32.xlu0 %v3692_v48  ;;  %v4113_v7 = vmul.f32 0.00390625, %v9921_v1  ;;  %v8908_v6 = vmul.f32 0.00390625, %v9922_v20  ;;  %v5692_v40 = vadd.f32 %v9923_v10, %v7311_v46  ;;  %v9925_v50 = vld [vmem:[#allocation98_spill] sm:$0xff]  ;;  %v8923_v48 = vpop.xlane.xlu0 %4006 }
 0x3d7   : > { %v4789_v21 = vmul.f32 %v7457_v12, %v4643_v51  ;;  %v4790_v30 = vmul.f32 %v7467_v22, %v4644_v15  ;;  %v5691_v49 = vadd.f32 %v5690_v52, %v9924_v58  ;;  %v3889_v18 = vmul.f32 %v8821_v29, %v8821_v29  ;;  %v8931_v52 = vpop.xlane.xlu1 %3624  ;;  %v9927_v58 = vld [vmem:[#allocation41_spill] sm:$0xff] }
 0x3d8   : > { %4075 = vadd.xlane.f32.xlu1 %v4074_v38  ;;  %v4241_v13 = vsub.f32 %v4113_v7, %v4177_v5  ;;  %v4178_v33 = vmul.f32 %v8908_v6, %v8908_v6  ;;  %v5693_v45 = vadd.f32 %v5692_v40, %v9925_v50  ;;  %v3890_v46 = vmul.f32 %v8823_v47, %v8823_v47  ;;  %v9926_v40 = vld [vmem:[#allocation40_spill] sm:$0xff] }
 0x3d9   : > { %v4935_v51 = vadd.f32 %v7474_v27, %v4789_v21  ;;  %v4936_v15 = vadd.f32 %v7478_v28, %v4790_v30  ;;  %v8927_v8 = vadd.f32 %v5691_v49, %v3382_v4  ;;  %v3695_v5 = vadd.f32 %v8865_v17, %v8843_v23  ;;  %v9928_v49 = vld [vmem:[#allocation24_spill] sm:$0xff] }
 0x3da   : > { %v6267_v38 = vpop.eup %6266  ;;  %v4305_v1 = vadd.f32 1e-12, %v4241_v13  ;;  %v8933_v7 = vadd.f32 %v5693_v45, %v3383_v36  ;;  %v4077_v20 = vadd.f32 %v3890_v46, %v3889_v18  ;;  %v4114_v10 = vmul.f32 0.00390625, %v8623_v24 }
 0x3db   : > { %5063 = vst [vmem:[%s8033_s26 + $0x150] sm:$0xff] %v4935_v51  ;;  %5064 = vst [vmem:[%s8033_s26 + $0x158] sm:$0xff] %v4936_v15  ;;  %v4453_v21 = vmul.f32 %v6267_v38, %v9926_v40  ;;  %v4454_v30 = vmul.f32 %v6267_v38, %v9927_v58  ;;  %v4559_v4 = vmul.f32 %v6267_v38, %v8781_v26  ;;  %v8942_v50 = vmul.f32 0.00390625, %v9928_v49  ;;  %v9929_v15 = vld [vmem:[#allocation42_spill] sm:$0xff]  ;;  %v8960_v49 = vpop.xlane.xlu1 %4009 }
 0x3dc   : > { %6270 = vrsqrt.f32 %v4305_v1  ;;  %4078 = vadd.xlane.f32.xlu0 %v4077_v20  ;;  %3696 = vadd.xlane.f32.xlu1 %v3695_v5  ;;  %v4242_v13 = vsub.f32 %v4114_v10, %v4178_v33  ;;  %v3891_v36 = vmul.f32 %v8843_v23, %v8843_v23  ;;  %v3892_v24 = vmul.f32 %v8865_v17, %v8865_v17  ;;  %v9930_v1 = vld [vmem:[#allocation43_spill] sm:$0xff]  ;;  %v8955_v10 = vpop.xlane.xlu0 %3627 }
 0x3dd   : > { %v6269_v18 = vpop.eup %6268  ;;  %v4645_v45 = vsub.f32 %v4453_v21, %v4559_v4  ;;  %v4646_v46 = vsub.f32 %v4454_v30, %v4559_v4  ;;  %v4179_v51 = vmul.f32 %v8942_v50, %v8942_v50  ;;  %v3698_v26 = vadd.f32 %v8899_v31, %v8888_v3  ;;  %v9931_v30 = vld [vmem:[#allocation103_spill] sm:$0xff] }
 0x3de   : > { %v4455_v38 = vmul.f32 %v6269_v18, %v9929_v15  ;;  %v4456_v5 = vmul.f32 %v6269_v18, %v9930_v1  ;;  %v4560_v33 = vmul.f32 %v6269_v18, %v8835_v63  ;;  %v4306_v20 = vadd.f32 1e-12, %v4242_v13  ;;  %v9932_v1 = vld [vmem:[#allocation25_spill] sm:$0xff] }
 0x3df   : > { %v4791_v40 = vmul.f32 %v7457_v12, %v4645_v45  ;;  %v4792_v21 = vmul.f32 %v7467_v22, %v4646_v46  ;;  %v4080_v58 = vadd.f32 %v3892_v24, %v3891_v36  ;;  %v4115_v4 = vmul.f32 0.00390625, %v9931_v30 }
 0x3e0   : > { %v4647_v17 = vsub.f32 %v4455_v38, %v4560_v33  ;;  %v4648_v15 = vsub.f32 %v4456_v5, %v4560_v33  ;;  %6272 = vrsqrt.f32 %v4306_v20  ;;  %3699 = vadd.xlane.f32.xlu0 %v3698_v26  ;;  %v8963_v63 = vmul.f32 0.00390625, %v9932_v1  ;;  %v8987_v30 = vpop.xlane.xlu0 %4012 }
 0x3e1   : > { %v4937_v13 = vadd.f32 %v7474_v27, %v4791_v40  ;;  %v4938_v18 = vadd.f32 %v7478_v28, %v4792_v21  ;;  %4081 = vadd.xlane.f32.xlu1 %v4080_v58  ;;  %v4243_v45 = vsub.f32 %v4115_v4, %v4179_v51  ;;  %v3893_v36 = vmul.f32 %v8888_v3, %v8888_v3 }
 0x3e2   : > { %v4793_v24 = vmul.f32 %v7457_v12, %v4647_v17  ;;  %v4794_v46 = vmul.f32 %v7467_v22, %v4648_v15  ;;  %v4180_v38 = vmul.f32 %v8963_v63, %v8963_v63  ;;  %v3894_v26 = vmul.f32 %v8899_v31, %v8899_v31 }
 0x3e3   : > { %5065 = vst [vmem:[%s8033_s26 + $0x160] sm:$0xff] %v4937_v13  ;;  %5066 = vst [vmem:[%s8033_s26 + $0x168] sm:$0xff] %v4938_v18  ;;  %v4307_v5 = vadd.f32 1e-12, %v4243_v45  ;;  %v3701_v51 = vadd.f32 %v8933_v7, %v8927_v8  ;;  %v4116_v33 = vmul.f32 0.00390625, %v8671_v41  ;;  %v8981_v17 = vmul.f32 0.00390625, %v8683_v0  ;;  %v8993_v0 = vpop.xlane.xlu1 %3630 }
 0x3e4   : > { %v4939_v20 = vadd.f32 %v7474_v27, %v4793_v24  ;;  %v4940_v40 = vadd.f32 %v7478_v28, %v4794_v46  ;;  %v4083_v21 = vadd.f32 %v3894_v26, %v3893_v36  ;;  %v3895_v58 = vmul.f32 %v8927_v8, %v8927_v8  ;;  %v9933_v24 = vld [vmem:[#allocation44_spill] sm:$0xff] }
 0x3e5   : > { %6274 = vrsqrt.f32 %v4307_v5  ;;  %3702 = vadd.xlane.f32.xlu1 %v3701_v51  ;;  %v4244_v4 = vsub.f32 %v4116_v33, %v4180_v38  ;;  %v4181_v15 = vmul.f32 %v8981_v17, %v8981_v17  ;;  %v3896_v41 = vmul.f32 %v8933_v7, %v8933_v7  ;;  %v9934_v38 = vld [vmem:[#allocation45_spill] sm:$0xff] }
 0x3e6   : > { %v6271_v1 = vpop.eup %6270  ;;  %5067 = vst [vmem:[%s8033_s26 + $0x170] sm:$0xff] %v4939_v20  ;;  %5068 = vst [vmem:[%s8033_s26 + $0x178] sm:$0xff] %v4940_v40  ;;  %4084 = vadd.xlane.f32.xlu0 %v4083_v21  ;;  %v4117_v13 = vmul.f32 0.00390625, %v8704_v56  ;;  %v8999_v18 = vmul.f32 0.00390625, %v8700_v14  ;;  %v4118_v45 = vmul.f32 0.00390625, %v8725_v53  ;;  %v9003_v36 = vmul.f32 0.00390625, %v8733_v57 }
 0x3e7   : > { %v4457_v46 = vmul.f32 %v6271_v1, %v9933_v24  ;;  %v4458_v26 = vmul.f32 %v6271_v1, %v9934_v38  ;;  %v4561_v5 = vmul.f32 %v6271_v1, %v8868_v54  ;;  %v4308_v51 = vadd.f32 1e-12, %v4244_v4  ;;  %v9017_v4 = vpop.xlane.xlu0 %3633  ;;  %v9935_v1 = vld [vmem:[#allocation46_spill] sm:$0xff] }
 0x3e8   : > { %v4086_v33 = vadd.f32 %v3896_v41, %v3895_v58  ;;  %v4245_v20 = vsub.f32 %v4117_v13, %v4181_v15  ;;  %v4182_v56 = vmul.f32 %v8999_v18, %v8999_v18  ;;  %v4183_v14 = vmul.f32 %v9003_v36, %v9003_v36 }
 0x3e9   : > { %v4649_v40 = vsub.f32 %v4457_v46, %v4561_v5  ;;  %v4650_v53 = vsub.f32 %v4458_v26, %v4561_v5  ;;  %6276 = vrsqrt.f32 %v4308_v51  ;;  %v4119_v57 = vmul.f32 0.00390625, %v8757_v61  ;;  %v9936_v46 = vld [vmem:[#allocation47_spill] sm:$0xff]  ;;  %v9023_v26 = vpop.xlane.xlu1 %4015 }
 0x3ea   : > { %v6273_v21 = vpop.eup %6272  ;;  %4087 = vadd.xlane.f32.xlu1 %v4086_v33  ;;  %v4309_v24 = vadd.f32 1e-12, %v4245_v20  ;;  %v4246_v38 = vsub.f32 %v4118_v45, %v4182_v56  ;;  %v9014_v54 = vmul.f32 0.00390625, %v8751_v16  ;;  %v4120_v58 = vmul.f32 0.00390625, %v8776_v59 }
 0x3eb   : > { %v4795_v15 = vmul.f32 %v7457_v12, %v4649_v40  ;;  %v4796_v41 = vmul.f32 %v7467_v22, %v4650_v53  ;;  %v4459_v13 = vmul.f32 %v6273_v21, %v9935_v1  ;;  %v4460_v61 = vmul.f32 %v6273_v21, %v9936_v46  ;;  %v9045_v46 = vpop.xlane.xlu0 %4018 }
 0x3ec   : > { %v4562_v45 = vmul.f32 %v6273_v21, %v8908_v6  ;;  %6278 = vrsqrt.f32 %v4309_v24  ;;  %v4310_v16 = vadd.f32 1e-12, %v4246_v38  ;;  %v4247_v5 = vsub.f32 %v4119_v57, %v4183_v14  ;;  %v9937_v38 = vld [vmem:[#allocation48_spill] sm:$0xff] }
 0x3ed   : > { %v4941_v59 = vadd.f32 %v7474_v27, %v4795_v15  ;;  %v4942_v51 = vadd.f32 %v7478_v28, %v4796_v41  ;;  %v4184_v33 = vmul.f32 %v9014_v54, %v9014_v54  ;;  %v9031_v20 = vmul.f32 0.00390625, %v8783_v19  ;;  %v9938_v41 = vld [vmem:[#allocation49_spill] sm:$0xff] }
 0x3ee   : > { %v4651_v56 = vsub.f32 %v4459_v13, %v4562_v45  ;;  %v4652_v40 = vsub.f32 %v4460_v61, %v4562_v45  ;;  %6280 = vrsqrt.f32 %v4310_v16  ;;  %v4311_v53 = vadd.f32 1e-12, %v4247_v5  ;;  %v9048_v45 = vpop.xlane.xlu1 %3636 }
 0x3ef   : > { %v6275_v1 = vpop.eup %6274  ;;  %5069 = vst [vmem:[%s8033_s26 + $0x180] sm:$0xff] %v4941_v59  ;;  %5070 = vst [vmem:[%s8033_s26 + $0x188] sm:$0xff] %v4942_v51  ;;  %v4248_v6 = vsub.f32 %v4120_v58, %v4184_v33  ;;  %v4185_v14 = vmul.f32 %v9031_v20, %v9031_v20  ;;  %v4121_v57 = vmul.f32 0.00390625, %v8809_v37  ;;  %v9039_v21 = vmul.f32 0.00390625, %v8800_v25 }
 0x3f0   : > { %v4797_v24 = vmul.f32 %v7457_v12, %v4651_v56  ;;  %v4798_v19 = vmul.f32 %v7467_v22, %v4652_v40  ;;  %v4461_v15 = vmul.f32 %v6275_v1, %v9937_v38  ;;  %v4462_v13 = vmul.f32 %v6275_v1, %v9938_v41 }
 0x3f1   : > { %v4563_v58 = vmul.f32 %v6275_v1, %v8942_v50  ;;  %6282 = vrsqrt.f32 %v4311_v53  ;;  %v4312_v61 = vadd.f32 1e-12, %v4248_v6  ;;  %v4249_v37 = vsub.f32 %v4121_v57, %v4185_v14  ;;  %v9939_v50 = vld [vmem:[#allocation50_spill] sm:$0xff]  ;;  %v9940_v1 = vld [vmem:[#allocation51_spill] sm:$0xff] }
 0x3f2   : > { %v4943_v25 = vadd.f32 %v7474_v27, %v4797_v24  ;;  %v4944_v16 = vadd.f32 %v7478_v28, %v4798_v19  ;;  %v4186_v5 = vmul.f32 %v9039_v21, %v9039_v21  ;;  %v4122_v59 = vmul.f32 0.00390625, %v8826_v62 }
 0x3f3   : > { %v6277_v51 = vpop.eup %6276  ;;  %v4653_v33 = vsub.f32 %v4461_v15, %v4563_v58  ;;  %v4654_v56 = vsub.f32 %v4462_v13, %v4563_v58  ;;  %6284 = vrsqrt.f32 %v4312_v61  ;;  %v4313_v40 = vadd.f32 1e-12, %v4249_v37  ;;  %v9066_v61 = vpop.xlane.xlu0 %3639 }
 0x3f4   : > { %5071 = vst [vmem:[%s8033_s26 + $0x190] sm:$0xff] %v4943_v25  ;;  %5072 = vst [vmem:[%s8033_s26 + $0x198] sm:$0xff] %v4944_v16  ;;  %v4463_v53 = vmul.f32 %v6277_v51, %v9939_v50  ;;  %v4464_v6 = vmul.f32 %v6277_v51, %v9940_v1  ;;  %v4564_v14 = vmul.f32 %v6277_v51, %v8963_v63  ;;  %v9063_v62 = vmul.f32 0.00390625, %v8829_v55  ;;  %v9941_v25 = vld [vmem:[#allocation52_spill] sm:$0xff]  ;;  %v9072_v55 = vpop.xlane.xlu1 %4021 }
 0x3f5   : > { %v4250_v57 = vsub.f32 %v4122_v59, %v4186_v5  ;;  %v4799_v24 = vmul.f32 %v7457_v12, %v4653_v33  ;;  %v4800_v19 = vmul.f32 %v7467_v22, %v4654_v56  ;;  %6286 = vrsqrt.f32 %v4313_v40  ;;  %v9942_v5 = vld [vmem:[#allocation53_spill] sm:$0xff] }
 0x3f6   : > { %v6279_v38 = vpop.eup %6278  ;;  %v4655_v15 = vsub.f32 %v4463_v53, %v4564_v14  ;;  %v4656_v41 = vsub.f32 %v4464_v6, %v4564_v14  ;;  %v4123_v58 = vmul.f32 0.00390625, %v8856_v44  ;;  %v9943_v44 = vld [vmem:[#allocation54_spill] sm:$0xff]  ;;  %v9944_v53 = vld [vmem:[#allocation55_spill] sm:$0xff]  ;;  %v4187_v14 = vmul.f32 %v9063_v62, %v9063_v62 }
 0x3f7   : > { %v4314_v13 = vadd.f32 1e-12, %v4250_v57  ;;  %v4945_v63 = vadd.f32 %v7474_v27, %v4799_v24  ;;  %v4946_v37 = vadd.f32 %v7478_v28, %v4800_v19  ;;  %v4465_v16 = vmul.f32 %v6279_v38, %v9941_v25  ;;  %v9945_v25 = vld [vmem:[#allocation56_spill] sm:$0xff] }
 0x3f8   : > { %v4466_v59 = vmul.f32 %v6279_v38, %v9942_v5  ;;  %v6281_v51 = vpop.eup %6280  ;;  %v4801_v33 = vmul.f32 %v7457_v12, %v4655_v15  ;;  %v4802_v56 = vmul.f32 %v7467_v22, %v4656_v41  ;;  %v4565_v40 = vmul.f32 %v6279_v38, %v8981_v17 }
 0x3f9   : > { %6288 = vrsqrt.f32 %v4314_v13  ;;  %5073 = vst [vmem:[%s8033_s26 + $0x1a0] sm:$0xff] %v4945_v63  ;;  %5074 = vst [vmem:[%s8033_s26 + $0x1a8] sm:$0xff] %v4946_v37  ;;  %v4467_v50 = vmul.f32 %v6281_v51, %v9943_v44  ;;  %v4468_v1 = vmul.f32 %v6281_v51, %v9944_v53  ;;  %v4566_v6 = vmul.f32 %v6281_v51, %v8999_v18  ;;  %v9946_v51 = vld [vmem:[#allocation57_spill] sm:$0xff]  ;;  %v9100_v44 = vpop.xlane.xlu1 %3642 }
 0x3fa   : > { %v4947_v57 = vadd.f32 %v7474_v27, %v4801_v33  ;;  %v4948_v24 = vadd.f32 %v7478_v28, %v4802_v56  ;;  %v4657_v19 = vsub.f32 %v4465_v16, %v4565_v40  ;;  %v4658_v17 = vsub.f32 %v4466_v59, %v4565_v40  ;;  %v9095_v56 = vpop.xlane.xlu0 %4024 }
 0x3fb   : > { %v6283_v38 = vpop.eup %6282  ;;  %v4659_v15 = vsub.f32 %v4467_v50, %v4566_v6  ;;  %v4660_v41 = vsub.f32 %v4468_v1, %v4566_v6  ;;  %v4251_v13 = vsub.f32 %v4123_v58, %v4187_v14  ;;  %v9087_v63 = vmul.f32 0.00390625, %v8858_v11  ;;  %v9947_v1 = vld [vmem:[#allocation58_spill] sm:$0xff]  ;;  %v9948_v14 = vld [vmem:[#allocation59_spill] sm:$0xff] }
 0x3fc   : > { %5075 = vst [vmem:[%s8033_s26 + $0x1b0] sm:$0xff] %v4947_v57  ;;  %5076 = vst [vmem:[%s8033_s26 + $0x1b8] sm:$0xff] %v4948_v24  ;;  %v4803_v18 = vmul.f32 %v7457_v12, %v4657_v19  ;;  %v4804_v37 = vmul.f32 %v7467_v22, %v4658_v17  ;;  %v4469_v5 = vmul.f32 %v6283_v38, %v9945_v25 }
 0x3fd   : > { %v4470_v33 = vmul.f32 %v6283_v38, %v9946_v51  ;;  %v6285_v16 = vpop.eup %6284  ;;  %v4805_v58 = vmul.f32 %v7457_v12, %v4659_v15  ;;  %v4806_v11 = vmul.f32 %v7467_v22, %v4660_v41  ;;  %v4567_v59 = vmul.f32 %v6283_v38, %v9003_v36  ;;  %v9949_v41 = vld [vmem:[#allocation60_spill] sm:$0xff] }
 0x3fe   : > { %v4315_v40 = vadd.f32 1e-12, %v4251_v13  ;;  %v4949_v50 = vadd.f32 %v7474_v27, %v4803_v18  ;;  %v4950_v53 = vadd.f32 %v7478_v28, %v4804_v37  ;;  %v4471_v6 = vmul.f32 %v6285_v16, %v9947_v1  ;;  %v9950_v18 = vld [vmem:[#allocation61_spill] sm:$0xff]  ;;  %v9951_v1 = vld [vmem:[#allocation62_spill] sm:$0xff] }
 0x3ff   : > { %v4472_v57 = vmul.f32 %v6285_v16, %v9948_v14  ;;  %v6287_v24 = vpop.eup %6286  ;;  %v4951_v19 = vadd.f32 %v7474_v27, %v4805_v58  ;;  %v4952_v17 = vadd.f32 %v7478_v28, %v4806_v11  ;;  %v4661_v15 = vsub.f32 %v4469_v5, %v4567_v59 }
 0x400   : > { %v4662_v36 = vsub.f32 %v4470_v33, %v4567_v59  ;;  %5077 = vst [vmem:[%s8033_s26 + $0x1c0] sm:$0xff] %v4949_v50  ;;  %5078 = vst [vmem:[%s8033_s26 + $0x1c8] sm:$0xff] %v4950_v53  ;;  %v4568_v38 = vmul.f32 %v6285_v16, %v9014_v54  ;;  %v4473_v13 = vmul.f32 %v6287_v24, %v9949_v41  ;;  %6290 = vrsqrt.f32 %v4315_v40  ;;  %v9120_v50 = vpop.xlane.xlu0 %3645 }
 0x401   : > { %v4474_v25 = vmul.f32 %v6287_v24, %v9950_v18  ;;  %v4569_v37 = vmul.f32 %v6287_v24, %v9031_v20  ;;  %5079 = vst [vmem:[%s8033_s26 + $0x1d0] sm:$0xff] %v4951_v19  ;;  %5080 = vst [vmem:[%s8033_s26 + $0x1d8] sm:$0xff] %v4952_v17  ;;  %v4807_v51 = vmul.f32 %v7457_v12, %v4661_v15  ;;  %v9952_v24 = vld [vmem:[#allocation63_spill] sm:$0xff]  ;;  %v9126_v19 = vpop.xlane.xlu1 %4027  ;;  %v9137_v41 = vmul.f32 0.00390625, %v8885_v42 }
 0x402   : > { %v4808_v58 = vmul.f32 %v7467_v22, %v4662_v36  ;;  %v4188_v5 = vmul.f32 %v9087_v63, %v9087_v63  ;;  %v4663_v54 = vsub.f32 %v4471_v6, %v4568_v38  ;;  %v4664_v16 = vsub.f32 %v4472_v57, %v4568_v38 }
 0x403   : > { %v6289_v33 = vpop.eup %6288  ;;  %v4665_v11 = vsub.f32 %v4473_v13, %v4569_v37  ;;  %v4666_v59 = vsub.f32 %v4474_v25, %v4569_v37  ;;  %v4953_v20 = vadd.f32 %v7474_v27, %v4807_v51  ;;  %v4124_v38 = vmul.f32 0.00390625, %v8891_v43 }
 0x404   : > { %v4954_v53 = vadd.f32 %v7478_v28, %v4808_v58  ;;  %v4475_v14 = vmul.f32 %v6289_v33, %v9951_v1  ;;  %v4476_v40 = vmul.f32 %v6289_v33, %v9952_v24  ;;  %v4809_v17 = vmul.f32 %v7457_v12, %v4663_v54 }
 0x405   : > { %v4810_v15 = vmul.f32 %v7467_v22, %v4664_v16  ;;  %v4811_v6 = vmul.f32 %v7457_v12, %v4665_v11  ;;  %v4812_v57 = vmul.f32 %v7467_v22, %v4666_v59  ;;  %5081 = vst [vmem:[%s8033_s26 + $0x1e0] sm:$0xff] %v4953_v20  ;;  %v4570_v36 = vmul.f32 %v6289_v33, %v9039_v21  ;;  %v4031_v11 = vpop.xlane.xlu0 %4030  ;;  %v3649_v1 = vpop.xlane.xlu1 %3648 }
 0x406   : > { %5082 = vst [vmem:[%s8033_s26 + $0x1e8] sm:$0xff] %v4954_v53  ;;  %v4125_v13 = vmul.f32 0.00390625, %v8923_v48  ;;  %v4955_v18 = vadd.f32 %v7474_v27, %v4809_v17  ;;  %v4252_v16 = vsub.f32 %v4124_v38, %v4188_v5  ;;  %v4189_v21 = vmul.f32 %v9137_v41, %v9137_v41 }
 0x407   : > { %v4956_v25 = vadd.f32 %v7478_v28, %v4810_v15  ;;  %v4957_v37 = vadd.f32 %v7474_v27, %v4811_v6  ;;  %v4958_v51 = vadd.f32 %v7478_v28, %v4812_v57  ;;  %v4667_v58 = vsub.f32 %v4475_v14, %v4570_v36  ;;  %v9953_v15 = vld [vmem:[#allocation64_spill] sm:$0xff]  ;;  %v9954_v57 = vld [vmem:[#allocation65_spill] sm:$0xff] }
 0x408   : > { %v4668_v54 = vsub.f32 %v4476_v40, %v4570_v36  ;;  %5083 = vst [vmem:[%s8033_s26 + $0x1f0] sm:$0xff] %v4955_v18  ;;  %v9151_v42 = vmul.f32 0.00390625, %v8931_v52  ;;  %v4126_v43 = vmul.f32 0.00390625, %v8960_v49  ;;  %v9155_v48 = vmul.f32 0.00390625, %v8955_v10 }
 0x409   : > { %5084 = vst [vmem:[%s8033_s26 + $0x1f8] sm:$0xff] %v4956_v25  ;;  %5085 = vst [vmem:[%s8033_s26 + $0x200] sm:$0xff] %v4957_v37  ;;  %v4127_v33 = vmul.f32 0.00390625, %v8987_v30  ;;  %v4813_v5 = vmul.f32 %v7457_v12, %v4667_v58  ;;  %v4316_v20 = vadd.f32 1e-12, %v4252_v16  ;;  %v4253_v53 = vsub.f32 %v4125_v13, %v4189_v21 }
 0x40a   : > { %5086 = vst [vmem:[%s8033_s26 + $0x208] sm:$0xff] %v4958_v51  ;;  %v4814_v59 = vmul.f32 %v7467_v22, %v4668_v54  ;;  %v4190_v52 = vmul.f32 %v9151_v42, %v9151_v42  ;;  %v4191_v49 = vmul.f32 %v9155_v48, %v9155_v48  ;;  %v9165_v10 = vmul.f32 0.00390625, %v8993_v0  ;;  %v6291_v14 = vpop.eup %6290  ;;  %v3652_v54 = vpop.xlane.xlu0 %3651 }
 0x40b   : > { %v4128_v30 = vmul.f32 0.00390625, %v9023_v26  ;;  %v4959_v24 = vadd.f32 %v7474_v27, %v4813_v5  ;;  %6292 = vrsqrt.f32 %v4316_v20  ;;  %v4317_v17 = vadd.f32 1e-12, %v4253_v53 }
 0x40c   : > { %v4960_v40 = vadd.f32 %v7478_v28, %v4814_v59  ;;  %v4477_v6 = vmul.f32 %v6291_v14, %v9953_v15  ;;  %v4478_v36 = vmul.f32 %v6291_v14, %v9954_v57  ;;  %v4571_v38 = vmul.f32 %v6291_v14, %v9063_v62 }
 0x40d   : > { %v4254_v13 = vsub.f32 %v4126_v43, %v4190_v52  ;;  %5087 = vst [vmem:[%s8033_s26 + $0x210] sm:$0xff] %v4959_v24  ;;  %6294 = vrsqrt.f32 %v4317_v17  ;;  %v4255_v0 = vsub.f32 %v4127_v33, %v4191_v49  ;;  %v4192_v26 = vmul.f32 %v9165_v10, %v9165_v10  ;;  %v4034_v33 = vpop.xlane.xlu1 %4033 }
 0x40e   : > { %5088 = vst [vmem:[%s8033_s26 + $0x218] sm:$0xff] %v4960_v40  ;;  %v9178_v18 = vmul.f32 0.00390625, %v9017_v4  ;;  %v4669_v25 = vsub.f32 %v4477_v6, %v4571_v38  ;;  %v4670_v37 = vsub.f32 %v4478_v36, %v4571_v38  ;;  %v4129_v58 = vmul.f32 0.00390625, %v9045_v46  ;;  %v9210_v6 = vpop.xlane.xlu0 %4036 }
 0x40f   : > { %v4318_v51 = vadd.f32 1e-12, %v4254_v13  ;;  %v4319_v16 = vadd.f32 1e-12, %v4255_v0  ;;  %v4256_v21 = vsub.f32 %v4128_v30, %v4192_v26  ;;  %v9184_v43 = vmul.f32 0.00390625, %v9048_v45  ;;  %v9955_v13 = vld [vmem:[#allocation66_spill] sm:$0xff] }
 0x410   : > { %v4193_v62 = vmul.f32 %v9178_v18, %v9178_v18  ;;  %v4815_v5 = vmul.f32 %v7457_v12, %v4669_v25  ;;  %v4816_v4 = vmul.f32 %v7467_v22, %v4670_v37  ;;  %v4130_v59 = vmul.f32 0.00390625, %v9072_v55 }
 0x411   : > { %6296 = vrsqrt.f32 %v4318_v51  ;;  %v4320_v46 = vadd.f32 1e-12, %v4256_v21  ;;  %v4194_v53 = vmul.f32 %v9184_v43, %v9184_v43  ;;  %v9194_v49 = vmul.f32 0.00390625, %v9066_v61  ;;  %v9216_v38 = vpop.xlane.xlu1 %3654  ;;  %v9957_v21 = vld [vmem:[#allocation68_spill] sm:$0xff] }
 0x412   : > { %6298 = vrsqrt.f32 %v4319_v16  ;;  %v4257_v20 = vsub.f32 %v4129_v58, %v4193_v62  ;;  %v4961_v52 = vadd.f32 %v7474_v27, %v4815_v5  ;;  %v4962_v45 = vadd.f32 %v7478_v28, %v4816_v4  ;;  %v9958_v5 = vld [vmem:[#allocation69_spill] sm:$0xff] }
 0x413   : > { %v4131_v30 = vmul.f32 0.00390625, %v9095_v56  ;;  %6300 = vrsqrt.f32 %v4320_v46  ;;  %v4258_v24 = vsub.f32 %v4130_v59, %v4194_v53  ;;  %v9198_v55 = vmul.f32 0.00390625, %v9100_v44 }
 0x414   : > { %v4321_v14 = vadd.f32 1e-12, %v4257_v20  ;;  %5089 = vst [vmem:[%s8033_s26 + $0x220] sm:$0xff] %v4961_v52  ;;  %5090 = vst [vmem:[%s8033_s26 + $0x228] sm:$0xff] %v4962_v45  ;;  %v4195_v40 = vmul.f32 %v9194_v49, %v9194_v49  ;;  %v4132_v17 = vmul.f32 0.00390625, %v9126_v19  ;;  %v9206_v15 = vmul.f32 0.00390625, %v9120_v50 }
 0x415   : > { %v9208_v61 = vmul.f32 0.00390625, %v4031_v11  ;;  %v6293_v56 = vpop.eup %6292  ;;  %v4322_v57 = vadd.f32 1e-12, %v4258_v24  ;;  %v4196_v44 = vmul.f32 %v9198_v55, %v9198_v55  ;;  %v9214_v36 = vmul.f32 0.00390625, %v3649_v1  ;;  %v9956_v19 = vld [vmem:[#allocation67_spill] sm:$0xff] }
 0x416   : > { %6302 = vrsqrt.f32 %v4321_v14  ;;  %v4479_v0 = vmul.f32 %v6293_v56, %v9955_v13  ;;  %v4480_v26 = vmul.f32 %v6293_v56, %v9956_v19  ;;  %v4572_v50 = vmul.f32 %v6293_v56, %v9087_v63  ;;  %v9959_v56 = vld [vmem:[#allocation70_spill] sm:$0xff] }
 0x417   : > { %v4259_v11 = vsub.f32 %v4131_v30, %v4195_v40  ;;  %v6295_v25 = vpop.eup %6294  ;;  %6304 = vrsqrt.f32 %v4322_v57  ;;  %v4260_v37 = vsub.f32 %v4132_v17, %v4196_v44  ;;  %v9223_v51 = vmul.f32 %v9206_v15, %v9206_v15  ;;  %v9244_v24 = vpop.xlane.xlu0 %3657  ;;  %v9960_v44 = vld [vmem:[#allocation71_spill] sm:$0xff] }
 0x418   : > { %v9227_v1 = vmul.f32 %v9214_v36, %v9214_v36  ;;  %v4671_v58 = vsub.f32 %v4479_v0, %v4572_v50  ;;  %v4672_v16 = vsub.f32 %v4480_v26, %v4572_v50  ;;  %v4481_v62 = vmul.f32 %v6295_v25, %v9957_v21  ;;  %v9248_v0 = vpop.xlane.xlu1 %4039  ;;  %v9961_v26 = vld [vmem:[#allocation72_spill] sm:$0xff] }
 0x419   : > { %v4482_v4 = vmul.f32 %v6295_v25, %v9958_v5  ;;  %v4573_v63 = vmul.f32 %v6295_v25, %v9137_v41  ;;  %v9232_v59 = vadd.f32 1e-12, %v4259_v11  ;;  %v9234_v46 = vadd.f32 1e-12, %v4260_v37 }
 0x41a   : > { %v4261_v20 = vsub.f32 %v9208_v61, %v9223_v51  ;;  %v4817_v52 = vmul.f32 %v7457_v12, %v4671_v58  ;;  %v4818_v45 = vmul.f32 %v7467_v22, %v4672_v16  ;;  %v9240_v30 = vmul.f32 0.00390625, %v4034_v33  ;;  %v9962_v58 = vld [vmem:[#allocation73_spill] sm:$0xff] }
 0x41b   : > { %v6297_v53 = vpop.eup %6296  ;;  %v9242_v14 = vmul.f32 0.00390625, %v3652_v54  ;;  %v4673_v40 = vsub.f32 %v4481_v62, %v4573_v63  ;;  %v4674_v17 = vsub.f32 %v4482_v4, %v4573_v63  ;;  %v9963_v4 = vld [vmem:[#allocation74_spill] sm:$0xff]  ;;  %6306 = vrsqrt.f32 %v9232_v59 }
 0x41c   : > { %v6299_v41 = vpop.eup %6298  ;;  %v4483_v57 = vmul.f32 %v6297_v53, %v9959_v56  ;;  %v4484_v13 = vmul.f32 %v6297_v53, %v9960_v44  ;;  %v4963_v19 = vadd.f32 %v7474_v27, %v4817_v52  ;;  %v4964_v33 = vadd.f32 %v7478_v28, %v4818_v45 }
 0x41d   : > { %v4574_v54 = vmul.f32 %v6297_v53, %v9151_v42  ;;  %v4485_v50 = vmul.f32 %v6299_v41, %v9961_v26  ;;  %v6301_v11 = vpop.eup %6300  ;;  %v4819_v25 = vmul.f32 %v7457_v12, %v4673_v40  ;;  %v4820_v37 = vmul.f32 %v7467_v22, %v4674_v17  ;;  %v9964_v42 = vld [vmem:[#allocation75_spill] sm:$0xff] }
 0x41e   : > { %v4486_v16 = vmul.f32 %v6299_v41, %v9962_v58  ;;  %v4575_v21 = vmul.f32 %v6299_v41, %v9155_v48  ;;  %5091 = vst [vmem:[%s8033_s26 + $0x230] sm:$0xff] %v4963_v19  ;;  %5092 = vst [vmem:[%s8033_s26 + $0x238] sm:$0xff] %v4964_v33  ;;  %v4487_v63 = vmul.f32 %v6301_v11, %v9963_v4  ;;  %v3661_v58 = vpop.xlane.xlu1 %3660  ;;  %6308 = vrsqrt.f32 %v9234_v46 }
 0x41f   : > { %v4675_v62 = vsub.f32 %v4483_v57, %v4574_v54  ;;  %v4676_v5 = vsub.f32 %v4484_v13, %v4574_v54  ;;  %v4488_v53 = vmul.f32 %v6301_v11, %v9964_v42  ;;  %v4965_v45 = vadd.f32 %v7474_v27, %v4819_v25  ;;  %v9965_v57 = vld [vmem:[#allocation76_spill] sm:$0xff]  ;;  %v4043_v13 = vpop.xlane.xlu0 %4042 }
 0x420   : > { %v6303_v52 = vpop.eup %6302  ;;  %v4966_v40 = vadd.f32 %v7478_v28, %v4820_v37  ;;  %v4677_v17 = vsub.f32 %v4485_v50, %v4575_v21  ;;  %v4678_v56 = vsub.f32 %v4486_v16, %v4575_v21  ;;  %v4576_v41 = vmul.f32 %v6301_v11, %v9165_v10  ;;  %v9966_v50 = vld [vmem:[#allocation77_spill] sm:$0xff] }
 0x421   : > { %v4821_v44 = vmul.f32 %v7457_v12, %v4675_v62  ;;  %v4822_v48 = vmul.f32 %v7467_v22, %v4676_v5  ;;  %v4489_v19 = vmul.f32 %v6303_v52, %v9965_v57  ;;  %v6305_v33 = vpop.eup %6304  ;;  %5093 = vst [vmem:[%s8033_s26 + $0x240] sm:$0xff] %v4965_v45  ;;  %v4490_v25 = vmul.f32 %v6303_v52, %v9966_v50 }
 0x422   : > { %5094 = vst [vmem:[%s8033_s26 + $0x248] sm:$0xff] %v4966_v40  ;;  %v4823_v54 = vmul.f32 %v7457_v12, %v4677_v17  ;;  %v4824_v26 = vmul.f32 %v7467_v22, %v4678_v56  ;;  %v4577_v37 = vmul.f32 %v6303_v52, %v9178_v18  ;;  %v4679_v16 = vsub.f32 %v4487_v63, %v4576_v41  ;;  %v9967_v52 = vld [vmem:[#allocation78_spill] sm:$0xff]  ;;  %v9968_v17 = vld [vmem:[#allocation79_spill] sm:$0xff] }
 0x423   : > { %v4967_v10 = vadd.f32 %v7474_v27, %v4821_v44  ;;  %v4968_v11 = vadd.f32 %v7478_v28, %v4822_v48  ;;  %v4680_v21 = vsub.f32 %v4488_v53, %v4576_v41  ;;  %v4491_v40 = vmul.f32 %v6305_v33, %v9967_v52 }
 0x424   : > { %v4969_v62 = vadd.f32 %v7474_v27, %v4823_v54  ;;  %v4970_v5 = vadd.f32 %v7478_v28, %v4824_v26  ;;  %v4681_v4 = vsub.f32 %v4489_v19, %v4577_v37  ;;  %v4682_v42 = vsub.f32 %v4490_v25, %v4577_v37  ;;  %v3664_v19 = vpop.xlane.xlu0 %3663 }
 0x425   : > { %5095 = vst [vmem:[%s8033_s26 + $0x250] sm:$0xff] %v4967_v10  ;;  %5096 = vst [vmem:[%s8033_s26 + $0x258] sm:$0xff] %v4968_v11  ;;  %v4825_v45 = vmul.f32 %v7457_v12, %v4679_v16  ;;  %v4826_v18 = vmul.f32 %v7467_v22, %v4680_v21  ;;  %v4492_v56 = vmul.f32 %v6305_v33, %v9968_v17  ;;  %v4325_v57 = vadd.f32 1e-12, %v4261_v20  ;;  %v4046_v59 = vpop.xlane.xlu1 %4045  ;;  %v6307_v52 = vpop.eup %6306 }
 0x426   : > { %5097 = vst [vmem:[%s8033_s26 + $0x260] sm:$0xff] %v4969_v62  ;;  %5098 = vst [vmem:[%s8033_s26 + $0x268] sm:$0xff] %v4970_v5  ;;  %v4827_v63 = vmul.f32 %v7457_v12, %v4681_v4  ;;  %v4828_v53 = vmul.f32 %v7467_v22, %v4682_v42  ;;  %v4578_v44 = vmul.f32 %v6305_v33, %v9184_v43  ;;  %v4135_v61 = vmul.f32 0.00390625, %v9210_v6 }
 0x427   : > { %v4971_v48 = vadd.f32 %v7474_v27, %v4825_v45  ;;  %v4972_v41 = vadd.f32 %v7478_v28, %v4826_v18  ;;  %6310 = vrsqrt.f32 %v4325_v57  ;;  %v4262_v50 = vsub.f32 %v9240_v30, %v9227_v1 }
 0x428   : > { %v4973_v54 = vadd.f32 %v7474_v27, %v4827_v63  ;;  %v4974_v26 = vadd.f32 %v7478_v28, %v4828_v53  ;;  %v4683_v43 = vsub.f32 %v4491_v40, %v4578_v44  ;;  %v4684_v33 = vsub.f32 %v4492_v56, %v4578_v44  ;;  %v6309_v53 = vpop.eup %6308  ;;  %v9969_v44 = vld [vmem:[#allocation80_spill] sm:$0xff] }
 0x429   : > { %5099 = vst [vmem:[%s8033_s26 + $0x270] sm:$0xff] %v4971_v48  ;;  %5100 = vst [vmem:[%s8033_s26 + $0x278] sm:$0xff] %v4972_v41  ;;  %v4199_v46 = vmul.f32 %v9242_v14, %v9242_v14  ;;  %v9310_v25 = vmul.f32 0.00390625, %v9216_v38  ;;  %v4136_v37 = vmul.f32 0.00390625, %v9248_v0  ;;  %v4326_v10 = vadd.f32 1e-12, %v4262_v50  ;;  %v4049_v38 = vpop.xlane.xlu0 %4048  ;;  %v3667_v42 = vpop.xlane.xlu1 %3666 }
 0x42a   : > { %5101 = vst [vmem:[%s8033_s26 + $0x280] sm:$0xff] %v4973_v54  ;;  %5102 = vst [vmem:[%s8033_s26 + $0x288] sm:$0xff] %v4974_v26  ;;  %v4829_v51 = vmul.f32 %v7457_v12, %v4683_v43  ;;  %v4830_v20 = vmul.f32 %v7467_v22, %v4684_v33  ;;  %v9314_v30 = vmul.f32 0.00390625, %v9244_v24  ;;  %v4137_v11 = vmul.f32 0.00390625, %v4043_v13  ;;  %v9970_v41 = vld [vmem:[#allocation81_spill] sm:$0xff]  ;;  %v9971_v26 = vld [vmem:[#allocation82_spill] sm:$0xff] }
 0x42b   : > { %v4263_v1 = vsub.f32 %v4135_v61, %v4199_v46  ;;  %v4200_v21 = vmul.f32 %v9310_v25, %v9310_v25  ;;  %v9320_v62 = vmul.f32 0.00390625, %v3661_v58  ;;  %6312 = vrsqrt.f32 %v4326_v10  ;;  %v9972_v33 = vld [vmem:[#allocation83_spill] sm:$0xff] }
 0x42c   : > { %v4975_v6 = vadd.f32 %v7474_v27, %v4829_v51  ;;  %v4976_v16 = vadd.f32 %v7478_v28, %v4830_v20  ;;  %v4201_v0 = vmul.f32 %v9314_v30, %v9314_v30  ;;  %v4138_v4 = vmul.f32 0.00390625, %v4046_v59 }
 0x42d   : > { %v4327_v5 = vadd.f32 1e-12, %v4263_v1  ;;  %v4264_v24 = vsub.f32 %v4136_v37, %v4200_v21  ;;  %v4202_v13 = vmul.f32 %v9320_v62, %v9320_v62  ;;  %v9328_v45 = vmul.f32 0.00390625, %v3664_v19  ;;  %v9973_v1 = vld [vmem:[#allocation84_spill] sm:$0xff] }
 0x42e   : > { %5103 = vst [vmem:[%s8033_s26 + $0x290] sm:$0xff] %v4975_v6  ;;  %5104 = vst [vmem:[%s8033_s26 + $0x298] sm:$0xff] %v4976_v16  ;;  %v4265_v18 = vsub.f32 %v4137_v11, %v4201_v0  ;;  %v4139_v58 = vmul.f32 0.00390625, %v4049_v38  ;;  %v9332_v63 = vmul.f32 0.00390625, %v3667_v42  ;;  %v4493_v48 = vmul.f32 %v6307_v52, %v9969_v44  ;;  %v9974_v6 = vld [vmem:[#allocation85_spill] sm:$0xff]  ;;  %v9342_v21 = vpop.xlane.xlu0 %3669  ;;  %v9975_v44 = vld [vmem:[#allocation86_spill] sm:$0xff] }
 0x42f   : > { %6314 = vrsqrt.f32 %v4327_v5  ;;  %v4328_v40 = vadd.f32 1e-12, %v4264_v24  ;;  %v4266_v17 = vsub.f32 %v4138_v4, %v4202_v13  ;;  %v4203_v56 = vmul.f32 %v9328_v45, %v9328_v45 }
 0x430   : > { %v4494_v57 = vmul.f32 %v6307_v52, %v9970_v41  ;;  %v4579_v54 = vmul.f32 %v6307_v52, %v9194_v49  ;;  %v4329_v19 = vadd.f32 1e-12, %v4265_v18  ;;  %v4495_v43 = vmul.f32 %v6309_v53, %v9971_v26  ;;  %v4052_v49 = vpop.xlane.xlu1 %4051 }
 0x431   : > { %v4496_v59 = vmul.f32 %v6309_v53, %v9972_v33  ;;  %v4580_v50 = vmul.f32 %v6309_v53, %v9198_v55  ;;  %6316 = vrsqrt.f32 %v4328_v40  ;;  %v6311_v46 = vpop.eup %6310  ;;  %v4330_v20 = vadd.f32 1e-12, %v4266_v17 }
 0x432   : > { %v4685_v61 = vsub.f32 %v4493_v48, %v4579_v54  ;;  %v4686_v51 = vsub.f32 %v4494_v57, %v4579_v54  ;;  %6318 = vrsqrt.f32 %v4329_v19  ;;  %v4497_v11 = vmul.f32 %v6311_v46, %v9973_v1 }
 0x433   : > { %v4687_v37 = vsub.f32 %v4495_v43, %v4580_v50  ;;  %v4688_v10 = vsub.f32 %v4496_v59, %v4580_v50  ;;  %v4498_v16 = vmul.f32 %v6311_v46, %v9974_v6  ;;  %v4581_v55 = vmul.f32 %v6311_v46, %v9206_v15  ;;  %v9977_v43 = vld [vmem:[#allocation88_spill] sm:$0xff]  ;;  %v9978_v59 = vld [vmem:[#allocation89_spill] sm:$0xff] }
 0x434   : > { %v4831_v38 = vmul.f32 %v7457_v12, %v4685_v61  ;;  %v4832_v5 = vmul.f32 %v7467_v22, %v4686_v51  ;;  %6320 = vrsqrt.f32 %v4330_v20  ;;  %v4267_v42 = vsub.f32 %v4139_v58, %v4203_v56  ;;  %v9976_v58 = vld [vmem:[#allocation87_spill] sm:$0xff] }
 0x435   : > { %v4833_v0 = vmul.f32 %v7457_v12, %v4687_v37  ;;  %v4834_v4 = vmul.f32 %v7467_v22, %v4688_v10  ;;  %v9351_v24 = vmul.f32 %v9332_v63, %v9332_v63  ;;  %v6313_v13 = vpop.eup %6312  ;;  %v4689_v15 = vsub.f32 %v4497_v11, %v4581_v55  ;;  %v3673_v20 = vpop.xlane.xlu1 %3672 }
 0x436   : > { %v4977_v18 = vadd.f32 %v7474_v27, %v4831_v38  ;;  %v4978_v52 = vadd.f32 %v7478_v28, %v4832_v5  ;;  %v4690_v40 = vsub.f32 %v4498_v16, %v4581_v55  ;;  %v4499_v48 = vmul.f32 %v6313_v13, %v9975_v44  ;;  %v9979_v55 = vld [vmem:[#allocation91_spill] sm:$0xff] }
 0x437   : > { %v4979_v17 = vadd.f32 %v7474_v27, %v4833_v0  ;;  %v4980_v53 = vadd.f32 %v7478_v28, %v4834_v4  ;;  %v4500_v56 = vmul.f32 %v6313_v13, %v9976_v58  ;;  %v4835_v57 = vmul.f32 %v7457_v12, %v4689_v15  ;;  %v4055_v51 = vpop.xlane.xlu0 %4054  ;;  %v9980_v4 = vld [vmem:[#allocation93_spill] sm:$0xff]  ;;  %v9982_v44 = vld [vmem:[#allocation95_spill] sm:$0xff] }
 0x438   : > { %5105 = vst [vmem:[%s8033_s26 + $0x2a0] sm:$0xff] %v4977_v18  ;;  %5106 = vst [vmem:[%s8033_s26 + $0x2a8] sm:$0xff] %v4978_v52  ;;  %v4836_v54 = vmul.f32 %v7467_v22, %v4690_v40  ;;  %v4582_v19 = vmul.f32 %v6313_v13, %v9214_v36  ;;  %v4331_v26 = vadd.f32 1e-12, %v4267_v42  ;;  %v4140_v61 = vmul.f32 0.00390625, %v4052_v49 }
 0x439   : > { %v6315_v41 = vpop.eup %6314  ;;  %5107 = vst [vmem:[%s8033_s26 + $0x2b0] sm:$0xff] %v4979_v17  ;;  %5108 = vst [vmem:[%s8033_s26 + $0x2b8] sm:$0xff] %v4980_v53  ;;  %v4981_v37 = vadd.f32 %v7474_v27, %v4835_v57 }
 0x43a   : > { %v4501_v33 = vmul.f32 %v6315_v41, %v9977_v43  ;;  %v4502_v50 = vmul.f32 %v6315_v41, %v9978_v59  ;;  %v4583_v46 = vmul.f32 %v6315_v41, %v9242_v14  ;;  %v4982_v10 = vadd.f32 %v7478_v28, %v4836_v54 }
 0x43b   : > { %v4691_v1 = vsub.f32 %v4499_v48, %v4582_v19  ;;  %v4692_v36 = vsub.f32 %v4500_v56, %v4582_v19  ;;  %v6317_v11 = vpop.eup %6316  ;;  %6322 = vrsqrt.f32 %v4331_v26  ;;  %v4268_v38 = vsub.f32 %v4140_v61, %v9351_v24  ;;  %5109 = vst [vmem:[%s8033_s26 + $0x2c0] sm:$0xff] %v4981_v37  ;;  %v9981_v24 = vld [vmem:[#allocation94_spill] sm:$0xff]  ;;  %v3676_v19 = vpop.xlane.xlu0 %3675 }
 0x43c   : > { %v4693_v6 = vsub.f32 %v4501_v33, %v4583_v46  ;;  %v4694_v16 = vsub.f32 %v4502_v50, %v4583_v46  ;;  %v6319_v5 = vpop.eup %6318  ;;  %5110 = vst [vmem:[%s8033_s26 + $0x2c8] sm:$0xff] %v4982_v10  ;;  %v4503_v0 = vmul.f32 %v6317_v11, %v9979_v55  ;;  %v4504_v42 = vmul.f32 %v6317_v11, %v9980_v4  ;;  %v9983_v33 = vld [vmem:[#allocation96_spill] sm:$0xff]  ;;  %v9984_v50 = vld [vmem:[#allocation97_spill] sm:$0xff] }
 0x43d   : > { %v4837_v14 = vmul.f32 %v7457_v12, %v4691_v1  ;;  %v4838_v49 = vmul.f32 %v7467_v22, %v4692_v36  ;;  %v4584_v52 = vmul.f32 %v6317_v11, %v9310_v25  ;;  %v4505_v15 = vmul.f32 %v6319_v5, %v9981_v24  ;;  %v4058_v25 = vpop.xlane.xlu1 %4057 }
 0x43e   : > { %v4839_v13 = vmul.f32 %v7457_v12, %v4693_v6  ;;  %v4840_v18 = vmul.f32 %v7467_v22, %v4694_v16  ;;  %v6321_v40 = vpop.eup %6320  ;;  %v4506_v48 = vmul.f32 %v6319_v5, %v9982_v44  ;;  %v4585_v58 = vmul.f32 %v6319_v5, %v9314_v30 }
 0x43f   : > { %v4983_v17 = vadd.f32 %v7474_v27, %v4837_v14  ;;  %v4984_v53 = vadd.f32 %v7478_v28, %v4838_v49  ;;  %v4695_v57 = vsub.f32 %v4503_v0, %v4584_v52  ;;  %v4696_v54 = vsub.f32 %v4504_v42, %v4584_v52  ;;  %v9985_v52 = vld [vmem:[#allocation101_spill] sm:$0xff] }
 0x440   : > { %v4985_v56 = vadd.f32 %v7474_v27, %v4839_v13  ;;  %v4986_v41 = vadd.f32 %v7478_v28, %v4840_v18  ;;  %v4697_v26 = vsub.f32 %v4505_v15, %v4585_v58  ;;  %v4698_v43 = vsub.f32 %v4506_v48, %v4585_v58  ;;  %v9986_v15 = vld [vmem:[#allocation102_spill] sm:$0xff] }
 0x441   : > { %5111 = vst [vmem:[%s8033_s26 + $0x2d0] sm:$0xff] %v4983_v17  ;;  %5112 = vst [vmem:[%s8033_s26 + $0x2d8] sm:$0xff] %v4984_v53  ;;  %v4507_v59 = vmul.f32 %v6321_v40, %v9983_v33  ;;  %v4508_v46 = vmul.f32 %v6321_v40, %v9984_v50  ;;  %v4841_v30 = vmul.f32 %v7457_v12, %v4695_v57  ;;  %v4332_v10 = vadd.f32 1e-12, %v4268_v38 }
 0x442   : > { %5113 = vst [vmem:[%s8033_s26 + $0x2e0] sm:$0xff] %v4985_v56  ;;  %5114 = vst [vmem:[%s8033_s26 + $0x2e8] sm:$0xff] %v4986_v41  ;;  %v4842_v61 = vmul.f32 %v7467_v22, %v4696_v54  ;;  %v4586_v37 = vmul.f32 %v6321_v40, %v9320_v62  ;;  %v4843_v1 = vmul.f32 %v7457_v12, %v4697_v26  ;;  %v9400_v11 = vmul.f32 0.00390625, %v9342_v21 }
 0x443   : > { %v4844_v36 = vmul.f32 %v7467_v22, %v4698_v43  ;;  %v4141_v6 = vmul.f32 0.00390625, %v4055_v51  ;;  %v4987_v16 = vadd.f32 %v7474_v27, %v4841_v30  ;;  %6324 = vrsqrt.f32 %v4332_v10 }
 0x444   : > { %v4988_v5 = vadd.f32 %v7478_v28, %v4842_v61  ;;  %v4699_v14 = vsub.f32 %v4507_v59, %v4586_v37  ;;  %v4700_v49 = vsub.f32 %v4508_v46, %v4586_v37  ;;  %v4989_v62 = vadd.f32 %v7474_v27, %v4843_v1  ;;  %v3679_v18 = vpop.xlane.xlu1 %3678 }
 0x445   : > { %v4990_v38 = vadd.f32 %v7478_v28, %v4844_v36  ;;  %v4205_v55 = vmul.f32 %v9400_v11, %v9400_v11  ;;  %v6323_v0 = vpop.eup %6322  ;;  %5115 = vst [vmem:[%s8033_s26 + $0x2f0] sm:$0xff] %v4987_v16  ;;  %v9412_v4 = vmul.f32 0.00390625, %v3673_v20  ;;  %v4142_v42 = vmul.f32 0.00390625, %v4058_v25  ;;  %v4061_v13 = vpop.xlane.xlu0 %4060 }
 0x446   : > { %5116 = vst [vmem:[%s8033_s26 + $0x2f8] sm:$0xff] %v4988_v5  ;;  %v4845_v21 = vmul.f32 %v7457_v12, %v4699_v14  ;;  %v4846_v51 = vmul.f32 %v7467_v22, %v4700_v49  ;;  %5117 = vst [vmem:[%s8033_s26 + $0x300] sm:$0xff] %v4989_v62  ;;  %v4509_v24 = vmul.f32 %v6323_v0, %v9985_v52  ;;  %v9423_v58 = vmul.f32 0.00390625, %v3676_v19  ;;  %v9987_v5 = vld [vmem:[#allocation92_spill] sm:$0xff] }
 0x447   : > { %5118 = vst [vmem:[%s8033_s26 + $0x308] sm:$0xff] %v4990_v38  ;;  %v4510_v40 = vmul.f32 %v6323_v0, %v9986_v15  ;;  %v4587_v17 = vmul.f32 %v6323_v0, %v9328_v45  ;;  %v4269_v53 = vsub.f32 %v4141_v6, %v4205_v55  ;;  %v4206_v20 = vmul.f32 %v9412_v4, %v9412_v4  ;;  %v9988_v49 = vld [vmem:[#allocation16_spill] sm:$0xff] }
 0x448   : > { %v4991_v44 = vadd.f32 %v7474_v27, %v4845_v21  ;;  %v4992_v48 = vadd.f32 %v7478_v28, %v4846_v51  ;;  %v4143_v54 = vmul.f32 0.00390625, %v4061_v13  ;;  %v4207_v45 = vmul.f32 %v9423_v58, %v9423_v58 }
 0x449   : > { %v4701_v56 = vsub.f32 %v4509_v24, %v4587_v17  ;;  %v4702_v41 = vsub.f32 %v4510_v40, %v4587_v17  ;;  %v4333_v57 = vadd.f32 1e-12, %v4269_v53  ;;  %v4270_v25 = vsub.f32 %v4142_v42, %v4206_v20  ;;  %v3682_v43 = vpop.xlane.xlu0 %3681  ;;  %v9989_v20 = vld [vmem:[#allocation19_spill] sm:$0xff] }
 0x44a   : > { %5119 = vst [vmem:[%s8033_s26 + $0x310] sm:$0xff] %v4991_v44  ;;  %5120 = vst [vmem:[%s8033_s26 + $0x318] sm:$0xff] %v4992_v48  ;;  %v9429_v26 = vmul.f32 0.00390625, %v3679_v18  ;;  %v4271_v50 = vsub.f32 %v4143_v54, %v4207_v45  ;;  %v9433_v30 = vmul.f32 0.00390625, %v3682_v43 }
 0x44b   : > { %v4847_v33 = vmul.f32 %v7457_v12, %v4701_v56  ;;  %v4848_v19 = vmul.f32 %v7467_v22, %v4702_v41  ;;  %6326 = vrsqrt.f32 %v4333_v57  ;;  %v4334_v59 = vadd.f32 1e-12, %v4270_v25  ;;  %v4064_v46 = vpop.xlane.xlu1 %4063  ;;  %v9990_v41 = vld [vmem:[#allocation108_spill] sm:$0xff] }
 0x44c   : > { %v4208_v10 = vmul.f32 %v9429_v26, %v9429_v26  ;;  %v4144_v1 = vmul.f32 0.00390625, %v4064_v46  ;;  %v4335_v36 = vadd.f32 1e-12, %v4271_v50  ;;  %v4209_v21 = vmul.f32 %v9433_v30, %v9433_v30  ;;  %v9992_v50 = vld [vmem:[#allocation113_spill] sm:$0xff] }
 0x44d   : > { %v4993_v61 = vadd.f32 %v7474_v27, %v4847_v33  ;;  %v4994_v37 = vadd.f32 %v7478_v28, %v4848_v19  ;;  %6328 = vrsqrt.f32 %v4334_v59  ;;  %v6325_v6 = vpop.eup %6324  ;;  %v9991_v19 = vld [vmem:[#allocation110_spill] sm:$0xff] }
 0x44e   : > { %v4272_v16 = vsub.f32 %v4144_v1, %v4208_v10  ;;  %v4511_v14 = vmul.f32 %v6325_v6, %v9987_v5  ;;  %v4512_v62 = vmul.f32 %v6325_v6, %v9988_v49  ;;  %v4588_v38 = vmul.f32 %v6325_v6, %v9332_v63 }
 0x44f   : > { %5121 = vst [vmem:[%s8033_s26 + $0x320] sm:$0xff] %v4993_v61  ;;  %5122 = vst [vmem:[%s8033_s26 + $0x328] sm:$0xff] %v4994_v37  ;;  %6330 = vrsqrt.f32 %v4335_v36  ;;  %v4067_v55 = vpop.xlane.xlu0 %4066  ;;  %v3685_v18 = vpop.xlane.xlu1 %3684 }
 0x450   : > { %v4336_v0 = vadd.f32 1e-12, %v4272_v16  ;;  %v4145_v51 = vmul.f32 0.00390625, %v4067_v55  ;;  %v4703_v42 = vsub.f32 %v4511_v14, %v4588_v38  ;;  %v4704_v13 = vsub.f32 %v4512_v62, %v4588_v38 }
 0x451   : > { %v9448_v17 = vmul.f32 0.00390625, %v3685_v18 }
 0x452   : > { %6332 = vrsqrt.f32 %v4336_v0  ;;  %v4273_v52 = vsub.f32 %v4145_v51, %v4209_v21  ;;  %v4849_v24 = vmul.f32 %v7457_v12, %v4703_v42  ;;  %v4850_v15 = vmul.f32 %v7467_v22, %v4704_v13 }
 0x453   : > { %v4210_v1 = vmul.f32 %v9448_v17, %v9448_v17 }
 0x454   : > { %v4337_v63 = vadd.f32 1e-12, %v4273_v52  ;;  %v3688_v53 = vpop.xlane.xlu0 %3687  ;;  %v4995_v44 = vadd.f32 %v7474_v27, %v4849_v24  ;;  %v4996_v48 = vadd.f32 %v7478_v28, %v4850_v15  ;;  %v9994_v52 = vld [vmem:[#allocation99_spill] sm:$0xff] }
 0x455   : > { %v6327_v40 = vpop.eup %6326  ;;  %v9457_v45 = vmul.f32 0.00390625, %v3688_v53 }
 0x456   : > { %v4513_v56 = vmul.f32 %v6327_v40, %v9989_v20  ;;  %v4514_v57 = vmul.f32 %v6327_v40, %v9990_v41  ;;  %v4589_v54 = vmul.f32 %v6327_v40, %v9400_v11  ;;  %6334 = vrsqrt.f32 %v4337_v63  ;;  %5123 = vst [vmem:[%s8033_s26 + $0x330] sm:$0xff] %v4995_v44  ;;  %5124 = vst [vmem:[%s8033_s26 + $0x338] sm:$0xff] %v4996_v48 }
 0x457   : > { %v6329_v25 = vpop.eup %6328  ;;  %v4070_v61 = vpop.xlane.xlu1 %4069  ;;  %v4211_v21 = vmul.f32 %v9457_v45, %v9457_v45 }
 0x458   : > { %v4705_v43 = vsub.f32 %v4513_v56, %v4589_v54  ;;  %v4706_v33 = vsub.f32 %v4514_v57, %v4589_v54  ;;  %v4515_v59 = vmul.f32 %v6329_v25, %v9991_v19  ;;  %v4516_v46 = vmul.f32 %v6329_v25, %v9992_v50 }
 0x459   : > { %v6331_v37 = vpop.eup %6330  ;;  %v4590_v10 = vmul.f32 %v6329_v25, %v9412_v4  ;;  %v4146_v11 = vmul.f32 0.00390625, %v4070_v61 }
 0x45a   : > { %v4851_v36 = vmul.f32 %v7457_v12, %v4705_v43  ;;  %v4852_v6 = vmul.f32 %v7467_v22, %v4706_v33  ;;  %v4517_v16 = vmul.f32 %v6331_v37, %v8553_v32  ;;  %v4518_v5 = vmul.f32 %v6331_v37, %v8584_v35  ;;  %v9995_v33 = vld [vmem:[#allocation26_spill] sm:$0xff] }
 0x45b   : > { %v4707_v14 = vsub.f32 %v4515_v59, %v4590_v10  ;;  %v4708_v49 = vsub.f32 %v4516_v46, %v4590_v10  ;;  %v4591_v62 = vmul.f32 %v6331_v37, %v9423_v58  ;;  %v4274_v38 = vsub.f32 %v4146_v11, %v4210_v1  ;;  %v9993_v58 = vld [vmem:[#allocation117_spill] sm:$0xff]  ;;  %v3691_v20 = vpop.xlane.xlu1 %3690 }
 0x45c   : > { %v6333_v4 = vpop.eup %6332  ;;  %v4997_v55 = vadd.f32 %v7474_v27, %v4851_v36  ;;  %v4998_v0 = vadd.f32 %v7478_v28, %v4852_v6  ;;  %v4073_v35 = vpop.xlane.xlu0 %4072  ;;  %v9495_v37 = vmul.f32 0.00390625, %v3691_v20 }
 0x45d   : > { %v4853_v51 = vmul.f32 %v7457_v12, %v4707_v14  ;;  %v4854_v32 = vmul.f32 %v7467_v22, %v4708_v49  ;;  %v4709_v42 = vsub.f32 %v4517_v16, %v4591_v62  ;;  %v4710_v13 = vsub.f32 %v4518_v5, %v4591_v62 }
 0x45e   : > { %5125 = vst [vmem:[%s8033_s26 + $0x340] sm:$0xff] %v4997_v55  ;;  %5126 = vst [vmem:[%s8033_s26 + $0x348] sm:$0xff] %v4998_v0  ;;  %v4519_v18 = vmul.f32 %v6333_v4, %v9993_v58  ;;  %v4520_v24 = vmul.f32 %v6333_v4, %v9994_v52  ;;  %v4592_v15 = vmul.f32 %v6333_v4, %v9429_v26  ;;  %v4338_v40 = vadd.f32 1e-12, %v4274_v38 }
 0x45f   : > { %v4999_v63 = vadd.f32 %v7474_v27, %v4853_v51  ;;  %v5000_v53 = vadd.f32 %v7478_v28, %v4854_v32  ;;  %v4855_v44 = vmul.f32 %v7457_v12, %v4709_v42  ;;  %v4856_v48 = vmul.f32 %v7467_v22, %v4710_v13 }
 0x460   : > { %v6335_v56 = vpop.eup %6334  ;;  %v4711_v41 = vsub.f32 %v4519_v18, %v4592_v15  ;;  %v4712_v57 = vsub.f32 %v4520_v24, %v4592_v15  ;;  %6336 = vrsqrt.f32 %v4338_v40  ;;  %v4147_v54 = vmul.f32 0.00390625, %v4073_v35  ;;  %v9996_v35 = vld [vmem:[#allocation27_spill] sm:$0xff]  ;;  %v9997_v18 = vld [vmem:[#allocation104_spill] sm:$0xff] }
 0x461   : > { %5127 = vst [vmem:[%s8033_s26 + $0x350] sm:$0xff] %v4999_v63  ;;  %5128 = vst [vmem:[%s8033_s26 + $0x358] sm:$0xff] %v5000_v53  ;;  %v5001_v26 = vadd.f32 %v7474_v27, %v4855_v44  ;;  %v5002_v25 = vadd.f32 %v7478_v28, %v4856_v48  ;;  %v4521_v43 = vmul.f32 %v6335_v56, %v8661_v34 }
 0x462   : > { %v4522_v19 = vmul.f32 %v6335_v56, %v9995_v33  ;;  %v4857_v59 = vmul.f32 %v7457_v12, %v4711_v41  ;;  %v4858_v50 = vmul.f32 %v7467_v22, %v4712_v57  ;;  %v4593_v46 = vmul.f32 %v6335_v56, %v9433_v30 }
 0x463   : > { %v4275_v61 = vsub.f32 %v4147_v54, %v4211_v21  ;;  %5129 = vst [vmem:[%s8033_s26 + $0x360] sm:$0xff] %v5001_v26  ;;  %5130 = vst [vmem:[%s8033_s26 + $0x368] sm:$0xff] %v5002_v25  ;;  %v3694_v10 = vpop.xlane.xlu0 %3693  ;;  %v4212_v16 = vmul.f32 %v9495_v37, %v9495_v37 }
 0x464   : > { %v5003_v1 = vadd.f32 %v7474_v27, %v4857_v59  ;;  %v5004_v34 = vadd.f32 %v7478_v28, %v4858_v50  ;;  %v4713_v11 = vsub.f32 %v4521_v43, %v4593_v46  ;;  %v4714_v36 = vsub.f32 %v4522_v19, %v4593_v46 }
 0x465   : > { %v4339_v6 = vadd.f32 1e-12, %v4275_v61  ;;  %v4076_v5 = vpop.xlane.xlu1 %4075  ;;  %v9505_v62 = vmul.f32 0.00390625, %v3694_v10 }
 0x466   : > { %5131 = vst [vmem:[%s8033_s26 + $0x370] sm:$0xff] %v5003_v1  ;;  %5132 = vst [vmem:[%s8033_s26 + $0x378] sm:$0xff] %v5004_v34  ;;  %v4859_v30 = vmul.f32 %v7457_v12, %v4713_v11  ;;  %v4860_v14 = vmul.f32 %v7467_v22, %v4714_v36  ;;  %v4148_v49 = vmul.f32 0.00390625, %v4076_v5 }
 0x467   : > { %6338 = vrsqrt.f32 %v4339_v6  ;;  %v4213_v42 = vmul.f32 %v9505_v62, %v9505_v62 }
 0x468   : > { %v5005_v38 = vadd.f32 %v7474_v27, %v4859_v30  ;;  %v5006_v4 = vadd.f32 %v7478_v28, %v4860_v14  ;;  %v4276_v55 = vsub.f32 %v4148_v49, %v4212_v16 }
 0x469   : > { %v4079_v0 = vpop.xlane.xlu0 %4078  ;;  %v3697_v21 = vpop.xlane.xlu1 %3696 }
 0x46a   : > { %v6337_v51 = vpop.eup %6336  ;;  %5133 = vst [vmem:[%s8033_s26 + $0x380] sm:$0xff] %v5005_v38  ;;  %5134 = vst [vmem:[%s8033_s26 + $0x388] sm:$0xff] %v5006_v4  ;;  %v4340_v32 = vadd.f32 1e-12, %v4276_v55  ;;  %v4149_v13 = vmul.f32 0.00390625, %v4079_v0  ;;  %v9516_v15 = vmul.f32 0.00390625, %v3697_v21 }
 0x46b   : > { %v4523_v58 = vmul.f32 %v6337_v51, %v9996_v35  ;;  %v4524_v52 = vmul.f32 %v6337_v51, %v9997_v18  ;;  %v4594_v24 = vmul.f32 %v6337_v51, %v9448_v17 }
 0x46c   : > { %6340 = vrsqrt.f32 %v4340_v32  ;;  %v4277_v40 = vsub.f32 %v4149_v13, %v4213_v42  ;;  %v4214_v57 = vmul.f32 %v9516_v15, %v9516_v15 }
 0x46d   : > { %v4715_v63 = vsub.f32 %v4523_v58, %v4594_v24  ;;  %v4716_v53 = vsub.f32 %v4524_v52, %v4594_v24  ;;  %v3700_v44 = vpop.xlane.xlu0 %3699 }
 0x46e   : > { %v4341_v48 = vadd.f32 1e-12, %v4277_v40  ;;  %v4082_v20 = vpop.xlane.xlu1 %4081  ;;  %v9522_v17 = vmul.f32 0.00390625, %v3700_v44 }
 0x46f   : > { %v4861_v56 = vmul.f32 %v7457_v12, %v4715_v63  ;;  %v4862_v41 = vmul.f32 %v7467_v22, %v4716_v53  ;;  %v4150_v54 = vmul.f32 0.00390625, %v4082_v20 }
 0x470   : > { %6342 = vrsqrt.f32 %v4341_v48  ;;  %v4215_v36 = vmul.f32 %v9522_v17, %v9522_v17 }
 0x471   : > { %v6339_v26 = vpop.eup %6338  ;;  %v5007_v25 = vadd.f32 %v7474_v27, %v4861_v56  ;;  %v5008_v43 = vadd.f32 %v7478_v28, %v4862_v41  ;;  %v4278_v33 = vsub.f32 %v4150_v54, %v4214_v57 }
 0x472   : > { %v4525_v19 = vmul.f32 %v6339_v26, %v8745_v39  ;;  %v4526_v59 = vmul.f32 %v6339_v26, %v8748_v9  ;;  %v4595_v50 = vmul.f32 %v6339_v26, %v9457_v45  ;;  %v3703_v46 = vpop.xlane.xlu1 %3702 }
 0x473   : > { %5135 = vst [vmem:[%s8033_s26 + $0x390] sm:$0xff] %v5007_v25  ;;  %5136 = vst [vmem:[%s8033_s26 + $0x398] sm:$0xff] %v5008_v43  ;;  %v4342_v61 = vadd.f32 1e-12, %v4278_v33  ;;  %v4085_v10 = vpop.xlane.xlu0 %4084  ;;  %v9531_v1 = vmul.f32 0.00390625, %v3703_v46 }
 0x474   : > { %v4717_v34 = vsub.f32 %v4525_v19, %v4595_v50  ;;  %v4718_v11 = vsub.f32 %v4526_v59, %v4595_v50  ;;  %v4151_v6 = vmul.f32 0.00390625, %v4085_v10 }
 0x475   : > { %6344 = vrsqrt.f32 %v4342_v61  ;;  %v4216_v49 = vmul.f32 %v9531_v1, %v9531_v1 }
 0x476   : > { %v6341_v16 = vpop.eup %6340  ;;  %v4863_v39 = vmul.f32 %v7457_v12, %v4717_v34  ;;  %v4864_v9 = vmul.f32 %v7467_v22, %v4718_v11  ;;  %v4279_v45 = vsub.f32 %v4151_v6, %v4215_v36 }
 0x477   : > { %v4527_v5 = vmul.f32 %v6341_v16, %v8759_v2  ;;  %v4528_v30 = vmul.f32 %v6341_v16, %v8788_v60  ;;  %v4596_v14 = vmul.f32 %v6341_v16, %v9495_v37  ;;  %v4088_v38 = vpop.xlane.xlu1 %4087 }
 0x478   : > { %v5009_v4 = vadd.f32 %v7474_v27, %v4863_v39  ;;  %v5010_v55 = vadd.f32 %v7478_v28, %v4864_v9  ;;  %v4343_v0 = vadd.f32 1e-12, %v4279_v45  ;;  %v4152_v21 = vmul.f32 0.00390625, %v4088_v38 }
 0x479   : > { %v4719_v51 = vsub.f32 %v4527_v5, %v4596_v14  ;;  %v4720_v32 = vsub.f32 %v4528_v30, %v4596_v14 }
 0x47a   : > { %v6343_v42 = vpop.eup %6342  ;;  %5137 = vst [vmem:[%s8033_s26 + $0x3a0] sm:$0xff] %v5009_v4  ;;  %5138 = vst [vmem:[%s8033_s26 + $0x3a8] sm:$0xff] %v5010_v55  ;;  %6346 = vrsqrt.f32 %v4343_v0  ;;  %v4280_v2 = vsub.f32 %v4152_v21, %v4216_v49 }
 0x47b   : > { %v4865_v60 = vmul.f32 %v7457_v12, %v4719_v51  ;;  %v4866_v37 = vmul.f32 %v7467_v22, %v4720_v32  ;;  %v4529_v13 = vmul.f32 %v6343_v42, %v8821_v29  ;;  %v4530_v35 = vmul.f32 %v6343_v42, %v8823_v47 }
 0x47c   : > { %v4597_v58 = vmul.f32 %v6343_v42, %v9505_v62  ;;  %v4344_v18 = vadd.f32 1e-12, %v4280_v2  ;;  %v9998_v62 = vld [vmem:[#allocation107_spill] sm:$0xff] }
 0x47d   : > { %v5011_v52 = vadd.f32 %v7474_v27, %v4865_v60  ;;  %v5012_v24 = vadd.f32 %v7478_v28, %v4866_v37 }
 0x47e   : > { %v4721_v40 = vsub.f32 %v4529_v13, %v4597_v58  ;;  %v4722_v63 = vsub.f32 %v4530_v35, %v4597_v58  ;;  %6348 = vrsqrt.f32 %v4344_v18 }
 0x47f   : > { %v6345_v53 = vpop.eup %6344  ;;  %5139 = vst [vmem:[%s8033_s26 + $0x3b0] sm:$0xff] %v5011_v52  ;;  %5140 = vst [vmem:[%s8033_s26 + $0x3b8] sm:$0xff] %v5012_v24 }
 0x480   : > { %v4867_v44 = vmul.f32 %v7457_v12, %v4721_v40  ;;  %v4868_v29 = vmul.f32 %v7467_v22, %v4722_v63  ;;  %v4531_v47 = vmul.f32 %v6345_v53, %v8843_v23  ;;  %v4532_v48 = vmul.f32 %v6345_v53, %v9998_v62 }
 0x481   : > { %v4598_v20 = vmul.f32 %v6345_v53, %v9516_v15 }
 0x482   : > { %v5013_v56 = vadd.f32 %v7474_v27, %v4867_v44  ;;  %v5014_v41 = vadd.f32 %v7478_v28, %v4868_v29 }
 0x483   : > { %v4723_v57 = vsub.f32 %v4531_v47, %v4598_v20  ;;  %v4724_v54 = vsub.f32 %v4532_v48, %v4598_v20 }
 0x484   : > { %v6347_v26 = vpop.eup %6346  ;;  %5141 = vst [vmem:[%s8033_s26 + $0x3c0] sm:$0xff] %v5013_v56  ;;  %5142 = vst [vmem:[%s8033_s26 + $0x3c8] sm:$0xff] %v5014_v41 }
 0x485   : > { %v4869_v25 = vmul.f32 %v7457_v12, %v4723_v57  ;;  %v4870_v43 = vmul.f32 %v7467_v22, %v4724_v54  ;;  %v4533_v23 = vmul.f32 %v6347_v26, %v8888_v3  ;;  %v4534_v33 = vmul.f32 %v6347_v26, %v8899_v31 }
 0x486   : > { %v4599_v15 = vmul.f32 %v6347_v26, %v9522_v17 }
 0x487   : > { %v5015_v19 = vadd.f32 %v7474_v27, %v4869_v25  ;;  %v5016_v59 = vadd.f32 %v7478_v28, %v4870_v43 }
 0x488   : > { %v6349_v50 = vpop.eup %6348  ;;  %v4725_v46 = vsub.f32 %v4533_v23, %v4599_v15  ;;  %v4726_v61 = vsub.f32 %v4534_v33, %v4599_v15 }
 0x489   : > { %5143 = vst [vmem:[%s8033_s26 + $0x3d0] sm:$0xff] %v5015_v19  ;;  %5144 = vst [vmem:[%s8033_s26 + $0x3d8] sm:$0xff] %v5016_v59  ;;  %v4535_v10 = vmul.f32 %v6349_v50, %v8927_v8  ;;  %v4536_v3 = vmul.f32 %v6349_v50, %v8933_v7  ;;  %v4600_v31 = vmul.f32 %v6349_v50, %v9531_v1 }
 0x48a   : > { %v4871_v17 = vmul.f32 %v7457_v12, %v4725_v46  ;;  %v4872_v34 = vmul.f32 %v7467_v22, %v4726_v61 }
 0x48b   : > { %v4727_v11 = vsub.f32 %v4535_v10, %v4600_v31  ;;  %v4728_v36 = vsub.f32 %v4536_v3, %v4600_v31 }
 0x48c   : > { %v5017_v6 = vadd.f32 %v7474_v27, %v4871_v17  ;;  %v5018_v8 = vadd.f32 %v7478_v28, %v4872_v34 }
 0x48d   : > { %v4873_v7 = vmul.f32 %v7457_v12, %v4727_v11  ;;  %v4874_v1 = vmul.f32 %v7467_v22, %v4728_v36 }
 0x48e   : > { %5145 = vst [vmem:[%s8033_s26 + $0x3e0] sm:$0xff] %v5017_v6  ;;  %5146 = vst [vmem:[%s8033_s26 + $0x3e8] sm:$0xff] %v5018_v8 }
 0x48f   : > { %v5019_v16 = vadd.f32 %v7474_v27, %v4873_v7  ;;  %v5020_v39 = vadd.f32 %v7478_v28, %v4874_v1 }
 0x491   : > { %5147 = vst [vmem:[%s8033_s26 + $0x3f0] sm:$0xff] %v5019_v16  ;;  %5148 = vst [vmem:[%s8033_s26 + $0x3f8] sm:$0xff] %v5020_v39 }
 0x492   : > { %6479 = shalt.err (!%p6476_p3)
}
 0x493   : > { %s6480_s11 = scalar_lea.hbm %s9589_s22, 16384  ;;  %s6484_s6 = scalar_lea.hbm %s9642_s4, 65536 }
 0x494   : > { %p6481_p9 = scmp.ne.s32.totalorder %s9589_s22, %s6480_s11  ;;  %p6485_p8 = scmp.lt.u32.totalorder %s9589_s22, %s9642_s4 }
 0x495   : > { %p6486_p5 = scmp.lt.u32.totalorder %s6484_s6, %s6480_s11  ;;  %p6488_p7 = scmp.lt.u32.totalorder %s6480_s11, %s9589_s22 }
 0x496   : > { %p6482_p10 = pnand %p6481_p9, %p9999_p4 }
 0x497   : > { %p6487_p1 = por %p6486_p5, %p6485_p8 }
 0x498   : > { %p6483_p6 = pneg %p6482_p10 }
 0x499   : > { %p6489_p2 = por %p6488_p7, %p6487_p1 }
 0x49b   : > { %p6490_p11 = pnand %p6489_p2, %p6483_p6 }
 0x49d   : > { %6493 = shalt.err (!%p6490_p11)
}
 0x49e   : > { %s6553_s14 = smov 256   ;;  %s6554_s26 = smov 16  }
 0x49f   : > { %5962 = dma.vmem_to_hbm [thread:$0]  (%p9999_p4), %s9591_s7, 16384, %s9589_s22, %s5150_s19, %s6553_s14, %s6553_s14, %s6554_s26  }
 0x4a0 PF: > { %p5987_p13 = scmp.ge.s32.totalorder %s6540_s18, 2  ;;  %s5179_s30 = sand.u32 1, %s6528_s15  }
 0x4a1   : > { %p10000_p0 = scmp.ne.s32.totalorder %s9745_s28, 0  ;;  %s5180_s9 = scalar_lea.sflag [#allocation4], %s5179_s30 }
 0x4a3   : > { %p5979_p12 = pnand %p5987_p13, %p10000_p0 }
 0x4a5   : > { %6523 = dma.done.wait (!%p5979_p12), %s5180_s9, 16384  }
 0x4a6   : > { %6525 = vsyncadd (!%p5979_p12), %s5180_s9, 4294950912  ;;  %s10001_s20 = sld [smem:[#allocation15_spill]]  ;;  %p21_p3 = scmp.ge.s32.totalorder %s6605_s21, 6  }
 0x4a7   : > { %s10002_s15 = smov %s6532_s16  ;;  %s10003_s16 = smov %s6536_s17 }
 0x4a8   : > { %s10005_s18 = smov %s6605_s21  ;;  %23 = sbr.rel (!%p21_p3) target bundleno = 8 (0x8), region = 102 }
 0x4ac   : > { %s10004_s17 = smov %s10001_s20 }
 0x4af   :  { %5185 = vsyncpa [#allocation3], 1 }
 0x4b0   :  { %5187 = vsyncpa [#allocation3 + $0x1], 1 }
 0x4b1   :  { %5188 = vsyncpa [#allocation6], 1 }
 0x4b2   :  { %5189 = vsyncpa [#allocation9], 1 }
 0x4b3   :  { %5191 = vsyncpa [#allocation9 + $0x1], 1 }
 0x4b4   :  { %5192 = vsyncpa [#allocation4], 1 }
 0x4b5   :  { %5194 = vsyncpa [#allocation4 + $0x1], 1 }

</bundles_post_ra>
